<compile_context>
chip_gen: v7x
topology: tpu7x:2x2x1
jax: 0.10.0
libtpu: 0.0.40
codegen_flags: <defaults>
</compile_context>

<pallas_src>
import math
from functools import partial

import jax
import jax.numpy as jnp
from jax.experimental import pallas as pl
from jax.experimental.pallas import tpu as pltpu

EPS = 1e-5


def _vmem_capacity_bytes():
    try:
        info = pltpu.get_tpu_info()
        cap = getattr(info, "vmem_capacity_bytes", None)
        if cap:
            return int(cap)
    except Exception:
        pass
    return 64 * 1024 * 1024                      # conservative (v7x-sized) fallback


_VMEM_BYTES = _vmem_capacity_bytes()
# ~96 MiB scoped limit on 128-MiB parts (v5e/v6e), ~48 MiB on 64-MiB v7x.
VMEM_LIMIT = int(_VMEM_BYTES * 3 // 4)
# 64/128-wide layers are HBM-bound -> big row tiles; the pooled kernel carries
# a (tile, 1024) f32 intermediate -> tighter cap where VMEM is 64 MiB.
ROW_TILE = 2048
POOL_ROW_TILE = 2048 if _VMEM_BYTES > 64 * 1024 * 1024 else 1024


def _pick_tile(n, target):
    """Largest row tile <= target that divides n and is a multiple of 8
    (falls back to the whole axis, which always satisfies the TPU tile rule)."""
    if n <= target:
        return n
    for cand in range(target - target % 8, 7, -8):
        if n % cand == 0:
            return cand
    return n


def _cparams(semantics):
    return pltpu.CompilerParams(dimension_semantics=semantics,
                                vmem_limit_bytes=VMEM_LIMIT)


# --------------------------------------------------------------------------
# Pallas kernels
# --------------------------------------------------------------------------
def _apply_moments_kernel(x_ref, w_ref, scale_ref, shift_ref,
                          h_ref, rs_ref, g_ref, *, relu):
    """h = relu?(scale * (x @ W) + shift)  (stored, bf16) plus per-batch
    moments of h (row-sum and Gram matrix) accumulated over the point tiles.
    The moments let the NEXT layer's BatchNorm statistics be computed in plain
    JAX for any weight (even per-batch effective weights), so no standalone
    stats pass is needed downstream."""
    n = pl.program_id(1)

    y = jnp.dot(x_ref[0], w_ref[0], preferred_element_type=jnp.float32)
    y = y * scale_ref[...] + shift_ref[...]
    if relu:
        y = jnp.maximum(y, 0.0)
    h = y.astype(h_ref.dtype)
    # TODO(synk): 64-wide bf16 outputs lower to masked stores; packing two rows
    # into 128 lanes (lane-dense store + unpack on the consumer side) is a
    # further store-side win, most relevant on v5e's single vst slot.
    h_ref[0] = h

    @pl.when(n == 0)
    def _():
        rs_ref[...] = jnp.zeros_like(rs_ref)
        g_ref[...] = jnp.zeros_like(g_ref)

    rs_ref[0] += jnp.sum(h.astype(jnp.float32), axis=0, keepdims=True)
    g_ref[0] += jnp.dot(h.T, h, preferred_element_type=jnp.float32)


def _apply_moments_pool_kernel(x_ref, w_ref, scale_ref, shift_ref, w3_ref,
                               rs_ref, g_ref, mx_ref, mn_ref, *, relu):
    """Apply the current conv+BN(+ReLU) layer (kept in VMEM only), accumulate
    (a) its per-batch moments (-> BN stats of the following pooled conv via the
    matmul-form trick, keeping sum/ssq off the VALU) and (b) the per-batch
    pre-BN max/min of z = h @ W3 so the global max-pool is finalized outside
    with the gamma-sign trick.  Neither h nor z ever touches HBM."""
    n = pl.program_id(1)

    y = jnp.dot(x_ref[0], w_ref[0], preferred_element_type=jnp.float32)
    y = y * scale_ref[...] + shift_ref[...]
    if relu:
        y = jnp.maximum(y, 0.0)
    h = y.astype(jnp.bfloat16)

    @pl.when(n == 0)
    def _():
        rs_ref[...] = jnp.zeros_like(rs_ref)
        g_ref[...] = jnp.zeros_like(g_ref)
        mx_ref[...] = jnp.full_like(mx_ref, -jnp.inf)
        mn_ref[...] = jnp.full_like(mn_ref, jnp.inf)

    rs_ref[0] += jnp.sum(h.astype(jnp.float32), axis=0, keepdims=True)
    g_ref[0] += jnp.dot(h.T, h, preferred_element_type=jnp.float32)

    z = jnp.dot(h, w3_ref[...], preferred_element_type=jnp.float32)
    mx_ref[0] = jnp.maximum(mx_ref[0], jnp.max(z, axis=0, keepdims=True))
    mn_ref[0] = jnp.minimum(mn_ref[0], jnp.min(z, axis=0, keepdims=True))


def _fc_head_kernel(mx_ref, mn_ref, sc_ref, sh_ref,
                    w1_ref, b1_ref, g1_ref, be1_ref,
                    w2_ref, b2_ref, g2_ref, be2_ref,
                    w3_ref, b3_ref, o_ref):
    """Fused [max-pool finalize (gamma-sign) + ReLU] -> fc1(BN,ReLU) ->
    fc2(BN,ReLU) -> fc3 head.  rows == batch; everything resident in VMEM."""
    sc = sc_ref[...]
    pooled = jnp.where(sc >= 0.0, mx_ref[...], mn_ref[...]) * sc + sh_ref[...]
    pooled = jnp.maximum(pooled, 0.0)            # ReLU after conv3+BN in QSTN/STN

    def bn_relu(y, g, be):
        mean = jnp.mean(y, axis=0, keepdims=True)
        var = jnp.mean((y - mean) ** 2, axis=0, keepdims=True)   # biased (train)
        return jnp.maximum((y - mean) * jax.lax.rsqrt(var + EPS) * g + be, 0.0)

    h = jnp.dot(pooled.astype(w1_ref.dtype), w1_ref[...],
                preferred_element_type=jnp.float32) + b1_ref[...]
    h = bn_relu(h, g1_ref[...], be1_ref[...])
    h = jnp.dot(h.astype(w2_ref.dtype), w2_ref[...],
                preferred_element_type=jnp.float32) + b2_ref[...]
    h = bn_relu(h, g2_ref[...], be2_ref[...])
    h = jnp.dot(h.astype(w3_ref.dtype), w3_ref[...],
                preferred_element_type=jnp.float32) + b3_ref[...]
    o_ref[...] = h


# --------------------------------------------------------------------------
# Wrappers
# --------------------------------------------------------------------------
def _w3d(p):
    return p[0][None].astype(jnp.bfloat16)       # (1, Cin, Cout)


def _moments(x):
    """Per-batch row-sum and Gram matrix of a channels-last tensor (plain JAX;
    only used for the tiny 3-channel chain inputs)."""
    xf = x.astype(jnp.float32)
    return jnp.sum(xf, axis=1), jnp.einsum('bnc,bnd->bcd', xf, xf)


def _bn_affine(rs, g, p, count, w=None):
    """Train-mode BatchNorm affine (scale, shift) for y = x @ W, computed from
    the input moments: sum(y) = rowsum(x) @ W, ssq(y) = diag(W^T G W).  Works
    for shared (Cin, Cout) and per-batch (B, Cin, Cout) weights.  The conv
    bias is omitted: a per-channel constant cancels under train-mode BN."""
    w = p[0] if w is None else w
    gamma, beta = p[2].reshape(-1), p[3].reshape(-1)
    if w.ndim == 2:
        s = jnp.sum(rs, axis=0) @ w                        # (Cout,)
        m = jnp.sum(g, axis=0)                             # (Cin, Cin)
        ssq = jnp.sum(w * (m @ w), axis=0)                 # (Cout,)
    else:
        s = jnp.einsum('bc,bco->o', rs, w)
        ssq = jnp.einsum('bco,bcd,bdo->o', w, g, w)
    mean = s / count
    var = jnp.maximum(ssq / count - mean * mean, 0.0)      # biased variance
    scale = gamma * jax.lax.rsqrt(var + EPS)
    shift = beta - mean * scale
    return scale[None, :], shift[None, :]                  # (1, Cout) each


def _apply_layer(x, w, scale, shift, *, relu=True):
    """(B, N, Cin) -> h = relu?(BN(x @ W)) (B, N, Cout) bf16, plus per-batch
    moments of h (the fused next-layer stats).  Batch axis "parallel"
    (megacore-safe: all accumulators are per-batch blocks), tiles "arbitrary"."""
    B, N, Cin = x.shape
    Cout = w.shape[-1]
    tile = _pick_tile(N, ROW_TILE)
    nt = N // tile

    per_batch_w = w.shape[0] > 1
    x_spec = pl.BlockSpec((1, tile, Cin), lambda b, n: (b, n, 0))
    w_spec = pl.BlockSpec((1, Cin, Cout),
                          (lambda b, n: (b, 0, 0)) if per_batch_w
                          else (lambda b, n: (0, 0, 0)))
    vec_spec = pl.BlockSpec((1, Cout), lambda b, n: (0, 0))

    h, rs, g = pl.pallas_call(
        partial(_apply_moments_kernel, relu=relu),
        grid=(B, nt),
        in_specs=[x_spec, w_spec, vec_spec, vec_spec],
        out_specs=[pl.BlockSpec((1, tile, Cout), lambda b, n: (b, n, 0)),
                   pl.BlockSpec((1, 1, Cout), lambda b, n: (b, 0, 0)),
                   pl.BlockSpec((1, Cout, Cout), lambda b, n: (b, 0, 0))],
        out_shape=[jax.ShapeDtypeStruct((B, N, Cout), jnp.bfloat16),
                   jax.ShapeDtypeStruct((B, 1, Cout), jnp.float32),
                   jax.ShapeDtypeStruct((B, Cout, Cout), jnp.float32)],
        compiler_params=_cparams(("parallel", "arbitrary")),
    )(x, w, scale, shift)
    return h, rs[:, 0, :], g


def _apply_layer_pool_stats(x, w, scale, shift, w3, *, relu=True):
    """Apply the current conv+BN+ReLU layer without storing it; return its
    per-batch moments and the per-batch max/min of z = h @ W3 (the pooled
    conv's pre-BN activation)."""
    B, N, Cin = x.shape
    Cout = w.shape[-1]
    C3 = w3.shape[-1]
    tile = _pick_tile(N, POOL_ROW_TILE)
    nt = N // tile

    per_batch_w = w.shape[0] > 1
    x_spec = pl.BlockSpec((1, tile, Cin), lambda b, n: (b, n, 0))
    w_spec = pl.BlockSpec((1, Cin, Cout),
                          (lambda b, n: (b, 0, 0)) if per_batch_w
                          else (lambda b, n: (0, 0, 0)))
    vec_spec = pl.BlockSpec((1, Cout), lambda b, n: (0, 0))
    w3_spec = pl.BlockSpec((Cout, C3), lambda b, n: (0, 0))

    rs, g, mx, mn = pl.pallas_call(
        partial(_apply_moments_pool_kernel, relu=relu),
        grid=(B, nt),
        in_specs=[x_spec, w_spec, vec_spec, vec_spec, w3_spec],
        out_specs=[pl.BlockSpec((1, 1, Cout), lambda b, n: (b, 0, 0)),
                   pl.BlockSpec((1, Cout, Cout), lambda b, n: (b, 0, 0)),
                   pl.BlockSpec((1, 1, C3), lambda b, n: (b, 0, 0)),
                   pl.BlockSpec((1, 1, C3), lambda b, n: (b, 0, 0))],
        out_shape=[jax.ShapeDtypeStruct((B, 1, Cout), jnp.float32),
                   jax.ShapeDtypeStruct((B, Cout, Cout), jnp.float32),
                   jax.ShapeDtypeStruct((B, 1, C3), jnp.float32),
                   jax.ShapeDtypeStruct((B, 1, C3), jnp.float32)],
        compiler_params=_cparams(("parallel", "arbitrary")),
    )(x, w, scale, shift, w3)
    return rs[:, 0, :], g, mx[:, 0, :], mn[:, 0, :]


def _fc_head(mx, mn, scale, shift, fc1, fc2, fc3):
    """Single pallas_call: pool finalize + fc1(BN,ReLU) + fc2(BN,ReLU) + fc3."""
    B = mx.shape[0]
    K = fc3[0].shape[1]
    w1, b1, g1, be1 = fc1
    w2, b2, g2, be2 = fc2
    w3, b3 = fc3[0], fc3[1]
    return pl.pallas_call(
        _fc_head_kernel,
        out_shape=jax.ShapeDtypeStruct((B, K), jnp.float32),
        compiler_params=pltpu.CompilerParams(vmem_limit_bytes=VMEM_LIMIT),
    )(mx, mn, scale, shift,
      w1.astype(jnp.bfloat16), b1, g1, be1,
      w2.astype(jnp.bfloat16), b2, g2, be2,
      w3.astype(jnp.bfloat16), b3)


# --------------------------------------------------------------------------
# Parameters (deterministic, PyTorch-style init shapes)
# --------------------------------------------------------------------------
def _linear_params(key, cin, cout):
    k1, k2 = jax.random.split(key)
    bound = 1.0 / math.sqrt(cin)
    w = jax.random.uniform(k1, (cin, cout), jnp.float32, -bound, bound)
    b = jax.random.uniform(k2, (1, cout), jnp.float32, -bound, bound)
    gamma = jnp.ones((1, cout), jnp.float32)     # BN weight init
    beta = jnp.zeros((1, cout), jnp.float32)     # BN bias init
    return (w, b, gamma, beta)


def init_pointnetfeat_params(key, point_tuple=1):
    keys = jax.random.split(key, 17)
    p = {}
    # QSTN (dim=3): conv 3->64->128->1024, fc 1024->512->256->4 (quaternion)
    p['q_conv1'] = _linear_params(keys[0], 3, 64)
    p['q_conv2'] = _linear_params(keys[1], 64, 128)
    p['q_conv3'] = _linear_params(keys[2], 128, 1024)
    p['q_fc1'] = _linear_params(keys[3], 1024, 512)
    p['q_fc2'] = _linear_params(keys[4], 512, 256)
    p['q_fc3'] = _linear_params(keys[5], 256, 4)
    # STN (dim=64): conv 64->64->128->1024, fc 1024->512->256->64*64
    p['s_conv1'] = _linear_params(keys[6], 64, 64)
    p['s_conv2'] = _linear_params(keys[7], 64, 128)
    p['s_conv3'] = _linear_params(keys[8], 128, 1024)
    p['s_fc1'] = _linear_params(keys[9], 1024, 512)
    p['s_fc2'] = _linear_params(keys[10], 512, 256)
    p['s_fc3'] = _linear_params(keys[11], 256, 64 * 64)
    # main path
    p['bnca'] = _linear_params(keys[12], 3 * point_tuple, 64)
    p['bncb'] = _linear_params(keys[13], 64, 64)
    p['bnc1'] = _linear_params(keys[14], 64, 64)
    p['bnc2'] = _linear_params(keys[15], 64, 128)
    p['bnc3'] = _linear_params(keys[16], 128, 1024)
    return p


# --------------------------------------------------------------------------
# Sub-networks (QSTN / STN) and forward pass
# --------------------------------------------------------------------------
def _batch_quat_to_rotmat(q):
    # tiny per-batch scalar glue, plain JAX (matches PCPNet utils)
    s = 2.0 / jnp.sum(q * q, axis=1)                 # (B,)
    h = jnp.einsum('bi,bj->bij', q, q)
    rows = [
        1 - (h[:, 2, 2] + h[:, 3, 3]) * s,
        (h[:, 1, 2] - h[:, 3, 0]) * s,
        (h[:, 1, 3] + h[:, 2, 0]) * s,
        (h[:, 1, 2] + h[:, 3, 0]) * s,
        1 - (h[:, 1, 1] + h[:, 3, 3]) * s,
        (h[:, 2, 3] - h[:, 1, 0]) * s,
        (h[:, 1, 3] - h[:, 2, 0]) * s,
        (h[:, 2, 3] + h[:, 1, 0]) * s,
        1 - (h[:, 1, 1] + h[:, 2, 2]) * s,
    ]
    return jnp.stack(rows, axis=1).reshape(-1, 3, 3)


def _qstn(x_pts3, p, count):
    rs0, g0 = _moments(x_pts3)                       # tiny (3-channel) input moments
    sc1, sh1 = _bn_affine(rs0, g0, p['q_conv1'], count)
    h1, rs1, g1 = _apply_layer(x_pts3, _w3d(p['q_conv1']), sc1, sh1)
    sc2, sh2 = _bn_affine(rs1, g1, p['q_conv2'], count)
    rs2, g2, mx, mn = _apply_layer_pool_stats(
        h1, _w3d(p['q_conv2']), sc2, sh2, p['q_conv3'][0].astype(jnp.bfloat16))
    sc3, sh3 = _bn_affine(rs2, g2, p['q_conv3'], count)
    q = _fc_head(mx, mn, sc3, sh3, p['q_fc1'], p['q_fc2'], p['q_fc3'])
    q = q + jnp.array([[1.0, 0.0, 0.0, 0.0]], jnp.float32)   # identity quaternion
    return _batch_quat_to_rotmat(q)                          # (B, 3, 3)


def _stn(h, rs_h, g_h, p, count, dim=64):
    # stats of s_conv1 come for free from the caller's moments of h (bncb out)
    sc1, sh1 = _bn_affine(rs_h, g_h, p['s_conv1'], count)
    h1, rs1, g1 = _apply_layer(h, _w3d(p['s_conv1']), sc1, sh1)
    sc2, sh2 = _bn_affine(rs1, g1, p['s_conv2'], count)
    rs2, g2, mx, mn = _apply_layer_pool_stats(
        h1, _w3d(p['s_conv2']), sc2, sh2, p['s_conv3'][0].astype(jnp.bfloat16))
    sc3, sh3 = _bn_affine(rs2, g2, p['s_conv3'], count)
    t = _fc_head(mx, mn, sc3, sh3, p['s_fc1'], p['s_fc2'], p['s_fc3'])
    t = t + jnp.eye(dim, dtype=jnp.float32).reshape(1, dim * dim)  # identity init
    return t.reshape(-1, dim, dim)                                  # (B, 64, 64)


def pointnetfeat_forward(x_ncw, params, *, num_points, point_tuple=1):
    """x_ncw: PyTorch-layout input (B, 3*point_tuple, num_points)."""
    B = x_ncw.shape[0]
    pt = point_tuple
    N = num_points

    # channels-last views: bnca input (B, N, 3*pt); QSTN sees (B, N*pt, 3)
    x4 = x_ncw.reshape(B, 3, pt, N)
    x_in = jnp.transpose(x4, (0, 3, 1, 2)).reshape(B, N, 3 * pt).astype(jnp.bfloat16)
    x_pts3 = (x_in if pt == 1 else
              jnp.transpose(x_ncw.reshape(B, 3, -1), (0, 2, 1)).astype(jnp.bfloat16))

    trans = _qstn(x_pts3, params, B * N * pt)                     # (B, 3, 3)

    # Fold the per-batch 3x3 rotation into the bnca weights:
    # (x @ T) @ W == x @ W_eff with W_eff[b, i*pt+k, o] = sum_j T[b,i,j] W[j*pt+k, o]
    wa = params['bnca'][0]
    wa_eff = jnp.einsum('bij,jko->biko', trans,
                        wa.reshape(3, pt, wa.shape[1])).reshape(B, 3 * pt, wa.shape[1])

    count = B * N
    rs_in, g_in = _moments(x_in)
    sca, sha = _bn_affine(rs_in, g_in, params['bnca'], count, w=wa_eff)
    h_a, rs_a, g_a = _apply_layer(x_in, wa_eff.astype(jnp.bfloat16), sca, sha)

    scb, shb = _bn_affine(rs_a, g_a, params['bncb'], count)
    h_b, rs_b, g_b = _apply_layer(h_a, _w3d(params['bncb']), scb, shb)

    trans2 = _stn(h_b, rs_b, g_b, params, count, dim=64)          # (B, 64, 64)

    # Fold the per-batch 64x64 feature transform into bnc1: (x@T2)@W == x@(T2@W).
    # bnc1's BN stats come from h_b's moments even though T2 was unknown then.
    w1_eff = jnp.einsum('bij,jo->bio', trans2, params['bnc1'][0])
    sc1, sh1 = _bn_affine(rs_b, g_b, params['bnc1'], count, w=w1_eff)
    h_1, rs_1, g_1 = _apply_layer(h_b, w1_eff.astype(jnp.bfloat16), sc1, sh1)

    sc2, sh2 = _bn_affine(rs_1, g_1, params['bnc2'], count)
    rs_2, g_2, mx, mn = _apply_layer_pool_stats(
        h_1, _w3d(params['bnc2']), sc2, sh2, params['bnc3'][0].astype(jnp.bfloat16))

    sc3, sh3 = _bn_affine(rs_2, g_2, params['bnc3'], count)
    # bnc3 has no ReLU: finalize max-pool( BN(conv3) ) with the gamma-sign trick.
    feat = jnp.where(sc3 >= 0.0, mx, mn) * sc3 + sh3              # (B, 1024) f32
    return feat, trans, trans2, None


# --------------------------------------------------------------------------
if __name__ == "__main__":
    B, num_points, point_tuple = 2, 64, 1
    key = jax.random.PRNGKey(0)
    kx, kp = jax.random.split(key)

    x = jax.random.normal(kx, (B, 3 * point_tuple, num_points), dtype=jnp.float32)
    params = init_pointnetfeat_params(kp, point_tuple=point_tuple)

    fwd = jax.jit(partial(pointnetfeat_forward,
                          num_points=num_points, point_tuple=point_tuple))
    feat, trans, trans2, _ = fwd(x, params)
    jax.block_until_ready((feat, trans, trans2))

    assert feat.shape == (B, 1024)
    assert trans.shape == (B, 3, 3)
    assert trans2.shape == (B, 64, 64)
    assert bool(jnp.all(jnp.isfinite(feat)))
    print("KERNEL_OK")
</pallas_src>

<mosaic_0001>
module attributes {stable_mosaic.version = 11 : i64} {
  func.func @_apply_moments_kernel(%arg0: i32, %arg1: i32, %arg2: memref<1x64x3xbf16, #tpu.memory_space<vmem>>, %arg3: memref<1x3x64xbf16, #tpu.memory_space<vmem>>, %arg4: memref<1x64xf32, #tpu.memory_space<vmem>>, %arg5: memref<1x64xf32, #tpu.memory_space<vmem>>, %arg6: memref<1x64x64xbf16, #tpu.memory_space<vmem>>, %arg7: memref<1x1x64xf32, #tpu.memory_space<vmem>>, %arg8: memref<1x64x64xf32, #tpu.memory_space<vmem>>) attributes {dimension_semantics = [#tpu.dimension_semantics<parallel>, #tpu.dimension_semantics<arbitrary>], iteration_bounds = array<i64: 2, 1>, scalar_prefetch = 0 : i64, scratch_operands = 0 : i64, tpu.core_type = #tpu.core_type<tc>, window_params = [{transform_indices = @transform_0, window_bounds = array<i64: 1, 64, 3>}, {pipeline_mode = #tpu.pipeline_mode<synchronous>, transform_indices = @transform_1, window_bounds = array<i64: 1, 3, 64>}, {pipeline_mode = #tpu.pipeline_mode<synchronous>, transform_indices = @transform_2, window_bounds = array<i64: 1, 64>}, {pipeline_mode = #tpu.pipeline_mode<synchronous>, transform_indices = @transform_3, window_bounds = array<i64: 1, 64>}, {transform_indices = @transform_4, window_bounds = array<i64: 1, 64, 64>}, {transform_indices = @transform_5, window_bounds = array<i64: 1, 1, 64>}, {transform_indices = @transform_6, window_bounds = array<i64: 1, 64, 64>}]} {
    %c0 = arith.constant 0 : index
    %c0_0 = arith.constant 0 : index
    %c0_1 = arith.constant 0 : index
    %0 = vector.load %arg2[%c0, %c0_0, %c0_1] : memref<1x64x3xbf16, #tpu.memory_space<vmem>>, vector<1x64x3xbf16>
    %1 = vector.shape_cast %0 : vector<1x64x3xbf16> to vector<64x3xbf16>
    %c0_2 = arith.constant 0 : index
    %c0_3 = arith.constant 0 : index
    %c0_4 = arith.constant 0 : index
    %2 = vector.load %arg3[%c0_2, %c0_3, %c0_4] : memref<1x3x64xbf16, #tpu.memory_space<vmem>>, vector<1x3x64xbf16>
    %3 = vector.shape_cast %2 : vector<1x3x64xbf16> to vector<3x64xbf16>
    %cst = arith.constant dense<0.000000e+00> : vector<64x64xf32>
    %4 = tpu.matmul %1, %3, %cst {dimension_numbers = #tpu.dot_dimension_numbers<[1], [0], [0], [1], [0, 0, 1, 1], [], []>} : vector<64x3xbf16>, vector<3x64xbf16>, vector<64x64xf32> -> vector<64x64xf32>
    %c0_5 = arith.constant 0 : index
    %c0_6 = arith.constant 0 : index
    %5 = vector.load %arg4[%c0_5, %c0_6] : memref<1x64xf32, #tpu.memory_space<vmem>>, vector<1x64xf32>
    %6 = vector.broadcast %5 : vector<1x64xf32> to vector<64x64xf32>
    %7 = arith.mulf %4, %6 : vector<64x64xf32>
    %c0_7 = arith.constant 0 : index
    %c0_8 = arith.constant 0 : index
    %8 = vector.load %arg5[%c0_7, %c0_8] : memref<1x64xf32, #tpu.memory_space<vmem>>, vector<1x64xf32>
    %9 = vector.broadcast %8 : vector<1x64xf32> to vector<64x64xf32>
    %10 = arith.addf %7, %9 : vector<64x64xf32>
    %cst_9 = arith.constant 0.000000e+00 : f32
    %11 = vector.broadcast %cst_9 : f32 to vector<64x64xf32>
    %12 = arith.maximumf %10, %11 : vector<64x64xf32>
    %13 = arith.truncf %12 : vector<64x64xf32> to vector<64x64xbf16>
    %c0_10 = arith.constant 0 : index
    %c0_11 = arith.constant 0 : index
    %c0_12 = arith.constant 0 : index
    %14 = vector.load %arg6[%c0_10, %c0_11, %c0_12] : memref<1x64x64xbf16, #tpu.memory_space<vmem>>, vector<1x64x64xbf16>
    %15 = vector.shape_cast %14 : vector<1x64x64xbf16> to vector<64x64xbf16>
    %16 = vector.shape_cast %13 : vector<64x64xbf16> to vector<1x64x64xbf16>
    tpu.vector_store %arg6[%c0_10, %c0_11, %c0_12], %16 {strides = array<i32>} : memref<1x64x64xbf16, #tpu.memory_space<vmem>>, vector<1x64x64xbf16>,
    %c0_i32 = arith.constant 0 : i32
    %17 = arith.cmpi eq, %arg1, %c0_i32 : i32
    %18 = arith.extui %17 : i1 to i32
    %c0_i32_13 = arith.constant 0 : i32
    %19 = arith.cmpi ne, %18, %c0_i32_13 : i32
    scf.if %19 {
      %cst_28 = arith.constant 0.000000e+00 : f32
      %37 = vector.broadcast %cst_28 : f32 to vector<1x1x64xf32>
      %c0_29 = arith.constant 0 : index
      %c0_30 = arith.constant 0 : index
      %c0_31 = arith.constant 0 : index
      %38 = vector.load %arg7[%c0_29, %c0_30, %c0_31] : memref<1x1x64xf32, #tpu.memory_space<vmem>>, vector<1x1x64xf32>
      tpu.vector_store %arg7[%c0_29, %c0_30, %c0_31], %37 {strides = array<i32>} : memref<1x1x64xf32, #tpu.memory_space<vmem>>, vector<1x1x64xf32>,
      %cst_32 = arith.constant 0.000000e+00 : f32
      %39 = vector.broadcast %cst_32 : f32 to vector<1x64x64xf32>
      %c0_33 = arith.constant 0 : index
      %c0_34 = arith.constant 0 : index
      %c0_35 = arith.constant 0 : index
      %40 = vector.load %arg8[%c0_33, %c0_34, %c0_35] : memref<1x64x64xf32, #tpu.memory_space<vmem>>, vector<1x64x64xf32>
      tpu.vector_store %arg8[%c0_33, %c0_34, %c0_35], %39 {strides = array<i32>} : memref<1x64x64xf32, #tpu.memory_space<vmem>>, vector<1x64x64xf32>,
    } else {
    }
    %c0_14 = arith.constant 0 : index
    %c0_15 = arith.constant 0 : index
    %c0_16 = arith.constant 0 : index
    %20 = vector.load %arg7[%c0_14, %c0_15, %c0_16] : memref<1x1x64xf32, #tpu.memory_space<vmem>>, vector<1x1x64xf32>
    %21 = vector.shape_cast %20 : vector<1x1x64xf32> to vector<1x64xf32>
    %22 = arith.extf %13 : vector<64x64xbf16> to vector<64x64xf32>
    %cst_17 = arith.constant dense<0.000000e+00> : vector<64xf32>
    %23 = vector.multi_reduction <add>, %22, %cst_17 [0] : vector<64x64xf32> to vector<64xf32>
    %24 = vector.shape_cast %23 : vector<64xf32> to vector<1x64xf32>
    %25 = arith.addf %21, %24 : vector<1x64xf32>
    %c0_18 = arith.constant 0 : index
    %c0_19 = arith.constant 0 : index
    %c0_20 = arith.constant 0 : index
    %26 = vector.load %arg7[%c0_18, %c0_19, %c0_20] : memref<1x1x64xf32, #tpu.memory_space<vmem>>, vector<1x1x64xf32>
    %27 = vector.shape_cast %26 : vector<1x1x64xf32> to vector<1x64xf32>
    %28 = vector.shape_cast %25 : vector<1x64xf32> to vector<1x1x64xf32>
    tpu.vector_store %arg7[%c0_18, %c0_19, %c0_20], %28 {strides = array<i32>} : memref<1x1x64xf32, #tpu.memory_space<vmem>>, vector<1x1x64xf32>,
    %c0_21 = arith.constant 0 : index
    %c0_22 = arith.constant 0 : index
    %c0_23 = arith.constant 0 : index
    %29 = vector.load %arg8[%c0_21, %c0_22, %c0_23] : memref<1x64x64xf32, #tpu.memory_space<vmem>>, vector<1x64x64xf32>
    %30 = vector.shape_cast %29 : vector<1x64x64xf32> to vector<64x64xf32>
    %31 = tpu.transpose %13, [1, 0] : vector<64x64xbf16> -> vector<64x64xbf16>
    %cst_24 = arith.constant dense<0.000000e+00> : vector<64x64xf32>
    %32 = tpu.matmul %31, %13, %cst_24 {dimension_numbers = #tpu.dot_dimension_numbers<[1], [0], [0], [1], [0, 0, 1, 1], [], []>} : vector<64x64xbf16>, vector<64x64xbf16>, vector<64x64xf32> -> vector<64x64xf32>
    %33 = arith.addf %30, %32 : vector<64x64xf32>
    %c0_25 = arith.constant 0 : index
    %c0_26 = arith.constant 0 : index
    %c0_27 = arith.constant 0 : index
    %34 = vector.load %arg8[%c0_25, %c0_26, %c0_27] : memref<1x64x64xf32, #tpu.memory_space<vmem>>, vector<1x64x64xf32>
    %35 = vector.shape_cast %34 : vector<1x64x64xf32> to vector<64x64xf32>
    %36 = vector.shape_cast %33 : vector<64x64xf32> to vector<1x64x64xf32>
    tpu.vector_store %arg8[%c0_25, %c0_26, %c0_27], %36 {strides = array<i32>} : memref<1x64x64xf32, #tpu.memory_space<vmem>>, vector<1x64x64xf32>,
    return
  }
  func.func @transform_0(%arg0: i32, %arg1: i32) -> (i32, i32, i32) {
    %c0_i32 = arith.constant 0 : i32
    %c0_i32_0 = arith.constant 0 : i32
    return %arg0, %arg1, %c0_i32 : i32, i32, i32
  }
  func.func @transform_1(%arg0: i32, %arg1: i32) -> (i32, i32, i32) {
    %c0_i32 = arith.constant 0 : i32
    %c0_i32_0 = arith.constant 0 : i32
    %c0_i32_1 = arith.constant 0 : i32
    %c0_i32_2 = arith.constant 0 : i32
    return %c0_i32, %c0_i32_0, %c0_i32_1 : i32, i32, i32
  }
  func.func @transform_2(%arg0: i32, %arg1: i32) -> (i32, i32) {
    %c0_i32 = arith.constant 0 : i32
    %c0_i32_0 = arith.constant 0 : i32
    %c0_i32_1 = arith.constant 0 : i32
    return %c0_i32, %c0_i32_0 : i32, i32
  }
  func.func @transform_3(%arg0: i32, %arg1: i32) -> (i32, i32) {
    %c0_i32 = arith.constant 0 : i32
    %c0_i32_0 = arith.constant 0 : i32
    %c0_i32_1 = arith.constant 0 : i32
    return %c0_i32, %c0_i32_0 : i32, i32
  }
  func.func @transform_4(%arg0: i32, %arg1: i32) -> (i32, i32, i32) {
    %c0_i32 = arith.constant 0 : i32
    %c0_i32_0 = arith.constant 0 : i32
    return %arg0, %arg1, %c0_i32 : i32, i32, i32
  }
  func.func @transform_5(%arg0: i32, %arg1: i32) -> (i32, i32, i32) {
    %c0_i32 = arith.constant 0 : i32
    %c0_i32_0 = arith.constant 0 : i32
    %c0_i32_1 = arith.constant 0 : i32
    return %arg0, %c0_i32, %c0_i32_0 : i32, i32, i32
  }
  func.func @transform_6(%arg0: i32, %arg1: i32) -> (i32, i32, i32) {
    %c0_i32 = arith.constant 0 : i32
    %c0_i32_0 = arith.constant 0 : i32
    %c0_i32_1 = arith.constant 0 : i32
    return %arg0, %c0_i32, %c0_i32_0 : i32, i32, i32
  }
}

module attributes {stable_mosaic.version = 11 : i64} {
  func.func @_apply_moments_pool_kernel(%arg0: i32, %arg1: i32, %arg2: memref<1x64x64xbf16, #tpu.memory_space<vmem>>, %arg3: memref<1x64x128xbf16, #tpu.memory_space<vmem>>, %arg4: memref<1x128xf32, #tpu.memory_space<vmem>>, %arg5: memref<1x128xf32, #tpu.memory_space<vmem>>, %arg6: memref<128x1024xbf16, #tpu.memory_space<vmem>>, %arg7: memref<1x1x128xf32, #tpu.memory_space<vmem>>, %arg8: memref<1x128x128xf32, #tpu.memory_space<vmem>>, %arg9: memref<1x1x1024xf32, #tpu.memory_space<vmem>>, %arg10: memref<1x1x1024xf32, #tpu.memory_space<vmem>>) attributes {dimension_semantics = [#tpu.dimension_semantics<parallel>, #tpu.dimension_semantics<arbitrary>], iteration_bounds = array<i64: 2, 1>, scalar_prefetch = 0 : i64, scratch_operands = 0 : i64, tpu.core_type = #tpu.core_type<tc>, window_params = [{transform_indices = @transform_0, window_bounds = array<i64: 1, 64, 64>}, {pipeline_mode = #tpu.pipeline_mode<synchronous>, transform_indices = @transform_1, window_bounds = array<i64: 1, 64, 128>}, {pipeline_mode = #tpu.pipeline_mode<synchronous>, transform_indices = @transform_2, window_bounds = array<i64: 1, 128>}, {pipeline_mode = #tpu.pipeline_mode<synchronous>, transform_indices = @transform_3, window_bounds = array<i64: 1, 128>}, {pipeline_mode = #tpu.pipeline_mode<synchronous>, transform_indices = @transform_4, window_bounds = array<i64: 128, 1024>}, {transform_indices = @transform_5, window_bounds = array<i64: 1, 1, 128>}, {transform_indices = @transform_6, window_bounds = array<i64: 1, 128, 128>}, {transform_indices = @transform_7, window_bounds = array<i64: 1, 1, 1024>}, {transform_indices = @transform_8, window_bounds = array<i64: 1, 1, 1024>}]} {
    %c0 = arith.constant 0 : index
    %c0_0 = arith.constant 0 : index
    %c0_1 = arith.constant 0 : index
    %0 = vector.load %arg2[%c0, %c0_0, %c0_1] : memref<1x64x64xbf16, #tpu.memory_space<vmem>>, vector<1x64x64xbf16>
    %1 = vector.shape_cast %0 : vector<1x64x64xbf16> to vector<64x64xbf16>
    %c0_2 = arith.constant 0 : index
    %c0_3 = arith.constant 0 : index
    %c0_4 = arith.constant 0 : index
    %2 = vector.load %arg3[%c0_2, %c0_3, %c0_4] : memref<1x64x128xbf16, #tpu.memory_space<vmem>>, vector<1x64x128xbf16>
    %3 = vector.shape_cast %2 : vector<1x64x128xbf16> to vector<64x128xbf16>
    %cst = arith.constant dense<0.000000e+00> : vector<64x128xf32>
    %4 = tpu.matmul %1, %3, %cst {dimension_numbers = #tpu.dot_dimension_numbers<[1], [0], [0], [1], [0, 0, 1, 1], [], []>} : vector<64x64xbf16>, vector<64x128xbf16>, vector<64x128xf32> -> vector<64x128xf32>
    %c0_5 = arith.constant 0 : index
    %c0_6 = arith.constant 0 : index
    %5 = vector.load %arg4[%c0_5, %c0_6] : memref<1x128xf32, #tpu.memory_space<vmem>>, vector<1x128xf32>
    %6 = vector.broadcast %5 : vector<1x128xf32> to vector<64x128xf32>
    %7 = arith.mulf %4, %6 : vector<64x128xf32>
    %c0_7 = arith.constant 0 : index
    %c0_8 = arith.constant 0 : index
    %8 = vector.load %arg5[%c0_7, %c0_8] : memref<1x128xf32, #tpu.memory_space<vmem>>, vector<1x128xf32>
    %9 = vector.broadcast %8 : vector<1x128xf32> to vector<64x128xf32>
    %10 = arith.addf %7, %9 : vector<64x128xf32>
    %cst_9 = arith.constant 0.000000e+00 : f32
    %11 = vector.broadcast %cst_9 : f32 to vector<64x128xf32>
    %12 = arith.maximumf %10, %11 : vector<64x128xf32>
    %13 = arith.truncf %12 : vector<64x128xf32> to vector<64x128xbf16>
    %c0_i32 = arith.constant 0 : i32
    %14 = arith.cmpi eq, %arg1, %c0_i32 : i32
    %15 = arith.extui %14 : i1 to i32
    %c0_i32_10 = arith.constant 0 : i32
    %16 = arith.cmpi ne, %15, %c0_i32_10 : i32
    scf.if %16 {
      %cst_42 = arith.constant 0.000000e+00 : f32
      %52 = vector.broadcast %cst_42 : f32 to vector<1x1x128xf32>
      %c0_43 = arith.constant 0 : index
      %c0_44 = arith.constant 0 : index
      %c0_45 = arith.constant 0 : index
      %53 = vector.load %arg7[%c0_43, %c0_44, %c0_45] : memref<1x1x128xf32, #tpu.memory_space<vmem>>, vector<1x1x128xf32>
      tpu.vector_store %arg7[%c0_43, %c0_44, %c0_45], %52 {strides = array<i32>} : memref<1x1x128xf32, #tpu.memory_space<vmem>>, vector<1x1x128xf32>,
      %cst_46 = arith.constant 0.000000e+00 : f32
      %54 = vector.broadcast %cst_46 : f32 to vector<1x128x128xf32>
      %c0_47 = arith.constant 0 : index
      %c0_48 = arith.constant 0 : index
      %c0_49 = arith.constant 0 : index
      %55 = vector.load %arg8[%c0_47, %c0_48, %c0_49] : memref<1x128x128xf32, #tpu.memory_space<vmem>>, vector<1x128x128xf32>
      tpu.vector_store %arg8[%c0_47, %c0_48, %c0_49], %54 {strides = array<i32>} : memref<1x128x128xf32, #tpu.memory_space<vmem>>, vector<1x128x128xf32>,
      %cst_50 = arith.constant 0xFF800000 : f32
      %56 = vector.broadcast %cst_50 : f32 to vector<1x1x1024xf32>
      %c0_51 = arith.constant 0 : index
      %c0_52 = arith.constant 0 : index
      %c0_53 = arith.constant 0 : index
      %57 = vector.load %arg9[%c0_51, %c0_52, %c0_53] : memref<1x1x1024xf32, #tpu.memory_space<vmem>>, vector<1x1x1024xf32>
      tpu.vector_store %arg9[%c0_51, %c0_52, %c0_53], %56 {strides = array<i32>} : memref<1x1x1024xf32, #tpu.memory_space<vmem>>, vector<1x1x1024xf32>,
      %cst_54 = arith.constant 0x7F800000 : f32
      %58 = vector.broadcast %cst_54 : f32 to vector<1x1x1024xf32>
      %c0_55 = arith.constant 0 : index
      %c0_56 = arith.constant 0 : index
      %c0_57 = arith.constant 0 : index
      %59 = vector.load %arg10[%c0_55, %c0_56, %c0_57] : memref<1x1x1024xf32, #tpu.memory_space<vmem>>, vector<1x1x1024xf32>
      tpu.vector_store %arg10[%c0_55, %c0_56, %c0_57], %58 {strides = array<i32>} : memref<1x1x1024xf32, #tpu.memory_space<vmem>>, vector<1x1x1024xf32>,
    } else {
    }
    %c0_11 = arith.constant 0 : index
    %c0_12 = arith.constant 0 : index
    %c0_13 = arith.constant 0 : index
    %17 = vector.load %arg7[%c0_11, %c0_12, %c0_13] : memref<1x1x128xf32, #tpu.memory_space<vmem>>, vector<1x1x128xf32>
    %18 = vector.shape_cast %17 : vector<1x1x128xf32> to vector<1x128xf32>
    %19 = arith.extf %13 : vector<64x128xbf16> to vector<64x128xf32>
    %cst_14 = arith.constant dense<0.000000e+00> : vector<128xf32>
    %20 = vector.multi_reduction <add>, %19, %cst_14 [0] : vector<64x128xf32> to vector<128xf32>
    %21 = vector.shape_cast %20 : vector<128xf32> to vector<1x128xf32>
    %22 = arith.addf %18, %21 : vector<1x128xf32>
    %c0_15 = arith.constant 0 : index
    %c0_16 = arith.constant 0 : index
    %c0_17 = arith.constant 0 : index
    %23 = vector.load %arg7[%c0_15, %c0_16, %c0_17] : memref<1x1x128xf32, #tpu.memory_space<vmem>>, vector<1x1x128xf32>
    %24 = vector.shape_cast %23 : vector<1x1x128xf32> to vector<1x128xf32>
    %25 = vector.shape_cast %22 : vector<1x128xf32> to vector<1x1x128xf32>
    tpu.vector_store %arg7[%c0_15, %c0_16, %c0_17], %25 {strides = array<i32>} : memref<1x1x128xf32, #tpu.memory_space<vmem>>, vector<1x1x128xf32>,
    %c0_18 = arith.constant 0 : index
    %c0_19 = arith.constant 0 : index
    %c0_20 = arith.constant 0 : index
    %26 = vector.load %arg8[%c0_18, %c0_19, %c0_20] : memref<1x128x128xf32, #tpu.memory_space<vmem>>, vector<1x128x128xf32>
    %27 = vector.shape_cast %26 : vector<1x128x128xf32> to vector<128x128xf32>
    %28 = tpu.transpose %13, [1, 0] : vector<64x128xbf16> -> vector<128x64xbf16>
    %cst_21 = arith.constant dense<0.000000e+00> : vector<128x128xf32>
    %29 = tpu.matmul %28, %13, %cst_21 {dimension_numbers = #tpu.dot_dimension_numbers<[1], [0], [0], [1], [0, 0, 1, 1], [], []>} : vector<128x64xbf16>, vector<64x128xbf16>, vector<128x128xf32> -> vector<128x128xf32>
    %30 = arith.addf %27, %29 : vector<128x128xf32>
    %c0_22 = arith.constant 0 : index
    %c0_23 = arith.constant 0 : index
    %c0_24 = arith.constant 0 : index
    %31 = vector.load %arg8[%c0_22, %c0_23, %c0_24] : memref<1x128x128xf32, #tpu.memory_space<vmem>>, vector<1x128x128xf32>
    %32 = vector.shape_cast %31 : vector<1x128x128xf32> to vector<128x128xf32>
    %33 = vector.shape_cast %30 : vector<128x128xf32> to vector<1x128x128xf32>
    tpu.vector_store %arg8[%c0_22, %c0_23, %c0_24], %33 {strides = array<i32>} : memref<1x128x128xf32, #tpu.memory_space<vmem>>, vector<1x128x128xf32>,
    %c0_25 = arith.constant 0 : index
    %c0_26 = arith.constant 0 : index
    %34 = vector.load %arg6[%c0_25, %c0_26] : memref<128x1024xbf16, #tpu.memory_space<vmem>>, vector<128x1024xbf16>
    %cst_27 = arith.constant dense<0.000000e+00> : vector<64x1024xf32>
    %35 = tpu.matmul %13, %34, %cst_27 {dimension_numbers = #tpu.dot_dimension_numbers<[1], [0], [0], [1], [0, 0, 1, 1], [], []>} : vector<64x128xbf16>, vector<128x1024xbf16>, vector<64x1024xf32> -> vector<64x1024xf32>
    %c0_28 = arith.constant 0 : index
    %c0_29 = arith.constant 0 : index
    %c0_30 = arith.constant 0 : index
    %36 = vector.load %arg9[%c0_28, %c0_29, %c0_30] : memref<1x1x1024xf32, #tpu.memory_space<vmem>>, vector<1x1x1024xf32>
    %37 = vector.shape_cast %36 : vector<1x1x1024xf32> to vector<1x1024xf32>
    %cst_31 = arith.constant dense<0xFF800000> : vector<1024xf32>
    %38 = vector.multi_reduction <maximumf>, %35, %cst_31 [0] : vector<64x1024xf32> to vector<1024xf32>
    %39 = vector.shape_cast %38 : vector<1024xf32> to vector<1x1024xf32>
    %40 = arith.maximumf %37, %39 : vector<1x1024xf32>
    %c0_32 = arith.constant 0 : index
    %c0_33 = arith.constant 0 : index
    %c0_34 = arith.constant 0 : index
    %41 = vector.load %arg9[%c0_32, %c0_33, %c0_34] : memref<1x1x1024xf32, #tpu.memory_space<vmem>>, vector<1x1x1024xf32>
    %42 = vector.shape_cast %41 : vector<1x1x1024xf32> to vector<1x1024xf32>
    %43 = vector.shape_cast %40 : vector<1x1024xf32> to vector<1x1x1024xf32>
    tpu.vector_store %arg9[%c0_32, %c0_33, %c0_34], %43 {strides = array<i32>} : memref<1x1x1024xf32, #tpu.memory_space<vmem>>, vector<1x1x1024xf32>,
    %c0_35 = arith.constant 0 : index
    %c0_36 = arith.constant 0 : index
    %c0_37 = arith.constant 0 : index
    %44 = vector.load %arg10[%c0_35, %c0_36, %c0_37] : memref<1x1x1024xf32, #tpu.memory_space<vmem>>, vector<1x1x1024xf32>
    %45 = vector.shape_cast %44 : vector<1x1x1024xf32> to vector<1x1024xf32>
    %cst_38 = arith.constant dense<0x7F800000> : vector<1024xf32>
    %46 = vector.multi_reduction <minimumf>, %35, %cst_38 [0] : vector<64x1024xf32> to vector<1024xf32>
    %47 = vector.shape_cast %46 : vector<1024xf32> to vector<1x1024xf32>
    %48 = arith.minimumf %45, %47 : vector<1x1024xf32>
    %c0_39 = arith.constant 0 : index
    %c0_40 = arith.constant 0 : index
    %c0_41 = arith.constant 0 : index
    %49 = vector.load %arg10[%c0_39, %c0_40, %c0_41] : memref<1x1x1024xf32, #tpu.memory_space<vmem>>, vector<1x1x1024xf32>
    %50 = vector.shape_cast %49 : vector<1x1x1024xf32> to vector<1x1024xf32>
    %51 = vector.shape_cast %48 : vector<1x1024xf32> to vector<1x1x1024xf32>
    tpu.vector_store %arg10[%c0_39, %c0_40, %c0_41], %51 {strides = array<i32>} : memref<1x1x1024xf32, #tpu.memory_space<vmem>>, vector<1x1x1024xf32>,
    return
  }
  func.func @transform_0(%arg0: i32, %arg1: i32) -> (i32, i32, i32) {
    %c0_i32 = arith.constant 0 : i32
    %c0_i32_0 = arith.constant 0 : i32
    return %arg0, %arg1, %c0_i32 : i32, i32, i32
  }
  func.func @transform_1(%arg0: i32, %arg1: i32) -> (i32, i32, i32) {
    %c0_i32 = arith.constant 0 : i32
    %c0_i32_0 = arith.constant 0 : i32
    %c0_i32_1 = arith.constant 0 : i32
    %c0_i32_2 = arith.constant 0 : i32
    return %c0_i32, %c0_i32_0, %c0_i32_1 : i32, i32, i32
  }
  func.func @transform_2(%arg0: i32, %arg1: i32) -> (i32, i32) {
    %c0_i32 = arith.constant 0 : i32
    %c0_i32_0 = arith.constant 0 : i32
    %c0_i32_1 = arith.constant 0 : i32
    return %c0_i32, %c0_i32_0 : i32, i32
  }
  func.func @transform_3(%arg0: i32, %arg1: i32) -> (i32, i32) {
    %c0_i32 = arith.constant 0 : i32
    %c0_i32_0 = arith.constant 0 : i32
    %c0_i32_1 = arith.constant 0 : i32
    return %c0_i32, %c0_i32_0 : i32, i32
  }
  func.func @transform_4(%arg0: i32, %arg1: i32) -> (i32, i32) {
    %c0_i32 = arith.constant 0 : i32
    %c0_i32_0 = arith.constant 0 : i32
    %c0_i32_1 = arith.constant 0 : i32
    return %c0_i32, %c0_i32_0 : i32, i32
  }
  func.func @transform_5(%arg0: i32, %arg1: i32) -> (i32, i32, i32) {
    %c0_i32 = arith.constant 0 : i32
    %c0_i32_0 = arith.constant 0 : i32
    %c0_i32_1 = arith.constant 0 : i32
    return %arg0, %c0_i32, %c0_i32_0 : i32, i32, i32
  }
  func.func @transform_6(%arg0: i32, %arg1: i32) -> (i32, i32, i32) {
    %c0_i32 = arith.constant 0 : i32
    %c0_i32_0 = arith.constant 0 : i32
    %c0_i32_1 = arith.constant 0 : i32
    return %arg0, %c0_i32, %c0_i32_0 : i32, i32, i32
  }
  func.func @transform_7(%arg0: i32, %arg1: i32) -> (i32, i32, i32) {
    %c0_i32 = arith.constant 0 : i32
    %c0_i32_0 = arith.constant 0 : i32
    %c0_i32_1 = arith.constant 0 : i32
    return %arg0, %c0_i32, %c0_i32_0 : i32, i32, i32
  }
  func.func @transform_8(%arg0: i32, %arg1: i32) -> (i32, i32, i32) {
    %c0_i32 = arith.constant 0 : i32
    %c0_i32_0 = arith.constant 0 : i32
    %c0_i32_1 = arith.constant 0 : i32
    return %arg0, %c0_i32, %c0_i32_0 : i32, i32, i32
  }
}

module attributes {stable_mosaic.version = 11 : i64} {
  func.func @_fc_head_kernel(%arg0: memref<2x1024xf32, #tpu.memory_space<vmem>>, %arg1: memref<2x1024xf32, #tpu.memory_space<vmem>>, %arg2: memref<1x1024xf32, #tpu.memory_space<vmem>>, %arg3: memref<1x1024xf32, #tpu.memory_space<vmem>>, %arg4: memref<1024x512xbf16, #tpu.memory_space<vmem>>, %arg5: memref<1x512xf32, #tpu.memory_space<vmem>>, %arg6: memref<1x512xf32, #tpu.memory_space<vmem>>, %arg7: memref<1x512xf32, #tpu.memory_space<vmem>>, %arg8: memref<512x256xbf16, #tpu.memory_space<vmem>>, %arg9: memref<1x256xf32, #tpu.memory_space<vmem>>, %arg10: memref<1x256xf32, #tpu.memory_space<vmem>>, %arg11: memref<1x256xf32, #tpu.memory_space<vmem>>, %arg12: memref<256x4xbf16, #tpu.memory_space<vmem>>, %arg13: memref<1x4xf32, #tpu.memory_space<vmem>>, %arg14: memref<2x4xf32, #tpu.memory_space<vmem>>) attributes {dimension_semantics = [], scalar_prefetch = 0 : i64, scratch_operands = 0 : i64, tpu.core_type = #tpu.core_type<tc>} {
    %c0 = arith.constant 0 : index
    %c0_0 = arith.constant 0 : index
    %0 = vector.load %arg2[%c0, %c0_0] : memref<1x1024xf32, #tpu.memory_space<vmem>>, vector<1x1024xf32>
    %cst = arith.constant 0.000000e+00 : f32
    %1 = vector.broadcast %cst : f32 to vector<1x1024xf32>
    %2 = arith.cmpf oge, %0, %1 : vector<1x1024xf32>
    %c0_1 = arith.constant 0 : index
    %c0_2 = arith.constant 0 : index
    %3 = vector.load %arg0[%c0_1, %c0_2] : memref<2x1024xf32, #tpu.memory_space<vmem>>, vector<2x1024xf32>
    %c0_3 = arith.constant 0 : index
    %c0_4 = arith.constant 0 : index
    %4 = vector.load %arg1[%c0_3, %c0_4] : memref<2x1024xf32, #tpu.memory_space<vmem>>, vector<2x1024xf32>
    %5 = vector.shape_cast %2 : vector<1x1024xi1> to vector<1x1024xi1>
    %6 = vector.broadcast %5 : vector<1x1024xi1> to vector<2x1024xi1>
    %7 = arith.select %6, %3, %4 : vector<2x1024xi1>, vector<2x1024xf32>
    %8 = vector.broadcast %0 : vector<1x1024xf32> to vector<2x1024xf32>
    %9 = arith.mulf %7, %8 : vector<2x1024xf32>
    %c0_5 = arith.constant 0 : index
    %c0_6 = arith.constant 0 : index
    %10 = vector.load %arg3[%c0_5, %c0_6] : memref<1x1024xf32, #tpu.memory_space<vmem>>, vector<1x1024xf32>
    %11 = vector.broadcast %10 : vector<1x1024xf32> to vector<2x1024xf32>
    %12 = arith.addf %9, %11 : vector<2x1024xf32>
    %cst_7 = arith.constant 0.000000e+00 : f32
    %13 = vector.broadcast %cst_7 : f32 to vector<2x1024xf32>
    %14 = arith.maximumf %12, %13 : vector<2x1024xf32>
    %15 = arith.truncf %14 : vector<2x1024xf32> to vector<2x1024xbf16>
    %c0_8 = arith.constant 0 : index
    %c0_9 = arith.constant 0 : index
    %16 = vector.load %arg4[%c0_8, %c0_9] : memref<1024x512xbf16, #tpu.memory_space<vmem>>, vector<1024x512xbf16>
    %cst_10 = arith.constant dense<0.000000e+00> : vector<2x512xf32>
    %17 = tpu.matmul %15, %16, %cst_10 {dimension_numbers = #tpu.dot_dimension_numbers<[1], [0], [0], [1], [0, 0, 1, 1], [], []>} : vector<2x1024xbf16>, vector<1024x512xbf16>, vector<2x512xf32> -> vector<2x512xf32>
    %c0_11 = arith.constant 0 : index
    %c0_12 = arith.constant 0 : index
    %18 = vector.load %arg5[%c0_11, %c0_12] : memref<1x512xf32, #tpu.memory_space<vmem>>, vector<1x512xf32>
    %19 = vector.broadcast %18 : vector<1x512xf32> to vector<2x512xf32>
    %20 = arith.addf %17, %19 : vector<2x512xf32>
    %c0_13 = arith.constant 0 : index
    %c0_14 = arith.constant 0 : index
    %21 = vector.load %arg6[%c0_13, %c0_14] : memref<1x512xf32, #tpu.memory_space<vmem>>, vector<1x512xf32>
    %c0_15 = arith.constant 0 : index
    %c0_16 = arith.constant 0 : index
    %22 = vector.load %arg7[%c0_15, %c0_16] : memref<1x512xf32, #tpu.memory_space<vmem>>, vector<1x512xf32>
    %cst_17 = arith.constant dense<0.000000e+00> : vector<512xf32>
    %23 = vector.multi_reduction <add>, %20, %cst_17 [0] : vector<2x512xf32> to vector<512xf32>
    %24 = vector.shape_cast %23 : vector<512xf32> to vector<1x512xf32>
    %cst_18 = arith.constant 2.000000e+00 : f32
    %25 = vector.broadcast %cst_18 : f32 to vector<1x512xf32>
    %26 = arith.divf %24, %25 : vector<1x512xf32>
    %27 = vector.broadcast %26 : vector<1x512xf32> to vector<2x512xf32>
    %28 = arith.subf %20, %27 : vector<2x512xf32>
    %29 = arith.mulf %28, %28 : vector<2x512xf32>
    %cst_19 = arith.constant dense<0.000000e+00> : vector<512xf32>
    %30 = vector.multi_reduction <add>, %29, %cst_19 [0] : vector<2x512xf32> to vector<512xf32>
    %31 = vector.shape_cast %30 : vector<512xf32> to vector<1x512xf32>
    %cst_20 = arith.constant 2.000000e+00 : f32
    %32 = vector.broadcast %cst_20 : f32 to vector<1x512xf32>
    %33 = arith.divf %31, %32 : vector<1x512xf32>
    %34 = vector.broadcast %26 : vector<1x512xf32> to vector<2x512xf32>
    %35 = arith.subf %20, %34 : vector<2x512xf32>
    %cst_21 = arith.constant 9.99999974E-6 : f32
    %36 = vector.broadcast %cst_21 : f32 to vector<1x512xf32>
    %37 = arith.addf %33, %36 : vector<1x512xf32>
    %38 = math.rsqrt %37 : vector<1x512xf32>
    %39 = vector.broadcast %38 : vector<1x512xf32> to vector<2x512xf32>
    %40 = arith.mulf %35, %39 : vector<2x512xf32>
    %41 = vector.broadcast %21 : vector<1x512xf32> to vector<2x512xf32>
    %42 = arith.mulf %40, %41 : vector<2x512xf32>
    %43 = vector.broadcast %22 : vector<1x512xf32> to vector<2x512xf32>
    %44 = arith.addf %42, %43 : vector<2x512xf32>
    %cst_22 = arith.constant 0.000000e+00 : f32
    %45 = vector.broadcast %cst_22 : f32 to vector<2x512xf32>
    %46 = arith.maximumf %44, %45 : vector<2x512xf32>
    %47 = arith.truncf %46 : vector<2x512xf32> to vector<2x512xbf16>
    %c0_23 = arith.constant 0 : index
    %c0_24 = arith.constant 0 : index
    %48 = vector.load %arg8[%c0_23, %c0_24] : memref<512x256xbf16, #tpu.memory_space<vmem>>, vector<512x256xbf16>
    %cst_25 = arith.constant dense<0.000000e+00> : vector<2x256xf32>
    %49 = tpu.matmul %47, %48, %cst_25 {dimension_numbers = #tpu.dot_dimension_numbers<[1], [0], [0], [1], [0, 0, 1, 1], [], []>} : vector<2x512xbf16>, vector<512x256xbf16>, vector<2x256xf32> -> vector<2x256xf32>
    %c0_26 = arith.constant 0 : index
    %c0_27 = arith.constant 0 : index
    %50 = vector.load %arg9[%c0_26, %c0_27] : memref<1x256xf32, #tpu.memory_space<vmem>>, vector<1x256xf32>
    %51 = vector.broadcast %50 : vector<1x256xf32> to vector<2x256xf32>
    %52 = arith.addf %49, %51 : vector<2x256xf32>
    %c0_28 = arith.constant 0 : index
    %c0_29 = arith.constant 0 : index
    %53 = vector.load %arg10[%c0_28, %c0_29] : memref<1x256xf32, #tpu.memory_space<vmem>>, vector<1x256xf32>
    %c0_30 = arith.constant 0 : index
    %c0_31 = arith.constant 0 : index
    %54 = vector.load %arg11[%c0_30, %c0_31] : memref<1x256xf32, #tpu.memory_space<vmem>>, vector<1x256xf32>
    %cst_32 = arith.constant dense<0.000000e+00> : vector<256xf32>
    %55 = vector.multi_reduction <add>, %52, %cst_32 [0] : vector<2x256xf32> to vector<256xf32>
    %56 = vector.shape_cast %55 : vector<256xf32> to vector<1x256xf32>
    %cst_33 = arith.constant 2.000000e+00 : f32
    %57 = vector.broadcast %cst_33 : f32 to vector<1x256xf32>
    %58 = arith.divf %56, %57 : vector<1x256xf32>
    %59 = vector.broadcast %58 : vector<1x256xf32> to vector<2x256xf32>
    %60 = arith.subf %52, %59 : vector<2x256xf32>
    %61 = arith.mulf %60, %60 : vector<2x256xf32>
    %cst_34 = arith.constant dense<0.000000e+00> : vector<256xf32>
    %62 = vector.multi_reduction <add>, %61, %cst_34 [0] : vector<2x256xf32> to vector<256xf32>
    %63 = vector.shape_cast %62 : vector<256xf32> to vector<1x256xf32>
    %cst_35 = arith.constant 2.000000e+00 : f32
    %64 = vector.broadcast %cst_35 : f32 to vector<1x256xf32>
    %65 = arith.divf %63, %64 : vector<1x256xf32>
    %66 = vector.broadcast %58 : vector<1x256xf32> to vector<2x256xf32>
    %67 = arith.subf %52, %66 : vector<2x256xf32>
    %cst_36 = arith.constant 9.99999974E-6 : f32
    %68 = vector.broadcast %cst_36 : f32 to vector<1x256xf32>
    %69 = arith.addf %65, %68 : vector<1x256xf32>
    %70 = math.rsqrt %69 : vector<1x256xf32>
    %71 = vector.broadcast %70 : vector<1x256xf32> to vector<2x256xf32>
    %72 = arith.mulf %67, %71 : vector<2x256xf32>
    %73 = vector.broadcast %53 : vector<1x256xf32> to vector<2x256xf32>
    %74 = arith.mulf %72, %73 : vector<2x256xf32>
    %75 = vector.broadcast %54 : vector<1x256xf32> to vector<2x256xf32>
    %76 = arith.addf %74, %75 : vector<2x256xf32>
    %cst_37 = arith.constant 0.000000e+00 : f32
    %77 = vector.broadcast %cst_37 : f32 to vector<2x256xf32>
    %78 = arith.maximumf %76, %77 : vector<2x256xf32>
    %79 = arith.truncf %78 : vector<2x256xf32> to vector<2x256xbf16>
    %c0_38 = arith.constant 0 : index
    %c0_39 = arith.constant 0 : index
    %80 = vector.load %arg12[%c0_38, %c0_39] : memref<256x4xbf16, #tpu.memory_space<vmem>>, vector<256x4xbf16>
    %cst_40 = arith.constant dense<0.000000e+00> : vector<2x4xf32>
    %81 = tpu.matmul %79, %80, %cst_40 {dimension_numbers = #tpu.dot_dimension_numbers<[1], [0], [0], [1], [0, 0, 1, 1], [], []>} : vector<2x256xbf16>, vector<256x4xbf16>, vector<2x4xf32> -> vector<2x4xf32>
    %c0_41 = arith.constant 0 : index
    %c0_42 = arith.constant 0 : index
    %82 = vector.load %arg13[%c0_41, %c0_42] : memref<1x4xf32, #tpu.memory_space<vmem>>, vector<1x4xf32>
    %83 = vector.broadcast %82 : vector<1x4xf32> to vector<2x4xf32>
    %84 = arith.addf %81, %83 : vector<2x4xf32>
    %c0_43 = arith.constant 0 : index
    %c0_44 = arith.constant 0 : index
    %85 = vector.load %arg14[%c0_43, %c0_44] : memref<2x4xf32, #tpu.memory_space<vmem>>, vector<2x4xf32>
    tpu.vector_store %arg14[%c0_43, %c0_44], %84 {strides = array<i32>} : memref<2x4xf32, #tpu.memory_space<vmem>>, vector<2x4xf32>,
    return
  }
}

module attributes {stable_mosaic.version = 11 : i64} {
  func.func @_apply_moments_kernel(%arg0: i32, %arg1: i32, %arg2: memref<1x64x3xbf16, #tpu.memory_space<vmem>>, %arg3: memref<1x3x64xbf16, #tpu.memory_space<vmem>>, %arg4: memref<1x64xf32, #tpu.memory_space<vmem>>, %arg5: memref<1x64xf32, #tpu.memory_space<vmem>>, %arg6: memref<1x64x64xbf16, #tpu.memory_space<vmem>>, %arg7: memref<1x1x64xf32, #tpu.memory_space<vmem>>, %arg8: memref<1x64x64xf32, #tpu.memory_space<vmem>>) attributes {dimension_semantics = [#tpu.dimension_semantics<parallel>, #tpu.dimension_semantics<arbitrary>], iteration_bounds = array<i64: 2, 1>, scalar_prefetch = 0 : i64, scratch_operands = 0 : i64, tpu.core_type = #tpu.core_type<tc>, window_params = [{transform_indices = @transform_0, window_bounds = array<i64: 1, 64, 3>}, {transform_indices = @transform_1, window_bounds = array<i64: 1, 3, 64>}, {pipeline_mode = #tpu.pipeline_mode<synchronous>, transform_indices = @transform_2, window_bounds = array<i64: 1, 64>}, {pipeline_mode = #tpu.pipeline_mode<synchronous>, transform_indices = @transform_3, window_bounds = array<i64: 1, 64>}, {transform_indices = @transform_4, window_bounds = array<i64: 1, 64, 64>}, {transform_indices = @transform_5, window_bounds = array<i64: 1, 1, 64>}, {transform_indices = @transform_6, window_bounds = array<i64: 1, 64, 64>}]} {
    %c0 = arith.constant 0 : index
    %c0_0 = arith.constant 0 : index
    %c0_1 = arith.constant 0 : index
    %0 = vector.load %arg2[%c0, %c0_0, %c0_1] : memref<1x64x3xbf16, #tpu.memory_space<vmem>>, vector<1x64x3xbf16>
    %1 = vector.shape_cast %0 : vector<1x64x3xbf16> to vector<64x3xbf16>
    %c0_2 = arith.constant 0 : index
    %c0_3 = arith.constant 0 : index
    %c0_4 = arith.constant 0 : index
    %2 = vector.load %arg3[%c0_2, %c0_3, %c0_4] : memref<1x3x64xbf16, #tpu.memory_space<vmem>>, vector<1x3x64xbf16>
    %3 = vector.shape_cast %2 : vector<1x3x64xbf16> to vector<3x64xbf16>
    %cst = arith.constant dense<0.000000e+00> : vector<64x64xf32>
    %4 = tpu.matmul %1, %3, %cst {dimension_numbers = #tpu.dot_dimension_numbers<[1], [0], [0], [1], [0, 0, 1, 1], [], []>} : vector<64x3xbf16>, vector<3x64xbf16>, vector<64x64xf32> -> vector<64x64xf32>
    %c0_5 = arith.constant 0 : index
    %c0_6 = arith.constant 0 : index
    %5 = vector.load %arg4[%c0_5, %c0_6] : memref<1x64xf32, #tpu.memory_space<vmem>>, vector<1x64xf32>
    %6 = vector.broadcast %5 : vector<1x64xf32> to vector<64x64xf32>
    %7 = arith.mulf %4, %6 : vector<64x64xf32>
    %c0_7 = arith.constant 0 : index
    %c0_8 = arith.constant 0 : index
    %8 = vector.load %arg5[%c0_7, %c0_8] : memref<1x64xf32, #tpu.memory_space<vmem>>, vector<1x64xf32>
    %9 = vector.broadcast %8 : vector<1x64xf32> to vector<64x64xf32>
    %10 = arith.addf %7, %9 : vector<64x64xf32>
    %cst_9 = arith.constant 0.000000e+00 : f32
    %11 = vector.broadcast %cst_9 : f32 to vector<64x64xf32>
    %12 = arith.maximumf %10, %11 : vector<64x64xf32>
    %13 = arith.truncf %12 : vector<64x64xf32> to vector<64x64xbf16>
    %c0_10 = arith.constant 0 : index
    %c0_11 = arith.constant 0 : index
    %c0_12 = arith.constant 0 : index
    %14 = vector.load %arg6[%c0_10, %c0_11, %c0_12] : memref<1x64x64xbf16, #tpu.memory_space<vmem>>, vector<1x64x64xbf16>
    %15 = vector.shape_cast %14 : vector<1x64x64xbf16> to vector<64x64xbf16>
    %16 = vector.shape_cast %13 : vector<64x64xbf16> to vector<1x64x64xbf16>
    tpu.vector_store %arg6[%c0_10, %c0_11, %c0_12], %16 {strides = array<i32>} : memref<1x64x64xbf16, #tpu.memory_space<vmem>>, vector<1x64x64xbf16>,
    %c0_i32 = arith.constant 0 : i32
    %17 = arith.cmpi eq, %arg1, %c0_i32 : i32
    %18 = arith.extui %17 : i1 to i32
    %c0_i32_13 = arith.constant 0 : i32
    %19 = arith.cmpi ne, %18, %c0_i32_13 : i32
    scf.if %19 {
      %cst_28 = arith.constant 0.000000e+00 : f32
      %37 = vector.broadcast %cst_28 : f32 to vector<1x1x64xf32>
      %c0_29 = arith.constant 0 : index
      %c0_30 = arith.constant 0 : index
      %c0_31 = arith.constant 0 : index
      %38 = vector.load %arg7[%c0_29, %c0_30, %c0_31] : memref<1x1x64xf32, #tpu.memory_space<vmem>>, vector<1x1x64xf32>
      tpu.vector_store %arg7[%c0_29, %c0_30, %c0_31], %37 {strides = array<i32>} : memref<1x1x64xf32, #tpu.memory_space<vmem>>, vector<1x1x64xf32>,
      %cst_32 = arith.constant 0.000000e+00 : f32
      %39 = vector.broadcast %cst_32 : f32 to vector<1x64x64xf32>
      %c0_33 = arith.constant 0 : index
      %c0_34 = arith.constant 0 : index
      %c0_35 = arith.constant 0 : index
      %40 = vector.load %arg8[%c0_33, %c0_34, %c0_35] : memref<1x64x64xf32, #tpu.memory_space<vmem>>, vector<1x64x64xf32>
      tpu.vector_store %arg8[%c0_33, %c0_34, %c0_35], %39 {strides = array<i32>} : memref<1x64x64xf32, #tpu.memory_space<vmem>>, vector<1x64x64xf32>,
    } else {
    }
    %c0_14 = arith.constant 0 : index
    %c0_15 = arith.constant 0 : index
    %c0_16 = arith.constant 0 : index
    %20 = vector.load %arg7[%c0_14, %c0_15, %c0_16] : memref<1x1x64xf32, #tpu.memory_space<vmem>>, vector<1x1x64xf32>
    %21 = vector.shape_cast %20 : vector<1x1x64xf32> to vector<1x64xf32>
    %22 = arith.extf %13 : vector<64x64xbf16> to vector<64x64xf32>
    %cst_17 = arith.constant dense<0.000000e+00> : vector<64xf32>
    %23 = vector.multi_reduction <add>, %22, %cst_17 [0] : vector<64x64xf32> to vector<64xf32>
    %24 = vector.shape_cast %23 : vector<64xf32> to vector<1x64xf32>
    %25 = arith.addf %21, %24 : vector<1x64xf32>
    %c0_18 = arith.constant 0 : index
    %c0_19 = arith.constant 0 : index
    %c0_20 = arith.constant 0 : index
    %26 = vector.load %arg7[%c0_18, %c0_19, %c0_20] : memref<1x1x64xf32, #tpu.memory_space<vmem>>, vector<1x1x64xf32>
    %27 = vector.shape_cast %26 : vector<1x1x64xf32> to vector<1x64xf32>
    %28 = vector.shape_cast %25 : vector<1x64xf32> to vector<1x1x64xf32>
    tpu.vector_store %arg7[%c0_18, %c0_19, %c0_20], %28 {strides = array<i32>} : memref<1x1x64xf32, #tpu.memory_space<vmem>>, vector<1x1x64xf32>,
    %c0_21 = arith.constant 0 : index
    %c0_22 = arith.constant 0 : index
    %c0_23 = arith.constant 0 : index
    %29 = vector.load %arg8[%c0_21, %c0_22, %c0_23] : memref<1x64x64xf32, #tpu.memory_space<vmem>>, vector<1x64x64xf32>
    %30 = vector.shape_cast %29 : vector<1x64x64xf32> to vector<64x64xf32>
    %31 = tpu.transpose %13, [1, 0] : vector<64x64xbf16> -> vector<64x64xbf16>
    %cst_24 = arith.constant dense<0.000000e+00> : vector<64x64xf32>
    %32 = tpu.matmul %31, %13, %cst_24 {dimension_numbers = #tpu.dot_dimension_numbers<[1], [0], [0], [1], [0, 0, 1, 1], [], []>} : vector<64x64xbf16>, vector<64x64xbf16>, vector<64x64xf32> -> vector<64x64xf32>
    %33 = arith.addf %30, %32 : vector<64x64xf32>
    %c0_25 = arith.constant 0 : index
    %c0_26 = arith.constant 0 : index
    %c0_27 = arith.constant 0 : index
    %34 = vector.load %arg8[%c0_25, %c0_26, %c0_27] : memref<1x64x64xf32, #tpu.memory_space<vmem>>, vector<1x64x64xf32>
    %35 = vector.shape_cast %34 : vector<1x64x64xf32> to vector<64x64xf32>
    %36 = vector.shape_cast %33 : vector<64x64xf32> to vector<1x64x64xf32>
    tpu.vector_store %arg8[%c0_25, %c0_26, %c0_27], %36 {strides = array<i32>} : memref<1x64x64xf32, #tpu.memory_space<vmem>>, vector<1x64x64xf32>,
    return
  }
  func.func @transform_0(%arg0: i32, %arg1: i32) -> (i32, i32, i32) {
    %c0_i32 = arith.constant 0 : i32
    %c0_i32_0 = arith.constant 0 : i32
    return %arg0, %arg1, %c0_i32 : i32, i32, i32
  }
  func.func @transform_1(%arg0: i32, %arg1: i32) -> (i32, i32, i32) {
    %c0_i32 = arith.constant 0 : i32
    %c0_i32_0 = arith.constant 0 : i32
    %c0_i32_1 = arith.constant 0 : i32
    return %arg0, %c0_i32, %c0_i32_0 : i32, i32, i32
  }
  func.func @transform_2(%arg0: i32, %arg1: i32) -> (i32, i32) {
    %c0_i32 = arith.constant 0 : i32
    %c0_i32_0 = arith.constant 0 : i32
    %c0_i32_1 = arith.constant 0 : i32
    return %c0_i32, %c0_i32_0 : i32, i32
  }
  func.func @transform_3(%arg0: i32, %arg1: i32) -> (i32, i32) {
    %c0_i32 = arith.constant 0 : i32
    %c0_i32_0 = arith.constant 0 : i32
    %c0_i32_1 = arith.constant 0 : i32
    return %c0_i32, %c0_i32_0 : i32, i32
  }
  func.func @transform_4(%arg0: i32, %arg1: i32) -> (i32, i32, i32) {
    %c0_i32 = arith.constant 0 : i32
    %c0_i32_0 = arith.constant 0 : i32
    return %arg0, %arg1, %c0_i32 : i32, i32, i32
  }
  func.func @transform_5(%arg0: i32, %arg1: i32) -> (i32, i32, i32) {
    %c0_i32 = arith.constant 0 : i32
    %c0_i32_0 = arith.constant 0 : i32
    %c0_i32_1 = arith.constant 0 : i32
    return %arg0, %c0_i32, %c0_i32_0 : i32, i32, i32
  }
  func.func @transform_6(%arg0: i32, %arg1: i32) -> (i32, i32, i32) {
    %c0_i32 = arith.constant 0 : i32
    %c0_i32_0 = arith.constant 0 : i32
    %c0_i32_1 = arith.constant 0 : i32
    return %arg0, %c0_i32, %c0_i32_0 : i32, i32, i32
  }
}

module attributes {stable_mosaic.version = 11 : i64} {
  func.func @_apply_moments_kernel(%arg0: i32, %arg1: i32, %arg2: memref<1x64x64xbf16, #tpu.memory_space<vmem>>, %arg3: memref<1x64x64xbf16, #tpu.memory_space<vmem>>, %arg4: memref<1x64xf32, #tpu.memory_space<vmem>>, %arg5: memref<1x64xf32, #tpu.memory_space<vmem>>, %arg6: memref<1x64x64xbf16, #tpu.memory_space<vmem>>, %arg7: memref<1x1x64xf32, #tpu.memory_space<vmem>>, %arg8: memref<1x64x64xf32, #tpu.memory_space<vmem>>) attributes {dimension_semantics = [#tpu.dimension_semantics<parallel>, #tpu.dimension_semantics<arbitrary>], iteration_bounds = array<i64: 2, 1>, scalar_prefetch = 0 : i64, scratch_operands = 0 : i64, tpu.core_type = #tpu.core_type<tc>, window_params = [{transform_indices = @transform_0, window_bounds = array<i64: 1, 64, 64>}, {pipeline_mode = #tpu.pipeline_mode<synchronous>, transform_indices = @transform_1, window_bounds = array<i64: 1, 64, 64>}, {pipeline_mode = #tpu.pipeline_mode<synchronous>, transform_indices = @transform_2, window_bounds = array<i64: 1, 64>}, {pipeline_mode = #tpu.pipeline_mode<synchronous>, transform_indices = @transform_3, window_bounds = array<i64: 1, 64>}, {transform_indices = @transform_4, window_bounds = array<i64: 1, 64, 64>}, {transform_indices = @transform_5, window_bounds = array<i64: 1, 1, 64>}, {transform_indices = @transform_6, window_bounds = array<i64: 1, 64, 64>}]} {
    %c0 = arith.constant 0 : index
    %c0_0 = arith.constant 0 : index
    %c0_1 = arith.constant 0 : index
    %0 = vector.load %arg2[%c0, %c0_0, %c0_1] : memref<1x64x64xbf16, #tpu.memory_space<vmem>>, vector<1x64x64xbf16>
    %1 = vector.shape_cast %0 : vector<1x64x64xbf16> to vector<64x64xbf16>
    %c0_2 = arith.constant 0 : index
    %c0_3 = arith.constant 0 : index
    %c0_4 = arith.constant 0 : index
    %2 = vector.load %arg3[%c0_2, %c0_3, %c0_4] : memref<1x64x64xbf16, #tpu.memory_space<vmem>>, vector<1x64x64xbf16>
    %3 = vector.shape_cast %2 : vector<1x64x64xbf16> to vector<64x64xbf16>
    %cst = arith.constant dense<0.000000e+00> : vector<64x64xf32>
    %4 = tpu.matmul %1, %3, %cst {dimension_numbers = #tpu.dot_dimension_numbers<[1], [0], [0], [1], [0, 0, 1, 1], [], []>} : vector<64x64xbf16>, vector<64x64xbf16>, vector<64x64xf32> -> vector<64x64xf32>
    %c0_5 = arith.constant 0 : index
    %c0_6 = arith.constant 0 : index
    %5 = vector.load %arg4[%c0_5, %c0_6] : memref<1x64xf32, #tpu.memory_space<vmem>>, vector<1x64xf32>
    %6 = vector.broadcast %5 : vector<1x64xf32> to vector<64x64xf32>
    %7 = arith.mulf %4, %6 : vector<64x64xf32>
    %c0_7 = arith.constant 0 : index
    %c0_8 = arith.constant 0 : index
    %8 = vector.load %arg5[%c0_7, %c0_8] : memref<1x64xf32, #tpu.memory_space<vmem>>, vector<1x64xf32>
    %9 = vector.broadcast %8 : vector<1x64xf32> to vector<64x64xf32>
    %10 = arith.addf %7, %9 : vector<64x64xf32>
    %cst_9 = arith.constant 0.000000e+00 : f32
    %11 = vector.broadcast %cst_9 : f32 to vector<64x64xf32>
    %12 = arith.maximumf %10, %11 : vector<64x64xf32>
    %13 = arith.truncf %12 : vector<64x64xf32> to vector<64x64xbf16>
    %c0_10 = arith.constant 0 : index
    %c0_11 = arith.constant 0 : index
    %c0_12 = arith.constant 0 : index
    %14 = vector.load %arg6[%c0_10, %c0_11, %c0_12] : memref<1x64x64xbf16, #tpu.memory_space<vmem>>, vector<1x64x64xbf16>
    %15 = vector.shape_cast %14 : vector<1x64x64xbf16> to vector<64x64xbf16>
    %16 = vector.shape_cast %13 : vector<64x64xbf16> to vector<1x64x64xbf16>
    tpu.vector_store %arg6[%c0_10, %c0_11, %c0_12], %16 {strides = array<i32>} : memref<1x64x64xbf16, #tpu.memory_space<vmem>>, vector<1x64x64xbf16>,
    %c0_i32 = arith.constant 0 : i32
    %17 = arith.cmpi eq, %arg1, %c0_i32 : i32
    %18 = arith.extui %17 : i1 to i32
    %c0_i32_13 = arith.constant 0 : i32
    %19 = arith.cmpi ne, %18, %c0_i32_13 : i32
    scf.if %19 {
      %cst_28 = arith.constant 0.000000e+00 : f32
      %37 = vector.broadcast %cst_28 : f32 to vector<1x1x64xf32>
      %c0_29 = arith.constant 0 : index
      %c0_30 = arith.constant 0 : index
      %c0_31 = arith.constant 0 : index
      %38 = vector.load %arg7[%c0_29, %c0_30, %c0_31] : memref<1x1x64xf32, #tpu.memory_space<vmem>>, vector<1x1x64xf32>
      tpu.vector_store %arg7[%c0_29, %c0_30, %c0_31], %37 {strides = array<i32>} : memref<1x1x64xf32, #tpu.memory_space<vmem>>, vector<1x1x64xf32>,
      %cst_32 = arith.constant 0.000000e+00 : f32
      %39 = vector.broadcast %cst_32 : f32 to vector<1x64x64xf32>
      %c0_33 = arith.constant 0 : index
      %c0_34 = arith.constant 0 : index
      %c0_35 = arith.constant 0 : index
      %40 = vector.load %arg8[%c0_33, %c0_34, %c0_35] : memref<1x64x64xf32, #tpu.memory_space<vmem>>, vector<1x64x64xf32>
      tpu.vector_store %arg8[%c0_33, %c0_34, %c0_35], %39 {strides = array<i32>} : memref<1x64x64xf32, #tpu.memory_space<vmem>>, vector<1x64x64xf32>,
    } else {
    }
    %c0_14 = arith.constant 0 : index
    %c0_15 = arith.constant 0 : index
    %c0_16 = arith.constant 0 : index
    %20 = vector.load %arg7[%c0_14, %c0_15, %c0_16] : memref<1x1x64xf32, #tpu.memory_space<vmem>>, vector<1x1x64xf32>
    %21 = vector.shape_cast %20 : vector<1x1x64xf32> to vector<1x64xf32>
    %22 = arith.extf %13 : vector<64x64xbf16> to vector<64x64xf32>
    %cst_17 = arith.constant dense<0.000000e+00> : vector<64xf32>
    %23 = vector.multi_reduction <add>, %22, %cst_17 [0] : vector<64x64xf32> to vector<64xf32>
    %24 = vector.shape_cast %23 : vector<64xf32> to vector<1x64xf32>
    %25 = arith.addf %21, %24 : vector<1x64xf32>
    %c0_18 = arith.constant 0 : index
    %c0_19 = arith.constant 0 : index
    %c0_20 = arith.constant 0 : index
    %26 = vector.load %arg7[%c0_18, %c0_19, %c0_20] : memref<1x1x64xf32, #tpu.memory_space<vmem>>, vector<1x1x64xf32>
    %27 = vector.shape_cast %26 : vector<1x1x64xf32> to vector<1x64xf32>
    %28 = vector.shape_cast %25 : vector<1x64xf32> to vector<1x1x64xf32>
    tpu.vector_store %arg7[%c0_18, %c0_19, %c0_20], %28 {strides = array<i32>} : memref<1x1x64xf32, #tpu.memory_space<vmem>>, vector<1x1x64xf32>,
    %c0_21 = arith.constant 0 : index
    %c0_22 = arith.constant 0 : index
    %c0_23 = arith.constant 0 : index
    %29 = vector.load %arg8[%c0_21, %c0_22, %c0_23] : memref<1x64x64xf32, #tpu.memory_space<vmem>>, vector<1x64x64xf32>
    %30 = vector.shape_cast %29 : vector<1x64x64xf32> to vector<64x64xf32>
    %31 = tpu.transpose %13, [1, 0] : vector<64x64xbf16> -> vector<64x64xbf16>
    %cst_24 = arith.constant dense<0.000000e+00> : vector<64x64xf32>
    %32 = tpu.matmul %31, %13, %cst_24 {dimension_numbers = #tpu.dot_dimension_numbers<[1], [0], [0], [1], [0, 0, 1, 1], [], []>} : vector<64x64xbf16>, vector<64x64xbf16>, vector<64x64xf32> -> vector<64x64xf32>
    %33 = arith.addf %30, %32 : vector<64x64xf32>
    %c0_25 = arith.constant 0 : index
    %c0_26 = arith.constant 0 : index
    %c0_27 = arith.constant 0 : index
    %34 = vector.load %arg8[%c0_25, %c0_26, %c0_27] : memref<1x64x64xf32, #tpu.memory_space<vmem>>, vector<1x64x64xf32>
    %35 = vector.shape_cast %34 : vector<1x64x64xf32> to vector<64x64xf32>
    %36 = vector.shape_cast %33 : vector<64x64xf32> to vector<1x64x64xf32>
    tpu.vector_store %arg8[%c0_25, %c0_26, %c0_27], %36 {strides = array<i32>} : memref<1x64x64xf32, #tpu.memory_space<vmem>>, vector<1x64x64xf32>,
    return
  }
  func.func @transform_0(%arg0: i32, %arg1: i32) -> (i32, i32, i32) {
    %c0_i32 = arith.constant 0 : i32
    %c0_i32_0 = arith.constant 0 : i32
    return %arg0, %arg1, %c0_i32 : i32, i32, i32
  }
  func.func @transform_1(%arg0: i32, %arg1: i32) -> (i32, i32, i32) {
    %c0_i32 = arith.constant 0 : i32
    %c0_i32_0 = arith.constant 0 : i32
    %c0_i32_1 = arith.constant 0 : i32
    %c0_i32_2 = arith.constant 0 : i32
    return %c0_i32, %c0_i32_0, %c0_i32_1 : i32, i32, i32
  }
  func.func @transform_2(%arg0: i32, %arg1: i32) -> (i32, i32) {
    %c0_i32 = arith.constant 0 : i32
    %c0_i32_0 = arith.constant 0 : i32
    %c0_i32_1 = arith.constant 0 : i32
    return %c0_i32, %c0_i32_0 : i32, i32
  }
  func.func @transform_3(%arg0: i32, %arg1: i32) -> (i32, i32) {
    %c0_i32 = arith.constant 0 : i32
    %c0_i32_0 = arith.constant 0 : i32
    %c0_i32_1 = arith.constant 0 : i32
    return %c0_i32, %c0_i32_0 : i32, i32
  }
  func.func @transform_4(%arg0: i32, %arg1: i32) -> (i32, i32, i32) {
    %c0_i32 = arith.constant 0 : i32
    %c0_i32_0 = arith.constant 0 : i32
    return %arg0, %arg1, %c0_i32 : i32, i32, i32
  }
  func.func @transform_5(%arg0: i32, %arg1: i32) -> (i32, i32, i32) {
    %c0_i32 = arith.constant 0 : i32
    %c0_i32_0 = arith.constant 0 : i32
    %c0_i32_1 = arith.constant 0 : i32
    return %arg0, %c0_i32, %c0_i32_0 : i32, i32, i32
  }
  func.func @transform_6(%arg0: i32, %arg1: i32) -> (i32, i32, i32) {
    %c0_i32 = arith.constant 0 : i32
    %c0_i32_0 = arith.constant 0 : i32
    %c0_i32_1 = arith.constant 0 : i32
    return %arg0, %c0_i32, %c0_i32_0 : i32, i32, i32
  }
}

module attributes {stable_mosaic.version = 11 : i64} {
  func.func @_fc_head_kernel(%arg0: memref<2x1024xf32, #tpu.memory_space<vmem>>, %arg1: memref<2x1024xf32, #tpu.memory_space<vmem>>, %arg2: memref<1x1024xf32, #tpu.memory_space<vmem>>, %arg3: memref<1x1024xf32, #tpu.memory_space<vmem>>, %arg4: memref<1024x512xbf16, #tpu.memory_space<vmem>>, %arg5: memref<1x512xf32, #tpu.memory_space<vmem>>, %arg6: memref<1x512xf32, #tpu.memory_space<vmem>>, %arg7: memref<1x512xf32, #tpu.memory_space<vmem>>, %arg8: memref<512x256xbf16, #tpu.memory_space<vmem>>, %arg9: memref<1x256xf32, #tpu.memory_space<vmem>>, %arg10: memref<1x256xf32, #tpu.memory_space<vmem>>, %arg11: memref<1x256xf32, #tpu.memory_space<vmem>>, %arg12: memref<256x4096xbf16, #tpu.memory_space<vmem>>, %arg13: memref<1x4096xf32, #tpu.memory_space<vmem>>, %arg14: memref<2x4096xf32, #tpu.memory_space<vmem>>) attributes {dimension_semantics = [], scalar_prefetch = 0 : i64, scratch_operands = 0 : i64, tpu.core_type = #tpu.core_type<tc>} {
    %c0 = arith.constant 0 : index
    %c0_0 = arith.constant 0 : index
    %0 = vector.load %arg2[%c0, %c0_0] : memref<1x1024xf32, #tpu.memory_space<vmem>>, vector<1x1024xf32>
    %cst = arith.constant 0.000000e+00 : f32
    %1 = vector.broadcast %cst : f32 to vector<1x1024xf32>
    %2 = arith.cmpf oge, %0, %1 : vector<1x1024xf32>
    %c0_1 = arith.constant 0 : index
    %c0_2 = arith.constant 0 : index
    %3 = vector.load %arg0[%c0_1, %c0_2] : memref<2x1024xf32, #tpu.memory_space<vmem>>, vector<2x1024xf32>
    %c0_3 = arith.constant 0 : index
    %c0_4 = arith.constant 0 : index
    %4 = vector.load %arg1[%c0_3, %c0_4] : memref<2x1024xf32, #tpu.memory_space<vmem>>, vector<2x1024xf32>
    %5 = vector.shape_cast %2 : vector<1x1024xi1> to vector<1x1024xi1>
    %6 = vector.broadcast %5 : vector<1x1024xi1> to vector<2x1024xi1>
    %7 = arith.select %6, %3, %4 : vector<2x1024xi1>, vector<2x1024xf32>
    %8 = vector.broadcast %0 : vector<1x1024xf32> to vector<2x1024xf32>
    %9 = arith.mulf %7, %8 : vector<2x1024xf32>
    %c0_5 = arith.constant 0 : index
    %c0_6 = arith.constant 0 : index
    %10 = vector.load %arg3[%c0_5, %c0_6] : memref<1x1024xf32, #tpu.memory_space<vmem>>, vector<1x1024xf32>
    %11 = vector.broadcast %10 : vector<1x1024xf32> to vector<2x1024xf32>
    %12 = arith.addf %9, %11 : vector<2x1024xf32>
    %cst_7 = arith.constant 0.000000e+00 : f32
    %13 = vector.broadcast %cst_7 : f32 to vector<2x1024xf32>
    %14 = arith.maximumf %12, %13 : vector<2x1024xf32>
    %15 = arith.truncf %14 : vector<2x1024xf32> to vector<2x1024xbf16>
    %c0_8 = arith.constant 0 : index
    %c0_9 = arith.constant 0 : index
    %16 = vector.load %arg4[%c0_8, %c0_9] : memref<1024x512xbf16, #tpu.memory_space<vmem>>, vector<1024x512xbf16>
    %cst_10 = arith.constant dense<0.000000e+00> : vector<2x512xf32>
    %17 = tpu.matmul %15, %16, %cst_10 {dimension_numbers = #tpu.dot_dimension_numbers<[1], [0], [0], [1], [0, 0, 1, 1], [], []>} : vector<2x1024xbf16>, vector<1024x512xbf16>, vector<2x512xf32> -> vector<2x512xf32>
    %c0_11 = arith.constant 0 : index
    %c0_12 = arith.constant 0 : index
    %18 = vector.load %arg5[%c0_11, %c0_12] : memref<1x512xf32, #tpu.memory_space<vmem>>, vector<1x512xf32>
    %19 = vector.broadcast %18 : vector<1x512xf32> to vector<2x512xf32>
    %20 = arith.addf %17, %19 : vector<2x512xf32>
    %c0_13 = arith.constant 0 : index
    %c0_14 = arith.constant 0 : index
    %21 = vector.load %arg6[%c0_13, %c0_14] : memref<1x512xf32, #tpu.memory_space<vmem>>, vector<1x512xf32>
    %c0_15 = arith.constant 0 : index
    %c0_16 = arith.constant 0 : index
    %22 = vector.load %arg7[%c0_15, %c0_16] : memref<1x512xf32, #tpu.memory_space<vmem>>, vector<1x512xf32>
    %cst_17 = arith.constant dense<0.000000e+00> : vector<512xf32>
    %23 = vector.multi_reduction <add>, %20, %cst_17 [0] : vector<2x512xf32> to vector<512xf32>
    %24 = vector.shape_cast %23 : vector<512xf32> to vector<1x512xf32>
    %cst_18 = arith.constant 2.000000e+00 : f32
    %25 = vector.broadcast %cst_18 : f32 to vector<1x512xf32>
    %26 = arith.divf %24, %25 : vector<1x512xf32>
    %27 = vector.broadcast %26 : vector<1x512xf32> to vector<2x512xf32>
    %28 = arith.subf %20, %27 : vector<2x512xf32>
    %29 = arith.mulf %28, %28 : vector<2x512xf32>
    %cst_19 = arith.constant dense<0.000000e+00> : vector<512xf32>
    %30 = vector.multi_reduction <add>, %29, %cst_19 [0] : vector<2x512xf32> to vector<512xf32>
    %31 = vector.shape_cast %30 : vector<512xf32> to vector<1x512xf32>
    %cst_20 = arith.constant 2.000000e+00 : f32
    %32 = vector.broadcast %cst_20 : f32 to vector<1x512xf32>
    %33 = arith.divf %31, %32 : vector<1x512xf32>
    %34 = vector.broadcast %26 : vector<1x512xf32> to vector<2x512xf32>
    %35 = arith.subf %20, %34 : vector<2x512xf32>
    %cst_21 = arith.constant 9.99999974E-6 : f32
    %36 = vector.broadcast %cst_21 : f32 to vector<1x512xf32>
    %37 = arith.addf %33, %36 : vector<1x512xf32>
    %38 = math.rsqrt %37 : vector<1x512xf32>
    %39 = vector.broadcast %38 : vector<1x512xf32> to vector<2x512xf32>
    %40 = arith.mulf %35, %39 : vector<2x512xf32>
    %41 = vector.broadcast %21 : vector<1x512xf32> to vector<2x512xf32>
    %42 = arith.mulf %40, %41 : vector<2x512xf32>
    %43 = vector.broadcast %22 : vector<1x512xf32> to vector<2x512xf32>
    %44 = arith.addf %42, %43 : vector<2x512xf32>
    %cst_22 = arith.constant 0.000000e+00 : f32
    %45 = vector.broadcast %cst_22 : f32 to vector<2x512xf32>
    %46 = arith.maximumf %44, %45 : vector<2x512xf32>
    %47 = arith.truncf %46 : vector<2x512xf32> to vector<2x512xbf16>
    %c0_23 = arith.constant 0 : index
    %c0_24 = arith.constant 0 : index
    %48 = vector.load %arg8[%c0_23, %c0_24] : memref<512x256xbf16, #tpu.memory_space<vmem>>, vector<512x256xbf16>
    %cst_25 = arith.constant dense<0.000000e+00> : vector<2x256xf32>
    %49 = tpu.matmul %47, %48, %cst_25 {dimension_numbers = #tpu.dot_dimension_numbers<[1], [0], [0], [1], [0, 0, 1, 1], [], []>} : vector<2x512xbf16>, vector<512x256xbf16>, vector<2x256xf32> -> vector<2x256xf32>
    %c0_26 = arith.constant 0 : index
    %c0_27 = arith.constant 0 : index
    %50 = vector.load %arg9[%c0_26, %c0_27] : memref<1x256xf32, #tpu.memory_space<vmem>>, vector<1x256xf32>
    %51 = vector.broadcast %50 : vector<1x256xf32> to vector<2x256xf32>
    %52 = arith.addf %49, %51 : vector<2x256xf32>
    %c0_28 = arith.constant 0 : index
    %c0_29 = arith.constant 0 : index
    %53 = vector.load %arg10[%c0_28, %c0_29] : memref<1x256xf32, #tpu.memory_space<vmem>>, vector<1x256xf32>
    %c0_30 = arith.constant 0 : index
    %c0_31 = arith.constant 0 : index
    %54 = vector.load %arg11[%c0_30, %c0_31] : memref<1x256xf32, #tpu.memory_space<vmem>>, vector<1x256xf32>
    %cst_32 = arith.constant dense<0.000000e+00> : vector<256xf32>
    %55 = vector.multi_reduction <add>, %52, %cst_32 [0] : vector<2x256xf32> to vector<256xf32>
    %56 = vector.shape_cast %55 : vector<256xf32> to vector<1x256xf32>
    %cst_33 = arith.constant 2.000000e+00 : f32
    %57 = vector.broadcast %cst_33 : f32 to vector<1x256xf32>
    %58 = arith.divf %56, %57 : vector<1x256xf32>
    %59 = vector.broadcast %58 : vector<1x256xf32> to vector<2x256xf32>
    %60 = arith.subf %52, %59 : vector<2x256xf32>
    %61 = arith.mulf %60, %60 : vector<2x256xf32>
    %cst_34 = arith.constant dense<0.000000e+00> : vector<256xf32>
    %62 = vector.multi_reduction <add>, %61, %cst_34 [0] : vector<2x256xf32> to vector<256xf32>
    %63 = vector.shape_cast %62 : vector<256xf32> to vector<1x256xf32>
    %cst_35 = arith.constant 2.000000e+00 : f32
    %64 = vector.broadcast %cst_35 : f32 to vector<1x256xf32>
    %65 = arith.divf %63, %64 : vector<1x256xf32>
    %66 = vector.broadcast %58 : vector<1x256xf32> to vector<2x256xf32>
    %67 = arith.subf %52, %66 : vector<2x256xf32>
    %cst_36 = arith.constant 9.99999974E-6 : f32
    %68 = vector.broadcast %cst_36 : f32 to vector<1x256xf32>
    %69 = arith.addf %65, %68 : vector<1x256xf32>
    %70 = math.rsqrt %69 : vector<1x256xf32>
    %71 = vector.broadcast %70 : vector<1x256xf32> to vector<2x256xf32>
    %72 = arith.mulf %67, %71 : vector<2x256xf32>
    %73 = vector.broadcast %53 : vector<1x256xf32> to vector<2x256xf32>
    %74 = arith.mulf %72, %73 : vector<2x256xf32>
    %75 = vector.broadcast %54 : vector<1x256xf32> to vector<2x256xf32>
    %76 = arith.addf %74, %75 : vector<2x256xf32>
    %cst_37 = arith.constant 0.000000e+00 : f32
    %77 = vector.broadcast %cst_37 : f32 to vector<2x256xf32>
    %78 = arith.maximumf %76, %77 : vector<2x256xf32>
    %79 = arith.truncf %78 : vector<2x256xf32> to vector<2x256xbf16>
    %c0_38 = arith.constant 0 : index
    %c0_39 = arith.constant 0 : index
    %80 = vector.load %arg12[%c0_38, %c0_39] : memref<256x4096xbf16, #tpu.memory_space<vmem>>, vector<256x4096xbf16>
    %cst_40 = arith.constant dense<0.000000e+00> : vector<2x4096xf32>
    %81 = tpu.matmul %79, %80, %cst_40 {dimension_numbers = #tpu.dot_dimension_numbers<[1], [0], [0], [1], [0, 0, 1, 1], [], []>} : vector<2x256xbf16>, vector<256x4096xbf16>, vector<2x4096xf32> -> vector<2x4096xf32>
    %c0_41 = arith.constant 0 : index
    %c0_42 = arith.constant 0 : index
    %82 = vector.load %arg13[%c0_41, %c0_42] : memref<1x4096xf32, #tpu.memory_space<vmem>>, vector<1x4096xf32>
    %83 = vector.broadcast %82 : vector<1x4096xf32> to vector<2x4096xf32>
    %84 = arith.addf %81, %83 : vector<2x4096xf32>
    %c0_43 = arith.constant 0 : index
    %c0_44 = arith.constant 0 : index
    %85 = vector.load %arg14[%c0_43, %c0_44] : memref<2x4096xf32, #tpu.memory_space<vmem>>, vector<2x4096xf32>
    tpu.vector_store %arg14[%c0_43, %c0_44], %84 {strides = array<i32>} : memref<2x4096xf32, #tpu.memory_space<vmem>>, vector<2x4096xf32>,
    return
  }
}

module attributes {stable_mosaic.version = 11 : i64} {
  func.func @_apply_moments_kernel(%arg0: i32, %arg1: i32, %arg2: memref<1x64x64xbf16, #tpu.memory_space<vmem>>, %arg3: memref<1x64x64xbf16, #tpu.memory_space<vmem>>, %arg4: memref<1x64xf32, #tpu.memory_space<vmem>>, %arg5: memref<1x64xf32, #tpu.memory_space<vmem>>, %arg6: memref<1x64x64xbf16, #tpu.memory_space<vmem>>, %arg7: memref<1x1x64xf32, #tpu.memory_space<vmem>>, %arg8: memref<1x64x64xf32, #tpu.memory_space<vmem>>) attributes {dimension_semantics = [#tpu.dimension_semantics<parallel>, #tpu.dimension_semantics<arbitrary>], iteration_bounds = array<i64: 2, 1>, scalar_prefetch = 0 : i64, scratch_operands = 0 : i64, tpu.core_type = #tpu.core_type<tc>, window_params = [{transform_indices = @transform_0, window_bounds = array<i64: 1, 64, 64>}, {transform_indices = @transform_1, window_bounds = array<i64: 1, 64, 64>}, {pipeline_mode = #tpu.pipeline_mode<synchronous>, transform_indices = @transform_2, window_bounds = array<i64: 1, 64>}, {pipeline_mode = #tpu.pipeline_mode<synchronous>, transform_indices = @transform_3, window_bounds = array<i64: 1, 64>}, {transform_indices = @transform_4, window_bounds = array<i64: 1, 64, 64>}, {transform_indices = @transform_5, window_bounds = array<i64: 1, 1, 64>}, {transform_indices = @transform_6, window_bounds = array<i64: 1, 64, 64>}]} {
    %c0 = arith.constant 0 : index
    %c0_0 = arith.constant 0 : index
    %c0_1 = arith.constant 0 : index
    %0 = vector.load %arg2[%c0, %c0_0, %c0_1] : memref<1x64x64xbf16, #tpu.memory_space<vmem>>, vector<1x64x64xbf16>
    %1 = vector.shape_cast %0 : vector<1x64x64xbf16> to vector<64x64xbf16>
    %c0_2 = arith.constant 0 : index
    %c0_3 = arith.constant 0 : index
    %c0_4 = arith.constant 0 : index
    %2 = vector.load %arg3[%c0_2, %c0_3, %c0_4] : memref<1x64x64xbf16, #tpu.memory_space<vmem>>, vector<1x64x64xbf16>
    %3 = vector.shape_cast %2 : vector<1x64x64xbf16> to vector<64x64xbf16>
    %cst = arith.constant dense<0.000000e+00> : vector<64x64xf32>
    %4 = tpu.matmul %1, %3, %cst {dimension_numbers = #tpu.dot_dimension_numbers<[1], [0], [0], [1], [0, 0, 1, 1], [], []>} : vector<64x64xbf16>, vector<64x64xbf16>, vector<64x64xf32> -> vector<64x64xf32>
    %c0_5 = arith.constant 0 : index
    %c0_6 = arith.constant 0 : index
    %5 = vector.load %arg4[%c0_5, %c0_6] : memref<1x64xf32, #tpu.memory_space<vmem>>, vector<1x64xf32>
    %6 = vector.broadcast %5 : vector<1x64xf32> to vector<64x64xf32>
    %7 = arith.mulf %4, %6 : vector<64x64xf32>
    %c0_7 = arith.constant 0 : index
    %c0_8 = arith.constant 0 : index
    %8 = vector.load %arg5[%c0_7, %c0_8] : memref<1x64xf32, #tpu.memory_space<vmem>>, vector<1x64xf32>
    %9 = vector.broadcast %8 : vector<1x64xf32> to vector<64x64xf32>
    %10 = arith.addf %7, %9 : vector<64x64xf32>
    %cst_9 = arith.constant 0.000000e+00 : f32
    %11 = vector.broadcast %cst_9 : f32 to vector<64x64xf32>
    %12 = arith.maximumf %10, %11 : vector<64x64xf32>
    %13 = arith.truncf %12 : vector<64x64xf32> to vector<64x64xbf16>
    %c0_10 = arith.constant 0 : index
    %c0_11 = arith.constant 0 : index
    %c0_12 = arith.constant 0 : index
    %14 = vector.load %arg6[%c0_10, %c0_11, %c0_12] : memref<1x64x64xbf16, #tpu.memory_space<vmem>>, vector<1x64x64xbf16>
    %15 = vector.shape_cast %14 : vector<1x64x64xbf16> to vector<64x64xbf16>
    %16 = vector.shape_cast %13 : vector<64x64xbf16> to vector<1x64x64xbf16>
    tpu.vector_store %arg6[%c0_10, %c0_11, %c0_12], %16 {strides = array<i32>} : memref<1x64x64xbf16, #tpu.memory_space<vmem>>, vector<1x64x64xbf16>,
    %c0_i32 = arith.constant 0 : i32
    %17 = arith.cmpi eq, %arg1, %c0_i32 : i32
    %18 = arith.extui %17 : i1 to i32
    %c0_i32_13 = arith.constant 0 : i32
    %19 = arith.cmpi ne, %18, %c0_i32_13 : i32
    scf.if %19 {
      %cst_28 = arith.constant 0.000000e+00 : f32
      %37 = vector.broadcast %cst_28 : f32 to vector<1x1x64xf32>
      %c0_29 = arith.constant 0 : index
      %c0_30 = arith.constant 0 : index
      %c0_31 = arith.constant 0 : index
      %38 = vector.load %arg7[%c0_29, %c0_30, %c0_31] : memref<1x1x64xf32, #tpu.memory_space<vmem>>, vector<1x1x64xf32>
      tpu.vector_store %arg7[%c0_29, %c0_30, %c0_31], %37 {strides = array<i32>} : memref<1x1x64xf32, #tpu.memory_space<vmem>>, vector<1x1x64xf32>,
      %cst_32 = arith.constant 0.000000e+00 : f32
      %39 = vector.broadcast %cst_32 : f32 to vector<1x64x64xf32>
      %c0_33 = arith.constant 0 : index
      %c0_34 = arith.constant 0 : index
      %c0_35 = arith.constant 0 : index
      %40 = vector.load %arg8[%c0_33, %c0_34, %c0_35] : memref<1x64x64xf32, #tpu.memory_space<vmem>>, vector<1x64x64xf32>
      tpu.vector_store %arg8[%c0_33, %c0_34, %c0_35], %39 {strides = array<i32>} : memref<1x64x64xf32, #tpu.memory_space<vmem>>, vector<1x64x64xf32>,
    } else {
    }
    %c0_14 = arith.constant 0 : index
    %c0_15 = arith.constant 0 : index
    %c0_16 = arith.constant 0 : index
    %20 = vector.load %arg7[%c0_14, %c0_15, %c0_16] : memref<1x1x64xf32, #tpu.memory_space<vmem>>, vector<1x1x64xf32>
    %21 = vector.shape_cast %20 : vector<1x1x64xf32> to vector<1x64xf32>
    %22 = arith.extf %13 : vector<64x64xbf16> to vector<64x64xf32>
    %cst_17 = arith.constant dense<0.000000e+00> : vector<64xf32>
    %23 = vector.multi_reduction <add>, %22, %cst_17 [0] : vector<64x64xf32> to vector<64xf32>
    %24 = vector.shape_cast %23 : vector<64xf32> to vector<1x64xf32>
    %25 = arith.addf %21, %24 : vector<1x64xf32>
    %c0_18 = arith.constant 0 : index
    %c0_19 = arith.constant 0 : index
    %c0_20 = arith.constant 0 : index
    %26 = vector.load %arg7[%c0_18, %c0_19, %c0_20] : memref<1x1x64xf32, #tpu.memory_space<vmem>>, vector<1x1x64xf32>
    %27 = vector.shape_cast %26 : vector<1x1x64xf32> to vector<1x64xf32>
    %28 = vector.shape_cast %25 : vector<1x64xf32> to vector<1x1x64xf32>
    tpu.vector_store %arg7[%c0_18, %c0_19, %c0_20], %28 {strides = array<i32>} : memref<1x1x64xf32, #tpu.memory_space<vmem>>, vector<1x1x64xf32>,
    %c0_21 = arith.constant 0 : index
    %c0_22 = arith.constant 0 : index
    %c0_23 = arith.constant 0 : index
    %29 = vector.load %arg8[%c0_21, %c0_22, %c0_23] : memref<1x64x64xf32, #tpu.memory_space<vmem>>, vector<1x64x64xf32>
    %30 = vector.shape_cast %29 : vector<1x64x64xf32> to vector<64x64xf32>
    %31 = tpu.transpose %13, [1, 0] : vector<64x64xbf16> -> vector<64x64xbf16>
    %cst_24 = arith.constant dense<0.000000e+00> : vector<64x64xf32>
    %32 = tpu.matmul %31, %13, %cst_24 {dimension_numbers = #tpu.dot_dimension_numbers<[1], [0], [0], [1], [0, 0, 1, 1], [], []>} : vector<64x64xbf16>, vector<64x64xbf16>, vector<64x64xf32> -> vector<64x64xf32>
    %33 = arith.addf %30, %32 : vector<64x64xf32>
    %c0_25 = arith.constant 0 : index
    %c0_26 = arith.constant 0 : index
    %c0_27 = arith.constant 0 : index
    %34 = vector.load %arg8[%c0_25, %c0_26, %c0_27] : memref<1x64x64xf32, #tpu.memory_space<vmem>>, vector<1x64x64xf32>
    %35 = vector.shape_cast %34 : vector<1x64x64xf32> to vector<64x64xf32>
    %36 = vector.shape_cast %33 : vector<64x64xf32> to vector<1x64x64xf32>
    tpu.vector_store %arg8[%c0_25, %c0_26, %c0_27], %36 {strides = array<i32>} : memref<1x64x64xf32, #tpu.memory_space<vmem>>, vector<1x64x64xf32>,
    return
  }
  func.func @transform_0(%arg0: i32, %arg1: i32) -> (i32, i32, i32) {
    %c0_i32 = arith.constant 0 : i32
    %c0_i32_0 = arith.constant 0 : i32
    return %arg0, %arg1, %c0_i32 : i32, i32, i32
  }
  func.func @transform_1(%arg0: i32, %arg1: i32) -> (i32, i32, i32) {
    %c0_i32 = arith.constant 0 : i32
    %c0_i32_0 = arith.constant 0 : i32
    %c0_i32_1 = arith.constant 0 : i32
    return %arg0, %c0_i32, %c0_i32_0 : i32, i32, i32
  }
  func.func @transform_2(%arg0: i32, %arg1: i32) -> (i32, i32) {
    %c0_i32 = arith.constant 0 : i32
    %c0_i32_0 = arith.constant 0 : i32
    %c0_i32_1 = arith.constant 0 : i32
    return %c0_i32, %c0_i32_0 : i32, i32
  }
  func.func @transform_3(%arg0: i32, %arg1: i32) -> (i32, i32) {
    %c0_i32 = arith.constant 0 : i32
    %c0_i32_0 = arith.constant 0 : i32
    %c0_i32_1 = arith.constant 0 : i32
    return %c0_i32, %c0_i32_0 : i32, i32
  }
  func.func @transform_4(%arg0: i32, %arg1: i32) -> (i32, i32, i32) {
    %c0_i32 = arith.constant 0 : i32
    %c0_i32_0 = arith.constant 0 : i32
    return %arg0, %arg1, %c0_i32 : i32, i32, i32
  }
  func.func @transform_5(%arg0: i32, %arg1: i32) -> (i32, i32, i32) {
    %c0_i32 = arith.constant 0 : i32
    %c0_i32_0 = arith.constant 0 : i32
    %c0_i32_1 = arith.constant 0 : i32
    return %arg0, %c0_i32, %c0_i32_0 : i32, i32, i32
  }
  func.func @transform_6(%arg0: i32, %arg1: i32) -> (i32, i32, i32) {
    %c0_i32 = arith.constant 0 : i32
    %c0_i32_0 = arith.constant 0 : i32
    %c0_i32_1 = arith.constant 0 : i32
    return %arg0, %c0_i32, %c0_i32_0 : i32, i32, i32
  }
}

</mosaic_0001>

<bundles_post_ra>
// kernel: pointnetfeat_forward.10
= control target key start
LH: loop header
LB: loop body
LE: loop exit
PB: predicated region body
PF: predicated region fallthrough
CT: control target
= control target key end

     0   :  { %s1002_s21 = smov 0   ;;  %s1004_s22 = smov 0   ;;  %s1138_s0 = inlined_call_operand.vmem [shape: bf16[2,64,3], index: 0, kind: input, shape index: {}]   ;;  %s1139_s1 = inlined_call_operand.vmem [shape: bf16[1,3,64], index: 1, kind: input, shape index: {}]   ;;  %s1140_s2 = inlined_call_operand.vmem [shape: f32[1,64], index: 2, kind: input, shape index: {}]   ;;  %s1141_s3 = inlined_call_operand.vmem [shape: f32[1,64], index: 3, kind: input, shape index: {}]   ;;  %s1142_s4 = inlined_call_operand.vmem [shape: bf16[2,64,64], index: 4, kind: output, shape index: {0}]   ;;  %s1143_s5 = inlined_call_operand.vmem [shape: f32[2,1,64], index: 5, kind: output, shape index: {1}]   ;;  %s1144_s6 = inlined_call_operand.vmem [shape: f32[2,64,64], index: 6, kind: output, shape index: {2}]  }
   0x1   :  { %s1006_s23 = smov 0  }
   0x2 LB: > { %s29_s24 = sadd.s32 1, %s959_s22  ;;  %p821_p0 = scmp.ge.s32.totalorder %s963_s23, 1  ;;  %s963_s23 = sphi %s1006_s23, %s17_s23   ;;  %s959_s22 = sphi %s1004_s22, %s1146_s22   ;;  %s955_s21 = sphi %s1002_s21, %s1145_s21  }
   0x3   : > { %p31_p1 = scmp.ge.s32.totalorder %s29_s24, 2  ;;  %p238_p2 = scmp.lt.s32.totalorder %s963_s23, 3 }
   0x5   : > { %s1148_s24 = smov (%p31_p1, %s29_s24), 0  ;;  %p239_p3 = pnand %p821_p0, %p238_p2 }
   0x6   : > { %v321_v0 = vld [vmem:[%s1139_s1] sm:$0x3] (!%p239_p3)  ;;  %vm355_vm0 = vcmask (!%p239_p3), 1040384   ;;  %vm356_vm1 = vcmask (!%p239_p3), 1041408   ;;  %p285_p4 = scmp.lt.s32.totalorder (!%p239_p3), %s955_s21, 1  ;;  %v965_v1 = vmov (!%p239_p3), 65535  }
   0x7   : > { %242 = sbr.rel (%p239_p3) target bundleno = 575 (0x23f), region = 36  ;;  %v357_v2 = vsel (!%p239_p3), %vm355_vm0, 4294967295, %v965_v1  ;;  %vm510_vm2 = vcmask (!%p239_p3), 516096   ;;  %vm342_vm3 = vcmask (!%p239_p3), 23552   ;;  %v966_v5 = vmov (!%p239_p3), 0.0  }
   0x8   : > { %v358_v3 = vsel (!%p239_p3), %vm356_vm1, %v357_v2, 0  ;;  %vm512_vm4 = vcmask (!%p239_p3), 523264   ;;  %v836_v10 = vld [vmem:[%s1140_s2] ss:$0 sm:$0xff] (!%p239_p3)  ;;  %vm497_vm5 = vcmask (!%p239_p3), 519168  }
   0x9   : > { %v360_v4 = vand.u32 (!%p239_p3), %v358_v3, %v321_v0  ;;  %v837_v12 = vld [vmem:[%s1141_s3] ss:$0 sm:$0xff] (!%p239_p3) }
   0xb   : > { %876 = vmatprep.subr.bf16.mxu0 (!%p239_p3), %v360_v4 }
   0xc   : > { %877 = vmatpush3.bf16.msra.mxu0 (!%p239_p3), %v360_v4 }
   0xe   : > { %s1150_s21 = smov (!%p285_p4, %s955_s21), 1 }
   0xf   : > { %s852_s27 = sshll.u32 %s1150_s21, 5  ;;  %s1030_s30 = scalar_lea.vmem %s1143_s5, %s1150_s21 }
  0x10   : > { %s292_s9 = scalar_lea.vmem %s1138_s0, %s852_s27  ;;  %511 = vst.msk [vmem:[%s1030_s30] sm:$0x1] %vm510_vm2, %v966_v5  ;;  %s854_s10 = sshll.u32 %s1150_s21, 6 }
  0x11   : > { %v937_v6 = vld [vmem:[%s292_s9] sm:$0xff]   ;;  %v938_v7 = vld [vmem:[%s292_s9 + $0x8] sm:$0xff]   ;;  %v939_v8 = vld [vmem:[%s292_s9 + $0x10] sm:$0xff]   ;;  %s1043_s13 = scalar_lea.vmem %s1144_s6, %s854_s10  ;;  %s1072_s20 = scalar_lea.vmem %s1142_s4, %s852_s27 }
  0x12   : > { %878 = vmatprep.mubr.msk.bf16.mxu0 %vm342_vm3, %v937_v6  ;;  %v940_v9 = vld [vmem:[%s292_s9 + $0x18] sm:$0xff]   ;;  %513 = vst.msk [vmem:[%s1043_s13] sm:$0xff] %vm512_vm4, %v966_v5  ;;  %514 = vst.msk [vmem:[%s1043_s13 + $0x8] sm:$0xff] %vm512_vm4, %v966_v5 }
  0x13   : > { %879 = vmatmul.mubr.msk.bf16.vlgmr.msra.gmra.mrb[0].mxu0 %vm342_vm3, %v938_v7  ;;  %515 = vst.msk [vmem:[%s1043_s13 + $0x10] sm:$0xff] %vm512_vm4, %v966_v5  ;;  %516 = vst.msk [vmem:[%s1043_s13 + $0x18] sm:$0xff] %vm512_vm4, %v966_v5 }
  0x14   : > { %882 = vmatprep.mubr.msk.bf16.mxu0 %vm342_vm3, %v939_v8  ;;  %517 = vst.msk [vmem:[%s1043_s13 + $0x20] sm:$0xff] %vm512_vm4, %v966_v5  ;;  %518 = vst.msk [vmem:[%s1043_s13 + $0x28] sm:$0xff] %vm512_vm4, %v966_v5 }
  0x15   : > { %519 = vst.msk [vmem:[%s1043_s13 + $0x30] sm:$0xff] %vm512_vm4, %v966_v5  ;;  %520 = vst.msk [vmem:[%s1043_s13 + $0x38] sm:$0xff] %vm512_vm4, %v966_v5 }
  0x1b   : > { %883 = vmatmul.mubr.msk.bf16.gmra.mrb[4].mxu0 %vm342_vm3, %v940_v9 }
  0xe6   : > { %v880_v11 = vpop.f32.mrb[0].mxu0 }
  0xe7   : > { %v436_v13 = vmul.f32 %v880_v11, %v836_v10  ;;  %v396_v14 = vpop.f32.mrb[1].mxu0 }
  0xe8   : > { %v434_v15 = vmul.f32 %v836_v10, %v396_v14  ;;  %v881_v16 = vpop.f32.mrb[2].mxu0 }
  0xe9   : > { %v451_v17 = vadd.f32 %v837_v12, %v436_v13  ;;  %v437_v18 = vmul.f32 %v881_v16, %v836_v10  ;;  %v399_v19 = vpop.f32.mrb[3].mxu0 }
  0xea   : > { %v449_v20 = vadd.f32 %v837_v12, %v434_v15  ;;  %v435_v21 = vmul.f32 %v836_v10, %v399_v19 }
  0xeb   : > { %v459_v22 = vmax.f32 %v451_v17, 0.0  ;;  %v452_v23 = vadd.f32 %v837_v12, %v437_v18 }
  0xec   : > { %v457_v24 = vmax.f32 %v449_v20, 0.0  ;;  %v450_v25 = vadd.f32 %v837_v12, %v435_v21  ;;  %v521_v20 = vld [vmem:[%s1030_s30] sm:$0x1] }
  0xed   : > { %v857_v26 = vpack.c.bf16 %v459_v22, %v459_v22  ;;  %v460_v27 = vmax.f32 %v452_v23, 0.0 }
  0xee   : > { %v855_v28 = vpack.c.bf16 %v457_v24, %v457_v24  ;;  %v458_v29 = vmax.f32 %v450_v25, 0.0  ;;  %v884_v30 = vpop.f32.mrb[4].mxu0 }
  0xef   : > { %500 = vst.msk [vmem:[%s1072_s20 + $0x8] sm:$0xf] %vm497_vm5, %v857_v26  ;;  %v466_v31 = vpack.c.bf16 %v460_v27, %v459_v22  ;;  %v858_v32 = vpack.c.bf16 %v460_v27, %v460_v27  ;;  %v440_v33 = vmul.f32 %v884_v30, %v836_v10  ;;  %v412_v34 = vpop.f32.mrb[5].mxu0  ;;  %v557_v27 = vld [vmem:[%s1043_s13 + $0x10] sm:$0xff]  ;;  %v558_v30 = vld [vmem:[%s1043_s13 + $0x18] sm:$0xff] }
  0xf0   : > { %498 = vst.msk [vmem:[%s1072_s20] sm:$0xf] %vm497_vm5, %v855_v28  ;;  %v465_v35 = vpack.c.bf16 %v458_v29, %v457_v24  ;;  %v856_v36 = vpack.c.bf16 %v458_v29, %v458_v29  ;;  %v438_v37 = vmul.f32 %v836_v10, %v412_v34  ;;  %v885_v38 = vpop.f32.mrb[6].mxu0  ;;  %v555_v28 = vld [vmem:[%s1043_s13] sm:$0xff] }
  0xf1   : > { %501 = vst.msk [vmem:[%s1072_s20 + $0xc] sm:$0xf] %vm497_vm5, %v858_v32  ;;  %v524_v39 = vunpack.c.l.bf16 %v466_v31  ;;  %v455_v40 = vadd.f32 %v837_v12, %v440_v33  ;;  %v441_v41 = vmul.f32 %v885_v38, %v836_v10  ;;  %v415_v42 = vpop.f32.mrb[7].mxu0  ;;  %v525_v47 = vunpack.c.h.bf16 %v466_v31  ;;  %v556_v33 = vld [vmem:[%s1043_s13 + $0x8] sm:$0xff] }
  0xf2   : > { %499 = vst.msk [vmem:[%s1072_s20 + $0x4] sm:$0xf] %vm497_vm5, %v856_v36  ;;  %v522_v43 = vunpack.c.l.bf16 %v465_v35  ;;  %v523_v44 = vunpack.c.h.bf16 %v465_v35  ;;  %v453_v45 = vadd.f32 %v837_v12, %v438_v37  ;;  %v439_v46 = vmul.f32 %v836_v10, %v415_v42  ;;  %563 = vxpose.xlu0.c.b16.start [1/4] (short) (narrow) %v465_v35, 64  ;;  %886 = vmatprep.subr.bf16.mxu0 %v465_v35  ;;  %v562_v42 = vld [vmem:[%s1043_s13 + $0x38] sm:$0xff] }
  0xf3   : > { %v463_v48 = vmax.f32 %v455_v40, 0.0  ;;  %v456_v49 = vadd.f32 %v837_v12, %v441_v41  ;;  %902 = vmatprep.subr.bf16.mxu1 %v465_v35  ;;  %887 = vmatpush3.bf16.msra.mxu0 %v465_v35  ;;  %v534_v57 = vsel %vm512_vm4, %v524_v39, 0.0  ;;  %v536_v63 = vsel %vm512_vm4, %v525_v47, 0.0  ;;  %v561_v39 = vld [vmem:[%s1043_s13 + $0x30] sm:$0xff]  ;;  %v559_v40 = vld [vmem:[%s1043_s13 + $0x20] sm:$0xff] }
  0xf4   : > { %v531_v50 = vsel %vm512_vm4, %v522_v43, 0.0  ;;  %v532_v51 = vsel %vm512_vm4, %v523_v44, 0.0  ;;  %v461_v52 = vmax.f32 %v453_v45, 0.0  ;;  %v454_v53 = vadd.f32 %v837_v12, %v439_v46  ;;  %906 = vmatpush3.bf16.msra.mxu1 %v465_v35  ;;  %888 = vmatprep.subr.bf16.mxu0 %v466_v31  ;;  %v560_v45 = vld [vmem:[%s1043_s13 + $0x28] sm:$0xff] }
  0xf5   : > { %v533_v54 = vadd.f32 %v532_v51, %v531_v50  ;;  %v861_v55 = vpack.c.bf16 %v463_v48, %v463_v48  ;;  %v464_v56 = vmax.f32 %v456_v49, 0.0  ;;  %903 = vmatprep.subr.bf16.mxu1 %v466_v31 }
  0xf6   : > { %v859_v58 = vpack.c.bf16 %v461_v52, %v461_v52  ;;  %v462_v59 = vmax.f32 %v454_v53, 0.0  ;;  %564 = vxpose.xlu0.c.b16.cont [2/4] (short) (narrow) %v466_v31, 64 }
  0xf7   : > { %v535_v60 = vadd.f32 %v534_v57, %v533_v54  ;;  %504 = vst.msk [vmem:[%s1072_s20 + $0x18] sm:$0xf] %vm497_vm5, %v861_v55  ;;  %v468_v61 = vpack.c.bf16 %v464_v56, %v463_v48  ;;  %v862_v62 = vpack.c.bf16 %v464_v56, %v464_v56  ;;  %889 = vmatpush3.bf16.msra.mxu0 %v466_v31 }
  0xf8   : > { %502 = vst.msk [vmem:[%s1072_s20 + $0x10] sm:$0xf] %vm497_vm5, %v859_v58  ;;  %v467_v0 = vpack.c.bf16 %v462_v59, %v461_v52  ;;  %v860_v1 = vpack.c.bf16 %v462_v59, %v462_v59  ;;  %907 = vmatpush3.bf16.msra.mxu1 %v466_v31 }
  0xf9   : > { %505 = vst.msk [vmem:[%s1072_s20 + $0x1c] sm:$0xf] %vm497_vm5, %v862_v62  ;;  %v537_v2 = vadd.f32 %v536_v63, %v535_v60  ;;  %v528_v5 = vunpack.c.l.bf16 %v468_v61  ;;  %v529_v8 = vunpack.c.h.bf16 %v468_v61 }
  0xfa   : > { %503 = vst.msk [vmem:[%s1072_s20 + $0x14] sm:$0xf] %vm497_vm5, %v860_v1  ;;  %v526_v3 = vunpack.c.l.bf16 %v467_v0  ;;  %v527_v4 = vunpack.c.h.bf16 %v467_v0  ;;  %565 = vxpose.xlu0.c.b16.cont [3/4] (short) (narrow) %v467_v0, 64  ;;  %890 = vmatprep.subr.bf16.mxu0 %v467_v0 }
  0xfb   : > { %904 = vmatprep.subr.bf16.mxu1 %v467_v0  ;;  %891 = vmatpush3.bf16.msra.mxu0 %v467_v0  ;;  %v542_v11 = vsel %vm512_vm4, %v528_v5, 0.0  ;;  %v544_v13 = vsel %vm512_vm4, %v529_v8, 0.0 }
  0xfc   : > { %v538_v6 = vsel %vm512_vm4, %v526_v3, 0.0  ;;  %908 = vmatpush3.bf16.msra.mxu1 %v467_v0  ;;  %892 = vmatprep.subr.bf16.mxu0 %v468_v61  ;;  %v540_v9 = vsel %vm512_vm4, %v527_v4, 0.0 }
  0xfd   : > { %v539_v7 = vadd.f32 %v538_v6, %v537_v2  ;;  %905 = vmatprep.subr.bf16.mxu1 %v468_v61 }
  0xfe   : > { %566 = vxpose.xlu0.c.b16.end [4/4] (short) (narrow) %v468_v61, 64 }
  0xff   : > { %v541_v10 = vadd.f32 %v540_v9, %v539_v7  ;;  %893 = vmatpush3.bf16.msra.mxu0 %v468_v61 }
 0x100   : > { %909 = vmatpush3.bf16.msra.mxu1 %v468_v61 }
 0x101   : > { %v543_v12 = vadd.f32 %v542_v11, %v541_v10 }
 0x103   : > { %v545_v14 = vadd.f32 %v544_v13, %v543_v12 }
 0x105   : > { %v546_v15 = vrot.slane %v545_v14, 4 }
 0x107   : > { %v547_v16 = vadd.f32 %v546_v15, %v545_v14 }
 0x109   : > { %v548_v17 = vrot.slane %v547_v16, 2 }
 0x10b   : > { %v549_v18 = vadd.f32 %v548_v17, %v547_v16 }
 0x10d   : > { %v550_v19 = vrot.slane %v549_v18, 1 }
 0x10f   : > { %v551_v21 = vadd.f32 %v550_v19, %v549_v18 }
 0x111   : > { %v552_v22 = vadd.f32 %v551_v21, %v521_v20 }
 0x113   : > { %554 = vst.msk [vmem:[%s1030_s30] sm:$0x1] %vm510_vm2, %v552_v22 }
 0x158   : > { %v571_v23 = vpop.trf.xlu0 }
 0x159   : > { %894 = vmatprep.mubr.msk.bf16.mxu0 %vm512_vm4, %v571_v23 }
 0x15c   : > { %v572_v24 = vpop.trf.xlu0 }
 0x15d   : > { %895 = vmatmul.mubr.msk.bf16.vlgmr.msra.gmra.mrb[8].mxu0 %vm512_vm4, %v572_v24 }
 0x160   : > { %v573_v25 = vpop.trf.xlu0 }
 0x161   : > { %898 = vmatprep.mubr.msk.bf16.mxu1 %vm512_vm4, %v573_v25 }
 0x164   : > { %v574_v26 = vpop.trf.xlu0 }
 0x165   : > { %899 = vmatmul.mubr.msk.bf16.vlgmr.msra.gmra.mrb[0].mxu1 %vm512_vm4, %v574_v26 }
 0x230   : > { %v896_v29 = vpop.f32.mrb[8].mxu0 }
 0x231   : > { %v658_v31 = vadd.f32 %v896_v29, %v557_v27  ;;  %v625_v32 = vpop.f32.mrb[9].mxu0 }
 0x232   : > { %v656_v34 = vadd.f32 %v625_v32, %v555_v28  ;;  %v897_v35 = vpop.f32.mrb[10].mxu0 }
 0x233   : > { %666 = vst.msk [vmem:[%s1043_s13 + $0x10] sm:$0xff] %vm512_vm4, %v658_v31  ;;  %v659_v36 = vadd.f32 %v897_v35, %v558_v30  ;;  %v628_v37 = vpop.f32.mrb[11].mxu0 }
 0x234   : > { %664 = vst.msk [vmem:[%s1043_s13] sm:$0xff] %vm512_vm4, %v656_v34  ;;  %v657_v38 = vadd.f32 %v628_v37, %v556_v33 }
 0x235   : > { %667 = vst.msk [vmem:[%s1043_s13 + $0x18] sm:$0xff] %vm512_vm4, %v659_v36 }
 0x236   : > { %665 = vst.msk [vmem:[%s1043_s13 + $0x8] sm:$0xff] %vm512_vm4, %v657_v38 }
 0x238   : > { %v900_v41 = vpop.f32.mrb[0].mxu1 }
 0x239   : > { %v662_v43 = vadd.f32 %v900_v41, %v561_v39  ;;  %v641_v44 = vpop.f32.mrb[1].mxu1 }
 0x23a   : > { %v660_v46 = vadd.f32 %v641_v44, %v559_v40  ;;  %v901_v47 = vpop.f32.mrb[2].mxu1 }
 0x23b   : > { %670 = vst.msk [vmem:[%s1043_s13 + $0x30] sm:$0xff] %vm512_vm4, %v662_v43  ;;  %v663_v48 = vadd.f32 %v901_v47, %v562_v42  ;;  %v644_v49 = vpop.f32.mrb[3].mxu1 }
 0x23c   : > { %668 = vst.msk [vmem:[%s1043_s13 + $0x20] sm:$0xff] %vm512_vm4, %v660_v46  ;;  %v661_v50 = vadd.f32 %v644_v49, %v560_v45 }
 0x23d   : > { %671 = vst.msk [vmem:[%s1043_s13 + $0x38] sm:$0xff] %vm512_vm4, %v663_v48 }
 0x23e   : > { %669 = vst.msk [vmem:[%s1043_s13 + $0x28] sm:$0xff] %vm512_vm4, %v661_v50 }
 0x23f PF: > { %s17_s23 = sadd.s32 1, %s963_s23   ;;  %s1145_s21 = smov %s959_s22 }
 0x240   : > { %p14_p5 = scmp.ge.s32.totalorder %s17_s23, 4   ;;  %s1146_s22 = smov %s1148_s24 }
 0x242   :  { %16 = sbr.rel (!%p14_p5) target bundleno = 2 (0x2), region = 94 }

// kernel: pointnetfeat_forward.11
= control target key start
LH: loop header
LB: loop body
LE: loop exit
PB: predicated region body
PF: predicated region fallthrough
CT: control target
= control target key end

     0   :  { %s2208_s27 = smov 0   ;;  %s2210_s28 = smov 0   ;;  %s2640_s0 = inlined_call_operand.vmem [shape: bf16[2,64,64], index: 0, kind: input, shape index: {}]   ;;  %s2641_s1 = inlined_call_operand.vmem [shape: bf16[1,64,128], index: 1, kind: input, shape index: {}]   ;;  %s2642_s2 = inlined_call_operand.vmem [shape: f32[1,128], index: 2, kind: input, shape index: {}]   ;;  %s2643_s3 = inlined_call_operand.vmem [shape: f32[1,128], index: 3, kind: input, shape index: {}]   ;;  %s2644_s4 = inlined_call_operand.vmem [shape: bf16[128,1024], index: 4, kind: input, shape index: {}]   ;;  %s2645_s5 = inlined_call_operand.vmem [shape: f32[2,1,128], index: 5, kind: output, shape index: {0}]   ;;  %s2646_s6 = inlined_call_operand.vmem [shape: f32[2,128,128], index: 6, kind: output, shape index: {1}]   ;;  %s2647_s7 = inlined_call_operand.vmem [shape: f32[2,1,1024], index: 7, kind: output, shape index: {2}]   ;;  %s2648_s8 = inlined_call_operand.vmem [shape: f32[2,1,1024], index: 8, kind: output, shape index: {3}]  }
   0x1   :  { %s2212_s29 = smov 0  }
   0x2 LB: > { %s31_s30 = sadd.s32 1, %s2154_s28  ;;  %p1942_p0 = scmp.ge.s32.totalorder %s2158_s29, 1  ;;  %s2158_s29 = sphi %s2212_s29, %s19_s29   ;;  %s2154_s28 = sphi %s2210_s28, %s2650_s28   ;;  %s2150_s27 = sphi %s2208_s27, %s2649_s27  }
   0x3   : > { %p33_p1 = scmp.ge.s32.totalorder %s31_s30, 2  ;;  %p288_p2 = scmp.lt.s32.totalorder %s2158_s29, 3 }
   0x5   : > { %s2652_s30 = smov (%p33_p1, %s31_s30), 0  ;;  %p289_p3 = pnand %p1942_p0, %p288_p2 }
   0x6   : > { %v2128_v0 = vld [vmem:[%s2641_s1] sm:$0xff] (!%p289_p3)   ;;  %p338_p4 = scmp.lt.s32.totalorder (!%p289_p3), %s2150_s27, 1  ;;  %v2129_v1 = vld [vmem:[%s2641_s1 + $0x8] sm:$0xff] (!%p289_p3)   ;;  %v2130_v2 = vld [vmem:[%s2641_s1 + $0x10] sm:$0xff] (!%p289_p3)   ;;  %vm424_vm0 = vcmask (!%p289_p3), 523264   ;;  %v2160_v3 = vmov (!%p289_p3), 0.0  }
   0x7   : > { %292 = sbr.rel (%p289_p3) target bundleno = 681 (0x2a9), region = 40  ;;  %2059 = vmatprep.subr.bf16.mxu0 (!%p289_p3), %v2128_v0  ;;  %v2131_v5 = vld [vmem:[%s2641_s1 + $0x18] sm:$0xff] (!%p289_p3)   ;;  %v776_v6 = vld [vmem:[%s2644_s4] sm:$0xff] (!%p289_p3)  ;;  %v778_v41 = vld [vmem:[%s2644_s4 + $0x10] sm:$0xff] (!%p289_p3)  ;;  %v2161_v44 = vmov (!%p289_p3), 0  }
   0x8   : > { %2060 = vmatpush3.bf16.msra.mxu0 (!%p289_p3), %v2128_v0  ;;  %v780_v7 = vld [vmem:[%s2644_s4 + $0x20] sm:$0xff] (!%p289_p3)  ;;  %v782_v42 = vld [vmem:[%s2644_s4 + $0x30] sm:$0xff] (!%p289_p3)  ;;  %v2319_v46 = vld [vmem:[%s2644_s4 + $0x8] sm:$0xff] (!%p289_p3) }
   0x9   : > { %2061 = vmatprep.subr.bf16.mxu0 (!%p289_p3), %v2129_v1  ;;  %v1972_v8 = vcombine.high (!%p289_p3), %v776_v6, %v780_v7  ;;  %v784_v9 = vld [vmem:[%s2644_s4 + $0x40] sm:$0xff] (!%p289_p3)  ;;  %v1971_v13 = vcombine.low (!%p289_p3), %v776_v6, %v780_v7  ;;  %v1976_v43 = vcombine.high (!%p289_p3), %v778_v41, %v782_v42  ;;  %v1975_v45 = vcombine.low (!%p289_p3), %v778_v41, %v782_v42  ;;  %v2324_v47 = vld [vmem:[%s2644_s4 + $0x28] sm:$0xff] (!%p289_p3)  ;;  %v810_v42 = vld [vmem:[%s2644_s4 + $0x110] sm:$0xff] (!%p289_p3) }
   0xa   : > { %v788_v10 = vld [vmem:[%s2644_s4 + $0x60] sm:$0xff] (!%p289_p3)  ;;  %v1973_v48 = vcombine.low (!%p289_p3), %v2319_v46, %v2324_v47 }
   0xb   : > { %v1980_v14 = vcombine.high (!%p289_p3), %v784_v9, %v788_v10  ;;  %v792_v15 = vld [vmem:[%s2644_s4 + $0x80] sm:$0xff] (!%p289_p3)  ;;  %v1979_v17 = vcombine.low (!%p289_p3), %v784_v9, %v788_v10 }
   0xc   : > { %2062 = vmatpush3.bf16.msra.mxu0 (!%p289_p3), %v2129_v1  ;;  %v796_v16 = vld [vmem:[%s2644_s4 + $0xa0] sm:$0xff] (!%p289_p3) }
   0xd   : > { %2063 = vmatprep.subr.bf16.mxu0 (!%p289_p3), %v2130_v2  ;;  %v1988_v18 = vcombine.high (!%p289_p3), %v792_v15, %v796_v16  ;;  %v800_v19 = vld [vmem:[%s2644_s4 + $0xc0] sm:$0xff] (!%p289_p3)  ;;  %v1987_v22 = vcombine.low (!%p289_p3), %v792_v15, %v796_v16 }
   0xe   : > { %s2654_s27 = smov (!%p338_p4, %s2150_s27), 1  ;;  %v804_v20 = vld [vmem:[%s2644_s4 + $0xe0] sm:$0xff] }
   0xf   : > { %s2037_s15 = sshll.u32 %s2654_s27, 5  ;;  %s2242_s18 = scalar_lea.vmem %s2645_s5, %s2654_s27  ;;  %v1996_v23 = vcombine.high %v800_v19, %v804_v20  ;;  %v808_v24 = vld [vmem:[%s2644_s4 + $0x100] sm:$0xff]  ;;  %v1995_v26 = vcombine.low %v800_v19, %v804_v20  ;;  %v794_v20 = vld [vmem:[%s2644_s4 + $0x90] sm:$0xff] }
  0x10   : > { %s2247_s21 = scalar_lea.vmem %s2640_s0, %s2037_s15  ;;  %548 = vst [vmem:[%s2242_s18] sm:$0x1] %v2160_v3  ;;  %2064 = vmatpush3.bf16.msra.mxu0 %v2130_v2  ;;  %v812_v25 = vld [vmem:[%s2644_s4 + $0x120] sm:$0xff]  ;;  %s2038_s15 = sshll.u32 %s2654_s27, 7 }
  0x11   : > { %v2132_v4 = vld [vmem:[%s2247_s21] sm:$0xff]   ;;  %2065 = vmatprep.subr.bf16.mxu0 %v2131_v5  ;;  %v2133_v11 = vld [vmem:[%s2247_s21 + $0x8] sm:$0xff]   ;;  %v2134_v12 = vld [vmem:[%s2247_s21 + $0x10] sm:$0xff]   ;;  %v2004_v27 = vcombine.high %v808_v24, %v812_v25  ;;  %v2003_v28 = vcombine.low %v808_v24, %v812_v25  ;;  %s2568_s19 = scalar_lea.vmem %s2646_s6, %s2038_s15  ;;  %s1947_s20 = sshll.u32 %s2654_s27, 3 }
  0x12   : > { %2067 = vmatprep.mubr.msk.bf16.mxu0 %vm424_vm0, %v2132_v4  ;;  %v2135_v21 = vld [vmem:[%s2247_s21 + $0x18] sm:$0xff]   ;;  %v816_v29 = vld [vmem:[%s2644_s4 + $0x140] sm:$0xff]  ;;  %v786_v4 = vld [vmem:[%s2644_s4 + $0x50] sm:$0xff]  ;;  %s358_s24 = scalar_lea.vmem %s2647_s7, %s1947_s20  ;;  %s362_s9 = scalar_lea.vmem %s2648_s8, %s1947_s20 }
  0x13   : > { %v820_v30 = vld [vmem:[%s2644_s4 + $0x160] sm:$0xff] }
  0x14   : > { %2066 = vmatpush3.bf16.msra.mxu0 %v2131_v5  ;;  %v2012_v31 = vcombine.high %v816_v29, %v820_v30  ;;  %v2011_v32 = vcombine.low %v816_v29, %v820_v30  ;;  %v824_v33 = vld [vmem:[%s2644_s4 + $0x180] sm:$0xff]  ;;  %v790_v5 = vld [vmem:[%s2644_s4 + $0x70] sm:$0xff] }
  0x15   : > { %1160 = vmatprep.subr.bf16.mxu0 %v1972_v8  ;;  %v828_v34 = vld [vmem:[%s2644_s4 + $0x1a0] sm:$0xff]  ;;  %v1984_v15 = vcombine.high %v786_v4, %v790_v5 }
  0x16   : > { %v2020_v35 = vcombine.high %v824_v33, %v828_v34  ;;  %v2019_v36 = vcombine.low %v824_v33, %v828_v34  ;;  %v832_v37 = vld [vmem:[%s2644_s4 + $0x1c0] sm:$0xff]  ;;  %v802_v33 = vld [vmem:[%s2644_s4 + $0xd0] sm:$0xff] }
  0x17   : > { %2068 = vmatmul.mubr.msk.bf16.vlgmr.msra.gmra.mrb[0].mxu0 %vm424_vm0, %v2133_v11  ;;  %v836_v38 = vld [vmem:[%s2644_s4 + $0x1e0] sm:$0xff]  ;;  %v806_v34 = vld [vmem:[%s2644_s4 + $0xf0] sm:$0xff] }
  0x18   : > { %2071 = vmatprep.mubr.msk.bf16.mxu0 %vm424_vm0, %v2134_v12  ;;  %1161 = vmatpush1.bf16.msra.mxu0 %v1971_v13  ;;  %v2028_v39 = vcombine.high %v832_v37, %v836_v38  ;;  %v2027_v40 = vcombine.low %v832_v37, %v836_v38  ;;  %v1961_v49 = vld [vmem:[%s2642_s2] ss:$0 sm:$0xff] }
  0x19   : > { %1162 = vmatprep.subr.bf16.mxu0 %v1980_v14  ;;  %v1962_v51 = vld [vmem:[%s2643_s3] ss:$0 sm:$0xff] }
  0x1c   : > { %1163 = vmatpush1.bf16.msra.mxu0 %v1979_v17 }
  0x1d   : > { %1164 = vmatprep.subr.bf16.mxu0 %v1988_v18 }
  0x1f   : > { %2072 = vmatmul.mubr.msk.bf16.gmra.mrb[4].mxu0 %vm424_vm0, %v2135_v21  ;;  %v798_v21 = vld [vmem:[%s2644_s4 + $0xb0] sm:$0xff] }
  0x20   : > { %1165 = vmatpush1.bf16.msra.mxu0 %v1987_v22  ;;  %1192 = vmatprep.mubr.bf16.mxu0 %v2161_v44  ;;  %v1992_v29 = vcombine.high %v794_v20, %v798_v21  ;;  %v1991_v38 = vcombine.low %v794_v20, %v798_v21 }
  0x21   : > { %1166 = vmatprep.subr.bf16.mxu0 %v1996_v23 }
  0x24   : > { %1167 = vmatpush1.bf16.msra.mxu0 %v1995_v26  ;;  %v1983_v26 = vcombine.low %v786_v4, %v790_v5  ;;  %v834_v4 = vld [vmem:[%s2644_s4 + $0x1d0] sm:$0xff] }
  0x25   : > { %1168 = vmatprep.subr.bf16.mxu0 %v2004_v27  ;;  %v838_v5 = vld [vmem:[%s2644_s4 + $0x1f0] sm:$0xff] }
  0x28   : > { %1169 = vmatpush1.bf16.msra.mxu0 %v2003_v28 }
  0x29   : > { %1170 = vmatprep.subr.bf16.mxu0 %v2012_v31 }
  0x2c   : > { %1171 = vmatpush1.bf16.msra.mxu0 %v2011_v32 }
  0x2d   : > { %1172 = vmatprep.subr.bf16.mxu0 %v2020_v35 }
  0x30   : > { %1173 = vmatpush1.bf16.msra.mxu0 %v2019_v36 }
  0x31   : > { %1174 = vmatprep.subr.bf16.mxu0 %v2028_v39  ;;  %v2000_v39 = vcombine.high %v802_v33, %v806_v34 }
  0x34   : > { %1175 = vmatpush1.bf16.msra.mxu0 %v2027_v40 }
  0x35   : > { %1306 = vmatprep.subr.bf16.mxu0 %v1976_v43  ;;  %v814_v43 = vld [vmem:[%s2644_s4 + $0x130] sm:$0xff] }
  0xea   : > { %v2069_v50 = vpop.f32.mrb[0].mxu0 }
  0xeb   : > { %v511_v52 = vmul.f32 %v2069_v50, %v1961_v49  ;;  %v471_v53 = vpop.f32.mrb[1].mxu0  ;;  %v1999_v50 = vcombine.low %v802_v33, %v806_v34  ;;  %v817_v34 = vld [vmem:[%s2644_s4 + $0x148] sm:$0xff] }
  0xec   : > { %v509_v54 = vmul.f32 %v1961_v49, %v471_v53  ;;  %v2070_v55 = vpop.f32.mrb[2].mxu0 }
  0xed   : > { %v526_v56 = vadd.f32 %v1962_v51, %v511_v52  ;;  %v512_v57 = vmul.f32 %v2070_v55, %v1961_v49  ;;  %v474_v58 = vpop.f32.mrb[3].mxu0  ;;  %v2008_v52 = vcombine.high %v810_v42, %v814_v43  ;;  %v818_v55 = vld [vmem:[%s2644_s4 + $0x150] sm:$0xff] }
  0xee   : > { %v524_v59 = vadd.f32 %v1962_v51, %v509_v54  ;;  %v510_v60 = vmul.f32 %v1961_v49, %v474_v58 }
  0xef   : > { %v527_v61 = vadd.f32 %v1962_v51, %v512_v57  ;;  %v534_v63 = vmax.f32 %v526_v56, 0.0  ;;  %v822_v56 = vld [vmem:[%s2644_s4 + $0x170] sm:$0xff] }
  0xf0   : > { %v525_v62 = vadd.f32 %v1962_v51, %v510_v60  ;;  %v532_v1 = vmax.f32 %v524_v59, 0.0  ;;  %v2007_v59 = vcombine.low %v810_v42, %v814_v43  ;;  %v2016_v60 = vcombine.high %v818_v55, %v822_v56  ;;  %v829_v42 = vld [vmem:[%s2644_s4 + $0x1a8] sm:$0xff] }
  0xf1   : > { %v535_v0 = vmax.f32 %v527_v61, 0.0 }
  0xf2   : > { %v533_v2 = vmax.f32 %v525_v62, 0.0  ;;  %v2073_v3 = vpop.f32.mrb[4].mxu0  ;;  %v826_v62 = vld [vmem:[%s2644_s4 + $0x190] sm:$0xff] }
  0xf3   : > { %v2340_v6 = vpack.c.bf16 %v535_v0, %v534_v63  ;;  %v515_v7 = vmul.f32 %v2073_v3, %v1961_v49  ;;  %v487_v8 = vpop.f32.mrb[5].mxu0  ;;  %v830_v63 = vld [vmem:[%s2644_s4 + $0x1b0] sm:$0xff] }
  0xf4   : > { %v2342_v9 = vpack.c.bf16 %v533_v2, %v532_v1  ;;  %v513_v10 = vmul.f32 %v1961_v49, %v487_v8  ;;  %v2074_v11 = vpop.f32.mrb[6].mxu0  ;;  %v2015_v1 = vcombine.low %v818_v55, %v822_v56  ;;  %v2024_v2 = vcombine.high %v826_v62, %v830_v63  ;;  %v779_v55 = vld [vmem:[%s2644_s4 + $0x18] sm:$0xff] }
  0xf5   : > { %v530_v12 = vadd.f32 %v1962_v51, %v515_v7  ;;  %v516_v13 = vmul.f32 %v2074_v11, %v1961_v49  ;;  %v490_v14 = vpop.f32.mrb[7].mxu0  ;;  %v570_v23 = vunpack.c.l.bf16 %v2340_v6  ;;  %v571_v36 = vunpack.c.h.bf16 %v2340_v6  ;;  %v783_v56 = vld [vmem:[%s2644_s4 + $0x38] sm:$0xff] }
  0xf6   : > { %v568_v16 = vunpack.c.l.bf16 %v2342_v9  ;;  %v569_v17 = vunpack.c.h.bf16 %v2342_v9  ;;  %v528_v18 = vadd.f32 %v1962_v51, %v513_v10  ;;  %v514_v19 = vmul.f32 %v1961_v49, %v490_v14  ;;  %607 = vxpose.xlu0.c.b16.start [1/4] (short) %v2342_v9, 128  ;;  %2075 = vmatprep.subr.bf16.mxu1 %v2342_v9  ;;  %v567_v14 = vld [vmem:[%s2242_s18] sm:$0x1] }
  0xf7   : > { %v531_v22 = vadd.f32 %v1962_v51, %v516_v13  ;;  %1193 = vmatmul.mubr.bf16.vlgmr.msra.gmra.mrb[8].mxu0 %v2342_v9  ;;  %2076 = vmatpush3.bf16.msra.mxu1 %v2342_v9  ;;  %v538_v27 = vmax.f32 %v530_v12, 0.0  ;;  %v2023_v8 = vcombine.low %v826_v62, %v830_v63  ;;  %v2032_v10 = vcombine.high %v834_v4, %v838_v5  ;;  %v795_v63 = vld [vmem:[%s2644_s4 + $0x98] sm:$0xff] }
  0xf8   : > { %v576_v24 = vadd.f32 %v569_v17, %v568_v16  ;;  %v529_v25 = vadd.f32 %v1962_v51, %v514_v19  ;;  %1307 = vmatpush1.bf16.msra.mxu0 %v1975_v45  ;;  %2077 = vmatprep.subr.bf16.mxu1 %v2340_v6  ;;  %v536_v31 = vmax.f32 %v528_v18, 0.0  ;;  %v1974_v51 = vcombine.high %v2319_v46, %v2324_v47  ;;  %v785_v18 = vld [vmem:[%s2644_s4 + $0x48] sm:$0xff] }
  0xf9   : > { %v539_v28 = vmax.f32 %v531_v22, 0.0  ;;  %1308 = vmatprep.subr.bf16.mxu0 %v1984_v15  ;;  %1202 = vmatprep.mubr.bf16.mxu0 %v2161_v44  ;;  %v2031_v13 = vcombine.low %v834_v4, %v838_v5  ;;  %v789_v19 = vld [vmem:[%s2644_s4 + $0x68] sm:$0xff]  ;;  %v807_v4 = vld [vmem:[%s2644_s4 + $0xf8] sm:$0xff] }
  0xfa   : > { %v577_v30 = vadd.f32 %v576_v24, %v570_v23  ;;  %v537_v32 = vmax.f32 %v529_v25, 0.0  ;;  %608 = vxpose.xlu0.c.b16.cont [2/4] (short) %v2340_v6, 128  ;;  %v1982_v20 = vcombine.high %v785_v18, %v789_v19  ;;  %v793_v22 = vld [vmem:[%s2644_s4 + $0x88] sm:$0xff]  ;;  %v1981_v24 = vcombine.low %v785_v18, %v789_v19  ;;  %v831_v18 = vld [vmem:[%s2644_s4 + $0x1b8] sm:$0xff] }
  0xfb   : > { %v2366_v35 = vpack.c.bf16 %v539_v28, %v538_v27  ;;  %2078 = vmatpush3.bf16.msra.mxu1 %v2340_v6  ;;  %v797_v23 = vld [vmem:[%s2644_s4 + $0xa8] sm:$0xff] }
  0xfc   : > { %v2370_v37 = vpack.c.bf16 %v537_v32, %v536_v31  ;;  %1309 = vmatpush1.bf16.msra.mxu0 %v1983_v26  ;;  %v578_v41 = vadd.f32 %v577_v30, %v571_v36  ;;  %v1990_v25 = vcombine.high %v793_v22, %v797_v23  ;;  %v801_v27 = vld [vmem:[%s2644_s4 + $0xc8] sm:$0xff] }
  0xfd   : > { %1310 = vmatprep.subr.bf16.mxu0 %v1992_v29  ;;  %v574_v53 = vunpack.c.l.bf16 %v2366_v35  ;;  %v575_v57 = vunpack.c.h.bf16 %v2366_v35  ;;  %v805_v28 = vld [vmem:[%s2644_s4 + $0xe8] sm:$0xff]  ;;  %v1989_v29 = vcombine.low %v793_v22, %v797_v23  ;;  %v839_v22 = vld [vmem:[%s2644_s4 + $0x1f8] sm:$0xff] }
  0xfe   : > { %v572_v40 = vunpack.c.l.bf16 %v2370_v37  ;;  %609 = vxpose.xlu0.c.b16.cont [3/4] (short) %v2370_v37, 128  ;;  %2079 = vmatprep.subr.bf16.mxu1 %v2370_v37  ;;  %v573_v45 = vunpack.c.h.bf16 %v2370_v37  ;;  %v1998_v30 = vcombine.high %v801_v27, %v805_v28  ;;  %v809_v47 = vld [vmem:[%s2644_s4 + $0x108] sm:$0xff]  ;;  %v1997_v31 = vcombine.low %v801_v27, %v805_v28 }
  0xff   : > { %1203 = vmatmul.mubr.bf16.gmra.mrb[12].mxu0 %v2340_v6  ;;  %2080 = vmatpush3.bf16.msra.mxu1 %v2370_v37  ;;  %v821_v36 = vld [vmem:[%s2644_s4 + $0x168] sm:$0xff] }
 0x100   : > { %v579_v49 = vadd.f32 %v578_v41, %v572_v40  ;;  %1311 = vmatpush1.bf16.msra.mxu0 %v1991_v38  ;;  %2081 = vmatprep.subr.bf16.mxu1 %v2366_v35  ;;  %v825_v41 = vld [vmem:[%s2644_s4 + $0x188] sm:$0xff]  ;;  %v2013_v43 = vcombine.low %v817_v34, %v821_v36 }
 0x101   : > { %1312 = vmatprep.subr.bf16.mxu0 %v2000_v39  ;;  %1212 = vmatprep.mubr.bf16.mxu0 %v2161_v44  ;;  %v2014_v39 = vcombine.high %v817_v34, %v821_v36 }
 0x102   : > { %v580_v54 = vadd.f32 %v579_v49, %v573_v45  ;;  %610 = vxpose.xlu0.c.b16.end [4/4] (short) %v2366_v35, 128  ;;  %v2022_v45 = vcombine.high %v825_v41, %v829_v42 }
 0x103   : > { %2082 = vmatpush3.bf16.msra.mxu1 %v2366_v35 }
 0x104   : > { %v581_v58 = vadd.f32 %v580_v54, %v574_v53  ;;  %1313 = vmatpush1.bf16.msra.mxu0 %v1999_v50  ;;  %1233 = vmatprep.subr.bf16.mxu1 %v1974_v51  ;;  %v833_v50 = vld [vmem:[%s2644_s4 + $0x1c8] sm:$0xff] }
 0x105   : > { %1314 = vmatprep.subr.bf16.mxu0 %v2008_v52  ;;  %v837_v51 = vld [vmem:[%s2644_s4 + $0x1e8] sm:$0xff]  ;;  %v2021_v52 = vcombine.low %v825_v41, %v829_v42 }
 0x106   : > { %v582_v61 = vadd.f32 %v581_v58, %v575_v57  ;;  %v2030_v53 = vcombine.high %v833_v50, %v837_v51  ;;  %v2029_v57 = vcombine.low %v833_v50, %v837_v51  ;;  %v1978_v58 = vcombine.high %v779_v55, %v783_v56 }
 0x107   : > { %1213 = vmatmul.mubr.bf16.gmra.mrb[16].mxu0 %v2370_v37 }
 0x108   : > { %v583_v0 = vrot.slane %v582_v61, 4  ;;  %1315 = vmatpush1.bf16.msra.mxu0 %v2007_v59  ;;  %1222 = vmatprep.mubr.bf16.mxu0 %v2161_v44  ;;  %v787_v59 = vld [vmem:[%s2644_s4 + $0x58] sm:$0xff] }
 0x109   : > { %1316 = vmatprep.subr.bf16.mxu0 %v2016_v60  ;;  %v791_v60 = vld [vmem:[%s2644_s4 + $0x78] sm:$0xff] }
 0x10a   : > { %v584_v3 = vadd.f32 %v583_v0, %v582_v61  ;;  %v1977_v61 = vcombine.low %v779_v55, %v783_v56  ;;  %v1986_v62 = vcombine.high %v787_v59, %v791_v60  ;;  %v799_v0 = vld [vmem:[%s2644_s4 + $0xb8] sm:$0xff] }
 0x10b   : > { %v1993_v5 = vcombine.low %v795_v63, %v799_v0 }
 0x10c   : > { %v585_v7 = vrot.slane %v584_v3, 2  ;;  %1317 = vmatpush1.bf16.msra.mxu0 %v2015_v1  ;;  %v1985_v1 = vcombine.low %v787_v59, %v791_v60 }
 0x10d   : > { %1318 = vmatprep.subr.bf16.mxu0 %v2024_v2  ;;  %v1994_v2 = vcombine.high %v795_v63, %v799_v0 }
 0x10e   : > { %v586_v11 = vadd.f32 %v585_v7, %v584_v3  ;;  %v803_v3 = vld [vmem:[%s2644_s4 + $0xd8] sm:$0xff] }
 0x10f   : > { %1223 = vmatmul.mubr.bf16.gmra.mrb[20].mxu0 %v2366_v35  ;;  %v2002_v7 = vcombine.high %v803_v3, %v807_v4 }
 0x110   : > { %v587_v12 = vrot.slane %v586_v11, 1  ;;  %1319 = vmatpush1.bf16.msra.mxu0 %v2023_v8  ;;  %1338 = vmatprep.mubr.bf16.mxu0 %v2161_v44  ;;  %v811_v8 = vld [vmem:[%s2644_s4 + $0x118] sm:$0xff] }
 0x111   : > { %1320 = vmatprep.subr.bf16.mxu0 %v2032_v10  ;;  %v815_v10 = vld [vmem:[%s2644_s4 + $0x138] sm:$0xff] }
 0x112   : > { %v588_v15 = vadd.f32 %v587_v12, %v586_v11  ;;  %v2001_v11 = vcombine.low %v803_v3, %v807_v4  ;;  %v2010_v12 = vcombine.high %v811_v8, %v815_v10 }
 0x114   : > { %v589_v16 = vadd.f32 %v588_v15, %v567_v14  ;;  %1321 = vmatpush1.bf16.msra.mxu0 %v2031_v13  ;;  %v819_v13 = vld [vmem:[%s2644_s4 + $0x158] sm:$0xff]  ;;  %v2009_v15 = vcombine.low %v811_v8, %v815_v10 }
 0x115   : > { %v823_v14 = vld [vmem:[%s2644_s4 + $0x178] sm:$0xff] }
 0x116   : > { %590 = vst [vmem:[%s2242_s18] sm:$0x1] %v589_v16  ;;  %v2018_v16 = vcombine.high %v819_v13, %v823_v14  ;;  %v2017_v19 = vcombine.low %v819_v13, %v823_v14 }
 0x117   : > { %1339 = vmatmul.mubr.bf16.vlgmr.msra.gmra.mrb[24].mxu0 %v2342_v9 }
 0x118   : > { %1348 = vmatprep.mubr.bf16.mxu0 %v2161_v44 }
 0x11f   : > { %1349 = vmatmul.mubr.bf16.gmra.mrb[28].mxu0 %v2340_v6 }
 0x120   : > { %1358 = vmatprep.mubr.bf16.mxu0 %v2161_v44 }
 0x127   : > { %1359 = vmatmul.mubr.bf16.gmra.mrb[32].mxu0 %v2370_v37 }
 0x128   : > { %1368 = vmatprep.mubr.bf16.mxu0 %v2161_v44 }
 0x12f   : > { %1369 = vmatmul.mubr.bf16.gmra.mrb[36].mxu0 %v2366_v35 }
 0x15c   : > { %v615_v17 = vpop.trf.xlu0 }
 0x15d   : > { %2083 = vmatprep.mubr.msk.bf16.mxu1 %vm424_vm0, %v615_v17  ;;  %v827_v17 = vld [vmem:[%s2644_s4 + $0x198] sm:$0xff] }
 0x15e   : > { %v2025_v23 = vcombine.low %v827_v17, %v831_v18 }
 0x160   : > { %v616_v21 = vpop.trf.xlu0 }
 0x161   : > { %2084 = vmatmul.mubr.msk.bf16.vlgmr.msra.gmra.mrb[0].mxu1 %vm424_vm0, %v616_v21  ;;  %v835_v21 = vld [vmem:[%s2644_s4 + $0x1d8] sm:$0xff] }
 0x162   : > { %1234 = vmatpush1.bf16.msra.mxu1 %v1973_v48  ;;  %v813_v48 = vld [vmem:[%s2644_s4 + $0x128] sm:$0xff] }
 0x163   : > { %1235 = vmatprep.subr.bf16.mxu1 %v1982_v20  ;;  %v2006_v32 = vcombine.high %v809_v47, %v813_v48  ;;  %v2005_v38 = vcombine.low %v809_v47, %v813_v48  ;;  %v2026_v20 = vcombine.high %v827_v17, %v831_v18 }
 0x164   : > { %v617_v26 = vpop.trf.xlu0 }
 0x165   : > { %2087 = vmatprep.mubr.msk.bf16.mxu1 %vm424_vm0, %v617_v26 }
 0x166   : > { %1236 = vmatpush1.bf16.msra.mxu1 %v1981_v24  ;;  %v2034_v24 = vcombine.high %v835_v21, %v839_v22 }
 0x167   : > { %1237 = vmatprep.subr.bf16.mxu1 %v1990_v25  ;;  %v2033_v25 = vcombine.low %v835_v21, %v839_v22 }
 0x168   : > { %v618_v46 = vpop.trf.xlu0 }
 0x169   : > { %2088 = vmatmul.mubr.msk.bf16.gmra.mrb[4].mxu1 %vm424_vm0, %v618_v46 }
 0x16a   : > { %1238 = vmatpush1.bf16.msra.mxu1 %v1989_v29 }
 0x16b   : > { %1239 = vmatprep.subr.bf16.mxu1 %v1998_v30 }
 0x16c   : > { %v619_v33 = vpop.trf.xlu0 }
 0x16d   : > { %2091 = vmatprep.mubr.msk.bf16.mxu1 %vm424_vm0, %v619_v33 }
 0x16e   : > { %1240 = vmatpush1.bf16.msra.mxu1 %v1997_v31 }
 0x16f   : > { %1241 = vmatprep.subr.bf16.mxu1 %v2006_v32 }
 0x170   : > { %v620_v40 = vpop.trf.xlu0 }
 0x171   : > { %2092 = vmatmul.mubr.msk.bf16.gmra.mrb[8].mxu1 %vm424_vm0, %v620_v40 }
 0x172   : > { %1242 = vmatpush1.bf16.msra.mxu1 %v2005_v38 }
 0x173   : > { %1243 = vmatprep.subr.bf16.mxu1 %v2014_v39 }
 0x174   : > { %v621_v49 = vpop.trf.xlu0 }
 0x175   : > { %2095 = vmatprep.mubr.msk.bf16.mxu1 %vm424_vm0, %v621_v49 }
 0x176   : > { %1244 = vmatpush1.bf16.msra.mxu1 %v2013_v43 }
 0x177   : > { %1245 = vmatprep.subr.bf16.mxu1 %v2022_v45 }
 0x178   : > { %v622_v54 = vpop.trf.xlu0 }
 0x179   : > { %2096 = vmatmul.mubr.msk.bf16.gmra.mrb[12].mxu1 %vm424_vm0, %v622_v54 }
 0x17a   : > { %1246 = vmatpush1.bf16.msra.mxu1 %v2021_v52  ;;  %1265 = vmatprep.mubr.bf16.mxu1 %v2161_v44 }
 0x17b   : > { %1247 = vmatprep.subr.bf16.mxu1 %v2030_v53 }
 0x17e   : > { %1248 = vmatpush1.bf16.msra.mxu1 %v2029_v57 }
 0x17f   : > { %1379 = vmatprep.subr.bf16.mxu1 %v1978_v58 }
 0x181   : > { %1266 = vmatmul.mubr.bf16.vlgmr.msra.gmra.mrb[16].mxu1 %v2342_v9 }
 0x182   : > { %1380 = vmatpush1.bf16.msra.mxu1 %v1977_v61  ;;  %1275 = vmatprep.mubr.bf16.mxu1 %v2161_v44 }
 0x183   : > { %1381 = vmatprep.subr.bf16.mxu1 %v1986_v62 }
 0x186   : > { %1382 = vmatpush1.bf16.msra.mxu1 %v1985_v1 }
 0x187   : > { %1383 = vmatprep.subr.bf16.mxu1 %v1994_v2 }
 0x189   : > { %1276 = vmatmul.mubr.bf16.gmra.mrb[20].mxu1 %v2340_v6 }
 0x18a   : > { %1384 = vmatpush1.bf16.msra.mxu1 %v1993_v5  ;;  %1285 = vmatprep.mubr.bf16.mxu1 %v2161_v44 }
 0x18b   : > { %1385 = vmatprep.subr.bf16.mxu1 %v2002_v7 }
 0x18e   : > { %1386 = vmatpush1.bf16.msra.mxu1 %v2001_v11 }
 0x18f   : > { %1387 = vmatprep.subr.bf16.mxu1 %v2010_v12 }
 0x191   : > { %1286 = vmatmul.mubr.bf16.gmra.mrb[24].mxu1 %v2370_v37 }
 0x192   : > { %1388 = vmatpush1.bf16.msra.mxu1 %v2009_v15  ;;  %1295 = vmatprep.mubr.bf16.mxu1 %v2161_v44 }
 0x193   : > { %1389 = vmatprep.subr.bf16.mxu1 %v2018_v16 }
 0x196   : > { %1390 = vmatpush1.bf16.msra.mxu1 %v2017_v19 }
 0x197   : > { %1391 = vmatprep.subr.bf16.mxu1 %v2026_v20 }
 0x199   : > { %1296 = vmatmul.mubr.bf16.gmra.mrb[28].mxu1 %v2366_v35 }
 0x19a   : > { %1392 = vmatpush1.bf16.msra.mxu1 %v2025_v23  ;;  %1411 = vmatprep.mubr.bf16.mxu1 %v2161_v44 }
 0x19b   : > { %1393 = vmatprep.subr.bf16.mxu1 %v2034_v24 }
 0x19e   : > { %1394 = vmatpush1.bf16.msra.mxu1 %v2033_v25 }
 0x1a1   : > { %1412 = vmatmul.mubr.bf16.vlgmr.msra.gmra.mrb[32].mxu1 %v2342_v9 }
 0x1a2   : > { %1421 = vmatprep.mubr.bf16.mxu1 %v2161_v44 }
 0x1a9   : > { %1422 = vmatmul.mubr.bf16.gmra.mrb[36].mxu1 %v2340_v6 }
 0x1aa   : > { %1431 = vmatprep.mubr.bf16.mxu1 %v2161_v44 }
 0x1b1   : > { %1432 = vmatmul.mubr.bf16.gmra.mrb[40].mxu1 %v2370_v37 }
 0x1b2   : > { %1441 = vmatprep.mubr.bf16.mxu1 %v2161_v44 }
 0x1b9   : > { %1442 = vmatmul.mubr.bf16.gmra.mrb[44].mxu1 %v2366_v35 }
 0x1ca   : > { %v1194_v26 = vpop.f32.mrb[8].mxu0 }
 0x1cb   : > { %v1196_v27 = vpop.f32.mrb[9].mxu0 }
 0x1cc   : > { %v1198_v28 = vpop.f32.mrb[10].mxu0 }
 0x1cd   : > { %v1453_v29 = vmax.f32 %v1194_v26, %v1198_v28  ;;  %v1618_v30 = vmin.f32 %v1194_v26, %v1198_v28  ;;  %v1200_v46 = vpop.f32.mrb[11].mxu0 }
 0x1ce   : > { %v1466_v47 = vmax.f32 %v1196_v27, %v1200_v46  ;;  %v1631_v9 = vmin.f32 %v1196_v27, %v1200_v46 }
 0x1d2   : > { %v1204_v48 = vpop.f32.mrb[12].mxu0 }
 0x1d3   : > { %v1454_v31 = vmax.f32 %v1453_v29, %v1204_v48  ;;  %v1619_v32 = vmin.f32 %v1618_v30, %v1204_v48  ;;  %v1206_v6 = vpop.f32.mrb[13].mxu0 }
 0x1d4   : > { %v1467_v33 = vmax.f32 %v1466_v47, %v1206_v6  ;;  %v1632_v34 = vmin.f32 %v1631_v9, %v1206_v6  ;;  %v1208_v36 = vpop.f32.mrb[14].mxu0 }
 0x1d5   : > { %v1455_v37 = vmax.f32 %v1454_v31, %v1208_v36  ;;  %v1620_v38 = vmin.f32 %v1619_v32, %v1208_v36  ;;  %v1210_v44 = vpop.f32.mrb[15].mxu0 }
 0x1d6   : > { %v1468_v39 = vmax.f32 %v1467_v33, %v1210_v44  ;;  %v1633_v35 = vmin.f32 %v1632_v34, %v1210_v44 }
 0x1da   : > { %v1214_v40 = vpop.f32.mrb[16].mxu0 }
 0x1db   : > { %v1456_v41 = vmax.f32 %v1455_v37, %v1214_v40  ;;  %v1621_v42 = vmin.f32 %v1620_v38, %v1214_v40  ;;  %v1216_v43 = vpop.f32.mrb[17].mxu0 }
 0x1dc   : > { %v1469_v45 = vmax.f32 %v1468_v39, %v1216_v43  ;;  %v1634_v49 = vmin.f32 %v1633_v35, %v1216_v43  ;;  %v1218_v50 = vpop.f32.mrb[18].mxu0 }
 0x1dd   : > { %v1457_v51 = vmax.f32 %v1456_v41, %v1218_v50  ;;  %v1622_v52 = vmin.f32 %v1621_v42, %v1218_v50  ;;  %v1220_v53 = vpop.f32.mrb[19].mxu0 }
 0x1de   : > { %v1470_v54 = vmax.f32 %v1469_v45, %v1220_v53  ;;  %v1635_v55 = vmin.f32 %v1634_v49, %v1220_v53 }
 0x1e2   : > { %v1224_v56 = vpop.f32.mrb[20].mxu0 }
 0x1e3   : > { %v1458_v57 = vmax.f32 %v1457_v51, %v1224_v56  ;;  %v1623_v58 = vmin.f32 %v1622_v52, %v1224_v56  ;;  %v1226_v59 = vpop.f32.mrb[21].mxu0 }
 0x1e4   : > { %v1471_v60 = vmax.f32 %v1470_v54, %v1226_v59  ;;  %v1636_v61 = vmin.f32 %v1635_v55, %v1226_v59  ;;  %v1228_v62 = vpop.f32.mrb[22].mxu0 }
 0x1e5   : > { %v1459_v63 = vmax.f32 %v1458_v57, %v1228_v62  ;;  %v1624_v0 = vmin.f32 %v1623_v58, %v1228_v62  ;;  %v1230_v1 = vpop.f32.mrb[23].mxu0 }
 0x1e6   : > { %v1472_v2 = vmax.f32 %v1471_v60, %v1230_v1  ;;  %v1637_v3 = vmin.f32 %v1636_v61, %v1230_v1 }
 0x1e7   : > { %v1460_v4 = vrot.slane %v1459_v63, 4  ;;  %v1625_v5 = vrot.slane %v1624_v0, 4 }
 0x1e8   : > { %v1473_v7 = vrot.slane %v1472_v2, 4  ;;  %v1638_v8 = vrot.slane %v1637_v3, 4 }
 0x1e9   : > { %v1461_v10 = vmax.f32 %v1459_v63, %v1460_v4  ;;  %v1626_v11 = vmin.f32 %v1624_v0, %v1625_v5 }
 0x1ea   : > { %v1474_v12 = vmax.f32 %v1472_v2, %v1473_v7  ;;  %v1639_v13 = vmin.f32 %v1637_v3, %v1638_v8  ;;  %v1340_v14 = vpop.f32.mrb[24].mxu0 }
 0x1eb   : > { %v1462_v15 = vrot.slane %v1461_v10, 2  ;;  %v1627_v16 = vrot.slane %v1626_v11, 2  ;;  %v1342_v17 = vpop.f32.mrb[25].mxu0 }
 0x1ec   : > { %v1475_v18 = vrot.slane %v1474_v12, 2  ;;  %v1640_v19 = vrot.slane %v1639_v13, 2  ;;  %v1344_v20 = vpop.f32.mrb[26].mxu0 }
 0x1ed   : > { %v1463_v21 = vmax.f32 %v1461_v10, %v1462_v15  ;;  %v1628_v22 = vmin.f32 %v1626_v11, %v1627_v16  ;;  %v1505_v23 = vmax.f32 %v1340_v14, %v1344_v20  ;;  %v1670_v24 = vmin.f32 %v1340_v14, %v1344_v20  ;;  %v1346_v25 = vpop.f32.mrb[27].mxu0 }
 0x1ee   : > { %v1476_v26 = vmax.f32 %v1474_v12, %v1475_v18  ;;  %v1641_v27 = vmin.f32 %v1639_v13, %v1640_v19  ;;  %v1518_v28 = vmax.f32 %v1342_v17, %v1346_v25  ;;  %v1683_v29 = vmin.f32 %v1342_v17, %v1346_v25 }
 0x1ef   : > { %v1464_v30 = vrot.slane %v1463_v21, 1  ;;  %v1629_v46 = vrot.slane %v1628_v22, 1 }
 0x1f0   : > { %v1477_v47 = vrot.slane %v1476_v26, 1  ;;  %v1642_v9 = vrot.slane %v1641_v27, 1 }
 0x1f1   : > { %v2540_v48 = vmax.f32 %v1463_v21, %v1464_v30  ;;  %v2542_v31 = vmin.f32 %v1628_v22, %v1629_v46 }
 0x1f2   : > { %v2544_v32 = vmax.f32 %v1476_v26, %v1477_v47  ;;  %v2546_v6 = vmin.f32 %v1641_v27, %v1642_v9  ;;  %v1350_v33 = vpop.f32.mrb[28].mxu0 }
 0x1f3   : > { %v1506_v34 = vmax.f32 %v1505_v23, %v1350_v33  ;;  %v1671_v36 = vmin.f32 %v1670_v24, %v1350_v33  ;;  %v1352_v37 = vpop.f32.mrb[29].mxu0 }
 0x1f4   : > { %v1565_v38 = vcombine.low %v2540_v48, %v2544_v32  ;;  %v1730_v44 = vcombine.low %v2542_v31, %v2546_v6  ;;  %v1519_v39 = vmax.f32 %v1518_v28, %v1352_v37  ;;  %v1684_v35 = vmin.f32 %v1683_v29, %v1352_v37  ;;  %v1354_v40 = vpop.f32.mrb[30].mxu0 }
 0x1f5   : > { %v1507_v41 = vmax.f32 %v1506_v34, %v1354_v40  ;;  %v1672_v42 = vmin.f32 %v1671_v36, %v1354_v40  ;;  %v1356_v43 = vpop.f32.mrb[31].mxu0 }
 0x1f6   : > { %v1520_v45 = vmax.f32 %v1519_v39, %v1356_v43  ;;  %v1685_v49 = vmin.f32 %v1684_v35, %v1356_v43 }
 0x1fa   : > { %v1360_v50 = vpop.f32.mrb[32].mxu0 }
 0x1fb   : > { %v1508_v51 = vmax.f32 %v1507_v41, %v1360_v50  ;;  %v1673_v52 = vmin.f32 %v1672_v42, %v1360_v50  ;;  %v1362_v53 = vpop.f32.mrb[33].mxu0 }
 0x1fc   : > { %v1521_v54 = vmax.f32 %v1520_v45, %v1362_v53  ;;  %v1686_v55 = vmin.f32 %v1685_v49, %v1362_v53  ;;  %v1364_v56 = vpop.f32.mrb[34].mxu0 }
 0x1fd   : > { %v1509_v57 = vmax.f32 %v1508_v51, %v1364_v56  ;;  %v1674_v58 = vmin.f32 %v1673_v52, %v1364_v56  ;;  %v1366_v59 = vpop.f32.mrb[35].mxu0 }
 0x1fe   : > { %v1522_v60 = vmax.f32 %v1521_v54, %v1366_v59  ;;  %v1687_v61 = vmin.f32 %v1686_v55, %v1366_v59 }
 0x202   : > { %v1370_v62 = vpop.f32.mrb[36].mxu0 }
 0x203   : > { %v1510_v63 = vmax.f32 %v1509_v57, %v1370_v62  ;;  %v1675_v0 = vmin.f32 %v1674_v58, %v1370_v62  ;;  %v1372_v1 = vpop.f32.mrb[37].mxu0 }
 0x204   : > { %v1523_v2 = vmax.f32 %v1522_v60, %v1372_v1  ;;  %v1688_v3 = vmin.f32 %v1687_v61, %v1372_v1  ;;  %v1374_v4 = vpop.f32.mrb[38].mxu0 }
 0x205   : > { %v1511_v5 = vmax.f32 %v1510_v63, %v1374_v4  ;;  %v1676_v7 = vmin.f32 %v1675_v0, %v1374_v4  ;;  %v1376_v8 = vpop.f32.mrb[39].mxu0 }
 0x206   : > { %v1524_v10 = vmax.f32 %v1523_v2, %v1376_v8  ;;  %v1689_v11 = vmin.f32 %v1688_v3, %v1376_v8 }
 0x207   : > { %v1512_v12 = vrot.slane %v1511_v5, 4  ;;  %v1677_v13 = vrot.slane %v1676_v7, 4 }
 0x208   : > { %v1525_v14 = vrot.slane %v1524_v10, 4  ;;  %v1690_v15 = vrot.slane %v1689_v11, 4 }
 0x209   : > { %v1513_v16 = vmax.f32 %v1511_v5, %v1512_v12  ;;  %v1678_v17 = vmin.f32 %v1676_v7, %v1677_v13 }
 0x20a   : > { %v1526_v18 = vmax.f32 %v1524_v10, %v1525_v14  ;;  %v1691_v19 = vmin.f32 %v1689_v11, %v1690_v15 }
 0x20b   : > { %v1514_v20 = vrot.slane %v1513_v16, 2  ;;  %v1679_v21 = vrot.slane %v1678_v17, 2 }
 0x20c   : > { %v1527_v22 = vrot.slane %v1526_v18, 2  ;;  %v1692_v23 = vrot.slane %v1691_v19, 2 }
 0x20d   : > { %v1515_v24 = vmax.f32 %v1513_v16, %v1514_v20  ;;  %v1680_v25 = vmin.f32 %v1678_v17, %v1679_v21 }
 0x20e   : > { %v1528_v26 = vmax.f32 %v1526_v18, %v1527_v22  ;;  %v1693_v27 = vmin.f32 %v1691_v19, %v1692_v23 }
 0x20f   : > { %v1516_v28 = vrot.slane %v1515_v24, 1  ;;  %v1681_v29 = vrot.slane %v1680_v25, 1 }
 0x210   : > { %v1529_v30 = vrot.slane %v1528_v26, 1  ;;  %v1694_v46 = vrot.slane %v1693_v27, 1 }
 0x211   : > { %v2552_v47 = vmax.f32 %v1515_v24, %v1516_v28  ;;  %v2554_v9 = vmin.f32 %v1680_v25, %v1681_v29 }
 0x212   : > { %v2556_v33 = vmax.f32 %v1528_v26, %v1529_v30  ;;  %v2558_v34 = vmin.f32 %v1693_v27, %v1694_v46 }
 0x214   : > { %v1567_v36 = vcombine.low %v2552_v47, %v2556_v33  ;;  %v1732_v37 = vcombine.low %v2554_v9, %v2558_v34 }
 0x234   : > { %v2085_v39 = vpop.f32.mrb[0].mxu1 }
 0x235   : > { %v681_v35 = vpop.f32.mrb[1].mxu1  ;;  %762 = vst [vmem:[%s2568_s19 + $0x10] sm:$0xff] %v2085_v39 }
 0x236   : > { %v2086_v40 = vpop.f32.mrb[2].mxu1  ;;  %760 = vst [vmem:[%s2568_s19] sm:$0xff] %v681_v35 }
 0x237   : > { %v684_v41 = vpop.f32.mrb[3].mxu1  ;;  %763 = vst [vmem:[%s2568_s19 + $0x18] sm:$0xff] %v2086_v40 }
 0x238   : > { %761 = vst [vmem:[%s2568_s19 + $0x8] sm:$0xff] %v684_v41 }
 0x23c   : > { %v2089_v42 = vpop.f32.mrb[4].mxu1 }
 0x23d   : > { %v697_v43 = vpop.f32.mrb[5].mxu1  ;;  %766 = vst [vmem:[%s2568_s19 + $0x30] sm:$0xff] %v2089_v42 }
 0x23e   : > { %v2090_v45 = vpop.f32.mrb[6].mxu1  ;;  %764 = vst [vmem:[%s2568_s19 + $0x20] sm:$0xff] %v697_v43 }
 0x23f   : > { %v700_v49 = vpop.f32.mrb[7].mxu1  ;;  %767 = vst [vmem:[%s2568_s19 + $0x38] sm:$0xff] %v2090_v45 }
 0x240   : > { %765 = vst [vmem:[%s2568_s19 + $0x28] sm:$0xff] %v700_v49 }
 0x244   : > { %v2093_v50 = vpop.f32.mrb[8].mxu1 }
 0x245   : > { %v713_v51 = vpop.f32.mrb[9].mxu1  ;;  %770 = vst [vmem:[%s2568_s19 + $0x50] sm:$0xff] %v2093_v50 }
 0x246   : > { %v2094_v52 = vpop.f32.mrb[10].mxu1  ;;  %768 = vst [vmem:[%s2568_s19 + $0x40] sm:$0xff] %v713_v51 }
 0x247   : > { %v716_v53 = vpop.f32.mrb[11].mxu1  ;;  %771 = vst [vmem:[%s2568_s19 + $0x58] sm:$0xff] %v2094_v52  ;;  %v2162_v52 = vmov 1966171168  }
 0x248   : > { %769 = vst [vmem:[%s2568_s19 + $0x48] sm:$0xff] %v716_v53  ;;  %v1570_v53 = vunpack.c.l.s4 %v2162_v52 }
 0x24c   : > { %v2097_v54 = vpop.f32.mrb[12].mxu1 }
 0x24d   : > { %v729_v55 = vpop.f32.mrb[13].mxu1  ;;  %774 = vst [vmem:[%s2568_s19 + $0x70] sm:$0xff] %v2097_v54  ;;  %v1572_v54 = vlaneseq }
 0x24e   : > { %v2098_v56 = vpop.f32.mrb[14].mxu1  ;;  %772 = vst [vmem:[%s2568_s19 + $0x60] sm:$0xff] %v729_v55 }
 0x24f   : > { %v732_v57 = vpop.f32.mrb[15].mxu1  ;;  %775 = vst [vmem:[%s2568_s19 + $0x78] sm:$0xff] %v2098_v56 }
 0x250   : > { %773 = vst [vmem:[%s2568_s19 + $0x68] sm:$0xff] %v732_v57 }
 0x254   : > { %v1267_v58 = vpop.f32.mrb[16].mxu1 }
 0x255   : > { %v1269_v59 = vpop.f32.mrb[17].mxu1 }
 0x256   : > { %v1271_v60 = vpop.f32.mrb[18].mxu1 }
 0x257   : > { %v1479_v61 = vmax.f32 %v1267_v58, %v1271_v60  ;;  %v1644_v62 = vmin.f32 %v1267_v58, %v1271_v60  ;;  %v1273_v63 = vpop.f32.mrb[19].mxu1 }
 0x258   : > { %v1492_v0 = vmax.f32 %v1269_v59, %v1273_v63  ;;  %v1657_v1 = vmin.f32 %v1269_v59, %v1273_v63 }
 0x25c   : > { %v1277_v2 = vpop.f32.mrb[20].mxu1 }
 0x25d   : > { %v1480_v3 = vmax.f32 %v1479_v61, %v1277_v2  ;;  %v1645_v4 = vmin.f32 %v1644_v62, %v1277_v2  ;;  %v1279_v5 = vpop.f32.mrb[21].mxu1  ;;  %v1573_v2 = vshrl.u32 %v1572_v54, 7 }
 0x25e   : > { %v1493_v7 = vmax.f32 %v1492_v0, %v1279_v5  ;;  %v1658_v8 = vmin.f32 %v1657_v1, %v1279_v5  ;;  %v1281_v10 = vpop.f32.mrb[22].mxu1  ;;  %v1571_v1 = vunpack.c.0.s8 %v1570_v53 }
 0x25f   : > { %v1481_v11 = vmax.f32 %v1480_v3, %v1281_v10  ;;  %v1646_v12 = vmin.f32 %v1645_v4, %v1281_v10  ;;  %v1283_v13 = vpop.f32.mrb[23].mxu1 }
 0x260   : > { %v1494_v14 = vmax.f32 %v1493_v7, %v1283_v13  ;;  %v1659_v15 = vmin.f32 %v1658_v8, %v1283_v13 }
 0x264   : > { %v1287_v16 = vpop.f32.mrb[24].mxu1 }
 0x265   : > { %v1482_v17 = vmax.f32 %v1481_v11, %v1287_v16  ;;  %v1647_v18 = vmin.f32 %v1646_v12, %v1287_v16  ;;  %v1289_v19 = vpop.f32.mrb[25].mxu1 }
 0x266   : > { %v1495_v20 = vmax.f32 %v1494_v14, %v1289_v19  ;;  %v1660_v21 = vmin.f32 %v1659_v15, %v1289_v19  ;;  %v1291_v22 = vpop.f32.mrb[26].mxu1 }
 0x267   : > { %v1483_v23 = vmax.f32 %v1482_v17, %v1291_v22  ;;  %v1648_v24 = vmin.f32 %v1647_v18, %v1291_v22  ;;  %v1293_v25 = vpop.f32.mrb[27].mxu1 }
 0x268   : > { %v1496_v26 = vmax.f32 %v1495_v20, %v1293_v25  ;;  %v1661_v27 = vmin.f32 %v1660_v21, %v1293_v25  ;;  %v2586_v21 = vsub.s32 %v1571_v1, %v1573_v2 }
 0x26c   : > { %v1297_v28 = vpop.f32.mrb[28].mxu1 }
 0x26d   : > { %v1484_v29 = vmax.f32 %v1483_v23, %v1297_v28  ;;  %v1649_v30 = vmin.f32 %v1648_v24, %v1297_v28  ;;  %v1299_v46 = vpop.f32.mrb[29].mxu1 }
 0x26e   : > { %v1497_v39 = vmax.f32 %v1496_v26, %v1299_v46  ;;  %v1662_v35 = vmin.f32 %v1661_v27, %v1299_v46  ;;  %v1301_v40 = vpop.f32.mrb[30].mxu1 }
 0x26f   : > { %v1485_v41 = vmax.f32 %v1484_v29, %v1301_v40  ;;  %v1650_v42 = vmin.f32 %v1649_v30, %v1301_v40  ;;  %v1303_v43 = vpop.f32.mrb[31].mxu1 }
 0x270   : > { %v1498_v45 = vmax.f32 %v1497_v39, %v1303_v43  ;;  %v1663_v49 = vmin.f32 %v1662_v35, %v1303_v43 }
 0x271   : > { %v1486_v50 = vrot.slane %v1485_v41, 4  ;;  %v1651_v51 = vrot.slane %v1650_v42, 4 }
 0x272   : > { %v1499_v55 = vrot.slane %v1498_v45, 4  ;;  %v1664_v56 = vrot.slane %v1663_v49, 4 }
 0x273   : > { %v1487_v57 = vmax.f32 %v1485_v41, %v1486_v50  ;;  %v1652_v58 = vmin.f32 %v1650_v42, %v1651_v51  ;;  %v2592_v41 = vrot.slane %v1565_v38, %v2586_v21  ;;  %v2598_v42 = vrot.slane %v1730_v44, %v2586_v21 }
 0x274   : > { %v1500_v59 = vmax.f32 %v1498_v45, %v1499_v55  ;;  %v1665_v60 = vmin.f32 %v1663_v49, %v1664_v56  ;;  %v1413_v61 = vpop.f32.mrb[32].mxu1 }
 0x275   : > { %v1488_v62 = vrot.slane %v1487_v57, 2  ;;  %v1653_v63 = vrot.slane %v1652_v58, 2  ;;  %v1415_v0 = vpop.f32.mrb[33].mxu1 }
 0x276   : > { %v1501_v3 = vrot.slane %v1500_v59, 2  ;;  %v1666_v4 = vrot.slane %v1665_v60, 2  ;;  %v1417_v5 = vpop.f32.mrb[34].mxu1 }
 0x277   : > { %v1489_v7 = vmax.f32 %v1487_v57, %v1488_v62  ;;  %v1654_v8 = vmin.f32 %v1652_v58, %v1653_v63  ;;  %v1531_v10 = vmax.f32 %v1413_v61, %v1417_v5  ;;  %v1696_v11 = vmin.f32 %v1413_v61, %v1417_v5  ;;  %v1419_v12 = vpop.f32.mrb[35].mxu1 }
 0x278   : > { %v1502_v13 = vmax.f32 %v1500_v59, %v1501_v3  ;;  %v1667_v14 = vmin.f32 %v1665_v60, %v1666_v4  ;;  %v1544_v15 = vmax.f32 %v1415_v0, %v1419_v12  ;;  %v1709_v16 = vmin.f32 %v1415_v0, %v1419_v12 }
 0x279   : > { %v1490_v17 = vrot.slane %v1489_v7, 1  ;;  %v1655_v18 = vrot.slane %v1654_v8, 1 }
 0x27a   : > { %v1503_v19 = vrot.slane %v1502_v13, 1  ;;  %v1668_v20 = vrot.slane %v1667_v14, 1 }
 0x27b   : > { %v1491_v22 = vmax.f32 %v1489_v7, %v1490_v17  ;;  %v1656_v23 = vmin.f32 %v1654_v8, %v1655_v18 }
 0x27c   : > { %v1504_v24 = vmax.f32 %v1502_v13, %v1503_v19  ;;  %v1669_v25 = vmin.f32 %v1667_v14, %v1668_v20  ;;  %v1423_v26 = vpop.f32.mrb[36].mxu1 }
 0x27d   : > { %v1532_v27 = vmax.f32 %v1531_v10, %v1423_v26  ;;  %v1697_v28 = vmin.f32 %v1696_v11, %v1423_v26  ;;  %v1425_v29 = vpop.f32.mrb[37].mxu1 }
 0x27e   : > { %v1566_v30 = vcombine.low %v1491_v22, %v1504_v24  ;;  %v1731_v46 = vcombine.low %v1656_v23, %v1669_v25  ;;  %v1545_v39 = vmax.f32 %v1544_v15, %v1425_v29  ;;  %v1710_v35 = vmin.f32 %v1709_v16, %v1425_v29  ;;  %v1427_v40 = vpop.f32.mrb[38].mxu1 }
 0x27f   : > { %v1533_v43 = vmax.f32 %v1532_v27, %v1427_v40  ;;  %v1698_v45 = vmin.f32 %v1697_v28, %v1427_v40  ;;  %v1429_v49 = vpop.f32.mrb[39].mxu1 }
 0x280   : > { %v2601_v50 = vrot.slane %v1566_v30, %v2586_v21  ;;  %v2604_v51 = vrot.slane %v1731_v46, %v2586_v21  ;;  %v1546_v52 = vmax.f32 %v1545_v39, %v1429_v49  ;;  %v1711_v53 = vmin.f32 %v1710_v35, %v1429_v49 }
 0x281   : > { %v1589_v49 = vrot.slane %v1567_v36, %v2586_v21 }
 0x282   : > { %v1597_v48 = vcombine.low %v2592_v41, %v2601_v50  ;;  %v1762_v32 = vcombine.low %v2598_v42, %v2604_v51  ;;  %v1754_v50 = vrot.slane %v1732_v37, %v2586_v21 }
 0x284   : > { %v1433_v31 = vpop.f32.mrb[40].mxu1 }
 0x285   : > { %v1534_v6 = vmax.f32 %v1533_v43, %v1433_v31  ;;  %v1699_v38 = vmin.f32 %v1698_v45, %v1433_v31  ;;  %v1435_v44 = vpop.f32.mrb[41].mxu1 }
 0x286   : > { %v1547_v54 = vmax.f32 %v1546_v52, %v1435_v44  ;;  %v1712_v55 = vmin.f32 %v1711_v53, %v1435_v44  ;;  %v1437_v56 = vpop.f32.mrb[42].mxu1 }
 0x287   : > { %v1535_v57 = vmax.f32 %v1534_v6, %v1437_v56  ;;  %v1700_v58 = vmin.f32 %v1699_v38, %v1437_v56  ;;  %v1439_v59 = vpop.f32.mrb[43].mxu1  ;;  %v1605_v6 = vrot.slane %v1597_v48, %v2586_v21  ;;  %v1770_v38 = vrot.slane %v1762_v32, %v2586_v21 }
 0x288   : > { %v1548_v60 = vmax.f32 %v1547_v54, %v1439_v59  ;;  %v1713_v61 = vmin.f32 %v1712_v55, %v1439_v59 }
 0x28c   : > { %v1443_v62 = vpop.f32.mrb[44].mxu1 }
 0x28d   : > { %v1536_v63 = vmax.f32 %v1535_v57, %v1443_v62  ;;  %v1701_v0 = vmin.f32 %v1700_v58, %v1443_v62  ;;  %v1445_v1 = vpop.f32.mrb[45].mxu1 }
 0x28e   : > { %v1549_v2 = vmax.f32 %v1548_v60, %v1445_v1  ;;  %v1714_v3 = vmin.f32 %v1713_v61, %v1445_v1  ;;  %v1447_v4 = vpop.f32.mrb[46].mxu1 }
 0x28f   : > { %v1537_v5 = vmax.f32 %v1536_v63, %v1447_v4  ;;  %v1702_v7 = vmin.f32 %v1701_v0, %v1447_v4  ;;  %v1449_v8 = vpop.f32.mrb[47].mxu1 }
 0x290   : > { %v1550_v10 = vmax.f32 %v1549_v2, %v1449_v8  ;;  %v1715_v11 = vmin.f32 %v1714_v3, %v1449_v8 }
 0x291   : > { %v1538_v12 = vrot.slane %v1537_v5, 4  ;;  %v1703_v13 = vrot.slane %v1702_v7, 4 }
 0x292   : > { %v1551_v14 = vrot.slane %v1550_v10, 4  ;;  %v1716_v15 = vrot.slane %v1715_v11, 4 }
 0x293   : > { %v1539_v16 = vmax.f32 %v1537_v5, %v1538_v12  ;;  %v1704_v17 = vmin.f32 %v1702_v7, %v1703_v13 }
 0x294   : > { %v1552_v18 = vmax.f32 %v1550_v10, %v1551_v14  ;;  %v1717_v19 = vmin.f32 %v1715_v11, %v1716_v15 }
 0x295   : > { %v1540_v20 = vrot.slane %v1539_v16, 2  ;;  %v1705_v22 = vrot.slane %v1704_v17, 2 }
 0x296   : > { %v1553_v23 = vrot.slane %v1552_v18, 2  ;;  %v1718_v24 = vrot.slane %v1717_v19, 2 }
 0x297   : > { %v1541_v25 = vmax.f32 %v1539_v16, %v1540_v20  ;;  %v1706_v26 = vmin.f32 %v1704_v17, %v1705_v22 }
 0x298   : > { %v1554_v27 = vmax.f32 %v1552_v18, %v1553_v23  ;;  %v1719_v28 = vmin.f32 %v1717_v19, %v1718_v24 }
 0x299   : > { %v1542_v29 = vrot.slane %v1541_v25, 1  ;;  %v1707_v30 = vrot.slane %v1706_v26, 1 }
 0x29a   : > { %v1555_v46 = vrot.slane %v1554_v27, 1  ;;  %v1720_v39 = vrot.slane %v1719_v28, 1 }
 0x29b   : > { %v1543_v35 = vmax.f32 %v1541_v25, %v1542_v29  ;;  %v1708_v40 = vmin.f32 %v1706_v26, %v1707_v30 }
 0x29c   : > { %v1556_v41 = vmax.f32 %v1554_v27, %v1555_v46  ;;  %v1721_v42 = vmin.f32 %v1719_v28, %v1720_v39 }
 0x29e   : > { %v1568_v43 = vcombine.low %v1543_v35, %v1556_v41  ;;  %v1733_v45 = vcombine.low %v1708_v40, %v1721_v42 }
 0x2a0   : > { %v1596_v51 = vrot.slane %v1568_v43, %v2586_v21  ;;  %v1761_v52 = vrot.slane %v1733_v45, %v2586_v21 }
 0x2a2   : > { %v1598_v53 = vcombine.low %v1589_v49, %v1596_v51  ;;  %v1763_v31 = vcombine.low %v1754_v50, %v1761_v52 }
 0x2a4   : > { %v1612_v44 = vrot.slane %v1598_v53, %v2586_v21  ;;  %v1777_v47 = vrot.slane %v1763_v31, %v2586_v21 }
 0x2a6   : > { %v1613_v33 = vcombine.low %v1605_v6, %v1612_v44  ;;  %v1778_v36 = vcombine.low %v1770_v38, %v1777_v47 }
 0x2a8   : > { %1616 = vst [vmem:[%s358_s24] sm:$0xff] %v1613_v33  ;;  %1781 = vst [vmem:[%s362_s9] sm:$0xff] %v1778_v36 }
 0x2a9 PF: > { %s19_s29 = sadd.s32 1, %s2158_s29   ;;  %s2649_s27 = smov %s2154_s28 }
 0x2aa   : > { %p16_p5 = scmp.ge.s32.totalorder %s19_s29, 4   ;;  %s2650_s28 = smov %s2652_s30 }
 0x2ac   :  { %18 = sbr.rel (!%p16_p5) target bundleno = 2 (0x2), region = 110 }

// kernel: pointnetfeat_forward.13
= control target key start
LH: loop header
LB: loop body
LE: loop exit
PB: predicated region body
PF: predicated region fallthrough
CT: control target
= control target key end

     0   :  { %s1032_s21 = smov 0   ;;  %s1034_s22 = smov 0   ;;  %s1169_s0 = inlined_call_operand.vmem [shape: bf16[2,64,3], index: 0, kind: input, shape index: {}]   ;;  %s1170_s1 = inlined_call_operand.vmem [shape: bf16[2,3,64], index: 1, kind: input, shape index: {}]   ;;  %s1171_s2 = inlined_call_operand.vmem [shape: f32[1,64], index: 2, kind: input, shape index: {}]   ;;  %s1172_s3 = inlined_call_operand.vmem [shape: f32[1,64], index: 3, kind: input, shape index: {}]   ;;  %s1173_s4 = inlined_call_operand.vmem [shape: bf16[2,64,64], index: 4, kind: output, shape index: {0}]   ;;  %s1174_s5 = inlined_call_operand.vmem [shape: f32[2,1,64], index: 5, kind: output, shape index: {1}]   ;;  %s1175_s6 = inlined_call_operand.vmem [shape: f32[2,64,64], index: 6, kind: output, shape index: {2}]  }
   0x1   :  { %s1036_s23 = smov 0  }
   0x2 LB: > { %s29_s24 = sadd.s32 1, %s989_s22  ;;  %p850_p0 = scmp.ge.s32.totalorder %s993_s23, 1  ;;  %s993_s23 = sphi %s1036_s23, %s17_s23   ;;  %s989_s22 = sphi %s1034_s22, %s1177_s22   ;;  %s985_s21 = sphi %s1032_s21, %s1176_s21  }
   0x3   : > { %p31_p1 = scmp.ge.s32.totalorder %s29_s24, 2  ;;  %p247_p2 = scmp.lt.s32.totalorder %s993_s23, 3 }
   0x5   : > { %s1179_s24 = smov (%p31_p1, %s29_s24), 0  ;;  %p248_p3 = pnand %p850_p0, %p247_p2 }
   0x6   : > { %p298_p4 = scmp.lt.s32.totalorder (!%p248_p3), %s985_s21, 1  ;;  %vm372_vm0 = vcmask (!%p248_p3), 1040384   ;;  %vm373_vm1 = vcmask (!%p248_p3), 1041408   ;;  %v995_v0 = vmov (!%p248_p3), 65535   ;;  %vm527_vm2 = vcmask (!%p248_p3), 516096  }
   0x7   : > { %251 = sbr.rel (%p248_p3) target bundleno = 580 (0x244), region = 36  ;;  %v374_v1 = vsel (!%p248_p3), %vm372_vm0, 4294967295, %v995_v0  ;;  %v996_v5 = vmov (!%p248_p3), 0.0   ;;  %vm359_vm3 = vcmask (!%p248_p3), 23552   ;;  %vm529_vm4 = vcmask (!%p248_p3), 523264  }
   0x8   : > { %v375_v2 = vsel (!%p248_p3), %vm373_vm1, %v374_v1, 0  ;;  %v866_v10 = vld [vmem:[%s1171_s2] ss:$0 sm:$0xff] (!%p248_p3)  ;;  %vm514_vm5 = vcmask (!%p248_p3), 519168  }
   0x9   : > { %v867_v12 = vld [vmem:[%s1172_s3] ss:$0 sm:$0xff] (!%p248_p3) }
   0xe   : > { %s1181_s21 = smov (!%p298_p4, %s985_s21), 1 }
   0xf   : > { %s882_s25 = sshll.u32 %s1181_s21, 5  ;;  %s853_s26 = sshll.u32 %s1181_s21, 1 }
  0x10   : > { %s310_s29 = scalar_lea.vmem %s1170_s1, %s853_s26  ;;  %s1061_s8 = scalar_lea.vmem %s1174_s5, %s1181_s21 }
  0x11   : > { %v338_v3 = vld [vmem:[%s310_s29] sm:$0x3]  ;;  %528 = vst.msk [vmem:[%s1061_s8] sm:$0x1] %vm527_vm2, %v996_v5  ;;  %s305_s11 = scalar_lea.vmem %s1169_s0, %s882_s25  ;;  %s884_s12 = sshll.u32 %s1181_s21, 6 }
  0x12   : > { %v377_v4 = vand.u32 %v375_v2, %v338_v3  ;;  %v967_v6 = vld [vmem:[%s305_s11] sm:$0xff]   ;;  %v968_v7 = vld [vmem:[%s305_s11 + $0x8] sm:$0xff]   ;;  %v969_v8 = vld [vmem:[%s305_s11 + $0x10] sm:$0xff]   ;;  %s1074_s15 = scalar_lea.vmem %s1175_s6, %s884_s12  ;;  %s1103_s27 = scalar_lea.vmem %s1173_s4, %s882_s25 }
  0x13   : > { %908 = vmatprep.mubr.msk.bf16.mxu0 %vm359_vm3, %v967_v6  ;;  %v970_v9 = vld [vmem:[%s305_s11 + $0x18] sm:$0xff]   ;;  %530 = vst.msk [vmem:[%s1074_s15] sm:$0xff] %vm529_vm4, %v996_v5  ;;  %531 = vst.msk [vmem:[%s1074_s15 + $0x8] sm:$0xff] %vm529_vm4, %v996_v5 }
  0x14   : > { %906 = vmatprep.subr.bf16.mxu0 %v377_v4  ;;  %532 = vst.msk [vmem:[%s1074_s15 + $0x10] sm:$0xff] %vm529_vm4, %v996_v5  ;;  %533 = vst.msk [vmem:[%s1074_s15 + $0x18] sm:$0xff] %vm529_vm4, %v996_v5 }
  0x15   : > { %907 = vmatpush3.bf16.msra.mxu0 %v377_v4  ;;  %534 = vst.msk [vmem:[%s1074_s15 + $0x20] sm:$0xff] %vm529_vm4, %v996_v5  ;;  %535 = vst.msk [vmem:[%s1074_s15 + $0x28] sm:$0xff] %vm529_vm4, %v996_v5 }
  0x16   : > { %536 = vst.msk [vmem:[%s1074_s15 + $0x30] sm:$0xff] %vm529_vm4, %v996_v5  ;;  %537 = vst.msk [vmem:[%s1074_s15 + $0x38] sm:$0xff] %vm529_vm4, %v996_v5 }
  0x18   : > { %909 = vmatmul.mubr.msk.bf16.vlgmr.msra.gmra.mrb[0].mxu0 %vm359_vm3, %v968_v7 }
  0x19   : > { %912 = vmatprep.mubr.msk.bf16.mxu0 %vm359_vm3, %v969_v8 }
  0x20   : > { %913 = vmatmul.mubr.msk.bf16.gmra.mrb[4].mxu0 %vm359_vm3, %v970_v9 }
  0xeb   : > { %v910_v11 = vpop.f32.mrb[0].mxu0 }
  0xec   : > { %v453_v13 = vmul.f32 %v910_v11, %v866_v10  ;;  %v413_v14 = vpop.f32.mrb[1].mxu0 }
  0xed   : > { %v451_v15 = vmul.f32 %v866_v10, %v413_v14  ;;  %v911_v16 = vpop.f32.mrb[2].mxu0 }
  0xee   : > { %v468_v17 = vadd.f32 %v867_v12, %v453_v13  ;;  %v454_v18 = vmul.f32 %v911_v16, %v866_v10  ;;  %v416_v19 = vpop.f32.mrb[3].mxu0 }
  0xef   : > { %v466_v20 = vadd.f32 %v867_v12, %v451_v15  ;;  %v452_v21 = vmul.f32 %v866_v10, %v416_v19 }
  0xf0   : > { %v476_v22 = vmax.f32 %v468_v17, 0.0  ;;  %v469_v23 = vadd.f32 %v867_v12, %v454_v18 }
  0xf1   : > { %v474_v24 = vmax.f32 %v466_v20, 0.0  ;;  %v467_v25 = vadd.f32 %v867_v12, %v452_v21  ;;  %v538_v20 = vld [vmem:[%s1061_s8] sm:$0x1] }
  0xf2   : > { %v887_v26 = vpack.c.bf16 %v476_v22, %v476_v22  ;;  %v477_v27 = vmax.f32 %v469_v23, 0.0 }
  0xf3   : > { %v885_v28 = vpack.c.bf16 %v474_v24, %v474_v24  ;;  %v475_v29 = vmax.f32 %v467_v25, 0.0  ;;  %v914_v30 = vpop.f32.mrb[4].mxu0 }
  0xf4   : > { %517 = vst.msk [vmem:[%s1103_s27 + $0x8] sm:$0xf] %vm514_vm5, %v887_v26  ;;  %v483_v31 = vpack.c.bf16 %v477_v27, %v476_v22  ;;  %v888_v32 = vpack.c.bf16 %v477_v27, %v477_v27  ;;  %v457_v33 = vmul.f32 %v914_v30, %v866_v10  ;;  %v429_v34 = vpop.f32.mrb[5].mxu0  ;;  %v574_v27 = vld [vmem:[%s1074_s15 + $0x10] sm:$0xff]  ;;  %v575_v30 = vld [vmem:[%s1074_s15 + $0x18] sm:$0xff] }
  0xf5   : > { %515 = vst.msk [vmem:[%s1103_s27] sm:$0xf] %vm514_vm5, %v885_v28  ;;  %v482_v35 = vpack.c.bf16 %v475_v29, %v474_v24  ;;  %v886_v36 = vpack.c.bf16 %v475_v29, %v475_v29  ;;  %v455_v37 = vmul.f32 %v866_v10, %v429_v34  ;;  %v915_v38 = vpop.f32.mrb[6].mxu0  ;;  %v572_v28 = vld [vmem:[%s1074_s15] sm:$0xff] }
  0xf6   : > { %518 = vst.msk [vmem:[%s1103_s27 + $0xc] sm:$0xf] %vm514_vm5, %v888_v32  ;;  %v541_v39 = vunpack.c.l.bf16 %v483_v31  ;;  %v472_v40 = vadd.f32 %v867_v12, %v457_v33  ;;  %v458_v41 = vmul.f32 %v915_v38, %v866_v10  ;;  %v432_v42 = vpop.f32.mrb[7].mxu0  ;;  %v542_v47 = vunpack.c.h.bf16 %v483_v31  ;;  %v573_v33 = vld [vmem:[%s1074_s15 + $0x8] sm:$0xff] }
  0xf7   : > { %516 = vst.msk [vmem:[%s1103_s27 + $0x4] sm:$0xf] %vm514_vm5, %v886_v36  ;;  %v539_v43 = vunpack.c.l.bf16 %v482_v35  ;;  %v540_v44 = vunpack.c.h.bf16 %v482_v35  ;;  %v470_v45 = vadd.f32 %v867_v12, %v455_v37  ;;  %v456_v46 = vmul.f32 %v866_v10, %v432_v42  ;;  %580 = vxpose.xlu0.c.b16.start [1/4] (short) (narrow) %v482_v35, 64  ;;  %916 = vmatprep.subr.bf16.mxu0 %v482_v35  ;;  %v579_v42 = vld [vmem:[%s1074_s15 + $0x38] sm:$0xff] }
  0xf8   : > { %v480_v48 = vmax.f32 %v472_v40, 0.0  ;;  %v473_v49 = vadd.f32 %v867_v12, %v458_v41  ;;  %932 = vmatprep.subr.bf16.mxu1 %v482_v35  ;;  %917 = vmatpush3.bf16.msra.mxu0 %v482_v35  ;;  %v551_v57 = vsel %vm529_vm4, %v541_v39, 0.0  ;;  %v553_v63 = vsel %vm529_vm4, %v542_v47, 0.0  ;;  %v578_v39 = vld [vmem:[%s1074_s15 + $0x30] sm:$0xff]  ;;  %v576_v40 = vld [vmem:[%s1074_s15 + $0x20] sm:$0xff] }
  0xf9   : > { %v548_v50 = vsel %vm529_vm4, %v539_v43, 0.0  ;;  %v549_v51 = vsel %vm529_vm4, %v540_v44, 0.0  ;;  %v478_v52 = vmax.f32 %v470_v45, 0.0  ;;  %v471_v53 = vadd.f32 %v867_v12, %v456_v46  ;;  %936 = vmatpush3.bf16.msra.mxu1 %v482_v35  ;;  %918 = vmatprep.subr.bf16.mxu0 %v483_v31  ;;  %v577_v45 = vld [vmem:[%s1074_s15 + $0x28] sm:$0xff] }
  0xfa   : > { %v550_v54 = vadd.f32 %v549_v51, %v548_v50  ;;  %v891_v55 = vpack.c.bf16 %v480_v48, %v480_v48  ;;  %v481_v56 = vmax.f32 %v473_v49, 0.0  ;;  %933 = vmatprep.subr.bf16.mxu1 %v483_v31 }
  0xfb   : > { %v889_v58 = vpack.c.bf16 %v478_v52, %v478_v52  ;;  %v479_v59 = vmax.f32 %v471_v53, 0.0  ;;  %581 = vxpose.xlu0.c.b16.cont [2/4] (short) (narrow) %v483_v31, 64 }
  0xfc   : > { %v552_v60 = vadd.f32 %v551_v57, %v550_v54  ;;  %521 = vst.msk [vmem:[%s1103_s27 + $0x18] sm:$0xf] %vm514_vm5, %v891_v55  ;;  %v485_v61 = vpack.c.bf16 %v481_v56, %v480_v48  ;;  %v892_v62 = vpack.c.bf16 %v481_v56, %v481_v56  ;;  %919 = vmatpush3.bf16.msra.mxu0 %v483_v31 }
  0xfd   : > { %519 = vst.msk [vmem:[%s1103_s27 + $0x10] sm:$0xf] %vm514_vm5, %v889_v58  ;;  %v484_v0 = vpack.c.bf16 %v479_v59, %v478_v52  ;;  %v890_v1 = vpack.c.bf16 %v479_v59, %v479_v59  ;;  %937 = vmatpush3.bf16.msra.mxu1 %v483_v31 }
  0xfe   : > { %522 = vst.msk [vmem:[%s1103_s27 + $0x1c] sm:$0xf] %vm514_vm5, %v892_v62  ;;  %v554_v2 = vadd.f32 %v553_v63, %v552_v60  ;;  %v545_v5 = vunpack.c.l.bf16 %v485_v61  ;;  %v546_v8 = vunpack.c.h.bf16 %v485_v61 }
  0xff   : > { %520 = vst.msk [vmem:[%s1103_s27 + $0x14] sm:$0xf] %vm514_vm5, %v890_v1  ;;  %v543_v3 = vunpack.c.l.bf16 %v484_v0  ;;  %v544_v4 = vunpack.c.h.bf16 %v484_v0  ;;  %582 = vxpose.xlu0.c.b16.cont [3/4] (short) (narrow) %v484_v0, 64  ;;  %920 = vmatprep.subr.bf16.mxu0 %v484_v0 }
 0x100   : > { %934 = vmatprep.subr.bf16.mxu1 %v484_v0  ;;  %921 = vmatpush3.bf16.msra.mxu0 %v484_v0  ;;  %v559_v11 = vsel %vm529_vm4, %v545_v5, 0.0  ;;  %v561_v13 = vsel %vm529_vm4, %v546_v8, 0.0 }
 0x101   : > { %v555_v6 = vsel %vm529_vm4, %v543_v3, 0.0  ;;  %938 = vmatpush3.bf16.msra.mxu1 %v484_v0  ;;  %922 = vmatprep.subr.bf16.mxu0 %v485_v61  ;;  %v557_v9 = vsel %vm529_vm4, %v544_v4, 0.0 }
 0x102   : > { %v556_v7 = vadd.f32 %v555_v6, %v554_v2  ;;  %935 = vmatprep.subr.bf16.mxu1 %v485_v61 }
 0x103   : > { %583 = vxpose.xlu0.c.b16.end [4/4] (short) (narrow) %v485_v61, 64 }
 0x104   : > { %v558_v10 = vadd.f32 %v557_v9, %v556_v7  ;;  %923 = vmatpush3.bf16.msra.mxu0 %v485_v61 }
 0x105   : > { %939 = vmatpush3.bf16.msra.mxu1 %v485_v61 }
 0x106   : > { %v560_v12 = vadd.f32 %v559_v11, %v558_v10 }
 0x108   : > { %v562_v14 = vadd.f32 %v561_v13, %v560_v12 }
 0x10a   : > { %v563_v15 = vrot.slane %v562_v14, 4 }
 0x10c   : > { %v564_v16 = vadd.f32 %v563_v15, %v562_v14 }
 0x10e   : > { %v565_v17 = vrot.slane %v564_v16, 2 }
 0x110   : > { %v566_v18 = vadd.f32 %v565_v17, %v564_v16 }
 0x112   : > { %v567_v19 = vrot.slane %v566_v18, 1 }
 0x114   : > { %v568_v21 = vadd.f32 %v567_v19, %v566_v18 }
 0x116   : > { %v569_v22 = vadd.f32 %v568_v21, %v538_v20 }
 0x118   : > { %571 = vst.msk [vmem:[%s1061_s8] sm:$0x1] %vm527_vm2, %v569_v22 }
 0x15d   : > { %v588_v23 = vpop.trf.xlu0 }
 0x15e   : > { %924 = vmatprep.mubr.msk.bf16.mxu0 %vm529_vm4, %v588_v23 }
 0x161   : > { %v589_v24 = vpop.trf.xlu0 }
 0x162   : > { %925 = vmatmul.mubr.msk.bf16.vlgmr.msra.gmra.mrb[8].mxu0 %vm529_vm4, %v589_v24 }
 0x165   : > { %v590_v25 = vpop.trf.xlu0 }
 0x166   : > { %928 = vmatprep.mubr.msk.bf16.mxu1 %vm529_vm4, %v590_v25 }
 0x169   : > { %v591_v26 = vpop.trf.xlu0 }
 0x16a   : > { %929 = vmatmul.mubr.msk.bf16.vlgmr.msra.gmra.mrb[0].mxu1 %vm529_vm4, %v591_v26 }
 0x235   : > { %v926_v29 = vpop.f32.mrb[8].mxu0 }
 0x236   : > { %v675_v31 = vadd.f32 %v926_v29, %v574_v27  ;;  %v642_v32 = vpop.f32.mrb[9].mxu0 }
 0x237   : > { %v673_v34 = vadd.f32 %v642_v32, %v572_v28  ;;  %v927_v35 = vpop.f32.mrb[10].mxu0 }
 0x238   : > { %683 = vst.msk [vmem:[%s1074_s15 + $0x10] sm:$0xff] %vm529_vm4, %v675_v31  ;;  %v676_v36 = vadd.f32 %v927_v35, %v575_v30  ;;  %v645_v37 = vpop.f32.mrb[11].mxu0 }
 0x239   : > { %681 = vst.msk [vmem:[%s1074_s15] sm:$0xff] %vm529_vm4, %v673_v34  ;;  %v674_v38 = vadd.f32 %v645_v37, %v573_v33 }
 0x23a   : > { %684 = vst.msk [vmem:[%s1074_s15 + $0x18] sm:$0xff] %vm529_vm4, %v676_v36 }
 0x23b   : > { %682 = vst.msk [vmem:[%s1074_s15 + $0x8] sm:$0xff] %vm529_vm4, %v674_v38 }
 0x23d   : > { %v930_v41 = vpop.f32.mrb[0].mxu1 }
 0x23e   : > { %v679_v43 = vadd.f32 %v930_v41, %v578_v39  ;;  %v658_v44 = vpop.f32.mrb[1].mxu1 }
 0x23f   : > { %v677_v46 = vadd.f32 %v658_v44, %v576_v40  ;;  %v931_v47 = vpop.f32.mrb[2].mxu1 }
 0x240   : > { %687 = vst.msk [vmem:[%s1074_s15 + $0x30] sm:$0xff] %vm529_vm4, %v679_v43  ;;  %v680_v48 = vadd.f32 %v931_v47, %v579_v42  ;;  %v661_v49 = vpop.f32.mrb[3].mxu1 }
 0x241   : > { %685 = vst.msk [vmem:[%s1074_s15 + $0x20] sm:$0xff] %vm529_vm4, %v677_v46  ;;  %v678_v50 = vadd.f32 %v661_v49, %v577_v45 }
 0x242   : > { %688 = vst.msk [vmem:[%s1074_s15 + $0x38] sm:$0xff] %vm529_vm4, %v680_v48 }
 0x243   : > { %686 = vst.msk [vmem:[%s1074_s15 + $0x28] sm:$0xff] %vm529_vm4, %v678_v50 }
 0x244 PF: > { %s17_s23 = sadd.s32 1, %s993_s23   ;;  %s1176_s21 = smov %s989_s22 }
 0x245   : > { %p14_p5 = scmp.ge.s32.totalorder %s17_s23, 4   ;;  %s1177_s22 = smov %s1179_s24 }
 0x247   :  { %16 = sbr.rel (!%p14_p5) target bundleno = 2 (0x2), region = 97 }

// kernel: pointnetfeat_forward.14
= control target key start
LH: loop header
LB: loop body
LE: loop exit
PB: predicated region body
PF: predicated region fallthrough
CT: control target
= control target key end

     0   :  { %s1031_s21 = smov 0   ;;  %s1033_s22 = smov 0   ;;  %s1180_s0 = inlined_call_operand.vmem [shape: bf16[2,64,64], index: 0, kind: input, shape index: {}]   ;;  %s1181_s1 = inlined_call_operand.vmem [shape: bf16[1,64,64], index: 1, kind: input, shape index: {}]   ;;  %s1182_s2 = inlined_call_operand.vmem [shape: f32[1,64], index: 2, kind: input, shape index: {}]   ;;  %s1183_s3 = inlined_call_operand.vmem [shape: f32[1,64], index: 3, kind: input, shape index: {}]   ;;  %s1184_s4 = inlined_call_operand.vmem [shape: bf16[2,64,64], index: 4, kind: output, shape index: {0}]   ;;  %s1185_s5 = inlined_call_operand.vmem [shape: f32[2,1,64], index: 5, kind: output, shape index: {1}]   ;;  %s1186_s6 = inlined_call_operand.vmem [shape: f32[2,64,64], index: 6, kind: output, shape index: {2}]  }
   0x1   :  { %s1035_s23 = smov 0  }
   0x2 LB: > { %s29_s24 = sadd.s32 1, %s989_s22  ;;  %p843_p0 = scmp.ge.s32.totalorder %s993_s23, 1  ;;  %s993_s23 = sphi %s1035_s23, %s17_s23   ;;  %s989_s22 = sphi %s1033_s22, %s1188_s22   ;;  %s985_s21 = sphi %s1031_s21, %s1187_s21  }
   0x3   : > { %p31_p1 = scmp.ge.s32.totalorder %s29_s24, 2  ;;  %p238_p2 = scmp.lt.s32.totalorder %s993_s23, 3 }
   0x5   : > { %s1190_s24 = smov (%p31_p1, %s29_s24), 0  ;;  %p239_p3 = pnand %p843_p0, %p238_p2 }
   0x6   : > { %v963_v0 = vld [vmem:[%s1181_s1] sm:$0xff] (!%p239_p3)   ;;  %p285_p4 = scmp.lt.s32.totalorder (!%p239_p3), %s985_s21, 1  ;;  %v964_v1 = vld [vmem:[%s1181_s1 + $0x8] sm:$0xff] (!%p239_p3)   ;;  %vm534_vm0 = vcmask (!%p239_p3), 516096   ;;  %v965_v2 = vld [vmem:[%s1181_s1 + $0x10] sm:$0xff] (!%p239_p3)   ;;  %vm373_vm1 = vcmask (!%p239_p3), 523264  }
   0x7   : > { %242 = sbr.rel (%p239_p3) target bundleno = 579 (0x243), region = 36  ;;  %905 = vmatprep.subr.bf16.mxu0 (!%p239_p3), %v963_v0  ;;  %v995_v3 = vmov (!%p239_p3), 0.0   ;;  %v966_v5 = vld [vmem:[%s1181_s1 + $0x18] sm:$0xff] (!%p239_p3)   ;;  %v862_v9 = vld [vmem:[%s1182_s2] ss:$0 sm:$0xff] (!%p239_p3)  ;;  %vm521_vm2 = vcmask (!%p239_p3), 519168  }
   0x8   : > { %906 = vmatpush3.bf16.msra.mxu0 (!%p239_p3), %v963_v0  ;;  %v863_v11 = vld [vmem:[%s1183_s3] ss:$0 sm:$0xff] (!%p239_p3) }
   0x9   : > { %907 = vmatprep.subr.bf16.mxu0 (!%p239_p3), %v964_v1 }
   0xc   : > { %908 = vmatpush3.bf16.msra.mxu0 (!%p239_p3), %v964_v1 }
   0xd   : > { %909 = vmatprep.subr.bf16.mxu0 (!%p239_p3), %v965_v2 }
   0xe   : > { %s1192_s21 = smov (!%p285_p4, %s985_s21), 1 }
   0xf   : > { %s878_s7 = sshll.u32 %s1192_s21, 5  ;;  %s1065_s10 = scalar_lea.vmem %s1185_s5, %s1192_s21 }
  0x10   : > { %s292_s13 = scalar_lea.vmem %s1180_s0, %s878_s7  ;;  %535 = vst.msk [vmem:[%s1065_s10] sm:$0x1] %vm534_vm0, %v995_v3  ;;  %s880_s14 = sshll.u32 %s1192_s21, 6  ;;  %910 = vmatpush3.bf16.msra.mxu0 %v965_v2 }
  0x11   : > { %v967_v4 = vld [vmem:[%s292_s13] sm:$0xff]   ;;  %s1078_s17 = scalar_lea.vmem %s1186_s6, %s880_s14  ;;  %911 = vmatprep.subr.bf16.mxu0 %v966_v5  ;;  %v968_v6 = vld [vmem:[%s292_s13 + $0x8] sm:$0xff]   ;;  %v969_v7 = vld [vmem:[%s292_s13 + $0x10] sm:$0xff]   ;;  %s1114_s30 = scalar_lea.vmem %s1184_s4, %s878_s7 }
  0x12   : > { %913 = vmatprep.mubr.msk.bf16.mxu0 %vm373_vm1, %v967_v4  ;;  %536 = vst.msk [vmem:[%s1078_s17] sm:$0xff] %vm373_vm1, %v995_v3  ;;  %537 = vst.msk [vmem:[%s1078_s17 + $0x8] sm:$0xff] %vm373_vm1, %v995_v3  ;;  %v970_v8 = vld [vmem:[%s292_s13 + $0x18] sm:$0xff]  }
  0x13   : > { %538 = vst.msk [vmem:[%s1078_s17 + $0x10] sm:$0xff] %vm373_vm1, %v995_v3  ;;  %539 = vst.msk [vmem:[%s1078_s17 + $0x18] sm:$0xff] %vm373_vm1, %v995_v3 }
  0x14   : > { %540 = vst.msk [vmem:[%s1078_s17 + $0x20] sm:$0xff] %vm373_vm1, %v995_v3  ;;  %541 = vst.msk [vmem:[%s1078_s17 + $0x28] sm:$0xff] %vm373_vm1, %v995_v3  ;;  %912 = vmatpush3.bf16.msra.mxu0 %v966_v5 }
  0x15   : > { %542 = vst.msk [vmem:[%s1078_s17 + $0x30] sm:$0xff] %vm373_vm1, %v995_v3  ;;  %543 = vst.msk [vmem:[%s1078_s17 + $0x38] sm:$0xff] %vm373_vm1, %v995_v3 }
  0x17   : > { %914 = vmatmul.mubr.msk.bf16.vlgmr.msra.gmra.mrb[0].mxu0 %vm373_vm1, %v968_v6 }
  0x18   : > { %917 = vmatprep.mubr.msk.bf16.mxu0 %vm373_vm1, %v969_v7 }
  0x1f   : > { %918 = vmatmul.mubr.msk.bf16.gmra.mrb[4].mxu0 %vm373_vm1, %v970_v8 }
  0xea   : > { %v915_v10 = vpop.f32.mrb[0].mxu0 }
  0xeb   : > { %v460_v12 = vmul.f32 %v915_v10, %v862_v9  ;;  %v420_v13 = vpop.f32.mrb[1].mxu0 }
  0xec   : > { %v458_v14 = vmul.f32 %v862_v9, %v420_v13  ;;  %v916_v15 = vpop.f32.mrb[2].mxu0 }
  0xed   : > { %v475_v16 = vadd.f32 %v863_v11, %v460_v12  ;;  %v461_v17 = vmul.f32 %v916_v15, %v862_v9  ;;  %v423_v18 = vpop.f32.mrb[3].mxu0 }
  0xee   : > { %v473_v19 = vadd.f32 %v863_v11, %v458_v14  ;;  %v459_v20 = vmul.f32 %v862_v9, %v423_v18 }
  0xef   : > { %v483_v21 = vmax.f32 %v475_v16, 0.0  ;;  %v476_v22 = vadd.f32 %v863_v11, %v461_v17 }
  0xf0   : > { %v481_v23 = vmax.f32 %v473_v19, 0.0  ;;  %v474_v24 = vadd.f32 %v863_v11, %v459_v20  ;;  %v544_v19 = vld [vmem:[%s1065_s10] sm:$0x1] }
  0xf1   : > { %v883_v25 = vpack.c.bf16 %v483_v21, %v483_v21  ;;  %v484_v26 = vmax.f32 %v476_v22, 0.0 }
  0xf2   : > { %v881_v27 = vpack.c.bf16 %v481_v23, %v481_v23  ;;  %v482_v28 = vmax.f32 %v474_v24, 0.0  ;;  %v919_v29 = vpop.f32.mrb[4].mxu0 }
  0xf3   : > { %524 = vst.msk [vmem:[%s1114_s30 + $0x8] sm:$0xf] %vm521_vm2, %v883_v25  ;;  %v490_v30 = vpack.c.bf16 %v484_v26, %v483_v21  ;;  %v884_v31 = vpack.c.bf16 %v484_v26, %v484_v26  ;;  %v464_v32 = vmul.f32 %v919_v29, %v862_v9  ;;  %v436_v33 = vpop.f32.mrb[5].mxu0  ;;  %v579_v26 = vld [vmem:[%s1078_s17 + $0x10] sm:$0xff]  ;;  %v580_v29 = vld [vmem:[%s1078_s17 + $0x18] sm:$0xff] }
  0xf4   : > { %522 = vst.msk [vmem:[%s1114_s30] sm:$0xf] %vm521_vm2, %v881_v27  ;;  %v489_v34 = vpack.c.bf16 %v482_v28, %v481_v23  ;;  %v882_v35 = vpack.c.bf16 %v482_v28, %v482_v28  ;;  %v462_v36 = vmul.f32 %v862_v9, %v436_v33  ;;  %v920_v37 = vpop.f32.mrb[6].mxu0  ;;  %v577_v27 = vld [vmem:[%s1078_s17] sm:$0xff] }
  0xf5   : > { %525 = vst.msk [vmem:[%s1114_s30 + $0xc] sm:$0xf] %vm521_vm2, %v884_v31  ;;  %v547_v38 = vunpack.c.l.bf16 %v490_v30  ;;  %v479_v39 = vadd.f32 %v863_v11, %v464_v32  ;;  %v465_v40 = vmul.f32 %v920_v37, %v862_v9  ;;  %v439_v41 = vpop.f32.mrb[7].mxu0  ;;  %v548_v46 = vunpack.c.h.bf16 %v490_v30  ;;  %v578_v32 = vld [vmem:[%s1078_s17 + $0x8] sm:$0xff] }
  0xf6   : > { %523 = vst.msk [vmem:[%s1114_s30 + $0x4] sm:$0xf] %vm521_vm2, %v882_v35  ;;  %v545_v42 = vunpack.c.l.bf16 %v489_v34  ;;  %v546_v43 = vunpack.c.h.bf16 %v489_v34  ;;  %v477_v44 = vadd.f32 %v863_v11, %v462_v36  ;;  %v463_v45 = vmul.f32 %v862_v9, %v439_v41  ;;  %585 = vxpose.xlu0.c.b16.start [1/4] (short) (narrow) %v489_v34, 64  ;;  %921 = vmatprep.subr.bf16.mxu1 %v489_v34  ;;  %v584_v41 = vld [vmem:[%s1078_s17 + $0x38] sm:$0xff] }
  0xf7   : > { %v487_v47 = vmax.f32 %v479_v39, 0.0  ;;  %v480_v48 = vadd.f32 %v863_v11, %v465_v40  ;;  %922 = vmatpush3.bf16.msra.mxu1 %v489_v34  ;;  %v556_v56 = vsel %vm373_vm1, %v547_v38, 0.0  ;;  %v558_v62 = vsel %vm373_vm1, %v548_v46, 0.0  ;;  %v583_v38 = vld [vmem:[%s1078_s17 + $0x30] sm:$0xff]  ;;  %v581_v39 = vld [vmem:[%s1078_s17 + $0x20] sm:$0xff] }
  0xf8   : > { %v553_v49 = vsel %vm373_vm1, %v545_v42, 0.0  ;;  %v554_v50 = vsel %vm373_vm1, %v546_v43, 0.0  ;;  %v485_v51 = vmax.f32 %v477_v44, 0.0  ;;  %v478_v52 = vadd.f32 %v863_v11, %v463_v45  ;;  %923 = vmatprep.subr.bf16.mxu1 %v490_v30  ;;  %v582_v44 = vld [vmem:[%s1078_s17 + $0x28] sm:$0xff] }
  0xf9   : > { %v555_v53 = vadd.f32 %v554_v50, %v553_v49  ;;  %v887_v54 = vpack.c.bf16 %v487_v47, %v487_v47  ;;  %v488_v55 = vmax.f32 %v480_v48, 0.0 }
  0xfa   : > { %v885_v57 = vpack.c.bf16 %v485_v51, %v485_v51  ;;  %v486_v58 = vmax.f32 %v478_v52, 0.0  ;;  %586 = vxpose.xlu0.c.b16.cont [2/4] (short) (narrow) %v490_v30, 64 }
  0xfb   : > { %v557_v59 = vadd.f32 %v556_v56, %v555_v53  ;;  %528 = vst.msk [vmem:[%s1114_s30 + $0x18] sm:$0xf] %vm521_vm2, %v887_v54  ;;  %v492_v60 = vpack.c.bf16 %v488_v55, %v487_v47  ;;  %v888_v61 = vpack.c.bf16 %v488_v55, %v488_v55  ;;  %924 = vmatpush3.bf16.msra.mxu1 %v490_v30 }
  0xfc   : > { %526 = vst.msk [vmem:[%s1114_s30 + $0x10] sm:$0xf] %vm521_vm2, %v885_v57  ;;  %v491_v63 = vpack.c.bf16 %v486_v58, %v485_v51  ;;  %v886_v0 = vpack.c.bf16 %v486_v58, %v486_v58 }
  0xfd   : > { %529 = vst.msk [vmem:[%s1114_s30 + $0x1c] sm:$0xf] %vm521_vm2, %v888_v61  ;;  %v559_v1 = vadd.f32 %v558_v62, %v557_v59  ;;  %v551_v4 = vunpack.c.l.bf16 %v492_v60  ;;  %v552_v7 = vunpack.c.h.bf16 %v492_v60 }
  0xfe   : > { %527 = vst.msk [vmem:[%s1114_s30 + $0x14] sm:$0xf] %vm521_vm2, %v886_v0  ;;  %v549_v2 = vunpack.c.l.bf16 %v491_v63  ;;  %v550_v3 = vunpack.c.h.bf16 %v491_v63  ;;  %587 = vxpose.xlu0.c.b16.cont [3/4] (short) (narrow) %v491_v63, 64  ;;  %925 = vmatprep.subr.bf16.mxu1 %v491_v63 }
  0xff   : > { %926 = vmatpush3.bf16.msra.mxu1 %v491_v63  ;;  %v564_v10 = vsel %vm373_vm1, %v551_v4, 0.0  ;;  %v566_v12 = vsel %vm373_vm1, %v552_v7, 0.0 }
 0x100   : > { %v560_v5 = vsel %vm373_vm1, %v549_v2, 0.0  ;;  %927 = vmatprep.subr.bf16.mxu1 %v492_v60  ;;  %v562_v8 = vsel %vm373_vm1, %v550_v3, 0.0 }
 0x101   : > { %v561_v6 = vadd.f32 %v560_v5, %v559_v1 }
 0x102   : > { %588 = vxpose.xlu0.c.b16.end [4/4] (short) (narrow) %v492_v60, 64 }
 0x103   : > { %v563_v9 = vadd.f32 %v562_v8, %v561_v6  ;;  %928 = vmatpush3.bf16.msra.mxu1 %v492_v60 }
 0x105   : > { %v565_v11 = vadd.f32 %v564_v10, %v563_v9 }
 0x107   : > { %v567_v13 = vadd.f32 %v566_v12, %v565_v11 }
 0x109   : > { %v568_v14 = vrot.slane %v567_v13, 4 }
 0x10b   : > { %v569_v15 = vadd.f32 %v568_v14, %v567_v13 }
 0x10d   : > { %v570_v16 = vrot.slane %v569_v15, 2 }
 0x10f   : > { %v571_v17 = vadd.f32 %v570_v16, %v569_v15 }
 0x111   : > { %v572_v18 = vrot.slane %v571_v17, 1 }
 0x113   : > { %v573_v20 = vadd.f32 %v572_v18, %v571_v17 }
 0x115   : > { %v574_v21 = vadd.f32 %v573_v20, %v544_v19 }
 0x117   : > { %576 = vst.msk [vmem:[%s1065_s10] sm:$0x1] %vm534_vm0, %v574_v21 }
 0x15c   : > { %v593_v22 = vpop.trf.xlu0 }
 0x15d   : > { %929 = vmatprep.mubr.msk.bf16.mxu1 %vm373_vm1, %v593_v22 }
 0x160   : > { %v594_v23 = vpop.trf.xlu0 }
 0x161   : > { %930 = vmatmul.mubr.msk.bf16.vlgmr.msra.gmra.mrb[0].mxu1 %vm373_vm1, %v594_v23 }
 0x164   : > { %v595_v24 = vpop.trf.xlu0 }
 0x165   : > { %933 = vmatprep.mubr.msk.bf16.mxu1 %vm373_vm1, %v595_v24 }
 0x168   : > { %v596_v25 = vpop.trf.xlu0 }
 0x169   : > { %934 = vmatmul.mubr.msk.bf16.gmra.mrb[4].mxu1 %vm373_vm1, %v596_v25 }
 0x234   : > { %v931_v28 = vpop.f32.mrb[0].mxu1 }
 0x235   : > { %v680_v30 = vadd.f32 %v931_v28, %v579_v26  ;;  %v647_v31 = vpop.f32.mrb[1].mxu1 }
 0x236   : > { %v678_v33 = vadd.f32 %v647_v31, %v577_v27  ;;  %v932_v34 = vpop.f32.mrb[2].mxu1 }
 0x237   : > { %688 = vst.msk [vmem:[%s1078_s17 + $0x10] sm:$0xff] %vm373_vm1, %v680_v30  ;;  %v681_v35 = vadd.f32 %v932_v34, %v580_v29  ;;  %v650_v36 = vpop.f32.mrb[3].mxu1 }
 0x238   : > { %686 = vst.msk [vmem:[%s1078_s17] sm:$0xff] %vm373_vm1, %v678_v33  ;;  %v679_v37 = vadd.f32 %v650_v36, %v578_v32 }
 0x239   : > { %689 = vst.msk [vmem:[%s1078_s17 + $0x18] sm:$0xff] %vm373_vm1, %v681_v35 }
 0x23a   : > { %687 = vst.msk [vmem:[%s1078_s17 + $0x8] sm:$0xff] %vm373_vm1, %v679_v37 }
 0x23c   : > { %v935_v40 = vpop.f32.mrb[4].mxu1 }
 0x23d   : > { %v684_v42 = vadd.f32 %v935_v40, %v583_v38  ;;  %v663_v43 = vpop.f32.mrb[5].mxu1 }
 0x23e   : > { %v682_v45 = vadd.f32 %v663_v43, %v581_v39  ;;  %v936_v46 = vpop.f32.mrb[6].mxu1 }
 0x23f   : > { %692 = vst.msk [vmem:[%s1078_s17 + $0x30] sm:$0xff] %vm373_vm1, %v684_v42  ;;  %v685_v47 = vadd.f32 %v936_v46, %v584_v41  ;;  %v666_v48 = vpop.f32.mrb[7].mxu1 }
 0x240   : > { %690 = vst.msk [vmem:[%s1078_s17 + $0x20] sm:$0xff] %vm373_vm1, %v682_v45  ;;  %v683_v49 = vadd.f32 %v666_v48, %v582_v44 }
 0x241   : > { %693 = vst.msk [vmem:[%s1078_s17 + $0x38] sm:$0xff] %vm373_vm1, %v685_v47 }
 0x242   : > { %691 = vst.msk [vmem:[%s1078_s17 + $0x28] sm:$0xff] %vm373_vm1, %v683_v49 }
 0x243 PF: > { %s17_s23 = sadd.s32 1, %s993_s23   ;;  %s1187_s21 = smov %s989_s22 }
 0x244   : > { %p14_p5 = scmp.ge.s32.totalorder %s17_s23, 4   ;;  %s1188_s22 = smov %s1190_s24 }
 0x246   :  { %16 = sbr.rel (!%p14_p5) target bundleno = 2 (0x2), region = 94 }

// kernel: pointnetfeat_forward.12
= control target key start
LH: loop header
LB: loop body
LE: loop exit
PB: predicated region body
PF: predicated region fallthrough
CT: control target
= control target key end

     0   :  { %v55_v37 = vlaneseq  ;;  %v3976_v38 = vmov 1983009808   ;;  %vm2194_vm9 = vcmask 1041408   ;;  %vm3065_vm10 = vcmask 25600   ;;  %s5327_s4 = inlined_call_operand.vmem [shape: bf16[1024,512], index: 4, kind: input, shape index: {}]   ;;  %s5328_s2 = inlined_call_operand.vmem [shape: f32[1,1024], index: 2, kind: input, shape index: {}]   ;;  %s5329_s0 = inlined_call_operand.vmem [shape: f32[2,1024], index: 0, kind: input, shape index: {}]   ;;  %s5330_s1 = inlined_call_operand.vmem [shape: f32[2,1024], index: 1, kind: input, shape index: {}]   ;;  %s5331_s3 = inlined_call_operand.vmem [shape: f32[1,1024], index: 3, kind: input, shape index: {}]   ;;  %s5332_s8 = inlined_call_operand.vmem [shape: bf16[512,256], index: 8, kind: input, shape index: {}]   ;;  %s5333_s5 = inlined_call_operand.vmem [shape: f32[1,512], index: 5, kind: input, shape index: {}]   ;;  %s5334_s6 = inlined_call_operand.vmem [shape: f32[1,512], index: 6, kind: input, shape index: {}]   ;;  %s5335_s7 = inlined_call_operand.vmem [shape: f32[1,512], index: 7, kind: input, shape index: {}]   ;;  %s5336_s12 = inlined_call_operand.vmem [shape: bf16[256,4], index: 12, kind: input, shape index: {}]   ;;  %s5337_s9 = inlined_call_operand.vmem [shape: f32[1,256], index: 9, kind: input, shape index: {}]   ;;  %s5338_s10 = inlined_call_operand.vmem [shape: f32[1,256], index: 10, kind: input, shape index: {}]   ;;  %s5339_s11 = inlined_call_operand.vmem [shape: f32[1,256], index: 11, kind: input, shape index: {}]   ;;  %s5340_s13 = inlined_call_operand.vmem [shape: f32[1,4], index: 13, kind: input, shape index: {}]   ;;  %s5341_s14 = inlined_call_operand.vmem [shape: f32[2,4], index: 14, kind: output, shape index: {}]  }
   0x1   :  { %v3464_v0 = vld [vmem:[%s5327_s4 + $0x4] ss:$16 sps:$4 sm:$0xff]   ;;  %v3468_v2 = vld [vmem:[%s5327_s4] ss:$16 sps:$4 sm:$0xff]   ;;  %v99_v39 = vunpack.c.l.s4 %v3976_v38  ;;  %v4229_v61 = vld [vmem:[%s5329_s0 + $0x8] sm:$0xff] }
   0x2   :  { %v3466_v1 = vld [vmem:[%s5327_s4 + $0x204] ss:$16 sps:$4 sm:$0xff]   ;;  %1864 = vmatprep.subr.bf16.mxu1 %v3464_v0  ;;  %v3469_v3 = vld [vmem:[%s5327_s4 + $0x200] ss:$16 sps:$4 sm:$0xff]   ;;  %v4176_v44 = vshrl.u32 %v55_v37, 7 }
   0x3   :  { %1905 = vmatprep.subr.bf16.mxu0 %v3466_v1  ;;  %v3470_v4 = vld [vmem:[%s5327_s4 + $0x24] ss:$16 sps:$4 sm:$0xff]   ;;  %1865 = vmatpush1.bf16.msra.mxu1 %v3468_v2  ;;  %v3474_v6 = vld [vmem:[%s5327_s4 + $0x20] ss:$16 sps:$4 sm:$0xff]   ;;  %v100_v45 = vunpack.c.0.s8 %v99_v39  ;;  %v4243_v2 = vld [vmem:[%s5330_s1 + $0x8] sm:$0xff] }
   0x4   :  { %1906 = vmatpush1.bf16.msra.mxu0 %v3469_v3  ;;  %v3472_v5 = vld [vmem:[%s5327_s4 + $0x224] ss:$16 sps:$4 sm:$0xff]   ;;  %1866 = vmatprep.subr.bf16.mxu1 %v3470_v4  ;;  %v3475_v7 = vld [vmem:[%s5327_s4 + $0x220] ss:$16 sps:$4 sm:$0xff]   ;;  %v4191_v50 = vsub.s32 1, %v4176_v44  ;;  %v4197_v52 = vsub.s32 0, %v4176_v44 }
   0x5   :  { %1907 = vmatprep.subr.bf16.mxu0 %v3472_v5  ;;  %v3476_v8 = vld [vmem:[%s5327_s4 + $0x44] ss:$16 sps:$4 sm:$0xff]   ;;  %v3480_v10 = vld [vmem:[%s5327_s4 + $0x40] ss:$16 sps:$4 sm:$0xff]   ;;  %v4194_v51 = vsub.s32 %v100_v45, %v4176_v44  ;;  %v4203_v54 = vsub.s32 3, %v4176_v44  ;;  %v4206_v55 = vsub.s32 2, %v4176_v44 }
   0x6   :  { %v3478_v9 = vld [vmem:[%s5327_s4 + $0x244] ss:$16 sps:$4 sm:$0xff]   ;;  %v3481_v11 = vld [vmem:[%s5327_s4 + $0x240] ss:$16 sps:$4 sm:$0xff]   ;;  %v4220_v59 = vsub.s32 5, %v4176_v44  ;;  %v3977_v3 = vmov 0  }
   0x7   :  { %1867 = vmatpush1.bf16.msra.mxu1 %v3474_v6  ;;  %v3482_v12 = vld [vmem:[%s5327_s4 + $0x64] ss:$16 sps:$4 sm:$0xff]   ;;  %v3486_v14 = vld [vmem:[%s5327_s4 + $0x60] ss:$16 sps:$4 sm:$0xff]   ;;  %v114_v6 = vcombine.high %v4229_v61, %v4229_v61 }
   0x8   :  { %1908 = vmatpush1.bf16.msra.mxu0 %v3475_v7  ;;  %1868 = vmatprep.subr.bf16.mxu1 %v3476_v8  ;;  %v3484_v13 = vld [vmem:[%s5327_s4 + $0x264] ss:$16 sps:$4 sm:$0xff]   ;;  %v3487_v15 = vld [vmem:[%s5327_s4 + $0x260] ss:$16 sps:$4 sm:$0xff]  }
   0x9   :  { %1909 = vmatprep.subr.bf16.mxu0 %v3478_v9  ;;  %v3488_v16 = vld [vmem:[%s5327_s4 + $0x84] ss:$16 sps:$4 sm:$0xff]   ;;  %v3492_v18 = vld [vmem:[%s5327_s4 + $0x80] ss:$16 sps:$4 sm:$0xff]  }
   0xa   :  { %v3490_v17 = vld [vmem:[%s5327_s4 + $0x284] ss:$16 sps:$4 sm:$0xff]   ;;  %v3493_v19 = vld [vmem:[%s5327_s4 + $0x280] ss:$16 sps:$4 sm:$0xff]  }
   0xb   :  { %1869 = vmatpush1.bf16.msra.mxu1 %v3480_v10  ;;  %v3494_v20 = vld [vmem:[%s5327_s4 + $0xa4] ss:$16 sps:$4 sm:$0xff]   ;;  %v3498_v22 = vld [vmem:[%s5327_s4 + $0xa0] ss:$16 sps:$4 sm:$0xff]  }
   0xc   :  { %1910 = vmatpush1.bf16.msra.mxu0 %v3481_v11  ;;  %1870 = vmatprep.subr.bf16.mxu1 %v3482_v12  ;;  %v3496_v21 = vld [vmem:[%s5327_s4 + $0x2a4] ss:$16 sps:$4 sm:$0xff]   ;;  %v3499_v23 = vld [vmem:[%s5327_s4 + $0x2a0] ss:$16 sps:$4 sm:$0xff]   ;;  %v158_v12 = vcombine.high %v4243_v2, %v4243_v2 }
   0xd   :  { %1911 = vmatprep.subr.bf16.mxu0 %v3484_v13  ;;  %v3500_v24 = vld [vmem:[%s5327_s4 + $0xc4] ss:$16 sps:$4 sm:$0xff]   ;;  %v3504_v26 = vld [vmem:[%s5327_s4 + $0xc0] ss:$16 sps:$4 sm:$0xff]  }
   0xe   :  { %v3502_v25 = vld [vmem:[%s5327_s4 + $0x2c4] ss:$16 sps:$4 sm:$0xff]   ;;  %v3505_v27 = vld [vmem:[%s5327_s4 + $0x2c0] ss:$16 sps:$4 sm:$0xff]  }
   0xf   :  { %1871 = vmatpush1.bf16.msra.mxu1 %v3486_v14  ;;  %v3506_v28 = vld [vmem:[%s5327_s4 + $0xe4] ss:$16 sps:$4 sm:$0xff]   ;;  %v3510_v30 = vld [vmem:[%s5327_s4 + $0xe0] ss:$16 sps:$4 sm:$0xff]   ;;  %v4269_v14 = vsub.s32 4, %v4176_v44 }
  0x10   :  { %1912 = vmatpush1.bf16.msra.mxu0 %v3487_v15  ;;  %1872 = vmatprep.subr.bf16.mxu1 %v3488_v16  ;;  %v3508_v29 = vld [vmem:[%s5327_s4 + $0x2e4] ss:$16 sps:$4 sm:$0xff]   ;;  %v3511_v31 = vld [vmem:[%s5327_s4 + $0x2e0] ss:$16 sps:$4 sm:$0xff]  }
  0x11   :  { %1913 = vmatprep.subr.bf16.mxu0 %v3490_v17  ;;  %v3512_v32 = vld [vmem:[%s5327_s4 + $0x104] ss:$16 sps:$4 sm:$0xff]   ;;  %v3516_v34 = vld [vmem:[%s5327_s4 + $0x100] ss:$16 sps:$4 sm:$0xff]  }
  0x12   :  { %v3514_v33 = vld [vmem:[%s5327_s4 + $0x304] ss:$16 sps:$4 sm:$0xff]   ;;  %v3517_v35 = vld [vmem:[%s5327_s4 + $0x300] ss:$16 sps:$4 sm:$0xff]  }
  0x13   :  { %1873 = vmatpush1.bf16.msra.mxu1 %v3492_v18  ;;  %v3518_v36 = vld [vmem:[%s5327_s4 + $0x124] ss:$16 sps:$4 sm:$0xff]   ;;  %v3522_v41 = vld [vmem:[%s5327_s4 + $0x120] ss:$16 sps:$4 sm:$0xff]  }
  0x14   :  { %1914 = vmatpush1.bf16.msra.mxu0 %v3493_v19  ;;  %1874 = vmatprep.subr.bf16.mxu1 %v3494_v20  ;;  %v3520_v40 = vld [vmem:[%s5327_s4 + $0x324] ss:$16 sps:$4 sm:$0xff]   ;;  %v3523_v42 = vld [vmem:[%s5327_s4 + $0x320] ss:$16 sps:$4 sm:$0xff]  }
  0x15   :  { %1915 = vmatprep.subr.bf16.mxu0 %v3496_v21  ;;  %v3524_v43 = vld [vmem:[%s5327_s4 + $0x144] ss:$16 sps:$4 sm:$0xff]   ;;  %v3528_v47 = vld [vmem:[%s5327_s4 + $0x140] ss:$16 sps:$4 sm:$0xff]  }
  0x16   :  { %v3526_v46 = vld [vmem:[%s5327_s4 + $0x344] ss:$16 sps:$4 sm:$0xff]   ;;  %v3529_v48 = vld [vmem:[%s5327_s4 + $0x340] ss:$16 sps:$4 sm:$0xff]  }
  0x17   :  { %1875 = vmatpush1.bf16.msra.mxu1 %v3498_v22  ;;  %v3530_v49 = vld [vmem:[%s5327_s4 + $0x164] ss:$16 sps:$4 sm:$0xff]   ;;  %v3534_v56 = vld [vmem:[%s5327_s4 + $0x160] ss:$16 sps:$4 sm:$0xff]  }
  0x18   :  { %1916 = vmatpush1.bf16.msra.mxu0 %v3499_v23  ;;  %1876 = vmatprep.subr.bf16.mxu1 %v3500_v24  ;;  %v3532_v53 = vld [vmem:[%s5327_s4 + $0x364] ss:$16 sps:$4 sm:$0xff]   ;;  %v3535_v57 = vld [vmem:[%s5327_s4 + $0x360] ss:$16 sps:$4 sm:$0xff]  }
  0x19   :  { %1917 = vmatprep.subr.bf16.mxu0 %v3502_v25  ;;  %v4217_v58 = vld [vmem:[%s5328_s2] sm:$0xff] }
  0x1a   :  { %vm49_vm0 = vcmp.ge.f32.partialorder %v4217_v58, 0.0  ;;  %v50_v60 = vld [vmem:[%s5329_s0] sm:$0xff]  ;;  %v199_v63 = vrot.slane %v4217_v58, %v4191_v50  ;;  %v195_v0 = vrot.slane %v4217_v58, %v4197_v52  ;;  %v207_v1 = vrot.slane %v4217_v58, %v4203_v54 }
  0x1b   :  { %1877 = vmatpush1.bf16.msra.mxu1 %v3504_v26  ;;  %v52_v62 = vld [vmem:[%s5330_s1] sm:$0xff]  ;;  %v4245_v4 = vsel %vm49_vm0, 1, %v3977_v3  ;;  %v104_v5 = vrot.slane %v50_v60, %v4194_v51  ;;  %v97_v20 = vcombine.high %v50_v60, %v50_v60  ;;  %v165_v60 = vrot.slane %v4243_v2, %v4194_v51 }
  0x1c   :  { %1918 = vmatpush1.bf16.msra.mxu0 %v3505_v27  ;;  %1878 = vmatprep.subr.bf16.mxu1 %v3506_v28  ;;  %v148_v7 = vrot.slane %v52_v62, %v4194_v51  ;;  %v4254_v8 = vld [vmem:[%s5331_s3] sm:$0xff]  ;;  %v62_v11 = vrot.slane %v4245_v4, %v4191_v50  ;;  %v58_v17 = vrot.slane %v4245_v4, %v4197_v52 }
  0x1d   :  { %1919 = vmatprep.subr.bf16.mxu0 %v3508_v29  ;;  %v3536_v9 = vld [vmem:[%s5327_s4 + $0x184] ss:$16 sps:$4 sm:$0xff]   ;;  %v249_v13 = vrot.slane %v4254_v8, %v4191_v50  ;;  %v112_v15 = vcombine.high %v104_v5, %v104_v5  ;;  %v245_v18 = vrot.slane %v4254_v8, %v4197_v52  ;;  %v70_v19 = vrot.slane %v4245_v4, %v4203_v54  ;;  %v3540_v22 = vld [vmem:[%s5327_s4 + $0x180] ss:$16 sps:$4 sm:$0xff]  }
  0x1e   :  { %v3538_v10 = vld [vmem:[%s5327_s4 + $0x384] ss:$16 sps:$4 sm:$0xff]   ;;  %v156_v16 = vcombine.high %v148_v7, %v148_v7  ;;  %vm88_vm1 = vcmp.eq.s32.totalorder %v62_v11, 1  ;;  %v141_v21 = vcombine.high %v52_v62, %v52_v62  ;;  %v3541_v23 = vld [vmem:[%s5327_s4 + $0x380] ss:$16 sps:$4 sm:$0xff]   ;;  %vm87_vm2 = vcmp.eq.s32.totalorder %v58_v17, 1 }
  0x1f   :  { %1879 = vmatpush1.bf16.msra.mxu1 %v3510_v30  ;;  %v257_v25 = vrot.slane %v4254_v8, %v4203_v54  ;;  %v66_v26 = vrot.slane %v4245_v4, %v4206_v55  ;;  %v3542_v27 = vld [vmem:[%s5327_s4 + $0x1a4] ss:$16 sps:$4 sm:$0xff]   ;;  %v183_v30 = vsel %vm87_vm2, %v104_v5, %v148_v7  ;;  %vm4293_vm3 = vcmp.eq.s32.totalorder %v70_v19, 1  ;;  %v3552_v11 = vld [vmem:[%s5327_s4 + $0x1c0] ss:$16 sps:$4 sm:$0xff]  }
  0x20   :  { %1920 = vmatpush1.bf16.msra.mxu0 %v3511_v31  ;;  %1880 = vmatprep.subr.bf16.mxu1 %v3512_v32  ;;  %v184_v24 = vsel %vm88_vm1, %v112_v15, %v156_v16  ;;  %v3544_v28 = vld [vmem:[%s5327_s4 + $0x3a4] ss:$16 sps:$4 sm:$0xff]   ;;  %v111_v32 = vrot.slane %v97_v20, %v4194_v51  ;;  %v253_v39 = vrot.slane %v4254_v8, %v4206_v55 }
  0x21   :  { %1921 = vmatprep.subr.bf16.mxu0 %v3514_v33  ;;  %v233_v29 = vmul.f32 %v199_v63, %v184_v24  ;;  %v232_v33 = vmul.f32 %v195_v0, %v183_v30  ;;  %vm4299_vm4 = vcmp.eq.s32.totalorder %v66_v26, 1  ;;  %v215_v3 = vrot.slane %v4217_v58, %v4220_v59  ;;  %v3556_v19 = vld [vmem:[%s5327_s4 + $0x3e4] ss:$16 sps:$4 sm:$0xff]  }
  0x22   :  { %v113_v38 = vcombine.high %v111_v32, %v111_v32  ;;  %v173_v16 = vcombine.high %v165_v60, %v165_v60  ;;  %v265_v17 = vrot.slane %v4254_v8, %v4220_v59  ;;  %v3584_v0 = vld [vmem:[%s5327_s4 + $0x464] ss:$16 sps:$4 sm:$0xff]  }
  0x23   :  { %1881 = vmatpush1.bf16.msra.mxu1 %v3516_v34  ;;  %v155_v34 = vrot.slane %v141_v21, %v4194_v51  ;;  %v283_v37 = vadd.f32 %v249_v13, %v233_v29  ;;  %v3553_v13 = vld [vmem:[%s5327_s4 + $0x3c0] ss:$16 sps:$4 sm:$0xff]  }
  0x24   :  { %1922 = vmatpush1.bf16.msra.mxu0 %v3517_v35  ;;  %1882 = vmatprep.subr.bf16.mxu1 %v3518_v36  ;;  %v203_v36 = vrot.slane %v4217_v58, %v4206_v55  ;;  %v3558_v29 = vld [vmem:[%s5327_s4 + $0x1e0] ss:$16 sps:$4 sm:$0xff]  }
  0x25   :  { %1923 = vmatprep.subr.bf16.mxu0 %v3520_v40  ;;  %v78_v40 = vrot.slane %v4245_v4, %v4220_v59  ;;  %v157_v45 = vcombine.high %v155_v34, %v155_v34  ;;  %v211_v59 = vrot.slane %v4217_v58, %v4269_v14 }
  0x27   :  { %1883 = vmatpush1.bf16.msra.mxu1 %v3522_v41  ;;  %v3546_v41 = vld [vmem:[%s5327_s4 + $0x1a0] ss:$16 sps:$4 sm:$0xff]   ;;  %v186_v63 = vsel %vm4293_vm3, %v113_v38, %v157_v45  ;;  %vm4332_vm5 = vcmp.eq.s32.totalorder %v78_v40, 1 }
  0x28   :  { %1924 = vmatpush1.bf16.msra.mxu0 %v3523_v42  ;;  %1884 = vmatprep.subr.bf16.mxu1 %v3524_v43  ;;  %v3547_v42 = vld [vmem:[%s5327_s4 + $0x3a0] ss:$16 sps:$4 sm:$0xff]   ;;  %v282_v43 = vadd.f32 %v245_v18, %v232_v33  ;;  %v235_v7 = vmul.f32 %v207_v1, %v186_v63  ;;  %v4354_v1 = vsub.s32 6, %v4176_v44  ;;  %v3554_v18 = vld [vmem:[%s5327_s4 + $0x1e4] ss:$16 sps:$4 sm:$0xff]  }
  0x29   :  { %1925 = vmatprep.subr.bf16.mxu0 %v3526_v46  ;;  %v185_v46 = vsel %vm4299_vm4, %v111_v32, %v155_v34  ;;  %v3566_v32 = vld [vmem:[%s5327_s4 + $0x404] ss:$16 sps:$4 sm:$0xff]   ;;  %v3569_v33 = vld [vmem:[%s5327_s4 + $0xc] ss:$16 sps:$4 sm:$0xff]   ;;  %v3579_v63 = vld [vmem:[%s5327_s4 + $0x48] ss:$16 sps:$4 sm:$0xff]  }
  0x2a   :  { %v290_v62 = vmax.f32 %v282_v43, 0.0  ;;  %v285_v20 = vadd.f32 %v257_v25, %v235_v7  ;;  %v128_v25 = vrot.slane %v114_v6, %v4194_v51  ;;  %v269_v40 = vrot.slane %v4254_v8, %v4354_v1  ;;  %v3585_v7 = vld [vmem:[%s5327_s4 + $0x68] ss:$16 sps:$4 sm:$0xff]  }
  0x2b   :  { %1885 = vmatpush1.bf16.msra.mxu1 %v3528_v47  ;;  %v4318_v47 = vsub.s32 7, %v4176_v44 }
  0x2c   :  { %1926 = vmatpush1.bf16.msra.mxu0 %v3529_v48  ;;  %1886 = vmatprep.subr.bf16.mxu1 %v3530_v49  ;;  %v3548_v48 = vld [vmem:[%s5327_s4 + $0x1c4] ss:$16 sps:$4 sm:$0xff]   ;;  %v4349_v15 = vpack.c.bf16 %v290_v62, %v290_v62  ;;  %v293_v26 = vmax.f32 %v285_v20, 0.0  ;;  %v130_v31 = vcombine.high %v128_v25, %v128_v25  ;;  %v3576_v62 = vld [vmem:[%s5327_s4 + $0x440] ss:$16 sps:$4 sm:$0xff]  }
  0x2d   :  { %1927 = vmatprep.subr.bf16.mxu0 %v3532_v53  ;;  %v3550_v49 = vld [vmem:[%s5327_s4 + $0x3c4] ss:$16 sps:$4 sm:$0xff]   ;;  %v291_v53 = vmax.f32 %v283_v37, 0.0  ;;  %v86_v24 = vrot.slane %v4245_v4, %v4318_v47  ;;  %v223_v2 = vrot.slane %v4217_v58, %v4318_v47  ;;  %v3605_v20 = vld [vmem:[%s5327_s4 + $0xcc] ss:$16 sps:$4 sm:$0xff]  }
  0x2e   :  { %v4389_v6 = vpack.c.bf16 %v293_v26, %v293_v26  ;;  %v3617_v26 = vld [vmem:[%s5327_s4 + $0x10c] ss:$16 sps:$4 sm:$0xff]  }
  0x2f   :  { %1887 = vmatpush1.bf16.msra.mxu1 %v3534_v56  ;;  %v234_v56 = vmul.f32 %v203_v36, %v185_v46  ;;  %v4338_v5 = vpack.c.bf16 %v291_v53, %v291_v53  ;;  %vm94_vm7 = vcmp.eq.s32.totalorder %v86_v24, 1  ;;  %v3573_v53 = vld [vmem:[%s5327_s4 + $0x28] ss:$16 sps:$4 sm:$0xff]  }
  0x30   :  { %1928 = vmatpush1.bf16.msra.mxu0 %v3535_v57  ;;  %1888 = vmatprep.subr.bf16.mxu1 %v3536_v9  ;;  %v121_v57 = vrot.slane %v4229_v61, %v4194_v51  ;;  %v172_v61 = vrot.slane %v158_v12, %v4194_v51  ;;  %v273_v51 = vrot.slane %v4254_v8, %v4318_v47  ;;  %v3609_v24 = vld [vmem:[%s5327_s4 + $0xe8] ss:$16 sps:$4 sm:$0xff]  }
  0x31   :  { %1929 = vmatprep.subr.bf16.mxu0 %v3538_v10  ;;  %v284_v9 = vadd.f32 %v253_v39, %v234_v56  ;;  %1896 = vmatprep.mubr.bf16.mxu1 %v4338_v5  ;;  %v82_v12 = vrot.slane %v4245_v4, %v4354_v1  ;;  %v219_v39 = vrot.slane %v4217_v58, %v4354_v1  ;;  %v3572_v58 = vld [vmem:[%s5327_s4 + $0x424] ss:$16 sps:$4 sm:$0xff]   ;;  %v3594_v1 = vld [vmem:[%s5327_s4 + $0x4a0] ss:$16 sps:$4 sm:$0xff]  }
  0x32   :  { %v129_v10 = vcombine.high %v121_v57, %v121_v57  ;;  %v174_v36 = vcombine.high %v172_v61, %v172_v61  ;;  %1937 = vmatprep.mubr.bf16.mxu0 %v4389_v6 }
  0x33   :  { %1889 = vmatpush1.bf16.msra.mxu1 %v3540_v22  ;;  %v292_v21 = vmax.f32 %v284_v9, 0.0  ;;  %v74_v22 = vrot.slane %v4245_v4, %v4269_v14  ;;  %v3567_v4 = vld [vmem:[%s5327_s4 + $0x8] ss:$16 sps:$4 sm:$0xff]   ;;  %vm93_vm8 = vcmp.eq.s32.totalorder %v82_v12, 1  ;;  %v3590_v9 = vld [vmem:[%s5327_s4 + $0x484] ss:$16 sps:$4 sm:$0xff]  }
  0x34   :  { %1930 = vmatpush1.bf16.msra.mxu0 %v3541_v23  ;;  %1890 = vmatprep.subr.bf16.mxu1 %v3542_v27  ;;  %v188_v44 = vsel %vm4332_vm5, %v129_v10, %v173_v16  ;;  %v261_v23 = vrot.slane %v4254_v8, %v4269_v14  ;;  %v3559_v14 = vld [vmem:[%s5327_s4 + $0x3e0] ss:$16 sps:$4 sm:$0xff]   ;;  %v3575_v8 = vld [vmem:[%s5327_s4 + $0x2c] ss:$16 sps:$4 sm:$0xff]   ;;  %v189_v45 = vsel %vm93_vm8, %v128_v25, %v172_v61  ;;  %v3596_v16 = vld [vmem:[%s5327_s4 + $0x4a4] ss:$16 sps:$4 sm:$0xff]  }
  0x35   :  { %1931 = vmatprep.subr.bf16.mxu0 %v3544_v28  ;;  %v4377_v27 = vpack.c.bf16 %v292_v21, %v292_v21  ;;  %v237_v28 = vmul.f32 %v215_v3, %v188_v44  ;;  %vm91_vm6 = vcmp.eq.s32.totalorder %v74_v22, 1  ;;  %v238_v47 = vmul.f32 %v219_v39, %v189_v45  ;;  %v3587_v3 = vld [vmem:[%s5327_s4 + $0x6c] ss:$16 sps:$4 sm:$0xff]   ;;  %v3600_v21 = vld [vmem:[%s5327_s4 + $0x4c0] ss:$16 sps:$4 sm:$0xff]  }
  0x36   :  { %v187_v30 = vsel %vm91_vm6, %v121_v57, %v165_v60  ;;  %v3578_v57 = vld [vmem:[%s5327_s4 + $0x444] ss:$16 sps:$4 sm:$0xff]   ;;  %v3581_v60 = vld [vmem:[%s5327_s4 + $0x4c] ss:$16 sps:$4 sm:$0xff]   ;;  %v3603_v22 = vld [vmem:[%s5327_s4 + $0xc8] ss:$16 sps:$4 sm:$0xff]  }
  0x37   :  { %1891 = vmatpush1.bf16.msra.mxu1 %v3546_v41  ;;  %v287_v34 = vadd.f32 %v265_v17, %v237_v28  ;;  %v236_v35 = vmul.f32 %v211_v59, %v187_v30  ;;  %v3564_v41 = vld [vmem:[%s5327_s4 + $0x400] ss:$16 sps:$4 sm:$0xff]   ;;  %v4434_v56 = vadd.f32 %v269_v40, %v238_v47  ;;  %v3593_v10 = vld [vmem:[%s5327_s4 + $0x8c] ss:$16 sps:$4 sm:$0xff]   ;;  %v3608_v59 = vld [vmem:[%s5327_s4 + $0x4e4] ss:$16 sps:$4 sm:$0xff]  }
  0x38   :  { %1932 = vmatpush1.bf16.msra.mxu0 %v3547_v42  ;;  %1892 = vmatprep.subr.bf16.mxu1 %v3548_v48  ;;  %v190_v42 = vsel %vm94_vm7, %v130_v31, %v174_v36  ;;  %v3599_v17 = vld [vmem:[%s5327_s4 + $0xac] ss:$16 sps:$4 sm:$0xff]   ;;  %v3614_v25 = vld [vmem:[%s5327_s4 + $0x504] ss:$16 sps:$4 sm:$0xff]   ;;  %v3612_v28 = vld [vmem:[%s5327_s4 + $0x500] ss:$16 sps:$4 sm:$0xff]  }
  0x39   :  { %1933 = vmatprep.subr.bf16.mxu0 %v3550_v49  ;;  %v295_v37 = vmax.f32 %v287_v34, 0.0  ;;  %v4404_v38 = vadd.f32 %v261_v23, %v236_v35  ;;  %v239_v43 = vmul.f32 %v223_v2, %v190_v42  ;;  %v3570_v49 = vld [vmem:[%s5327_s4 + $0x420] ss:$16 sps:$4 sm:$0xff]   ;;  %v3611_v44 = vld [vmem:[%s5327_s4 + $0xec] ss:$16 sps:$4 sm:$0xff]  }
  0x3a   :  { %v3606_v23 = vld [vmem:[%s5327_s4 + $0x4e0] ss:$16 sps:$4 sm:$0xff]   ;;  %v3623_v30 = vld [vmem:[%s5327_s4 + $0x12c] ss:$16 sps:$4 sm:$0xff]   ;;  %v3621_v61 = vld [vmem:[%s5327_s4 + $0x128] ss:$16 sps:$4 sm:$0xff]  }
  0x3b   :  { %1893 = vmatpush1.bf16.msra.mxu1 %v3552_v11  ;;  %v4422_v46 = vpack.c.bf16 %v295_v37, %v295_v37  ;;  %v4426_v48 = vadd.f32 %v273_v51, %v239_v43  ;;  %v3588_v11 = vld [vmem:[%s5327_s4 + $0x480] ss:$16 sps:$4 sm:$0xff]   ;;  %v3627_v35 = vld [vmem:[%s5327_s4 + $0x148] ss:$16 sps:$4 sm:$0xff]   ;;  %v3632_v36 = vld [vmem:[%s5327_s4 + $0x564] ss:$16 sps:$4 sm:$0xff]  }
  0x3c   :  { %1934 = vmatpush1.bf16.msra.mxu0 %v3553_v13  ;;  %1894 = vmatprep.subr.bf16.mxu1 %v3554_v18  ;;  %v3591_v13 = vld [vmem:[%s5327_s4 + $0x88] ss:$16 sps:$4 sm:$0xff]   ;;  %v3618_v31 = vld [vmem:[%s5327_s4 + $0x520] ss:$16 sps:$4 sm:$0xff]   ;;  %v3635_v2 = vld [vmem:[%s5327_s4 + $0x16c] ss:$16 sps:$4 sm:$0xff]  }
  0x3d   :  { %1935 = vmatprep.subr.bf16.mxu0 %v3556_v19  ;;  %v3597_v18 = vld [vmem:[%s5327_s4 + $0xa8] ss:$16 sps:$4 sm:$0xff]   ;;  %v3602_v19 = vld [vmem:[%s5327_s4 + $0x4c4] ss:$16 sps:$4 sm:$0xff]   ;;  %v3624_v34 = vld [vmem:[%s5327_s4 + $0x540] ss:$16 sps:$4 sm:$0xff]  }
  0x3e   :  { %v3630_v51 = vld [vmem:[%s5327_s4 + $0x560] ss:$16 sps:$4 sm:$0xff]   ;;  %v3633_v12 = vld [vmem:[%s5327_s4 + $0x168] ss:$16 sps:$4 sm:$0xff]   ;;  %v3638_v37 = vld [vmem:[%s5327_s4 + $0x584] ss:$16 sps:$4 sm:$0xff]  }
  0x3f   :  { %1895 = vmatpush1.bf16.msra.mxu1 %v3558_v29  ;;  %v3615_v29 = vld [vmem:[%s5327_s4 + $0x108] ss:$16 sps:$4 sm:$0xff]   ;;  %v3641_v39 = vld [vmem:[%s5327_s4 + $0x18c] ss:$16 sps:$4 sm:$0xff]   ;;  %v3636_v40 = vld [vmem:[%s5327_s4 + $0x580] ss:$16 sps:$4 sm:$0xff]  }
  0x40   :  { %1936 = vmatpush1.bf16.msra.mxu0 %v3559_v14  ;;  %2028 = vmatprep.subr.bf16.mxu1 %v3569_v33  ;;  %v3620_v14 = vld [vmem:[%s5327_s4 + $0x524] ss:$16 sps:$4 sm:$0xff]   ;;  %v3629_v33 = vld [vmem:[%s5327_s4 + $0x14c] ss:$16 sps:$4 sm:$0xff]   ;;  %v3648_v47 = vld [vmem:[%s5327_s4 + $0x5c0] ss:$16 sps:$4 sm:$0xff]  }
  0x41   :  { %1946 = vmatprep.subr.bf16.mxu0 %v3566_v32  ;;  %v3626_v32 = vld [vmem:[%s5327_s4 + $0x544] ss:$16 sps:$4 sm:$0xff]   ;;  %v3647_v42 = vld [vmem:[%s5327_s4 + $0x1ac] ss:$16 sps:$4 sm:$0xff]  }
  0x42   :  { %1897 = vmatmul.mubr.bf16.vlgmr.msra.gmra.mrb[0].mxu1 %v4349_v15  ;;  %v3650_v43 = vld [vmem:[%s5327_s4 + $0x5c4] ss:$16 sps:$4 sm:$0xff]   ;;  %v3653_v45 = vld [vmem:[%s5327_s4 + $0x1cc] ss:$16 sps:$4 sm:$0xff]  }
  0x43   :  { %1938 = vmatmul.mubr.bf16.vlgmr.msra.gmra.mrb[0].mxu0 %v4377_v27  ;;  %2029 = vmatpush1.bf16.msra.mxu1 %v3567_v4  ;;  %v3644_v4 = vld [vmem:[%s5327_s4 + $0x5a4] ss:$16 sps:$4 sm:$0xff]  }
  0x44   :  { %1947 = vmatpush1.bf16.msra.mxu0 %v3564_v41  ;;  %2030 = vmatprep.subr.bf16.mxu1 %v3575_v8  ;;  %v3639_v41 = vld [vmem:[%s5327_s4 + $0x188] ss:$16 sps:$4 sm:$0xff]  }
  0x45   :  { %1948 = vmatprep.subr.bf16.mxu0 %v3572_v58  ;;  %1978 = vmatprep.mubr.bf16.mxu0 %v4422_v46  ;;  %v3642_v58 = vld [vmem:[%s5327_s4 + $0x5a0] ss:$16 sps:$4 sm:$0xff]   ;;  %v3645_v8 = vld [vmem:[%s5327_s4 + $0x1a8] ss:$16 sps:$4 sm:$0xff]  }
  0x46   :  { %2060 = vmatprep.mubr.bf16.mxu1 %v4338_v5  ;;  %v3582_v5 = vld [vmem:[%s5327_s4 + $0x460] ss:$16 sps:$4 sm:$0xff]  }
  0x47   :  { %2031 = vmatpush1.bf16.msra.mxu1 %v3573_v53  ;;  %v3656_v53 = vld [vmem:[%s5327_s4 + $0x5e4] ss:$16 sps:$4 sm:$0xff]  }
  0x48   :  { %1949 = vmatpush1.bf16.msra.mxu0 %v3570_v49  ;;  %2032 = vmatprep.subr.bf16.mxu1 %v3581_v60  ;;  %v3651_v49 = vld [vmem:[%s5327_s4 + $0x1c8] ss:$16 sps:$4 sm:$0xff]   ;;  %v294_v60 = vmax.f32 %v4404_v38, 0.0  ;;  %v3665_v38 = vld [vmem:[%s5327_s4 + $0x20c] ss:$16 sps:$4 sm:$0xff]  }
  0x49   :  { %1950 = vmatprep.subr.bf16.mxu0 %v3578_v57  ;;  %v3659_v57 = vld [vmem:[%s5327_s4 + $0x1ec] ss:$16 sps:$4 sm:$0xff]  }
  0x4b   :  { %2033 = vmatpush1.bf16.msra.mxu1 %v3579_v63  ;;  %v3657_v63 = vld [vmem:[%s5327_s4 + $0x1e8] ss:$16 sps:$4 sm:$0xff]  }
  0x4c   :  { %1951 = vmatpush1.bf16.msra.mxu0 %v3576_v62  ;;  %2034 = vmatprep.subr.bf16.mxu1 %v3587_v3  ;;  %v3654_v62 = vld [vmem:[%s5327_s4 + $0x5e0] ss:$16 sps:$4 sm:$0xff]   ;;  %v297_v3 = vmax.f32 %v4426_v48, 0.0  ;;  %v3671_v48 = vld [vmem:[%s5327_s4 + $0x22c] ss:$16 sps:$4 sm:$0xff]  }
  0x4d   :  { %1952 = vmatprep.subr.bf16.mxu0 %v3584_v0  ;;  %v3662_v0 = vld [vmem:[%s5327_s4 + $0x604] ss:$16 sps:$4 sm:$0xff]  }
  0x4f   :  { %2035 = vmatpush1.bf16.msra.mxu1 %v3585_v7  ;;  %v3660_v7 = vld [vmem:[%s5327_s4 + $0x600] ss:$16 sps:$4 sm:$0xff]  }
  0x50   :  { %1953 = vmatpush1.bf16.msra.mxu0 %v3582_v5  ;;  %2036 = vmatprep.subr.bf16.mxu1 %v3593_v10  ;;  %v4614_v5 = vpack.c.bf16 %v294_v60, %v294_v60  ;;  %v3668_v10 = vld [vmem:[%s5327_s4 + $0x624] ss:$16 sps:$4 sm:$0xff]   ;;  %v3735_v60 = vld [vmem:[%s5327_s4 + $0x388] ss:$16 sps:$4 sm:$0xff]  }
  0x51   :  { %1954 = vmatprep.subr.bf16.mxu0 %v3590_v9  ;;  %v3663_v9 = vld [vmem:[%s5327_s4 + $0x208] ss:$16 sps:$4 sm:$0xff]  }
  0x53   :  { %2037 = vmatpush1.bf16.msra.mxu1 %v3591_v13  ;;  %v3666_v13 = vld [vmem:[%s5327_s4 + $0x620] ss:$16 sps:$4 sm:$0xff]  }
  0x54   :  { %1955 = vmatpush1.bf16.msra.mxu0 %v3588_v11  ;;  %2038 = vmatprep.subr.bf16.mxu1 %v3599_v17  ;;  %v4628_v11 = vpack.c.bf16 %v297_v3, %v297_v3  ;;  %v3674_v17 = vld [vmem:[%s5327_s4 + $0x644] ss:$16 sps:$4 sm:$0xff]  }
  0x55   :  { %1956 = vmatprep.subr.bf16.mxu0 %v3596_v16  ;;  %v3669_v16 = vld [vmem:[%s5327_s4 + $0x228] ss:$16 sps:$4 sm:$0xff]   ;;  %v3746_v3 = vld [vmem:[%s5327_s4 + $0x7c4] ss:$16 sps:$4 sm:$0xff]  }
  0x57   :  { %2039 = vmatpush1.bf16.msra.mxu1 %v3597_v18  ;;  %v3675_v18 = vld [vmem:[%s5327_s4 + $0x248] ss:$16 sps:$4 sm:$0xff]  }
  0x58   :  { %1957 = vmatpush1.bf16.msra.mxu0 %v3594_v1  ;;  %2040 = vmatprep.subr.bf16.mxu1 %v3605_v20  ;;  %v3672_v1 = vld [vmem:[%s5327_s4 + $0x640] ss:$16 sps:$4 sm:$0xff]  }
  0x59   :  { %1958 = vmatprep.subr.bf16.mxu0 %v3602_v19  ;;  %v3680_v19 = vld [vmem:[%s5327_s4 + $0x664] ss:$16 sps:$4 sm:$0xff]   ;;  %v3678_v20 = vld [vmem:[%s5327_s4 + $0x660] ss:$16 sps:$4 sm:$0xff]  }
  0x5b   :  { %2041 = vmatpush1.bf16.msra.mxu1 %v3603_v22  ;;  %v3686_v22 = vld [vmem:[%s5327_s4 + $0x684] ss:$16 sps:$4 sm:$0xff]  }
  0x5c   :  { %1959 = vmatpush1.bf16.msra.mxu0 %v3600_v21  ;;  %2042 = vmatprep.subr.bf16.mxu1 %v3611_v44  ;;  %v3681_v21 = vld [vmem:[%s5327_s4 + $0x268] ss:$16 sps:$4 sm:$0xff]   ;;  %v3684_v44 = vld [vmem:[%s5327_s4 + $0x680] ss:$16 sps:$4 sm:$0xff]  }
  0x5d   :  { %1960 = vmatprep.subr.bf16.mxu0 %v3608_v59  ;;  %v3689_v59 = vld [vmem:[%s5327_s4 + $0x28c] ss:$16 sps:$4 sm:$0xff]  }
  0x5f   :  { %2043 = vmatpush1.bf16.msra.mxu1 %v3609_v24  ;;  %v3692_v24 = vld [vmem:[%s5327_s4 + $0x6a4] ss:$16 sps:$4 sm:$0xff]  }
  0x60   :  { %1961 = vmatpush1.bf16.msra.mxu0 %v3606_v23  ;;  %2044 = vmatprep.subr.bf16.mxu1 %v3617_v26  ;;  %v3687_v23 = vld [vmem:[%s5327_s4 + $0x288] ss:$16 sps:$4 sm:$0xff]   ;;  %v3690_v26 = vld [vmem:[%s5327_s4 + $0x6a0] ss:$16 sps:$4 sm:$0xff]  }
  0x61   :  { %1962 = vmatprep.subr.bf16.mxu0 %v3614_v25  ;;  %v3695_v25 = vld [vmem:[%s5327_s4 + $0x2ac] ss:$16 sps:$4 sm:$0xff]  }
  0x63   :  { %2045 = vmatpush1.bf16.msra.mxu1 %v3615_v29  ;;  %v3698_v29 = vld [vmem:[%s5327_s4 + $0x6c4] ss:$16 sps:$4 sm:$0xff]  }
  0x64   :  { %1963 = vmatpush1.bf16.msra.mxu0 %v3612_v28  ;;  %2046 = vmatprep.subr.bf16.mxu1 %v3623_v30  ;;  %v3693_v28 = vld [vmem:[%s5327_s4 + $0x2a8] ss:$16 sps:$4 sm:$0xff]   ;;  %v3696_v30 = vld [vmem:[%s5327_s4 + $0x6c0] ss:$16 sps:$4 sm:$0xff]  }
  0x65   :  { %1964 = vmatprep.subr.bf16.mxu0 %v3620_v14  ;;  %v3701_v14 = vld [vmem:[%s5327_s4 + $0x2cc] ss:$16 sps:$4 sm:$0xff]  }
  0x67   :  { %2047 = vmatpush1.bf16.msra.mxu1 %v3621_v61  ;;  %v3704_v61 = vld [vmem:[%s5327_s4 + $0x6e4] ss:$16 sps:$4 sm:$0xff]  }
  0x68   :  { %1965 = vmatpush1.bf16.msra.mxu0 %v3618_v31  ;;  %2048 = vmatprep.subr.bf16.mxu1 %v3629_v33  ;;  %v3699_v31 = vld [vmem:[%s5327_s4 + $0x2c8] ss:$16 sps:$4 sm:$0xff]   ;;  %v3702_v33 = vld [vmem:[%s5327_s4 + $0x6e0] ss:$16 sps:$4 sm:$0xff]  }
  0x69   :  { %1966 = vmatprep.subr.bf16.mxu0 %v3626_v32  ;;  %v3707_v32 = vld [vmem:[%s5327_s4 + $0x2ec] ss:$16 sps:$4 sm:$0xff]  }
  0x6b   :  { %2049 = vmatpush1.bf16.msra.mxu1 %v3627_v35  ;;  %v3710_v35 = vld [vmem:[%s5327_s4 + $0x704] ss:$16 sps:$4 sm:$0xff]  }
  0x6c   :  { %1967 = vmatpush1.bf16.msra.mxu0 %v3624_v34  ;;  %2050 = vmatprep.subr.bf16.mxu1 %v3635_v2  ;;  %v3705_v34 = vld [vmem:[%s5327_s4 + $0x2e8] ss:$16 sps:$4 sm:$0xff]   ;;  %v3708_v2 = vld [vmem:[%s5327_s4 + $0x700] ss:$16 sps:$4 sm:$0xff]  }
  0x6d   :  { %1968 = vmatprep.subr.bf16.mxu0 %v3632_v36  ;;  %v3713_v36 = vld [vmem:[%s5327_s4 + $0x30c] ss:$16 sps:$4 sm:$0xff]  }
  0x6f   :  { %2051 = vmatpush1.bf16.msra.mxu1 %v3633_v12  ;;  %v3716_v12 = vld [vmem:[%s5327_s4 + $0x724] ss:$16 sps:$4 sm:$0xff]  }
  0x70   :  { %1969 = vmatpush1.bf16.msra.mxu0 %v3630_v51  ;;  %2052 = vmatprep.subr.bf16.mxu1 %v3641_v39  ;;  %v3711_v51 = vld [vmem:[%s5327_s4 + $0x308] ss:$16 sps:$4 sm:$0xff]   ;;  %v3714_v39 = vld [vmem:[%s5327_s4 + $0x720] ss:$16 sps:$4 sm:$0xff]  }
  0x71   :  { %1970 = vmatprep.subr.bf16.mxu0 %v3638_v37  ;;  %v3719_v37 = vld [vmem:[%s5327_s4 + $0x32c] ss:$16 sps:$4 sm:$0xff]  }
  0x73   :  { %2053 = vmatpush1.bf16.msra.mxu1 %v3639_v41  ;;  %v3722_v41 = vld [vmem:[%s5327_s4 + $0x744] ss:$16 sps:$4 sm:$0xff]  }
  0x74   :  { %1971 = vmatpush1.bf16.msra.mxu0 %v3636_v40  ;;  %2054 = vmatprep.subr.bf16.mxu1 %v3647_v42  ;;  %v3717_v40 = vld [vmem:[%s5327_s4 + $0x328] ss:$16 sps:$4 sm:$0xff]   ;;  %v3720_v42 = vld [vmem:[%s5327_s4 + $0x740] ss:$16 sps:$4 sm:$0xff]  }
  0x75   :  { %1972 = vmatprep.subr.bf16.mxu0 %v3644_v4  ;;  %v3725_v4 = vld [vmem:[%s5327_s4 + $0x34c] ss:$16 sps:$4 sm:$0xff]  }
  0x77   :  { %2055 = vmatpush1.bf16.msra.mxu1 %v3645_v8  ;;  %v3728_v8 = vld [vmem:[%s5327_s4 + $0x764] ss:$16 sps:$4 sm:$0xff]  }
  0x78   :  { %1973 = vmatpush1.bf16.msra.mxu0 %v3642_v58  ;;  %2056 = vmatprep.subr.bf16.mxu1 %v3653_v45  ;;  %v3723_v58 = vld [vmem:[%s5327_s4 + $0x348] ss:$16 sps:$4 sm:$0xff]   ;;  %v3726_v45 = vld [vmem:[%s5327_s4 + $0x760] ss:$16 sps:$4 sm:$0xff]  }
  0x79   :  { %1974 = vmatprep.subr.bf16.mxu0 %v3650_v43  ;;  %v3731_v43 = vld [vmem:[%s5327_s4 + $0x36c] ss:$16 sps:$4 sm:$0xff]  }
  0x7b   :  { %2057 = vmatpush1.bf16.msra.mxu1 %v3651_v49  ;;  %v3734_v49 = vld [vmem:[%s5327_s4 + $0x784] ss:$16 sps:$4 sm:$0xff]  }
  0x7c   :  { %1975 = vmatpush1.bf16.msra.mxu0 %v3648_v47  ;;  %2058 = vmatprep.subr.bf16.mxu1 %v3659_v57  ;;  %v3729_v47 = vld [vmem:[%s5327_s4 + $0x368] ss:$16 sps:$4 sm:$0xff]   ;;  %v3732_v57 = vld [vmem:[%s5327_s4 + $0x780] ss:$16 sps:$4 sm:$0xff]  }
  0x7d   :  { %1976 = vmatprep.subr.bf16.mxu0 %v3656_v53  ;;  %v3737_v53 = vld [vmem:[%s5327_s4 + $0x38c] ss:$16 sps:$4 sm:$0xff]  }
  0x7f   :  { %2059 = vmatpush1.bf16.msra.mxu1 %v3657_v63  ;;  %v3743_v63 = vld [vmem:[%s5327_s4 + $0x3ac] ss:$16 sps:$4 sm:$0xff]  }
  0x80   :  { %1977 = vmatpush1.bf16.msra.mxu0 %v3654_v62  ;;  %2069 = vmatprep.subr.bf16.mxu1 %v3665_v38  ;;  %v3740_v62 = vld [vmem:[%s5327_s4 + $0x7a4] ss:$16 sps:$4 sm:$0xff]   ;;  %v3741_v38 = vld [vmem:[%s5327_s4 + $0x3a8] ss:$16 sps:$4 sm:$0xff]  }
  0x81   :  { %1987 = vmatprep.subr.bf16.mxu0 %v3662_v0  ;;  %v3738_v0 = vld [vmem:[%s5327_s4 + $0x7a0] ss:$16 sps:$4 sm:$0xff]  }
  0x82   :  { %2061 = vmatmul.mubr.bf16.vlgmr.msra.gmra.mrb[4].mxu1 %v4349_v15  ;;  %v3677_v15 = vld [vmem:[%s5327_s4 + $0x24c] ss:$16 sps:$4 sm:$0xff]  }
  0x83   :  { %1979 = vmatmul.mubr.bf16.vlgmr.msra.gmra.mrb[0].mxu0 %v4614_v5  ;;  %2070 = vmatpush1.bf16.msra.mxu1 %v3663_v9  ;;  %v3744_v9 = vld [vmem:[%s5327_s4 + $0x7c0] ss:$16 sps:$4 sm:$0xff]  }
  0x84   :  { %1988 = vmatpush1.bf16.msra.mxu0 %v3660_v7  ;;  %2071 = vmatprep.subr.bf16.mxu1 %v3671_v48  ;;  %v3749_v7 = vld [vmem:[%s5327_s4 + $0x3cc] ss:$16 sps:$4 sm:$0xff]   ;;  %v3752_v48 = vld [vmem:[%s5327_s4 + $0x7e4] ss:$16 sps:$4 sm:$0xff]  }
  0x85   :  { %1989 = vmatprep.subr.bf16.mxu0 %v3668_v10  ;;  %2019 = vmatprep.mubr.bf16.mxu0 %v4628_v11  ;;  %v3747_v10 = vld [vmem:[%s5327_s4 + $0x3c8] ss:$16 sps:$4 sm:$0xff]  }
  0x86   :  { %2101 = vmatprep.mubr.bf16.mxu1 %v4389_v6  ;;  %v3683_v6 = vld [vmem:[%s5327_s4 + $0x26c] ss:$16 sps:$4 sm:$0xff]  }
  0x87   :  { %2072 = vmatpush1.bf16.msra.mxu1 %v3669_v16  ;;  %v296_v16 = vmax.f32 %v4434_v56, 0.0  ;;  %v3756_v56 = vld [vmem:[%s5327_s4 + $0x408] ss:$16 sps:$4 sm:$0xff]  }
  0x88   :  { %1990 = vmatpush1.bf16.msra.mxu0 %v3666_v13  ;;  %2073 = vmatprep.subr.bf16.mxu1 %v3677_v15  ;;  %v3755_v13 = vld [vmem:[%s5327_s4 + $0x3ec] ss:$16 sps:$4 sm:$0xff]   ;;  %v3753_v15 = vld [vmem:[%s5327_s4 + $0x3e8] ss:$16 sps:$4 sm:$0xff]  }
  0x89   :  { %1991 = vmatprep.subr.bf16.mxu0 %v3674_v17  ;;  %v3750_v17 = vld [vmem:[%s5327_s4 + $0x7e0] ss:$16 sps:$4 sm:$0xff]  }
  0x8b   :  { %2074 = vmatpush1.bf16.msra.mxu1 %v3675_v18  ;;  %v4812_v18 = vpack.c.bf16 %v296_v16, %v296_v16  ;;  %v3858_v16 = vld [vmem:[%s5332_s8 + $0x20] ss:$8 sps:$4 sm:$0xff]  }
  0x8c   :  { %1992 = vmatpush1.bf16.msra.mxu0 %v3672_v1  ;;  %2075 = vmatprep.subr.bf16.mxu1 %v3683_v6  ;;  %v3758_v1 = vld [vmem:[%s5327_s4 + $0x40c] ss:$16 sps:$4 sm:$0xff]   ;;  %v3759_v6 = vld [vmem:[%s5327_s4 + $0x428] ss:$16 sps:$4 sm:$0xff]  }
  0x8d   :  { %1993 = vmatprep.subr.bf16.mxu0 %v3680_v19  ;;  %v3761_v19 = vld [vmem:[%s5327_s4 + $0x42c] ss:$16 sps:$4 sm:$0xff]  }
  0x8f   :  { %2076 = vmatpush1.bf16.msra.mxu1 %v3681_v21  ;;  %v3852_v21 = vld [vmem:[%s5332_s8] ss:$8 sps:$4 sm:$0xff]  }
  0x90   :  { %1994 = vmatpush1.bf16.msra.mxu0 %v3678_v20  ;;  %2077 = vmatprep.subr.bf16.mxu1 %v3689_v59  ;;  %v3764_v20 = vld [vmem:[%s5327_s4 + $0x44c] ss:$16 sps:$4 sm:$0xff]  }
  0x91   :  { %1995 = vmatprep.subr.bf16.mxu0 %v3686_v22  ;;  %v3762_v22 = vld [vmem:[%s5327_s4 + $0x448] ss:$16 sps:$4 sm:$0xff]   ;;  %v3767_v59 = vld [vmem:[%s5327_s4 + $0x46c] ss:$16 sps:$4 sm:$0xff]  }
  0x93   :  { %2078 = vmatpush1.bf16.msra.mxu1 %v3687_v23  ;;  %v3768_v23 = vld [vmem:[%s5327_s4 + $0x488] ss:$16 sps:$4 sm:$0xff]  }
  0x94   :  { %1996 = vmatpush1.bf16.msra.mxu0 %v3684_v44  ;;  %2079 = vmatprep.subr.bf16.mxu1 %v3695_v25  ;;  %v3770_v44 = vld [vmem:[%s5327_s4 + $0x48c] ss:$16 sps:$4 sm:$0xff]   ;;  %v3771_v25 = vld [vmem:[%s5327_s4 + $0x4a8] ss:$16 sps:$4 sm:$0xff]  }
  0x95   :  { %1997 = vmatprep.subr.bf16.mxu0 %v3692_v24  ;;  %v3773_v24 = vld [vmem:[%s5327_s4 + $0x4ac] ss:$16 sps:$4 sm:$0xff]  }
  0x97   :  { %2080 = vmatpush1.bf16.msra.mxu1 %v3693_v28  ;;  %v3774_v28 = vld [vmem:[%s5327_s4 + $0x4c8] ss:$16 sps:$4 sm:$0xff]  }
  0x98   :  { %1998 = vmatpush1.bf16.msra.mxu0 %v3690_v26  ;;  %2081 = vmatprep.subr.bf16.mxu1 %v3701_v14  ;;  %v3776_v26 = vld [vmem:[%s5327_s4 + $0x4cc] ss:$16 sps:$4 sm:$0xff]   ;;  %v3777_v14 = vld [vmem:[%s5327_s4 + $0x4e8] ss:$16 sps:$4 sm:$0xff]  }
  0x99   :  { %1999 = vmatprep.subr.bf16.mxu0 %v3698_v29  ;;  %v3779_v29 = vld [vmem:[%s5327_s4 + $0x4ec] ss:$16 sps:$4 sm:$0xff]  }
  0x9b   :  { %2082 = vmatpush1.bf16.msra.mxu1 %v3699_v31  ;;  %v3780_v31 = vld [vmem:[%s5327_s4 + $0x508] ss:$16 sps:$4 sm:$0xff]  }
  0x9c   :  { %2000 = vmatpush1.bf16.msra.mxu0 %v3696_v30  ;;  %2083 = vmatprep.subr.bf16.mxu1 %v3707_v32  ;;  %v3782_v30 = vld [vmem:[%s5327_s4 + $0x50c] ss:$16 sps:$4 sm:$0xff]   ;;  %v3783_v32 = vld [vmem:[%s5327_s4 + $0x528] ss:$16 sps:$4 sm:$0xff]  }
  0x9d   :  { %2001 = vmatprep.subr.bf16.mxu0 %v3704_v61  ;;  %v3785_v61 = vld [vmem:[%s5327_s4 + $0x52c] ss:$16 sps:$4 sm:$0xff]  }
  0x9f   :  { %2084 = vmatpush1.bf16.msra.mxu1 %v3705_v34  ;;  %v3786_v34 = vld [vmem:[%s5327_s4 + $0x548] ss:$16 sps:$4 sm:$0xff]  }
  0xa0   :  { %2002 = vmatpush1.bf16.msra.mxu0 %v3702_v33  ;;  %2085 = vmatprep.subr.bf16.mxu1 %v3713_v36  ;;  %v3788_v33 = vld [vmem:[%s5327_s4 + $0x54c] ss:$16 sps:$4 sm:$0xff]   ;;  %v3789_v36 = vld [vmem:[%s5327_s4 + $0x568] ss:$16 sps:$4 sm:$0xff]  }
  0xa1   :  { %2003 = vmatprep.subr.bf16.mxu0 %v3710_v35  ;;  %v3791_v35 = vld [vmem:[%s5327_s4 + $0x56c] ss:$16 sps:$4 sm:$0xff]  }
  0xa3   :  { %2086 = vmatpush1.bf16.msra.mxu1 %v3711_v51  ;;  %v3792_v51 = vld [vmem:[%s5327_s4 + $0x588] ss:$16 sps:$4 sm:$0xff]  }
  0xa4   :  { %2004 = vmatpush1.bf16.msra.mxu0 %v3708_v2  ;;  %2087 = vmatprep.subr.bf16.mxu1 %v3719_v37  ;;  %v3794_v2 = vld [vmem:[%s5327_s4 + $0x58c] ss:$16 sps:$4 sm:$0xff]   ;;  %v3795_v37 = vld [vmem:[%s5327_s4 + $0x5a8] ss:$16 sps:$4 sm:$0xff]  }
  0xa5   :  { %2005 = vmatprep.subr.bf16.mxu0 %v3716_v12  ;;  %v3797_v12 = vld [vmem:[%s5327_s4 + $0x5ac] ss:$16 sps:$4 sm:$0xff]  }
  0xa7   :  { %2088 = vmatpush1.bf16.msra.mxu1 %v3717_v40  ;;  %v3798_v40 = vld [vmem:[%s5327_s4 + $0x5c8] ss:$16 sps:$4 sm:$0xff]  }
  0xa8   :  { %2006 = vmatpush1.bf16.msra.mxu0 %v3714_v39  ;;  %2089 = vmatprep.subr.bf16.mxu1 %v3725_v4  ;;  %v3800_v39 = vld [vmem:[%s5327_s4 + $0x5cc] ss:$16 sps:$4 sm:$0xff]   ;;  %v3801_v4 = vld [vmem:[%s5327_s4 + $0x5e8] ss:$16 sps:$4 sm:$0xff]  }
  0xa9   :  { %2007 = vmatprep.subr.bf16.mxu0 %v3722_v41  ;;  %v3803_v41 = vld [vmem:[%s5327_s4 + $0x5ec] ss:$16 sps:$4 sm:$0xff]  }
  0xab   :  { %2090 = vmatpush1.bf16.msra.mxu1 %v3723_v58  ;;  %v3804_v58 = vld [vmem:[%s5327_s4 + $0x608] ss:$16 sps:$4 sm:$0xff]  }
  0xac   :  { %2008 = vmatpush1.bf16.msra.mxu0 %v3720_v42  ;;  %2091 = vmatprep.subr.bf16.mxu1 %v3731_v43  ;;  %v3806_v42 = vld [vmem:[%s5327_s4 + $0x60c] ss:$16 sps:$4 sm:$0xff]   ;;  %v3807_v43 = vld [vmem:[%s5327_s4 + $0x628] ss:$16 sps:$4 sm:$0xff]  }
  0xad   :  { %2009 = vmatprep.subr.bf16.mxu0 %v3728_v8  ;;  %v3809_v8 = vld [vmem:[%s5327_s4 + $0x62c] ss:$16 sps:$4 sm:$0xff]  }
  0xaf   :  { %2092 = vmatpush1.bf16.msra.mxu1 %v3729_v47  ;;  %v3810_v47 = vld [vmem:[%s5327_s4 + $0x648] ss:$16 sps:$4 sm:$0xff]  }
  0xb0   :  { %2010 = vmatpush1.bf16.msra.mxu0 %v3726_v45  ;;  %2093 = vmatprep.subr.bf16.mxu1 %v3737_v53  ;;  %v3812_v45 = vld [vmem:[%s5327_s4 + $0x64c] ss:$16 sps:$4 sm:$0xff]   ;;  %v3816_v53 = vld [vmem:[%s5327_s4 + $0x688] ss:$16 sps:$4 sm:$0xff]  }
  0xb1   :  { %2011 = vmatprep.subr.bf16.mxu0 %v3734_v49  ;;  %v3818_v49 = vld [vmem:[%s5327_s4 + $0x68c] ss:$16 sps:$4 sm:$0xff]  }
  0xb3   :  { %2094 = vmatpush1.bf16.msra.mxu1 %v3735_v60  ;;  %v3819_v60 = vld [vmem:[%s5327_s4 + $0x6a8] ss:$16 sps:$4 sm:$0xff]  }
  0xb4   :  { %2012 = vmatpush1.bf16.msra.mxu0 %v3732_v57  ;;  %2095 = vmatprep.subr.bf16.mxu1 %v3743_v63  ;;  %v3821_v57 = vld [vmem:[%s5327_s4 + $0x6ac] ss:$16 sps:$4 sm:$0xff]  }
  0xb5   :  { %2013 = vmatprep.subr.bf16.mxu0 %v3740_v62  ;;  %v3824_v62 = vld [vmem:[%s5327_s4 + $0x6cc] ss:$16 sps:$4 sm:$0xff]  }
  0xb7   :  { %2096 = vmatpush1.bf16.msra.mxu1 %v3741_v38 }
  0xb8   :  { %2014 = vmatpush1.bf16.msra.mxu0 %v3738_v0  ;;  %2097 = vmatprep.subr.bf16.mxu1 %v3749_v7  ;;  %v3857_v0 = vld [vmem:[%s5332_s8 + $0x14] ss:$8 sps:$4 sm:$0xff]  }
  0xb9   :  { %2015 = vmatprep.subr.bf16.mxu0 %v3746_v3  ;;  %v3855_v3 = vld [vmem:[%s5332_s8 + $0x10] ss:$8 sps:$4 sm:$0xff]  }
  0xbb   :  { %2098 = vmatpush1.bf16.msra.mxu1 %v3747_v10 }
  0xbc   :  { %2016 = vmatpush1.bf16.msra.mxu0 %v3744_v9  ;;  %2099 = vmatprep.subr.bf16.mxu1 %v3755_v13  ;;  %v3822_v9 = vld [vmem:[%s5327_s4 + $0x6c8] ss:$16 sps:$4 sm:$0xff]   ;;  %v3860_v13 = vld [vmem:[%s5332_s8 + $0x24] ss:$8 sps:$4 sm:$0xff]  }
  0xbd   :  { %2017 = vmatprep.subr.bf16.mxu0 %v3752_v48  ;;  %v3827_v48 = vld [vmem:[%s5327_s4 + $0x6ec] ss:$16 sps:$4 sm:$0xff]  }
  0xbf   :  { %2100 = vmatpush1.bf16.msra.mxu1 %v3753_v15  ;;  %v3830_v15 = vld [vmem:[%s5327_s4 + $0x70c] ss:$16 sps:$4 sm:$0xff]  }
  0xc0   :  { %2018 = vmatpush1.bf16.msra.mxu0 %v3750_v17  ;;  %2110 = vmatprep.subr.bf16.mxu1 %v3758_v1  ;;  %v3825_v17 = vld [vmem:[%s5327_s4 + $0x6e8] ss:$16 sps:$4 sm:$0xff]   ;;  %v3863_v1 = vld [vmem:[%s5332_s8 + $0x34] ss:$8 sps:$4 sm:$0xff]  }
  0xc2   :  { %2102 = vmatmul.mubr.bf16.vlgmr.msra.gmra.mrb[4].mxu1 %v4377_v27  ;;  %v3854_v27 = vld [vmem:[%s5332_s8 + $0x4] ss:$8 sps:$4 sm:$0xff]  }
  0xc3   :  { %2020 = vmatmul.mubr.bf16.vlgmr.msra.gmra.mrb[0].mxu0 %v4812_v18  ;;  %2111 = vmatpush1.bf16.msra.mxu1 %v3756_v56  ;;  %v3861_v56 = vld [vmem:[%s5332_s8 + $0x30] ss:$8 sps:$4 sm:$0xff]  }
  0xc4   :  { %2142 = vmatprep.mubr.bf16.mxu1 %v4422_v46  ;;  %2112 = vmatprep.subr.bf16.mxu1 %v3761_v19  ;;  %v3765_v46 = vld [vmem:[%s5327_s4 + $0x468] ss:$16 sps:$4 sm:$0xff]  }
  0xc5   :  { %2734 = vmatprep.subr.bf16.mxu0 %v3854_v27  ;;  %v3828_v19 = vld [vmem:[%s5327_s4 + $0x708] ss:$16 sps:$4 sm:$0xff]  }
  0xc6   :  { %2735 = vmatpush1.bf16.msra.mxu0 %v3852_v21  ;;  %v3864_v21 = vld [vmem:[%s5332_s8 + $0x40] ss:$8 sps:$4 sm:$0xff]  }
  0xc7   :  { %2113 = vmatpush1.bf16.msra.mxu1 %v3759_v6  ;;  %2736 = vmatprep.subr.bf16.mxu0 %v3857_v0  ;;  %v3833_v6 = vld [vmem:[%s5327_s4 + $0x72c] ss:$16 sps:$4 sm:$0xff]   ;;  %v3831_v27 = vld [vmem:[%s5327_s4 + $0x728] ss:$16 sps:$4 sm:$0xff]  }
  0xc8   :  { %2114 = vmatprep.subr.bf16.mxu1 %v3764_v20  ;;  %v3866_v20 = vld [vmem:[%s5332_s8 + $0x44] ss:$8 sps:$4 sm:$0xff]  }
  0xca   :  { %2737 = vmatpush1.bf16.msra.mxu0 %v3855_v3 }
  0xcb   :  { %2115 = vmatpush1.bf16.msra.mxu1 %v3762_v22  ;;  %2738 = vmatprep.subr.bf16.mxu0 %v3860_v13  ;;  %v3836_v22 = vld [vmem:[%s5327_s4 + $0x74c] ss:$16 sps:$4 sm:$0xff]  }
  0xcc   :  { %2116 = vmatprep.subr.bf16.mxu1 %v3767_v59  ;;  %v3869_v59 = vld [vmem:[%s5332_s8 + $0x54] ss:$8 sps:$4 sm:$0xff]  }
  0xce   :  { %2739 = vmatpush1.bf16.msra.mxu0 %v3858_v16 }
  0xcf   :  { %2117 = vmatpush1.bf16.msra.mxu1 %v3765_v46  ;;  %2740 = vmatprep.subr.bf16.mxu0 %v3863_v1  ;;  %v3867_v46 = vld [vmem:[%s5332_s8 + $0x50] ss:$8 sps:$4 sm:$0xff]  }
  0xd0   :  { %2118 = vmatprep.subr.bf16.mxu1 %v3770_v44  ;;  %v3834_v44 = vld [vmem:[%s5327_s4 + $0x748] ss:$16 sps:$4 sm:$0xff]  }
  0xd2   :  { %2741 = vmatpush1.bf16.msra.mxu0 %v3861_v56 }
  0xd3   :  { %2119 = vmatpush1.bf16.msra.mxu1 %v3768_v23  ;;  %2742 = vmatprep.subr.bf16.mxu0 %v3866_v20  ;;  %v3839_v23 = vld [vmem:[%s5327_s4 + $0x76c] ss:$16 sps:$4 sm:$0xff]  }
  0xd4   :  { %2120 = vmatprep.subr.bf16.mxu1 %v3773_v24  ;;  %v3872_v24 = vld [vmem:[%s5332_s8 + $0x64] ss:$8 sps:$4 sm:$0xff]  }
  0xd6   :  { %2743 = vmatpush1.bf16.msra.mxu0 %v3864_v21 }
  0xd7   :  { %2121 = vmatpush1.bf16.msra.mxu1 %v3771_v25  ;;  %2744 = vmatprep.subr.bf16.mxu0 %v3869_v59  ;;  %v3870_v25 = vld [vmem:[%s5332_s8 + $0x60] ss:$8 sps:$4 sm:$0xff]  }
  0xd8   :  { %2122 = vmatprep.subr.bf16.mxu1 %v3776_v26  ;;  %v3837_v26 = vld [vmem:[%s5327_s4 + $0x768] ss:$16 sps:$4 sm:$0xff]  }
  0xda   :  { %2745 = vmatpush1.bf16.msra.mxu0 %v3867_v46 }
  0xdb   :  { %2123 = vmatpush1.bf16.msra.mxu1 %v3774_v28  ;;  %2746 = vmatprep.subr.bf16.mxu0 %v3872_v24  ;;  %v3842_v28 = vld [vmem:[%s5327_s4 + $0x78c] ss:$16 sps:$4 sm:$0xff]  }
  0xdc   :  { %2124 = vmatprep.subr.bf16.mxu1 %v3779_v29  ;;  %v3875_v29 = vld [vmem:[%s5332_s8 + $0x74] ss:$8 sps:$4 sm:$0xff]  }
  0xde   :  { %2747 = vmatpush1.bf16.msra.mxu0 %v3870_v25 }
  0xdf   :  { %2125 = vmatpush1.bf16.msra.mxu1 %v3777_v14  ;;  %v3873_v14 = vld [vmem:[%s5332_s8 + $0x70] ss:$8 sps:$4 sm:$0xff]   ;;  %2748 = vmatprep.subr.bf16.mxu0 %v3875_v29 }
  0xe0   :  { %2126 = vmatprep.subr.bf16.mxu1 %v3782_v30  ;;  %v3840_v30 = vld [vmem:[%s5327_s4 + $0x788] ss:$16 sps:$4 sm:$0xff]  }
  0xe2   :  { %2749 = vmatpush1.bf16.msra.mxu0 %v3873_v14 }
  0xe3   :  { %2127 = vmatpush1.bf16.msra.mxu1 %v3780_v31  ;;  %v3845_v31 = vld [vmem:[%s5327_s4 + $0x7ac] ss:$16 sps:$4 sm:$0xff]  }
  0xe4   :  { %2128 = vmatprep.subr.bf16.mxu1 %v3785_v61  ;;  %v3878_v61 = vld [vmem:[%s5332_s8 + $0x84] ss:$8 sps:$4 sm:$0xff]  }
  0xe5   :  { %2750 = vmatprep.subr.bf16.mxu0 %v3878_v61 }
  0xe7   :  { %2129 = vmatpush1.bf16.msra.mxu1 %v3783_v32  ;;  %v3876_v32 = vld [vmem:[%s5332_s8 + $0x80] ss:$8 sps:$4 sm:$0xff]  }
  0xe8   :  { %2130 = vmatprep.subr.bf16.mxu1 %v3788_v33  ;;  %v3843_v33 = vld [vmem:[%s5327_s4 + $0x7a8] ss:$16 sps:$4 sm:$0xff]   ;;  %2751 = vmatpush1.bf16.msra.mxu0 %v3876_v32 }
  0xeb   :  { %2131 = vmatpush1.bf16.msra.mxu1 %v3786_v34  ;;  %v3848_v34 = vld [vmem:[%s5327_s4 + $0x7cc] ss:$16 sps:$4 sm:$0xff]  }
  0xec   :  { %2132 = vmatprep.subr.bf16.mxu1 %v3791_v35  ;;  %v3881_v35 = vld [vmem:[%s5332_s8 + $0x94] ss:$8 sps:$4 sm:$0xff]  }
  0xed   :  { %2752 = vmatprep.subr.bf16.mxu0 %v3881_v35 }
  0xef   :  { %2133 = vmatpush1.bf16.msra.mxu1 %v3789_v36  ;;  %v3879_v36 = vld [vmem:[%s5332_s8 + $0x90] ss:$8 sps:$4 sm:$0xff]  }
  0xf0   :  { %2134 = vmatprep.subr.bf16.mxu1 %v3794_v2  ;;  %v3846_v2 = vld [vmem:[%s5327_s4 + $0x7c8] ss:$16 sps:$4 sm:$0xff]   ;;  %2753 = vmatpush1.bf16.msra.mxu0 %v3879_v36 }
  0xf3   :  { %2135 = vmatpush1.bf16.msra.mxu1 %v3792_v51  ;;  %v3851_v51 = vld [vmem:[%s5327_s4 + $0x7ec] ss:$16 sps:$4 sm:$0xff]  }
  0xf4   :  { %2136 = vmatprep.subr.bf16.mxu1 %v3797_v12  ;;  %v3884_v12 = vld [vmem:[%s5332_s8 + $0xa4] ss:$8 sps:$4 sm:$0xff]  }
  0xf5   :  { %2754 = vmatprep.subr.bf16.mxu0 %v3884_v12 }
  0xf7   :  { %2137 = vmatpush1.bf16.msra.mxu1 %v3795_v37  ;;  %v3882_v37 = vld [vmem:[%s5332_s8 + $0xa0] ss:$8 sps:$4 sm:$0xff]  }
  0xf8   :  { %2138 = vmatprep.subr.bf16.mxu1 %v3800_v39  ;;  %v3849_v39 = vld [vmem:[%s5327_s4 + $0x7e8] ss:$16 sps:$4 sm:$0xff]   ;;  %2755 = vmatpush1.bf16.msra.mxu0 %v3882_v37 }
  0xfb   :  { %2139 = vmatpush1.bf16.msra.mxu1 %v3798_v40  ;;  %v3887_v40 = vld [vmem:[%s5332_s8 + $0xb4] ss:$8 sps:$4 sm:$0xff]  }
  0xfc   :  { %2140 = vmatprep.subr.bf16.mxu1 %v3803_v41  ;;  %v3885_v41 = vld [vmem:[%s5332_s8 + $0xb0] ss:$8 sps:$4 sm:$0xff]   ;;  %2756 = vmatprep.subr.bf16.mxu0 %v3887_v40  ;;  %v5130_v40 = vld [vmem:[%s5334_s6] sm:$0xf] }
  0xfd   :  { %2757 = vmatpush1.bf16.msra.mxu0 %v3885_v41  ;;  %v5135_v41 = vld [vmem:[%s5335_s7] sm:$0xf] }
  0xff   :  { %2141 = vmatpush1.bf16.msra.mxu1 %v3801_v4  ;;  %v3890_v4 = vld [vmem:[%s5332_s8 + $0xc4] ss:$8 sps:$4 sm:$0xff]  }
 0x100   :  { %2151 = vmatprep.subr.bf16.mxu1 %v3806_v42  ;;  %v3888_v42 = vld [vmem:[%s5332_s8 + $0xc0] ss:$8 sps:$4 sm:$0xff]   ;;  %2758 = vmatprep.subr.bf16.mxu0 %v3890_v4  ;;  %v2284_v4 = vrot.slane %v5130_v40, %v4197_v52 }
 0x101   :  { %2759 = vmatpush1.bf16.msra.mxu0 %v3888_v42 }
 0x102   :  { %2143 = vmatmul.mubr.bf16.vlgmr.msra.gmra.mrb[4].mxu1 %v4614_v5  ;;  %v3815_v5 = vld [vmem:[%s5327_s4 + $0x66c] ss:$16 sps:$4 sm:$0xff]  }
 0x103   :  { %2152 = vmatpush1.bf16.msra.mxu1 %v3804_v58  ;;  %2183 = vmatprep.mubr.bf16.mxu1 %v4628_v11  ;;  %v3813_v11 = vld [vmem:[%s5327_s4 + $0x668] ss:$16 sps:$4 sm:$0xff]   ;;  %v3893_v58 = vld [vmem:[%s5332_s8 + $0xd4] ss:$8 sps:$4 sm:$0xff]  }
 0x104   :  { %2153 = vmatprep.subr.bf16.mxu1 %v3809_v8  ;;  %v3891_v8 = vld [vmem:[%s5332_s8 + $0xd0] ss:$8 sps:$4 sm:$0xff]   ;;  %2760 = vmatprep.subr.bf16.mxu0 %v3893_v58  ;;  %v2288_v58 = vrot.slane %v5130_v40, %v4191_v50 }
 0x105   :  { %2761 = vmatpush1.bf16.msra.mxu0 %v3891_v8 }
 0x107   :  { %2154 = vmatpush1.bf16.msra.mxu1 %v3807_v43  ;;  %v3894_v43 = vld [vmem:[%s5332_s8 + $0xe0] ss:$8 sps:$4 sm:$0xff]  }
 0x108   :  { %2155 = vmatprep.subr.bf16.mxu1 %v3812_v45  ;;  %v3899_v45 = vld [vmem:[%s5332_s8 + $0xf4] ss:$8 sps:$4 sm:$0xff]  }
 0x10b   :  { %2156 = vmatpush1.bf16.msra.mxu1 %v3810_v47  ;;  %v3897_v47 = vld [vmem:[%s5332_s8 + $0xf0] ss:$8 sps:$4 sm:$0xff]  }
 0x10c   :  { %2157 = vmatprep.subr.bf16.mxu1 %v3815_v5  ;;  %v3902_v5 = vld [vmem:[%s5332_s8 + $0x104] ss:$8 sps:$4 sm:$0xff]  }
 0x10f   :  { %2158 = vmatpush1.bf16.msra.mxu1 %v3813_v11  ;;  %v5115_v11 = vld [vmem:[%s5333_s5] sm:$0xf] }
 0x110   :  { %2159 = vmatprep.subr.bf16.mxu1 %v3818_v49  ;;  %v567_v49 = vrot.slane %v5115_v11, %v4197_v52 }
 0x113   :  { %2160 = vmatpush1.bf16.msra.mxu1 %v3816_v53  ;;  %v571_v53 = vrot.slane %v5115_v11, %v4191_v50 }
 0x114   :  { %2161 = vmatprep.subr.bf16.mxu1 %v3821_v57 }
 0x115   :  { %v4957_v63 = vpop.f32.mrb[0].mxu1 }
 0x116   :  { %v4962_v38 = vpop.f32.mrb[1].mxu1  ;;  %v1899_v57 = vadd.f32 %v4957_v63, %v567_v49 }
 0x117   :  { %v1902_v7 = vpop.f32.mrb[2].mxu1  ;;  %2162 = vmatpush1.bf16.msra.mxu1 %v3819_v60  ;;  %v1901_v60 = vadd.f32 %v4962_v38, %v571_v53 }
 0x118   :  { %v1903_v10 = vpop.f32.mrb[3].mxu1  ;;  %2163 = vmatprep.subr.bf16.mxu1 %v3824_v62 }
 0x11b   :  { %2164 = vmatpush1.bf16.msra.mxu1 %v3822_v9 }
 0x11c   :  { %2165 = vmatprep.subr.bf16.mxu1 %v3827_v48 }
 0x11f   :  { %2166 = vmatpush1.bf16.msra.mxu1 %v3825_v17 }
 0x120   :  { %2167 = vmatprep.subr.bf16.mxu1 %v3830_v15 }
 0x123   :  { %2168 = vmatpush1.bf16.msra.mxu1 %v3828_v19 }
 0x124   :  { %2169 = vmatprep.subr.bf16.mxu1 %v3833_v6 }
 0x127   :  { %2170 = vmatpush1.bf16.msra.mxu1 %v3831_v27 }
 0x128   :  { %2171 = vmatprep.subr.bf16.mxu1 %v3836_v22 }
 0x12b   :  { %2172 = vmatpush1.bf16.msra.mxu1 %v3834_v44 }
 0x12c   :  { %2173 = vmatprep.subr.bf16.mxu1 %v3839_v23 }
 0x12f   :  { %2174 = vmatpush1.bf16.msra.mxu1 %v3837_v26 }
 0x130   :  { %2175 = vmatprep.subr.bf16.mxu1 %v3842_v28 }
 0x133   :  { %2176 = vmatpush1.bf16.msra.mxu1 %v3840_v30 }
 0x134   :  { %2177 = vmatprep.subr.bf16.mxu1 %v3845_v31 }
 0x137   :  { %2178 = vmatpush1.bf16.msra.mxu1 %v3843_v33 }
 0x138   :  { %2179 = vmatprep.subr.bf16.mxu1 %v3848_v34 }
 0x13b   :  { %2180 = vmatpush1.bf16.msra.mxu1 %v3846_v2 }
 0x13c   :  { %2181 = vmatprep.subr.bf16.mxu1 %v3851_v51 }
 0x13f   :  { %2182 = vmatpush1.bf16.msra.mxu1 %v3849_v39 }
 0x142   :  { %2184 = vmatmul.mubr.bf16.vlgmr.msra.gmra.mrb[4].mxu1 %v4812_v18  ;;  %v3896_v18 = vld [vmem:[%s5332_s8 + $0xe4] ss:$8 sps:$4 sm:$0xff]  }
 0x143   :  { %2762 = vmatprep.subr.bf16.mxu0 %v3896_v18 }
 0x144   :  { %2763 = vmatpush1.bf16.msra.mxu0 %v3894_v43  ;;  %v2309_v43 = vrot.slane %v5135_v41, %v4197_v52 }
 0x145   :  { %2764 = vmatprep.subr.bf16.mxu0 %v3899_v45 }
 0x148   :  { %2765 = vmatpush1.bf16.msra.mxu0 %v3897_v47  ;;  %v2313_v47 = vrot.slane %v5135_v41, %v4191_v50 }
 0x149   :  { %2775 = vmatprep.subr.bf16.mxu0 %v3902_v5 }
 0x196   :  { %v2021_v62 = vpop.f32.mrb[0].mxu0 }
 0x197   :  { %v3431_v0 = vadd.f32 %v2021_v62, %v1899_v57  ;;  %v2023_v3 = vpop.f32.mrb[1].mxu0 }
 0x198   :  { %v3433_v7 = vadd.f32 %v2023_v3, %v1901_v60  ;;  %v2025_v9 = vpop.f32.mrb[2].mxu0  ;;  %v3900_v3 = vld [vmem:[%s5332_s8 + $0x100] ss:$8 sps:$4 sm:$0xff]  }
 0x199   :  { %v2195_v10 = vsel %vm2194_vm9, %v3431_v0, 0.0  ;;  %v2026_v48 = vpop.f32.mrb[3].mxu0  ;;  %v3905_v9 = vld [vmem:[%s5332_s8 + $0x114] ss:$8 sps:$4 sm:$0xff]  }
 0x19a   :  { %v2196_v13 = vrot.slane %v2195_v10, 4  ;;  %v2202_v16 = vsel %vm2194_vm9, %v3433_v7, 0.0  ;;  %v3908_v48 = vld [vmem:[%s5332_s8 + $0x124] ss:$8 sps:$4 sm:$0xff]  }
 0x19b   :  { %v2203_v17 = vrot.slane %v2202_v16, 4 }
 0x19c   :  { %v2197_v15 = vadd.f32 %v2196_v13, %v2195_v10  ;;  %v3903_v10 = vld [vmem:[%s5332_s8 + $0x110] ss:$8 sps:$4 sm:$0xff]   ;;  %v3906_v13 = vld [vmem:[%s5332_s8 + $0x120] ss:$8 sps:$4 sm:$0xff]  }
 0x19d   :  { %v2204_v1 = vadd.f32 %v2203_v17, %v2202_v16  ;;  %v3911_v16 = vld [vmem:[%s5332_s8 + $0x134] ss:$8 sps:$4 sm:$0xff]   ;;  %v3909_v17 = vld [vmem:[%s5332_s8 + $0x130] ss:$8 sps:$4 sm:$0xff]  }
 0x19e   :  { %v2198_v56 = vrot.slane %v2197_v15, 2 }
 0x19f   :  { %v2205_v19 = vrot.slane %v2204_v1, 2 }
 0x1a0   :  { %v2199_v63 = vadd.f32 %v2198_v56, %v2197_v15  ;;  %v3914_v15 = vld [vmem:[%s5332_s8 + $0x144] ss:$8 sps:$4 sm:$0xff]   ;;  %v3917_v56 = vld [vmem:[%s5332_s8 + $0x154] ss:$8 sps:$4 sm:$0xff]  }
 0x1a1   :  { %v2206_v6 = vadd.f32 %v2205_v19, %v2204_v1  ;;  %v3912_v1 = vld [vmem:[%s5332_s8 + $0x140] ss:$8 sps:$4 sm:$0xff]   ;;  %v3915_v19 = vld [vmem:[%s5332_s8 + $0x150] ss:$8 sps:$4 sm:$0xff]  }
 0x1a2   :  { %v2200_v38 = vrot.slane %v2199_v63, 1 }
 0x1a3   :  { %v2207_v20 = vrot.slane %v2206_v6, 1 }
 0x1a4   :  { %v2201_v21 = vadd.f32 %v2200_v38, %v2199_v63  ;;  %v3920_v63 = vld [vmem:[%s5332_s8 + $0x164] ss:$8 sps:$4 sm:$0xff]   ;;  %v3923_v38 = vld [vmem:[%s5332_s8 + $0x174] ss:$8 sps:$4 sm:$0xff]  }
 0x1a5   :  { %v2208_v27 = vadd.f32 %v2207_v20, %v2206_v6  ;;  %v3918_v6 = vld [vmem:[%s5332_s8 + $0x160] ss:$8 sps:$4 sm:$0xff]   ;;  %v3921_v20 = vld [vmem:[%s5332_s8 + $0x170] ss:$8 sps:$4 sm:$0xff]  }
 0x1a6   :  { %v2224_v22 = vmul.f32 0.5, %v2201_v21  ;;  %v3926_v21 = vld [vmem:[%s5332_s8 + $0x184] ss:$8 sps:$4 sm:$0xff]  }
 0x1a7   :  { %v2225_v59 = vmul.f32 0.5, %v2208_v27  ;;  %v3924_v27 = vld [vmem:[%s5332_s8 + $0x180] ss:$8 sps:$4 sm:$0xff]  }
 0x1a8   :  { %v2228_v46 = vsub.f32 %v3431_v0, %v2224_v22  ;;  %v3929_v22 = vld [vmem:[%s5332_s8 + $0x194] ss:$8 sps:$4 sm:$0xff]  }
 0x1a9   :  { %v2229_v44 = vsub.f32 %v3433_v7, %v2225_v59  ;;  %v3927_v59 = vld [vmem:[%s5332_s8 + $0x190] ss:$8 sps:$4 sm:$0xff]  }
 0x1aa   :  { %v2232_v23 = vmul.f32 %v2228_v46, %v2228_v46 }
 0x1ab   :  { %v2233_v24 = vmul.f32 %v2229_v44, %v2229_v44 }
 0x1ac   :  { %v2236_v25 = vsel %vm2194_vm9, %v2232_v23, 0.0  ;;  %v3935_v23 = vld [vmem:[%s5332_s8 + $0x1b4] ss:$8 sps:$4 sm:$0xff]  }
 0x1ad   :  { %v2237_v26 = vrot.slane %v2236_v25, 4  ;;  %v2243_v28 = vsel %vm2194_vm9, %v2233_v24, 0.0  ;;  %v3933_v24 = vld [vmem:[%s5332_s8 + $0x1b0] ss:$8 sps:$4 sm:$0xff]  }
 0x1ae   :  { %v2244_v29 = vrot.slane %v2243_v28, 4 }
 0x1af   :  { %v2238_v14 = vadd.f32 %v2237_v26, %v2236_v25  ;;  %v3938_v25 = vld [vmem:[%s5332_s8 + $0x1c4] ss:$8 sps:$4 sm:$0xff]   ;;  %v3936_v26 = vld [vmem:[%s5332_s8 + $0x1c0] ss:$8 sps:$4 sm:$0xff]  }
 0x1b0   :  { %v2245_v30 = vadd.f32 %v2244_v29, %v2243_v28  ;;  %v3941_v28 = vld [vmem:[%s5332_s8 + $0x1d4] ss:$8 sps:$4 sm:$0xff]   ;;  %v3939_v29 = vld [vmem:[%s5332_s8 + $0x1d0] ss:$8 sps:$4 sm:$0xff]  }
 0x1b1   :  { %v2239_v31 = vrot.slane %v2238_v14, 2 }
 0x1b2   :  { %v2246_v61 = vrot.slane %v2245_v30, 2 }
 0x1b3   :  { %v2240_v32 = vadd.f32 %v2239_v31, %v2238_v14  ;;  %v3944_v14 = vld [vmem:[%s5332_s8 + $0x1e4] ss:$8 sps:$4 sm:$0xff]   ;;  %v3947_v31 = vld [vmem:[%s5332_s8 + $0x1f4] ss:$8 sps:$4 sm:$0xff]  }
 0x1b4   :  { %v2247_v33 = vadd.f32 %v2246_v61, %v2245_v30  ;;  %v3942_v30 = vld [vmem:[%s5332_s8 + $0x1e0] ss:$8 sps:$4 sm:$0xff]   ;;  %v3945_v61 = vld [vmem:[%s5332_s8 + $0x1f0] ss:$8 sps:$4 sm:$0xff]  }
 0x1b5   :  { %v2241_v34 = vrot.slane %v2240_v32, 1 }
 0x1b6   :  { %v2248_v35 = vrot.slane %v2247_v33, 1 }
 0x1b7   :  { %v2242_v36 = vadd.f32 %v2241_v34, %v2240_v32  ;;  %v575_v32 = vrot.slane %v5115_v11, %v4206_v55 }
 0x1b8   :  { %v2249_v2 = vadd.f32 %v2248_v35, %v2247_v33  ;;  %v579_v33 = vrot.slane %v5115_v11, %v4203_v54 }
 0x1b9   :  { %v2264_v51 = vmul.f32 0.5, %v2242_v36 }
 0x1ba   :  { %v2265_v12 = vmul.f32 0.5, %v2249_v2 }
 0x1bb   :  { %v2268_v37 = vadd.f32 1e-05, %v2264_v51 }
 0x1bc   :  { %v2269_v39 = vadd.f32 1e-05, %v2265_v12 }
 0x1bd   :  { %3964 = vrsqrt.f32 %v2268_v37 }
 0x1be   :  { %3966 = vrsqrt.f32 %v2269_v39 }
 0x1c7   :  { %v3965_v42 = vpop.eup %3964 }
 0x1c8   :  { %v3967_v8 = vpop.eup %3966  ;;  %v2276_v18 = vmul.f32 %v3965_v42, %v2228_v46  ;;  %v3932_v46 = vld [vmem:[%s5332_s8 + $0x1a4] ss:$8 sps:$4 sm:$0xff]  }
 0x1c9   :  { %v2277_v45 = vmul.f32 %v3967_v8, %v2229_v44  ;;  %v3930_v44 = vld [vmem:[%s5332_s8 + $0x1a0] ss:$8 sps:$4 sm:$0xff]  }
 0x1ca   :  { %v2301_v5 = vmul.f32 %v2284_v4, %v2276_v18 }
 0x1cb   :  { %v2302_v49 = vmul.f32 %v2288_v58, %v2277_v45 }
 0x1cc   :  { %v2326_v53 = vadd.f32 %v2309_v43, %v2301_v5 }
 0x1cd   :  { %v2327_v57 = vadd.f32 %v2313_v47, %v2302_v49 }
 0x1ce   :  { %v2330_v60 = vmax.f32 %v2326_v53, 0.0 }
 0x1cf   :  { %v2331_v62 = vmax.f32 %v2327_v57, 0.0 }
 0x1d0   :  { %v2334_v7 = vpack.c.bf16 %v2330_v60, %v2330_v60 }
 0x1d1   :  { %v2335_v0 = vpack.c.bf16 %v2331_v62, %v2331_v62 }
 0x1d3   :  { %2766 = vmatprep.mubr.bf16.mxu0 %v2335_v0 }
 0x1d4   :  { %2767 = vmatmul.mubr.bf16.vlgmr.msra.gmra.mrb[4].mxu0 %v2334_v7 }
 0x1d5   :  { %2776 = vmatpush1.bf16.msra.mxu0 %v3900_v3 }
 0x1d6   :  { %2777 = vmatprep.subr.bf16.mxu0 %v3905_v9 }
 0x1d9   :  { %2778 = vmatpush1.bf16.msra.mxu0 %v3903_v10 }
 0x1da   :  { %2779 = vmatprep.subr.bf16.mxu0 %v3908_v48 }
 0x1dd   :  { %2780 = vmatpush1.bf16.msra.mxu0 %v3906_v13 }
 0x1de   :  { %2781 = vmatprep.subr.bf16.mxu0 %v3911_v16 }
 0x1e1   :  { %2782 = vmatpush1.bf16.msra.mxu0 %v3909_v17 }
 0x1e2   :  { %2783 = vmatprep.subr.bf16.mxu0 %v3914_v15 }
 0x1e5   :  { %2784 = vmatpush1.bf16.msra.mxu0 %v3912_v1 }
 0x1e6   :  { %2785 = vmatprep.subr.bf16.mxu0 %v3917_v56 }
 0x1e9   :  { %2786 = vmatpush1.bf16.msra.mxu0 %v3915_v19 }
 0x1ea   :  { %2787 = vmatprep.subr.bf16.mxu0 %v3920_v63 }
 0x1ed   :  { %2788 = vmatpush1.bf16.msra.mxu0 %v3918_v6 }
 0x1ee   :  { %2789 = vmatprep.subr.bf16.mxu0 %v3923_v38 }
 0x1f1   :  { %2790 = vmatpush1.bf16.msra.mxu0 %v3921_v20 }
 0x1f2   :  { %2791 = vmatprep.subr.bf16.mxu0 %v3926_v21 }
 0x1f5   :  { %2792 = vmatpush1.bf16.msra.mxu0 %v3924_v27 }
 0x1f6   :  { %2793 = vmatprep.subr.bf16.mxu0 %v3929_v22 }
 0x1f9   :  { %2794 = vmatpush1.bf16.msra.mxu0 %v3927_v59 }
 0x1fa   :  { %2795 = vmatprep.subr.bf16.mxu0 %v3932_v46  ;;  %v2292_v46 = vrot.slane %v5130_v40, %v4206_v55 }
 0x1fd   :  { %2796 = vmatpush1.bf16.msra.mxu0 %v3930_v44 }
 0x1fe   :  { %2797 = vmatprep.subr.bf16.mxu0 %v3935_v23  ;;  %v2296_v23 = vrot.slane %v5130_v40, %v4203_v54  ;;  %v3948_v40 = vld [vmem:[%s5336_s12 + $0x40] sm:$0xff]  }
 0x1ff   :  { %3408 = vmatprep.subr.bf16.mxu1 %v3948_v40 }
 0x201   :  { %2798 = vmatpush1.bf16.msra.mxu0 %v3933_v24 }
 0x202   :  { %2799 = vmatprep.subr.bf16.mxu0 %v3938_v25 }
 0x205   :  { %2800 = vmatpush1.bf16.msra.mxu0 %v3936_v26  ;;  %v2317_v26 = vrot.slane %v5135_v41, %v4206_v55  ;;  %v3949_v55 = vld [vmem:[%s5336_s12] sm:$0xff]  }
 0x206   :  { %2801 = vmatprep.subr.bf16.mxu0 %v3941_v28  ;;  %3409 = vmatpush3.bf16.msra.mxu1 %v3949_v55  ;;  %v2816_v55 = vld [vmem:[%s5338_s10] sm:$0x3] }
 0x209   :  { %2802 = vmatpush1.bf16.msra.mxu0 %v3939_v29  ;;  %v2321_v29 = vrot.slane %v5135_v41, %v4203_v54  ;;  %v3950_v54 = vld [vmem:[%s5336_s12 + $0x48] sm:$0xff]  }
 0x20a   :  { %2803 = vmatprep.subr.bf16.mxu0 %v3944_v14  ;;  %v3951_v41 = vld [vmem:[%s5336_s12 + $0x8] sm:$0xff]   ;;  %3410 = vmatprep.subr.bf16.mxu1 %v3950_v54  ;;  %v2817_v54 = vld [vmem:[%s5339_s11] sm:$0x3] }
 0x20b   :  { %3411 = vmatpush3.bf16.msra.mxu1 %v3951_v41  ;;  %v2864_v41 = vrot.slane %v2816_v55, %v4197_v52 }
 0x20d   :  { %2804 = vmatpush1.bf16.msra.mxu0 %v3942_v30 }
 0x20e   :  { %2805 = vmatprep.subr.bf16.mxu0 %v3947_v31 }
 0x211   :  { %2806 = vmatpush1.bf16.msra.mxu0 %v3945_v61 }
 0x215   :  { %v2185_v34 = vpop.f32.mrb[4].mxu1 }
 0x216   :  { %v3434_v35 = vadd.f32 %v2185_v34, %v575_v32  ;;  %v2187_v36 = vpop.f32.mrb[5].mxu1 }
 0x217   :  { %v3435_v2 = vadd.f32 %v2187_v36, %v579_v33  ;;  %v2189_v51 = vpop.f32.mrb[6].mxu1  ;;  %v3952_v36 = vld [vmem:[%s5336_s12 + $0x50] sm:$0xff]  }
 0x218   :  { %v2209_v12 = vsel %vm2194_vm9, %v3434_v35, 0.0  ;;  %v2190_v37 = vpop.f32.mrb[7].mxu1  ;;  %3412 = vmatprep.subr.bf16.mxu1 %v3952_v36  ;;  %v3954_v51 = vld [vmem:[%s5336_s12 + $0x58] sm:$0xff]  }
 0x219   :  { %v2210_v39 = vrot.slane %v2209_v12, 4  ;;  %v2216_v4 = vsel %vm2194_vm9, %v3435_v2, 0.0  ;;  %v3956_v37 = vld [vmem:[%s5336_s12 + $0x60] sm:$0xff]  }
 0x21a   :  { %v2217_v42 = vrot.slane %v2216_v4, 4 }
 0x21b   :  { %v2211_v58 = vadd.f32 %v2210_v39, %v2209_v12  ;;  %v3955_v12 = vld [vmem:[%s5336_s12 + $0x18] sm:$0xff]   ;;  %v3957_v39 = vld [vmem:[%s5336_s12 + $0x20] sm:$0xff]  }
 0x21c   :  { %v2218_v8 = vadd.f32 %v2217_v42, %v2216_v4  ;;  %v3958_v4 = vld [vmem:[%s5336_s12 + $0x68] sm:$0xff]  }
 0x21d   :  { %v2212_v18 = vrot.slane %v2211_v58, 2  ;;  %v3959_v42 = vld [vmem:[%s5336_s12 + $0x28] sm:$0xff]  }
 0x21e   :  { %v2219_v43 = vrot.slane %v2218_v8, 2 }
 0x21f   :  { %v2213_v45 = vadd.f32 %v2212_v18, %v2211_v58  ;;  %v3960_v58 = vld [vmem:[%s5336_s12 + $0x70] sm:$0xff]   ;;  %v3962_v18 = vld [vmem:[%s5336_s12 + $0x78] sm:$0xff]  }
 0x220   :  { %v2220_v47 = vadd.f32 %v2219_v43, %v2218_v8  ;;  %v3961_v8 = vld [vmem:[%s5336_s12 + $0x30] sm:$0xff]   ;;  %v3963_v43 = vld [vmem:[%s5336_s12 + $0x38] sm:$0xff]  }
 0x221   :  { %v2214_v5 = vrot.slane %v2213_v45, 1 }
 0x222   :  { %v2221_v11 = vrot.slane %v2220_v47, 1 }
 0x223   :  { %v2215_v49 = vadd.f32 %v2214_v5, %v2213_v45  ;;  %v2402_v45 = vld [vmem:[%s5337_s9] sm:$0x3] }
 0x224   :  { %v2222_v53 = vadd.f32 %v2221_v11, %v2220_v47  ;;  %v2407_v47 = vrot.slane %v2402_v45, %v4197_v52  ;;  %v2411_v5 = vrot.slane %v2402_v45, %v4191_v50 }
 0x225   :  { %v2226_v57 = vmul.f32 0.5, %v2215_v49 }
 0x226   :  { %v2227_v60 = vmul.f32 0.5, %v2222_v53 }
 0x227   :  { %v2230_v62 = vsub.f32 %v3434_v35, %v2226_v57 }
 0x228   :  { %v2231_v0 = vsub.f32 %v3435_v2, %v2227_v60  ;;  %v3953_v2 = vld [vmem:[%s5336_s12 + $0x10] sm:$0xff]  }
 0x229   :  { %v2234_v3 = vmul.f32 %v2230_v62, %v2230_v62  ;;  %3413 = vmatpush3.bf16.msra.mxu1 %v3953_v2  ;;  %v2868_v2 = vrot.slane %v2816_v55, %v4191_v50 }
 0x22a   :  { %v2235_v7 = vmul.f32 %v2231_v0, %v2231_v0  ;;  %3414 = vmatprep.subr.bf16.mxu1 %v3954_v51 }
 0x22b   :  { %v2250_v9 = vsel %vm2194_vm9, %v2234_v3, 0.0 }
 0x22c   :  { %v2251_v10 = vrot.slane %v2250_v9, 4  ;;  %v2257_v48 = vsel %vm2194_vm9, %v2235_v7, 0.0 }
 0x22d   :  { %v2258_v13 = vrot.slane %v2257_v48, 4  ;;  %3415 = vmatpush3.bf16.msra.mxu1 %v3955_v12 }
 0x22e   :  { %v2252_v16 = vadd.f32 %v2251_v10, %v2250_v9  ;;  %3416 = vmatprep.subr.bf16.mxu1 %v3956_v37  ;;  %v2877_v37 = vrot.slane %v2817_v54, %v4197_v52 }
 0x22f   :  { %v2259_v17 = vadd.f32 %v2258_v13, %v2257_v48 }
 0x230   :  { %v2253_v15 = vrot.slane %v2252_v16, 2 }
 0x231   :  { %v2260_v1 = vrot.slane %v2259_v17, 2  ;;  %3417 = vmatpush3.bf16.msra.mxu1 %v3957_v39 }
 0x232   :  { %v2254_v56 = vadd.f32 %v2253_v15, %v2252_v16  ;;  %3418 = vmatprep.subr.bf16.mxu1 %v3958_v4  ;;  %v2881_v4 = vrot.slane %v2817_v54, %v4191_v50 }
 0x233   :  { %v2261_v19 = vadd.f32 %v2260_v1, %v2259_v17 }
 0x234   :  { %v2255_v63 = vrot.slane %v2254_v56, 1 }
 0x235   :  { %v2262_v6 = vrot.slane %v2261_v19, 1  ;;  %3419 = vmatpush3.bf16.msra.mxu1 %v3959_v42 }
 0x236   :  { %v2256_v38 = vadd.f32 %v2255_v63, %v2254_v56  ;;  %3420 = vmatprep.subr.bf16.mxu1 %v3960_v58 }
 0x237   :  { %v2263_v20 = vadd.f32 %v2262_v6, %v2261_v19 }
 0x238   :  { %v2266_v21 = vmul.f32 0.5, %v2256_v38 }
 0x239   :  { %v2267_v27 = vmul.f32 0.5, %v2263_v20  ;;  %3421 = vmatpush3.bf16.msra.mxu1 %v3961_v8 }
 0x23a   :  { %v2270_v22 = vadd.f32 1e-05, %v2266_v21  ;;  %3422 = vmatprep.subr.bf16.mxu1 %v3962_v18 }
 0x23b   :  { %v2271_v59 = vadd.f32 1e-05, %v2267_v27 }
 0x23c   :  { %3968 = vrsqrt.f32 %v2270_v22 }
 0x23d   :  { %3970 = vrsqrt.f32 %v2271_v59  ;;  %3423 = vmatpush3.bf16.msra.mxu1 %v3963_v43 }
 0x246   :  { %v3969_v44 = vpop.eup %3968 }
 0x247   :  { %v3971_v24 = vpop.eup %3970  ;;  %v2278_v25 = vmul.f32 %v3969_v44, %v2230_v62 }
 0x248   :  { %v2279_v28 = vmul.f32 %v3971_v24, %v2231_v0 }
 0x249   :  { %v2303_v14 = vmul.f32 %v2292_v46, %v2278_v25 }
 0x24a   :  { %v2304_v30 = vmul.f32 %v2296_v23, %v2279_v28 }
 0x24b   :  { %v2328_v31 = vadd.f32 %v2317_v26, %v2303_v14 }
 0x24c   :  { %v2329_v61 = vadd.f32 %v2321_v29, %v2304_v30 }
 0x24d   :  { %v2332_v32 = vmax.f32 %v2328_v31, 0.0 }
 0x24e   :  { %v2333_v33 = vmax.f32 %v2329_v61, 0.0 }
 0x24f   :  { %v2336_v35 = vpack.c.bf16 %v2332_v32, %v2332_v32 }
 0x250   :  { %v2337_v34 = vpack.c.bf16 %v2333_v33, %v2333_v33 }
 0x252   :  { %2807 = vmatprep.mubr.bf16.mxu0 %v2337_v34 }
 0x253   :  { %2808 = vmatmul.mubr.bf16.vlgmr.msra.gmra.mrb[4].mxu0 %v2336_v35 }
 0x326   :  { %v2809_v11 = vpop.f32.mrb[4].mxu0 }
 0x327   :  { %v3436_v49 = vadd.f32 %v2809_v11, %v2407_v47  ;;  %v2811_v53 = vpop.f32.mrb[5].mxu0 }
 0x328   :  { %v3437_v57 = vadd.f32 %v2811_v53, %v2411_v5  ;;  %v2813_v60 = vpop.f32.mrb[6].mxu0 }
 0x329   :  { %v2818_v62 = vsel %vm2194_vm9, %v3436_v49, 0.0  ;;  %v2814_v0 = vpop.f32.mrb[7].mxu0 }
 0x32a   :  { %v2819_v3 = vrot.slane %v2818_v62, 4  ;;  %v2825_v7 = vsel %vm2194_vm9, %v3437_v57, 0.0 }
 0x32b   :  { %v2826_v9 = vrot.slane %v2825_v7, 4 }
 0x32c   :  { %v2820_v10 = vadd.f32 %v2819_v3, %v2818_v62 }
 0x32d   :  { %v2827_v48 = vadd.f32 %v2826_v9, %v2825_v7 }
 0x32e   :  { %v2821_v13 = vrot.slane %v2820_v10, 2 }
 0x32f   :  { %v2828_v16 = vrot.slane %v2827_v48, 2 }
 0x330   :  { %v2822_v17 = vadd.f32 %v2821_v13, %v2820_v10 }
 0x331   :  { %v2829_v15 = vadd.f32 %v2828_v16, %v2827_v48 }
 0x332   :  { %v2823_v1 = vrot.slane %v2822_v17, 1 }
 0x333   :  { %v2830_v56 = vrot.slane %v2829_v15, 1 }
 0x334   :  { %v2824_v19 = vadd.f32 %v2823_v1, %v2822_v17 }
 0x335   :  { %v2831_v63 = vadd.f32 %v2830_v56, %v2829_v15 }
 0x336   :  { %v2832_v6 = vmul.f32 0.5, %v2824_v19 }
 0x337   :  { %v2833_v38 = vmul.f32 0.5, %v2831_v63 }
 0x338   :  { %v2834_v20 = vsub.f32 %v3436_v49, %v2832_v6  ;;  %v3391_v49 = vld [vmem:[%s5340_s13] ss:$0 sm:$0xff] }
 0x339   :  { %v2835_v21 = vsub.f32 %v3437_v57, %v2833_v38 }
 0x33a   :  { %v2836_v27 = vmul.f32 %v2834_v20, %v2834_v20 }
 0x33b   :  { %v2837_v22 = vmul.f32 %v2835_v21, %v2835_v21 }
 0x33c   :  { %v2838_v59 = vsel %vm2194_vm9, %v2836_v27, 0.0 }
 0x33d   :  { %v2839_v46 = vrot.slane %v2838_v59, 4  ;;  %v2845_v44 = vsel %vm2194_vm9, %v2837_v22, 0.0 }
 0x33e   :  { %v2846_v23 = vrot.slane %v2845_v44, 4 }
 0x33f   :  { %v2840_v24 = vadd.f32 %v2839_v46, %v2838_v59 }
 0x340   :  { %v2847_v25 = vadd.f32 %v2846_v23, %v2845_v44 }
 0x341   :  { %v2841_v26 = vrot.slane %v2840_v24, 2 }
 0x342   :  { %v2848_v28 = vrot.slane %v2847_v25, 2 }
 0x343   :  { %v2842_v29 = vadd.f32 %v2841_v26, %v2840_v24 }
 0x344   :  { %v2849_v14 = vadd.f32 %v2848_v28, %v2847_v25 }
 0x345   :  { %v2843_v30 = vrot.slane %v2842_v29, 1 }
 0x346   :  { %v2850_v31 = vrot.slane %v2849_v14, 1 }
 0x347   :  { %v2844_v61 = vadd.f32 %v2843_v30, %v2842_v29 }
 0x348   :  { %v2851_v32 = vadd.f32 %v2850_v31, %v2849_v14 }
 0x349   :  { %v2852_v33 = vmul.f32 0.5, %v2844_v61 }
 0x34a   :  { %v2853_v34 = vmul.f32 0.5, %v2851_v32 }
 0x34b   :  { %v2854_v35 = vadd.f32 1e-05, %v2852_v33 }
 0x34c   :  { %v2855_v40 = vadd.f32 1e-05, %v2853_v34 }
 0x34d   :  { %3972 = vrsqrt.f32 %v2854_v35 }
 0x34e   :  { %3974 = vrsqrt.f32 %v2855_v40 }
 0x357   :  { %v3973_v36 = vpop.eup %3972 }
 0x358   :  { %v3975_v51 = vpop.eup %3974  ;;  %v2858_v12 = vmul.f32 %v3973_v36, %v2834_v20 }
 0x359   :  { %v2859_v39 = vmul.f32 %v3975_v51, %v2835_v21 }
 0x35a   :  { %v2871_v42 = vmul.f32 %v2864_v41, %v2858_v12 }
 0x35b   :  { %v2872_v58 = vmul.f32 %v2868_v2, %v2859_v39 }
 0x35c   :  { %v2884_v8 = vadd.f32 %v2877_v37, %v2871_v42 }
 0x35d   :  { %v2885_v18 = vadd.f32 %v2881_v4, %v2872_v58 }
 0x35e   :  { %v2886_v43 = vmax.f32 %v2884_v8, 0.0 }
 0x35f   :  { %v2887_v45 = vmax.f32 %v2885_v18, 0.0 }
 0x360   :  { %v2888_v5 = vpack.c.bf16 %v2886_v43, %v2886_v43 }
 0x361   :  { %v2889_v47 = vpack.c.bf16 %v2887_v45, %v2887_v45 }
 0x363   :  { %3057 = vmatprep.mubr.bf16.mxu1 %v2889_v47 }
 0x364   :  { %3058 = vmatmul.mubr.bf16.vlgmr.msra.gmra.mrb[8].mxu1 %v2888_v5 }
 0x437   :  { %v3424_v11 = vpop.f32.mrb[8].mxu1 }
 0x438   :  { %v3425_v53 = vpop.f32.mrb[9].mxu1 }
 0x439   :  { %v3426_v52 = vadd.f32 %v3425_v53, %v3424_v11  ;;  %v3427_v57 = vpop.f32.mrb[10].mxu1 }
 0x43a   :  { %v3428_v50 = vpop.f32.mrb[11].mxu1 }
 0x43b   :  { %v3060_v60 = vadd.f32 %v3426_v52, %v3391_v49 }
 0x43d   :  { %3066 = vst.msk [vmem:[%s5341_s14] sm:$0x3] %vm3065_vm10, %v3060_v60 }

// kernel: pointnetfeat_forward.18
= control target key start
LH: loop header
LB: loop body
LE: loop exit
PB: predicated region body
PF: predicated region fallthrough
CT: control target
= control target key end

     0   :  { %s1066_s21 = smov 0   ;;  %s1068_s22 = smov 0   ;;  %s1202_s0 = inlined_call_operand.vmem [shape: bf16[2,64,64], index: 0, kind: input, shape index: {}]   ;;  %s1203_s1 = inlined_call_operand.vmem [shape: bf16[2,64,64], index: 1, kind: input, shape index: {}]   ;;  %s1204_s2 = inlined_call_operand.vmem [shape: f32[1,64], index: 2, kind: input, shape index: {}]   ;;  %s1205_s3 = inlined_call_operand.vmem [shape: f32[1,64], index: 3, kind: input, shape index: {}]   ;;  %s1206_s4 = inlined_call_operand.vmem [shape: bf16[2,64,64], index: 4, kind: output, shape index: {0}]   ;;  %s1207_s5 = inlined_call_operand.vmem [shape: f32[2,1,64], index: 5, kind: output, shape index: {1}]   ;;  %s1208_s6 = inlined_call_operand.vmem [shape: f32[2,64,64], index: 6, kind: output, shape index: {2}]  }
   0x1   :  { %s1070_s23 = smov 0  }
   0x2 LB: > { %s29_s24 = sadd.s32 1, %s1024_s22  ;;  %p875_p0 = scmp.ge.s32.totalorder %s1028_s23, 1  ;;  %s1028_s23 = sphi %s1070_s23, %s17_s23   ;;  %s1024_s22 = sphi %s1068_s22, %s1210_s22   ;;  %s1020_s21 = sphi %s1066_s21, %s1209_s21  }
   0x3   : > { %p31_p1 = scmp.ge.s32.totalorder %s29_s24, 2  ;;  %p248_p2 = scmp.lt.s32.totalorder %s1028_s23, 3 }
   0x5   : > { %s1212_s24 = smov (%p31_p1, %s29_s24), 0  ;;  %p249_p3 = pnand %p875_p0, %p248_p2 }
   0x6   : > { %p300_p4 = scmp.lt.s32.totalorder (!%p249_p3), %s1020_s21, 1  ;;  %vm554_vm0 = vcmask (!%p249_p3), 516096   ;;  %v1030_v0 = vmov (!%p249_p3), 0.0   ;;  %vm393_vm1 = vcmask (!%p249_p3), 523264   ;;  %v896_v9 = vld [vmem:[%s1204_s2] ss:$0 sm:$0xff] (!%p249_p3) }
   0x7   : > { %252 = sbr.rel (%p249_p3) target bundleno = 590 (0x24e), region = 36  ;;  %v897_v11 = vld [vmem:[%s1205_s3] ss:$0 sm:$0xff] (!%p249_p3)  ;;  %vm541_vm2 = vcmask (!%p249_p3), 519168  }
   0xe   : > { %s1214_s21 = smov (!%p300_p4, %s1020_s21), 1 }
   0xf   : > { %s1084_s25 = sshll.u32 %s1214_s21, 5  ;;  %s1089_s28 = scalar_lea.vmem %s1207_s5, %s1214_s21 }
  0x10   : > { %s313_s7 = scalar_lea.vmem %s1203_s1, %s1084_s25  ;;  %555 = vst.msk [vmem:[%s1089_s28] sm:$0x1] %vm554_vm0, %v1030_v0  ;;  %s915_s8 = sshll.u32 %s1214_s21, 6 }
  0x11   : > { %v998_v1 = vld [vmem:[%s313_s7] sm:$0xff]   ;;  %s1100_s11 = scalar_lea.vmem %s1208_s6, %s915_s8  ;;  %v999_v2 = vld [vmem:[%s313_s7 + $0x8] sm:$0xff]   ;;  %s307_s14 = scalar_lea.vmem %s1202_s0, %s1084_s25  ;;  %v1000_v3 = vld [vmem:[%s313_s7 + $0x10] sm:$0xff]  }
  0x12   : > { %940 = vmatprep.subr.bf16.mxu0 %v998_v1  ;;  %556 = vst.msk [vmem:[%s1100_s11] sm:$0xff] %vm393_vm1, %v1030_v0  ;;  %557 = vst.msk [vmem:[%s1100_s11 + $0x8] sm:$0xff] %vm393_vm1, %v1030_v0  ;;  %v1002_v4 = vld [vmem:[%s307_s14] sm:$0xff]   ;;  %v1001_v5 = vld [vmem:[%s313_s7 + $0x18] sm:$0xff]   ;;  %s1136_s21 = scalar_lea.vmem %s1206_s4, %s1084_s25 }
  0x13   : > { %558 = vst.msk [vmem:[%s1100_s11 + $0x10] sm:$0xff] %vm393_vm1, %v1030_v0  ;;  %559 = vst.msk [vmem:[%s1100_s11 + $0x18] sm:$0xff] %vm393_vm1, %v1030_v0  ;;  %941 = vmatpush3.bf16.msra.mxu0 %v998_v1  ;;  %948 = vmatprep.mubr.msk.bf16.mxu0 %vm393_vm1, %v1002_v4  ;;  %v1003_v6 = vld [vmem:[%s307_s14 + $0x8] sm:$0xff]   ;;  %v1004_v7 = vld [vmem:[%s307_s14 + $0x10] sm:$0xff]  }
  0x14   : > { %560 = vst.msk [vmem:[%s1100_s11 + $0x20] sm:$0xff] %vm393_vm1, %v1030_v0  ;;  %561 = vst.msk [vmem:[%s1100_s11 + $0x28] sm:$0xff] %vm393_vm1, %v1030_v0  ;;  %942 = vmatprep.subr.bf16.mxu0 %v999_v2  ;;  %v1005_v8 = vld [vmem:[%s307_s14 + $0x18] sm:$0xff]  }
  0x15   : > { %562 = vst.msk [vmem:[%s1100_s11 + $0x30] sm:$0xff] %vm393_vm1, %v1030_v0  ;;  %563 = vst.msk [vmem:[%s1100_s11 + $0x38] sm:$0xff] %vm393_vm1, %v1030_v0 }
  0x17   : > { %943 = vmatpush3.bf16.msra.mxu0 %v999_v2 }
  0x18   : > { %944 = vmatprep.subr.bf16.mxu0 %v1000_v3 }
  0x1b   : > { %945 = vmatpush3.bf16.msra.mxu0 %v1000_v3 }
  0x1c   : > { %946 = vmatprep.subr.bf16.mxu0 %v1001_v5 }
  0x1f   : > { %947 = vmatpush3.bf16.msra.mxu0 %v1001_v5 }
  0x22   : > { %949 = vmatmul.mubr.msk.bf16.vlgmr.msra.gmra.mrb[0].mxu0 %vm393_vm1, %v1003_v6 }
  0x23   : > { %952 = vmatprep.mubr.msk.bf16.mxu0 %vm393_vm1, %v1004_v7 }
  0x2a   : > { %953 = vmatmul.mubr.msk.bf16.gmra.mrb[4].mxu0 %vm393_vm1, %v1005_v8 }
  0xf5   : > { %v950_v10 = vpop.f32.mrb[0].mxu0 }
  0xf6   : > { %v480_v12 = vmul.f32 %v950_v10, %v896_v9  ;;  %v440_v13 = vpop.f32.mrb[1].mxu0 }
  0xf7   : > { %v478_v14 = vmul.f32 %v896_v9, %v440_v13  ;;  %v951_v15 = vpop.f32.mrb[2].mxu0 }
  0xf8   : > { %v495_v16 = vadd.f32 %v897_v11, %v480_v12  ;;  %v481_v17 = vmul.f32 %v951_v15, %v896_v9  ;;  %v443_v18 = vpop.f32.mrb[3].mxu0 }
  0xf9   : > { %v493_v19 = vadd.f32 %v897_v11, %v478_v14  ;;  %v479_v20 = vmul.f32 %v896_v9, %v443_v18 }
  0xfa   : > { %v503_v21 = vmax.f32 %v495_v16, 0.0  ;;  %v496_v22 = vadd.f32 %v897_v11, %v481_v17 }
  0xfb   : > { %v501_v23 = vmax.f32 %v493_v19, 0.0  ;;  %v494_v24 = vadd.f32 %v897_v11, %v479_v20  ;;  %v564_v19 = vld [vmem:[%s1089_s28] sm:$0x1] }
  0xfc   : > { %v918_v25 = vpack.c.bf16 %v503_v21, %v503_v21  ;;  %v504_v26 = vmax.f32 %v496_v22, 0.0 }
  0xfd   : > { %v916_v27 = vpack.c.bf16 %v501_v23, %v501_v23  ;;  %v502_v28 = vmax.f32 %v494_v24, 0.0  ;;  %v954_v29 = vpop.f32.mrb[4].mxu0 }
  0xfe   : > { %544 = vst.msk [vmem:[%s1136_s21 + $0x8] sm:$0xf] %vm541_vm2, %v918_v25  ;;  %v510_v30 = vpack.c.bf16 %v504_v26, %v503_v21  ;;  %v919_v31 = vpack.c.bf16 %v504_v26, %v504_v26  ;;  %v484_v32 = vmul.f32 %v954_v29, %v896_v9  ;;  %v456_v33 = vpop.f32.mrb[5].mxu0  ;;  %v599_v26 = vld [vmem:[%s1100_s11 + $0x10] sm:$0xff]  ;;  %v600_v29 = vld [vmem:[%s1100_s11 + $0x18] sm:$0xff] }
  0xff   : > { %542 = vst.msk [vmem:[%s1136_s21] sm:$0xf] %vm541_vm2, %v916_v27  ;;  %v509_v34 = vpack.c.bf16 %v502_v28, %v501_v23  ;;  %v917_v35 = vpack.c.bf16 %v502_v28, %v502_v28  ;;  %v482_v36 = vmul.f32 %v896_v9, %v456_v33  ;;  %v955_v37 = vpop.f32.mrb[6].mxu0  ;;  %v597_v27 = vld [vmem:[%s1100_s11] sm:$0xff] }
 0x100   : > { %545 = vst.msk [vmem:[%s1136_s21 + $0xc] sm:$0xf] %vm541_vm2, %v919_v31  ;;  %v567_v38 = vunpack.c.l.bf16 %v510_v30  ;;  %v499_v39 = vadd.f32 %v897_v11, %v484_v32  ;;  %v485_v40 = vmul.f32 %v955_v37, %v896_v9  ;;  %v459_v41 = vpop.f32.mrb[7].mxu0  ;;  %v568_v46 = vunpack.c.h.bf16 %v510_v30  ;;  %v598_v32 = vld [vmem:[%s1100_s11 + $0x8] sm:$0xff] }
 0x101   : > { %543 = vst.msk [vmem:[%s1136_s21 + $0x4] sm:$0xf] %vm541_vm2, %v917_v35  ;;  %v565_v42 = vunpack.c.l.bf16 %v509_v34  ;;  %v566_v43 = vunpack.c.h.bf16 %v509_v34  ;;  %v497_v44 = vadd.f32 %v897_v11, %v482_v36  ;;  %v483_v45 = vmul.f32 %v896_v9, %v459_v41  ;;  %605 = vxpose.xlu0.c.b16.start [1/4] (short) (narrow) %v509_v34, 64  ;;  %956 = vmatprep.subr.bf16.mxu1 %v509_v34  ;;  %v604_v41 = vld [vmem:[%s1100_s11 + $0x38] sm:$0xff] }
 0x102   : > { %v507_v47 = vmax.f32 %v499_v39, 0.0  ;;  %v500_v48 = vadd.f32 %v897_v11, %v485_v40  ;;  %957 = vmatpush3.bf16.msra.mxu1 %v509_v34  ;;  %v576_v56 = vsel %vm393_vm1, %v567_v38, 0.0  ;;  %v578_v62 = vsel %vm393_vm1, %v568_v46, 0.0  ;;  %v603_v38 = vld [vmem:[%s1100_s11 + $0x30] sm:$0xff]  ;;  %v601_v39 = vld [vmem:[%s1100_s11 + $0x20] sm:$0xff] }
 0x103   : > { %v573_v49 = vsel %vm393_vm1, %v565_v42, 0.0  ;;  %v574_v50 = vsel %vm393_vm1, %v566_v43, 0.0  ;;  %v505_v51 = vmax.f32 %v497_v44, 0.0  ;;  %v498_v52 = vadd.f32 %v897_v11, %v483_v45  ;;  %958 = vmatprep.subr.bf16.mxu1 %v510_v30  ;;  %v602_v44 = vld [vmem:[%s1100_s11 + $0x28] sm:$0xff] }
 0x104   : > { %v575_v53 = vadd.f32 %v574_v50, %v573_v49  ;;  %v922_v54 = vpack.c.bf16 %v507_v47, %v507_v47  ;;  %v508_v55 = vmax.f32 %v500_v48, 0.0 }
 0x105   : > { %v920_v57 = vpack.c.bf16 %v505_v51, %v505_v51  ;;  %v506_v58 = vmax.f32 %v498_v52, 0.0  ;;  %606 = vxpose.xlu0.c.b16.cont [2/4] (short) (narrow) %v510_v30, 64 }
 0x106   : > { %v577_v59 = vadd.f32 %v576_v56, %v575_v53  ;;  %548 = vst.msk [vmem:[%s1136_s21 + $0x18] sm:$0xf] %vm541_vm2, %v922_v54  ;;  %v512_v60 = vpack.c.bf16 %v508_v55, %v507_v47  ;;  %v923_v61 = vpack.c.bf16 %v508_v55, %v508_v55  ;;  %959 = vmatpush3.bf16.msra.mxu1 %v510_v30 }
 0x107   : > { %546 = vst.msk [vmem:[%s1136_s21 + $0x10] sm:$0xf] %vm541_vm2, %v920_v57  ;;  %v511_v63 = vpack.c.bf16 %v506_v58, %v505_v51  ;;  %v921_v0 = vpack.c.bf16 %v506_v58, %v506_v58 }
 0x108   : > { %549 = vst.msk [vmem:[%s1136_s21 + $0x1c] sm:$0xf] %vm541_vm2, %v923_v61  ;;  %v579_v1 = vadd.f32 %v578_v62, %v577_v59  ;;  %v571_v4 = vunpack.c.l.bf16 %v512_v60  ;;  %v572_v7 = vunpack.c.h.bf16 %v512_v60 }
 0x109   : > { %547 = vst.msk [vmem:[%s1136_s21 + $0x14] sm:$0xf] %vm541_vm2, %v921_v0  ;;  %v569_v2 = vunpack.c.l.bf16 %v511_v63  ;;  %v570_v3 = vunpack.c.h.bf16 %v511_v63  ;;  %607 = vxpose.xlu0.c.b16.cont [3/4] (short) (narrow) %v511_v63, 64  ;;  %960 = vmatprep.subr.bf16.mxu1 %v511_v63 }
 0x10a   : > { %961 = vmatpush3.bf16.msra.mxu1 %v511_v63  ;;  %v584_v10 = vsel %vm393_vm1, %v571_v4, 0.0  ;;  %v586_v12 = vsel %vm393_vm1, %v572_v7, 0.0 }
 0x10b   : > { %v580_v5 = vsel %vm393_vm1, %v569_v2, 0.0  ;;  %962 = vmatprep.subr.bf16.mxu1 %v512_v60  ;;  %v582_v8 = vsel %vm393_vm1, %v570_v3, 0.0 }
 0x10c   : > { %v581_v6 = vadd.f32 %v580_v5, %v579_v1 }
 0x10d   : > { %608 = vxpose.xlu0.c.b16.end [4/4] (short) (narrow) %v512_v60, 64 }
 0x10e   : > { %v583_v9 = vadd.f32 %v582_v8, %v581_v6  ;;  %963 = vmatpush3.bf16.msra.mxu1 %v512_v60 }
 0x110   : > { %v585_v11 = vadd.f32 %v584_v10, %v583_v9 }
 0x112   : > { %v587_v13 = vadd.f32 %v586_v12, %v585_v11 }
 0x114   : > { %v588_v14 = vrot.slane %v587_v13, 4 }
 0x116   : > { %v589_v15 = vadd.f32 %v588_v14, %v587_v13 }
 0x118   : > { %v590_v16 = vrot.slane %v589_v15, 2 }
 0x11a   : > { %v591_v17 = vadd.f32 %v590_v16, %v589_v15 }
 0x11c   : > { %v592_v18 = vrot.slane %v591_v17, 1 }
 0x11e   : > { %v593_v20 = vadd.f32 %v592_v18, %v591_v17 }
 0x120   : > { %v594_v21 = vadd.f32 %v593_v20, %v564_v19 }
 0x122   : > { %596 = vst.msk [vmem:[%s1089_s28] sm:$0x1] %vm554_vm0, %v594_v21 }
 0x167   : > { %v613_v22 = vpop.trf.xlu0 }
 0x168   : > { %964 = vmatprep.mubr.msk.bf16.mxu1 %vm393_vm1, %v613_v22 }
 0x16b   : > { %v614_v23 = vpop.trf.xlu0 }
 0x16c   : > { %965 = vmatmul.mubr.msk.bf16.vlgmr.msra.gmra.mrb[0].mxu1 %vm393_vm1, %v614_v23 }
 0x16f   : > { %v615_v24 = vpop.trf.xlu0 }
 0x170   : > { %968 = vmatprep.mubr.msk.bf16.mxu1 %vm393_vm1, %v615_v24 }
 0x173   : > { %v616_v25 = vpop.trf.xlu0 }
 0x174   : > { %969 = vmatmul.mubr.msk.bf16.gmra.mrb[4].mxu1 %vm393_vm1, %v616_v25 }
 0x23f   : > { %v966_v28 = vpop.f32.mrb[0].mxu1 }
 0x240   : > { %v700_v30 = vadd.f32 %v966_v28, %v599_v26  ;;  %v667_v31 = vpop.f32.mrb[1].mxu1 }
 0x241   : > { %v698_v33 = vadd.f32 %v667_v31, %v597_v27  ;;  %v967_v34 = vpop.f32.mrb[2].mxu1 }
 0x242   : > { %708 = vst.msk [vmem:[%s1100_s11 + $0x10] sm:$0xff] %vm393_vm1, %v700_v30  ;;  %v701_v35 = vadd.f32 %v967_v34, %v600_v29  ;;  %v670_v36 = vpop.f32.mrb[3].mxu1 }
 0x243   : > { %706 = vst.msk [vmem:[%s1100_s11] sm:$0xff] %vm393_vm1, %v698_v33  ;;  %v699_v37 = vadd.f32 %v670_v36, %v598_v32 }
 0x244   : > { %709 = vst.msk [vmem:[%s1100_s11 + $0x18] sm:$0xff] %vm393_vm1, %v701_v35 }
 0x245   : > { %707 = vst.msk [vmem:[%s1100_s11 + $0x8] sm:$0xff] %vm393_vm1, %v699_v37 }
 0x247   : > { %v970_v40 = vpop.f32.mrb[4].mxu1 }
 0x248   : > { %v704_v42 = vadd.f32 %v970_v40, %v603_v38  ;;  %v683_v43 = vpop.f32.mrb[5].mxu1 }
 0x249   : > { %v702_v45 = vadd.f32 %v683_v43, %v601_v39  ;;  %v971_v46 = vpop.f32.mrb[6].mxu1 }
 0x24a   : > { %712 = vst.msk [vmem:[%s1100_s11 + $0x30] sm:$0xff] %vm393_vm1, %v704_v42  ;;  %v705_v47 = vadd.f32 %v971_v46, %v604_v41  ;;  %v686_v48 = vpop.f32.mrb[7].mxu1 }
 0x24b   : > { %710 = vst.msk [vmem:[%s1100_s11 + $0x20] sm:$0xff] %vm393_vm1, %v702_v45  ;;  %v703_v49 = vadd.f32 %v686_v48, %v602_v44 }
 0x24c   : > { %713 = vst.msk [vmem:[%s1100_s11 + $0x38] sm:$0xff] %vm393_vm1, %v705_v47 }
 0x24d   : > { %711 = vst.msk [vmem:[%s1100_s11 + $0x28] sm:$0xff] %vm393_vm1, %v703_v49 }
 0x24e PF: > { %s17_s23 = sadd.s32 1, %s1028_s23   ;;  %s1209_s21 = smov %s1024_s22 }
 0x24f   : > { %p14_p5 = scmp.ge.s32.totalorder %s17_s23, 4   ;;  %s1210_s22 = smov %s1212_s24 }
 0x251   :  { %16 = sbr.rel (!%p14_p5) target bundleno = 2 (0x2), region = 97 }

// kernel: pointnetfeat_forward.17
= control target key start
LH: loop header
LB: loop body
LE: loop exit
PB: predicated region body
PF: predicated region fallthrough
CT: control target
= control target key end

     0   :  { %v54_v37 = vlaneseq  ;;  %v8340_v38 = vmov 1983009808   ;;  %v8341_v61 = vmov 0   ;;  %vm2193_vm9 = vcmask 1041408   ;;  %s11428_s4 = inlined_call_operand.vmem [shape: bf16[1024,512], index: 4, kind: input, shape index: {}]   ;;  %s11429_s2 = inlined_call_operand.vmem [shape: f32[1,1024], index: 2, kind: input, shape index: {}]   ;;  %s11430_s0 = inlined_call_operand.vmem [shape: f32[2,1024], index: 0, kind: input, shape index: {}]   ;;  %s11431_s1 = inlined_call_operand.vmem [shape: f32[2,1024], index: 1, kind: input, shape index: {}]   ;;  %s11432_s3 = inlined_call_operand.vmem [shape: f32[1,1024], index: 3, kind: input, shape index: {}]   ;;  %s11433_s8 = inlined_call_operand.vmem [shape: bf16[512,256], index: 8, kind: input, shape index: {}]   ;;  %s11434_s5 = inlined_call_operand.vmem [shape: f32[1,512], index: 5, kind: input, shape index: {}]   ;;  %s11435_s12 = inlined_call_operand.vmem [shape: bf16[256,4096], index: 12, kind: input, shape index: {}]   ;;  %s11436_s6 = inlined_call_operand.vmem [shape: f32[1,512], index: 6, kind: input, shape index: {}]   ;;  %s11437_s7 = inlined_call_operand.vmem [shape: f32[1,512], index: 7, kind: input, shape index: {}]   ;;  %s11438_s9 = inlined_call_operand.vmem [shape: f32[1,256], index: 9, kind: input, shape index: {}]   ;;  %s11439_s10 = inlined_call_operand.vmem [shape: f32[1,256], index: 10, kind: input, shape index: {}]   ;;  %s11440_s11 = inlined_call_operand.vmem [shape: f32[1,256], index: 11, kind: input, shape index: {}]   ;;  %s11441_s13 = inlined_call_operand.vmem [shape: f32[1,4096], index: 13, kind: input, shape index: {}]   ;;  %s11442_s14 = inlined_call_operand.vmem [shape: f32[2,4096], index: 14, kind: output, shape index: {}]  }
   0x1   :  { %v7841_v0 = vld [vmem:[%s11428_s4 + $0x4] ss:$16 sps:$4 sm:$0xff]   ;;  %v7843_v1 = vld [vmem:[%s11428_s4 + $0xc] ss:$16 sps:$4 sm:$0xff]   ;;  %v7845_v2 = vld [vmem:[%s11428_s4] ss:$16 sps:$4 sm:$0xff]   ;;  %v98_v39 = vunpack.c.l.s4 %v8340_v38 }
   0x2   :  { %1863 = vmatprep.subr.bf16.mxu0 %v7841_v0  ;;  %v7846_v3 = vld [vmem:[%s11428_s4 + $0x8] ss:$16 sps:$4 sm:$0xff]   ;;  %2027 = vmatprep.subr.bf16.mxu1 %v7843_v1  ;;  %v7847_v4 = vld [vmem:[%s11428_s4 + $0x24] ss:$16 sps:$4 sm:$0xff]   ;;  %v7849_v5 = vld [vmem:[%s11428_s4 + $0x2c] ss:$16 sps:$4 sm:$0xff]  }
   0x3   :  { %1864 = vmatpush1.bf16.msra.mxu0 %v7845_v2  ;;  %2028 = vmatpush1.bf16.msra.mxu1 %v7846_v3  ;;  %v7851_v6 = vld [vmem:[%s11428_s4 + $0x20] ss:$16 sps:$4 sm:$0xff]   ;;  %v7852_v7 = vld [vmem:[%s11428_s4 + $0x28] ss:$16 sps:$4 sm:$0xff]   ;;  %v7853_v8 = vld [vmem:[%s11428_s4 + $0x44] ss:$16 sps:$4 sm:$0xff]   ;;  %v99_v45 = vunpack.c.0.s8 %v98_v39 }
   0x4   :  { %1865 = vmatprep.subr.bf16.mxu0 %v7847_v4  ;;  %2029 = vmatprep.subr.bf16.mxu1 %v7849_v5  ;;  %v7855_v9 = vld [vmem:[%s11428_s4 + $0x4c] ss:$16 sps:$4 sm:$0xff]   ;;  %v7857_v10 = vld [vmem:[%s11428_s4 + $0x40] ss:$16 sps:$4 sm:$0xff]   ;;  %v7858_v11 = vld [vmem:[%s11428_s4 + $0x48] ss:$16 sps:$4 sm:$0xff]  }
   0x5   :  { %v7859_v12 = vld [vmem:[%s11428_s4 + $0x64] ss:$16 sps:$4 sm:$0xff]   ;;  %v7861_v13 = vld [vmem:[%s11428_s4 + $0x6c] ss:$16 sps:$4 sm:$0xff]   ;;  %v7863_v14 = vld [vmem:[%s11428_s4 + $0x60] ss:$16 sps:$4 sm:$0xff]  }
   0x6   :  { %v7864_v15 = vld [vmem:[%s11428_s4 + $0x68] ss:$16 sps:$4 sm:$0xff]   ;;  %v7865_v16 = vld [vmem:[%s11428_s4 + $0x84] ss:$16 sps:$4 sm:$0xff]   ;;  %v7867_v17 = vld [vmem:[%s11428_s4 + $0x8c] ss:$16 sps:$4 sm:$0xff]  }
   0x7   :  { %1866 = vmatpush1.bf16.msra.mxu0 %v7851_v6  ;;  %2030 = vmatpush1.bf16.msra.mxu1 %v7852_v7  ;;  %v7869_v18 = vld [vmem:[%s11428_s4 + $0x80] ss:$16 sps:$4 sm:$0xff]   ;;  %v7870_v19 = vld [vmem:[%s11428_s4 + $0x88] ss:$16 sps:$4 sm:$0xff]   ;;  %v7871_v20 = vld [vmem:[%s11428_s4 + $0xa4] ss:$16 sps:$4 sm:$0xff]  }
   0x8   :  { %1867 = vmatprep.subr.bf16.mxu0 %v7853_v8  ;;  %2031 = vmatprep.subr.bf16.mxu1 %v7855_v9  ;;  %v7873_v21 = vld [vmem:[%s11428_s4 + $0xac] ss:$16 sps:$4 sm:$0xff]   ;;  %v7875_v22 = vld [vmem:[%s11428_s4 + $0xa0] ss:$16 sps:$4 sm:$0xff]   ;;  %v7876_v23 = vld [vmem:[%s11428_s4 + $0xa8] ss:$16 sps:$4 sm:$0xff]  }
   0x9   :  { %v7877_v24 = vld [vmem:[%s11428_s4 + $0xc4] ss:$16 sps:$4 sm:$0xff]   ;;  %v7879_v25 = vld [vmem:[%s11428_s4 + $0xcc] ss:$16 sps:$4 sm:$0xff]   ;;  %v7881_v26 = vld [vmem:[%s11428_s4 + $0xc0] ss:$16 sps:$4 sm:$0xff]  }
   0xa   :  { %v7882_v27 = vld [vmem:[%s11428_s4 + $0xc8] ss:$16 sps:$4 sm:$0xff]   ;;  %v7883_v28 = vld [vmem:[%s11428_s4 + $0xe4] ss:$16 sps:$4 sm:$0xff]   ;;  %v7885_v29 = vld [vmem:[%s11428_s4 + $0xec] ss:$16 sps:$4 sm:$0xff]  }
   0xb   :  { %1868 = vmatpush1.bf16.msra.mxu0 %v7857_v10  ;;  %2032 = vmatpush1.bf16.msra.mxu1 %v7858_v11  ;;  %v7887_v30 = vld [vmem:[%s11428_s4 + $0xe0] ss:$16 sps:$4 sm:$0xff]   ;;  %v7888_v31 = vld [vmem:[%s11428_s4 + $0xe8] ss:$16 sps:$4 sm:$0xff]   ;;  %v7889_v32 = vld [vmem:[%s11428_s4 + $0x104] ss:$16 sps:$4 sm:$0xff]  }
   0xc   :  { %1869 = vmatprep.subr.bf16.mxu0 %v7859_v12  ;;  %2033 = vmatprep.subr.bf16.mxu1 %v7861_v13  ;;  %v7891_v33 = vld [vmem:[%s11428_s4 + $0x10c] ss:$16 sps:$4 sm:$0xff]   ;;  %v7893_v34 = vld [vmem:[%s11428_s4 + $0x100] ss:$16 sps:$4 sm:$0xff]   ;;  %v7894_v35 = vld [vmem:[%s11428_s4 + $0x108] ss:$16 sps:$4 sm:$0xff]  }
   0xd   :  { %v7895_v36 = vld [vmem:[%s11428_s4 + $0x124] ss:$16 sps:$4 sm:$0xff]   ;;  %v7897_v40 = vld [vmem:[%s11428_s4 + $0x12c] ss:$16 sps:$4 sm:$0xff]   ;;  %v7899_v41 = vld [vmem:[%s11428_s4 + $0x120] ss:$16 sps:$4 sm:$0xff]  }
   0xe   :  { %v7900_v42 = vld [vmem:[%s11428_s4 + $0x128] ss:$16 sps:$4 sm:$0xff]   ;;  %v7901_v43 = vld [vmem:[%s11428_s4 + $0x144] ss:$16 sps:$4 sm:$0xff]   ;;  %v8540_v44 = vshrl.u32 %v54_v37, 7 }
   0xf   :  { %1870 = vmatpush1.bf16.msra.mxu0 %v7863_v14  ;;  %2034 = vmatpush1.bf16.msra.mxu1 %v7864_v15  ;;  %v7903_v46 = vld [vmem:[%s11428_s4 + $0x14c] ss:$16 sps:$4 sm:$0xff]   ;;  %v7905_v47 = vld [vmem:[%s11428_s4 + $0x140] ss:$16 sps:$4 sm:$0xff]   ;;  %v7906_v48 = vld [vmem:[%s11428_s4 + $0x148] ss:$16 sps:$4 sm:$0xff]  }
  0x10   :  { %1871 = vmatprep.subr.bf16.mxu0 %v7865_v16  ;;  %2035 = vmatprep.subr.bf16.mxu1 %v7867_v17  ;;  %v7907_v49 = vld [vmem:[%s11428_s4 + $0x164] ss:$16 sps:$4 sm:$0xff]   ;;  %v8555_v50 = vsub.s32 %v99_v45, %v8540_v44  ;;  %v7909_v51 = vld [vmem:[%s11428_s4 + $0x16c] ss:$16 sps:$4 sm:$0xff]   ;;  %v8561_v52 = vsub.s32 1, %v8540_v44  ;;  %v8569_v54 = vsub.s32 0, %v8540_v44 }
  0x11   :  { %v8566_v53 = vld [vmem:[%s11429_s2] sm:$0xff]  ;;  %v8582_v58 = vsub.s32 3, %v8540_v44  ;;  %v7912_v59 = vld [vmem:[%s11428_s4 + $0x168] ss:$16 sps:$4 sm:$0xff]   ;;  %v7915_v1 = vld [vmem:[%s11428_s4 + $0x18c] ss:$16 sps:$4 sm:$0xff]  }
  0x12   :  { %v7911_v55 = vld [vmem:[%s11428_s4 + $0x160] ss:$16 sps:$4 sm:$0xff]   ;;  %vm48_vm0 = vcmp.ge.f32.partialorder %v8566_v53, 0.0  ;;  %v7913_v60 = vld [vmem:[%s11428_s4 + $0x184] ss:$16 sps:$4 sm:$0xff]   ;;  %v8605_v6 = vsub.s32 2, %v8540_v44  ;;  %v198_v8 = vrot.slane %v8566_v53, %v8561_v52  ;;  %v194_v12 = vrot.slane %v8566_v53, %v8569_v54 }
  0x13   :  { %1872 = vmatpush1.bf16.msra.mxu0 %v7869_v18  ;;  %2036 = vmatpush1.bf16.msra.mxu1 %v7870_v19  ;;  %v49_v56 = vld [vmem:[%s11430_s0] sm:$0xff]  ;;  %v8590_v62 = vsel %vm48_vm0, 1, %v8341_v61  ;;  %v7918_v15 = vld [vmem:[%s11428_s4 + $0x188] ss:$16 sps:$4 sm:$0xff]   ;;  %v7933_v61 = vld [vmem:[%s11428_s4 + $0x1ec] ss:$16 sps:$4 sm:$0xff]  }
  0x14   :  { %1873 = vmatprep.subr.bf16.mxu0 %v7871_v20  ;;  %2037 = vmatprep.subr.bf16.mxu1 %v7873_v21  ;;  %v51_v57 = vld [vmem:[%s11431_s1] sm:$0xff]  ;;  %v96_v63 = vcombine.high %v49_v56, %v49_v56  ;;  %v103_v0 = vrot.slane %v49_v56, %v8555_v50  ;;  %v61_v2 = vrot.slane %v8590_v62, %v8561_v52  ;;  %v7921_v21 = vld [vmem:[%s11428_s4 + $0x1ac] ss:$16 sps:$4 sm:$0xff]  }
  0x15   :  { %v140_v3 = vcombine.high %v51_v57, %v51_v57  ;;  %v147_v4 = vrot.slane %v51_v57, %v8555_v50  ;;  %v8602_v5 = vld [vmem:[%s11432_s3] sm:$0xff]  ;;  %v57_v9 = vrot.slane %v8590_v62, %v8569_v54  ;;  %v69_v13 = vrot.slane %v8590_v62, %v8582_v58  ;;  %v7930_v57 = vld [vmem:[%s11428_s4 + $0x1c8] ss:$16 sps:$4 sm:$0xff]  }
  0x16   :  { %v111_v7 = vcombine.high %v103_v0, %v103_v0  ;;  %vm8611_vm1 = vcmp.eq.s32.totalorder %v61_v2, 1  ;;  %v7917_v14 = vld [vmem:[%s11428_s4 + $0x180] ss:$16 sps:$4 sm:$0xff]   ;;  %v248_v16 = vrot.slane %v8602_v5, %v8561_v52  ;;  %v8632_v18 = vrot.slane %v96_v63, %v8555_v50  ;;  %v7919_v20 = vld [vmem:[%s11428_s4 + $0x1a4] ss:$16 sps:$4 sm:$0xff]  }
  0x17   :  { %1874 = vmatpush1.bf16.msra.mxu0 %v7875_v22  ;;  %2038 = vmatpush1.bf16.msra.mxu1 %v7876_v23  ;;  %v155_v11 = vcombine.high %v147_v4, %v147_v4  ;;  %vm8627_vm2 = vcmp.eq.s32.totalorder %v57_v9, 1  ;;  %v8635_v19 = vrot.slane %v140_v3, %v8555_v50  ;;  %vm8647_vm3 = vcmp.eq.s32.totalorder %v69_v13, 1  ;;  %v7925_v39 = vld [vmem:[%s11428_s4 + $0x1c4] ss:$16 sps:$4 sm:$0xff]   ;;  %v7929_v56 = vld [vmem:[%s11428_s4 + $0x1c0] ss:$16 sps:$4 sm:$0xff]  }
  0x18   :  { %1875 = vmatprep.subr.bf16.mxu0 %v7877_v24  ;;  %2039 = vmatprep.subr.bf16.mxu1 %v7879_v25  ;;  %v182_v23 = vsel %vm8627_vm2, %v103_v0, %v147_v4  ;;  %v65_v25 = vrot.slane %v8590_v62, %v8605_v6  ;;  %v7943_v10 = vld [vmem:[%s11428_s4 + $0x204] ss:$16 sps:$4 sm:$0xff]   ;;  %v8121_v9 = vld [vmem:[%s11428_s4 + $0x5c0] ss:$16 sps:$4 sm:$0xff]  }
  0x19   :  { %v183_v22 = vsel %vm8611_vm1, %v111_v7, %v155_v11  ;;  %v7935_v7 = vld [vmem:[%s11428_s4 + $0x1e0] ss:$16 sps:$4 sm:$0xff]   ;;  %v7946_v11 = vld [vmem:[%s11428_s4 + $0x20c] ss:$16 sps:$4 sm:$0xff]   ;;  %v7949_v17 = vld [vmem:[%s11428_s4 + $0x224] ss:$16 sps:$4 sm:$0xff]  }
  0x1a   :  { %vm8669_vm4 = vcmp.eq.s32.totalorder %v65_v25, 1  ;;  %v7955_v24 = vld [vmem:[%s11428_s4 + $0x244] ss:$16 sps:$4 sm:$0xff]   ;;  %v7958_v25 = vld [vmem:[%s11428_s4 + $0x24c] ss:$16 sps:$4 sm:$0xff]  }
  0x1b   :  { %1876 = vmatpush1.bf16.msra.mxu0 %v7881_v26  ;;  %2040 = vmatpush1.bf16.msra.mxu1 %v7882_v27  ;;  %v7923_v26 = vld [vmem:[%s11428_s4 + $0x1a0] ss:$16 sps:$4 sm:$0xff]   ;;  %v232_v27 = vmul.f32 %v198_v8, %v183_v22  ;;  %v7936_v8 = vld [vmem:[%s11428_s4 + $0x1e8] ss:$16 sps:$4 sm:$0xff]  }
  0x1c   :  { %1877 = vmatprep.subr.bf16.mxu0 %v7883_v28  ;;  %2041 = vmatprep.subr.bf16.mxu1 %v7885_v29  ;;  %v112_v28 = vcombine.high %v8632_v18, %v8632_v18  ;;  %v156_v29 = vcombine.high %v8635_v19, %v8635_v19  ;;  %v7947_v22 = vld [vmem:[%s11428_s4 + $0x220] ss:$16 sps:$4 sm:$0xff]  }
  0x1d   :  { %v282_v37 = vadd.f32 %v248_v16, %v232_v27  ;;  %v7944_v16 = vld [vmem:[%s11428_s4 + $0x208] ss:$16 sps:$4 sm:$0xff]  }
  0x1e   :  { %v185_v38 = vsel %vm8647_vm3, %v112_v28, %v156_v29  ;;  %v7956_v27 = vld [vmem:[%s11428_s4 + $0x248] ss:$16 sps:$4 sm:$0xff]   ;;  %v7961_v28 = vld [vmem:[%s11428_s4 + $0x264] ss:$16 sps:$4 sm:$0xff]   ;;  %v7964_v29 = vld [vmem:[%s11428_s4 + $0x26c] ss:$16 sps:$4 sm:$0xff]  }
  0x1f   :  { %1878 = vmatpush1.bf16.msra.mxu0 %v7887_v30  ;;  %2042 = vmatpush1.bf16.msra.mxu1 %v7888_v31  ;;  %v206_v30 = vrot.slane %v8566_v53, %v8582_v58  ;;  %v8665_v31 = vld [vmem:[%s11430_s0 + $0x8] sm:$0xff] }
  0x20   :  { %1879 = vmatprep.subr.bf16.mxu0 %v7889_v32  ;;  %2043 = vmatprep.subr.bf16.mxu1 %v7891_v33  ;;  %v231_v32 = vmul.f32 %v194_v12, %v182_v23  ;;  %v244_v33 = vrot.slane %v8602_v5, %v8569_v54  ;;  %v7950_v23 = vld [vmem:[%s11428_s4 + $0x228] ss:$16 sps:$4 sm:$0xff]  }
  0x21   :  { %v234_v45 = vmul.f32 %v206_v30, %v185_v38  ;;  %v7959_v30 = vld [vmem:[%s11428_s4 + $0x260] ss:$16 sps:$4 sm:$0xff]   ;;  %v7968_v38 = vld [vmem:[%s11428_s4 + $0x288] ss:$16 sps:$4 sm:$0xff]  }
  0x23   :  { %1880 = vmatpush1.bf16.msra.mxu0 %v7893_v34  ;;  %2044 = vmatpush1.bf16.msra.mxu1 %v7894_v35  ;;  %v7924_v35 = vld [vmem:[%s11428_s4 + $0x1a8] ss:$16 sps:$4 sm:$0xff]  }
  0x24   :  { %1881 = vmatprep.subr.bf16.mxu0 %v7895_v36  ;;  %2045 = vmatprep.subr.bf16.mxu1 %v7897_v40  ;;  %v8679_v36 = vld [vmem:[%s11431_s1 + $0x8] sm:$0xff] }
  0x25   :  { %v7927_v40 = vld [vmem:[%s11428_s4 + $0x1cc] ss:$16 sps:$4 sm:$0xff]  }
  0x27   :  { %1882 = vmatpush1.bf16.msra.mxu0 %v7899_v41  ;;  %2046 = vmatpush1.bf16.msra.mxu1 %v7900_v42  ;;  %v184_v41 = vsel %vm8669_vm4, %v8632_v18, %v8635_v19  ;;  %v8694_v42 = vsub.s32 5, %v8540_v44  ;;  %v8027_v18 = vld [vmem:[%s11428_s4 + $0x3c4] ss:$16 sps:$4 sm:$0xff]   ;;  %v8030_v19 = vld [vmem:[%s11428_s4 + $0x3cc] ss:$16 sps:$4 sm:$0xff]  }
  0x28   :  { %1883 = vmatprep.subr.bf16.mxu0 %v7901_v43  ;;  %2047 = vmatprep.subr.bf16.mxu1 %v7903_v46  ;;  %v290_v43 = vmax.f32 %v282_v37, 0.0  ;;  %v256_v46 = vrot.slane %v8602_v5, %v8582_v58  ;;  %v7965_v37 = vld [vmem:[%s11428_s4 + $0x280] ss:$16 sps:$4 sm:$0xff]  }
  0x2b   :  { %1884 = vmatpush1.bf16.msra.mxu0 %v7905_v47  ;;  %2048 = vmatpush1.bf16.msra.mxu1 %v7906_v48  ;;  %v8700_v47 = vrot.slane %v8665_v31, %v8555_v50  ;;  %v281_v48 = vadd.f32 %v244_v33, %v231_v32  ;;  %v7962_v32 = vld [vmem:[%s11428_s4 + $0x268] ss:$16 sps:$4 sm:$0xff]   ;;  %v7967_v33 = vld [vmem:[%s11428_s4 + $0x284] ss:$16 sps:$4 sm:$0xff]  }
  0x2c   :  { %1885 = vmatprep.subr.bf16.mxu0 %v7907_v49  ;;  %2049 = vmatprep.subr.bf16.mxu1 %v7909_v51  ;;  %v77_v49 = vrot.slane %v8590_v62, %v8694_v42  ;;  %v8706_v51 = vrot.slane %v8679_v36, %v8555_v50 }
  0x2d   :  { %v128_v63 = vcombine.high %v8700_v47, %v8700_v47  ;;  %v289_v3 = vmax.f32 %v281_v48, 0.0  ;;  %v7982_v48 = vld [vmem:[%s11428_s4 + $0x2cc] ss:$16 sps:$4 sm:$0xff]  }
  0x2e   :  { %v172_v0 = vcombine.high %v8706_v51, %v8706_v51  ;;  %vm91_vm5 = vcmp.eq.s32.totalorder %v77_v49, 1  ;;  %v7977_v49 = vld [vmem:[%s11428_s4 + $0x2c0] ss:$16 sps:$4 sm:$0xff]  }
  0x2f   :  { %1886 = vmatpush1.bf16.msra.mxu0 %v7911_v55  ;;  %2050 = vmatpush1.bf16.msra.mxu1 %v7912_v59  ;;  %v8709_v55 = vsub.s32 4, %v8540_v44  ;;  %v298_v59 = vpack.c.bf16 %v290_v43, %v290_v43  ;;  %v7971_v43 = vld [vmem:[%s11428_s4 + $0x2a0] ss:$16 sps:$4 sm:$0xff]  }
  0x30   :  { %1887 = vmatprep.subr.bf16.mxu0 %v7913_v60  ;;  %2051 = vmatprep.subr.bf16.mxu1 %v7915_v1  ;;  %v7931_v60 = vld [vmem:[%s11428_s4 + $0x1e4] ss:$16 sps:$4 sm:$0xff]   ;;  %v284_v1 = vadd.f32 %v256_v46, %v234_v45  ;;  %v8729_v4 = vsel %vm91_vm5, %v128_v63, %v172_v0  ;;  %v7974_v45 = vld [vmem:[%s11428_s4 + $0x2a8] ss:$16 sps:$4 sm:$0xff]   ;;  %v7994_v0 = vld [vmem:[%s11428_s4 + $0x30c] ss:$16 sps:$4 sm:$0xff]  }
  0x31   :  { %1895 = vmatprep.mubr.bf16.mxu0 %v298_v59  ;;  %2059 = vmatprep.mubr.bf16.mxu1 %v298_v59  ;;  %v73_v2 = vrot.slane %v8590_v62, %v8709_v55  ;;  %v7979_v46 = vld [vmem:[%s11428_s4 + $0x2c4] ss:$16 sps:$4 sm:$0xff]   ;;  %v7988_v59 = vld [vmem:[%s11428_s4 + $0x2ec] ss:$16 sps:$4 sm:$0xff]  }
  0x32   :  { %v292_v13 = vmax.f32 %v284_v1, 0.0  ;;  %v7991_v63 = vld [vmem:[%s11428_s4 + $0x304] ss:$16 sps:$4 sm:$0xff]   ;;  %v7989_v1 = vld [vmem:[%s11428_s4 + $0x300] ss:$16 sps:$4 sm:$0xff]  }
  0x33   :  { %1888 = vmatpush1.bf16.msra.mxu0 %v7917_v14  ;;  %2052 = vmatpush1.bf16.msra.mxu1 %v7918_v15  ;;  %vm8737_vm6 = vcmp.eq.s32.totalorder %v73_v2, 1  ;;  %v297_v14 = vpack.c.bf16 %v289_v3, %v289_v3  ;;  %v7941_v15 = vld [vmem:[%s11428_s4 + $0x200] ss:$16 sps:$4 sm:$0xff]   ;;  %v7992_v2 = vld [vmem:[%s11428_s4 + $0x308] ss:$16 sps:$4 sm:$0xff]  }
  0x34   :  { %1889 = vmatprep.subr.bf16.mxu0 %v7919_v20  ;;  %2053 = vmatprep.subr.bf16.mxu1 %v7921_v21  ;;  %v186_v12 = vsel %vm8737_vm6, %v8700_v47, %v8706_v51  ;;  %v7952_v20 = vld [vmem:[%s11428_s4 + $0x22c] ss:$16 sps:$4 sm:$0xff]   ;;  %v300_v21 = vpack.c.bf16 %v292_v13, %v292_v13  ;;  %v7997_v3 = vld [vmem:[%s11428_s4 + $0x324] ss:$16 sps:$4 sm:$0xff]   ;;  %v8124_v47 = vld [vmem:[%s11428_s4 + $0x5c8] ss:$16 sps:$4 sm:$0xff]  }
  0x35   :  { %v8006_v13 = vld [vmem:[%s11428_s4 + $0x34c] ss:$16 sps:$4 sm:$0xff]  }
  0x37   :  { %1890 = vmatpush1.bf16.msra.mxu0 %v7923_v26  ;;  %2054 = vmatpush1.bf16.msra.mxu1 %v7924_v35  ;;  %v7953_v26 = vld [vmem:[%s11428_s4 + $0x240] ss:$16 sps:$4 sm:$0xff]   ;;  %v7970_v35 = vld [vmem:[%s11428_s4 + $0x28c] ss:$16 sps:$4 sm:$0xff]  }
  0x38   :  { %1891 = vmatprep.subr.bf16.mxu0 %v7925_v39  ;;  %2055 = vmatprep.subr.bf16.mxu1 %v7927_v40  ;;  %v7973_v39 = vld [vmem:[%s11428_s4 + $0x2a4] ss:$16 sps:$4 sm:$0xff]   ;;  %v7976_v40 = vld [vmem:[%s11428_s4 + $0x2ac] ss:$16 sps:$4 sm:$0xff]  }
  0x3b   :  { %1892 = vmatpush1.bf16.msra.mxu0 %v7929_v56  ;;  %2056 = vmatpush1.bf16.msra.mxu1 %v7930_v57  ;;  %v7980_v56 = vld [vmem:[%s11428_s4 + $0x2c8] ss:$16 sps:$4 sm:$0xff]   ;;  %v7985_v57 = vld [vmem:[%s11428_s4 + $0x2e4] ss:$16 sps:$4 sm:$0xff]  }
  0x3c   :  { %1893 = vmatprep.subr.bf16.mxu0 %v7931_v60  ;;  %2057 = vmatprep.subr.bf16.mxu1 %v7933_v61  ;;  %v7983_v60 = vld [vmem:[%s11428_s4 + $0x2e0] ss:$16 sps:$4 sm:$0xff]   ;;  %v7986_v61 = vld [vmem:[%s11428_s4 + $0x2e8] ss:$16 sps:$4 sm:$0xff]  }
  0x3f   :  { %1894 = vmatpush1.bf16.msra.mxu0 %v7935_v7  ;;  %2058 = vmatpush1.bf16.msra.mxu1 %v7936_v8  ;;  %v8000_v7 = vld [vmem:[%s11428_s4 + $0x32c] ss:$16 sps:$4 sm:$0xff]   ;;  %v7995_v8 = vld [vmem:[%s11428_s4 + $0x320] ss:$16 sps:$4 sm:$0xff]  }
  0x40   :  { %1904 = vmatprep.subr.bf16.mxu0 %v7943_v10  ;;  %2068 = vmatprep.subr.bf16.mxu1 %v7946_v11  ;;  %v7998_v10 = vld [vmem:[%s11428_s4 + $0x328] ss:$16 sps:$4 sm:$0xff]   ;;  %v8003_v11 = vld [vmem:[%s11428_s4 + $0x344] ss:$16 sps:$4 sm:$0xff]  }
  0x42   :  { %1896 = vmatmul.mubr.bf16.vlgmr.msra.gmra.mrb[0].mxu0 %v297_v14  ;;  %2060 = vmatmul.mubr.bf16.vlgmr.msra.gmra.mrb[0].mxu1 %v297_v14  ;;  %v8001_v14 = vld [vmem:[%s11428_s4 + $0x340] ss:$16 sps:$4 sm:$0xff]  }
  0x43   :  { %1905 = vmatpush1.bf16.msra.mxu0 %v7941_v15  ;;  %2069 = vmatpush1.bf16.msra.mxu1 %v7944_v16  ;;  %v8004_v15 = vld [vmem:[%s11428_s4 + $0x348] ss:$16 sps:$4 sm:$0xff]   ;;  %v8009_v16 = vld [vmem:[%s11428_s4 + $0x364] ss:$16 sps:$4 sm:$0xff]  }
  0x44   :  { %1906 = vmatprep.subr.bf16.mxu0 %v7949_v17  ;;  %2070 = vmatprep.subr.bf16.mxu1 %v7952_v20  ;;  %v8012_v17 = vld [vmem:[%s11428_s4 + $0x36c] ss:$16 sps:$4 sm:$0xff]   ;;  %v8007_v20 = vld [vmem:[%s11428_s4 + $0x360] ss:$16 sps:$4 sm:$0xff]  }
  0x45   :  { %1936 = vmatprep.mubr.bf16.mxu0 %v300_v21  ;;  %2100 = vmatprep.mubr.bf16.mxu1 %v300_v21  ;;  %v8010_v21 = vld [vmem:[%s11428_s4 + $0x368] ss:$16 sps:$4 sm:$0xff]  }
  0x47   :  { %1907 = vmatpush1.bf16.msra.mxu0 %v7947_v22  ;;  %2071 = vmatpush1.bf16.msra.mxu1 %v7950_v23  ;;  %v8015_v22 = vld [vmem:[%s11428_s4 + $0x384] ss:$16 sps:$4 sm:$0xff]   ;;  %v8018_v23 = vld [vmem:[%s11428_s4 + $0x38c] ss:$16 sps:$4 sm:$0xff]  }
  0x48   :  { %1908 = vmatprep.subr.bf16.mxu0 %v7955_v24  ;;  %2072 = vmatprep.subr.bf16.mxu1 %v7958_v25  ;;  %v202_v24 = vrot.slane %v8566_v53, %v8605_v6  ;;  %v8013_v25 = vld [vmem:[%s11428_s4 + $0x380] ss:$16 sps:$4 sm:$0xff]  }
  0x4b   :  { %1909 = vmatpush1.bf16.msra.mxu0 %v7953_v26  ;;  %2073 = vmatpush1.bf16.msra.mxu1 %v7956_v27  ;;  %v8016_v26 = vld [vmem:[%s11428_s4 + $0x388] ss:$16 sps:$4 sm:$0xff]   ;;  %v113_v27 = vcombine.high %v8665_v31, %v8665_v31  ;;  %v233_v31 = vmul.f32 %v202_v24, %v184_v41  ;;  %v8055_v24 = vld [vmem:[%s11428_s4 + $0x460] ss:$16 sps:$4 sm:$0xff]  }
  0x4c   :  { %1910 = vmatprep.subr.bf16.mxu0 %v7961_v28  ;;  %2074 = vmatprep.subr.bf16.mxu1 %v7964_v29  ;;  %v157_v28 = vcombine.high %v8679_v36, %v8679_v36  ;;  %v8021_v29 = vld [vmem:[%s11428_s4 + $0x3a4] ss:$16 sps:$4 sm:$0xff]   ;;  %v252_v36 = vrot.slane %v8602_v5, %v8605_v6 }
  0x4d   :  { %v8938_v34 = vrot.slane %v113_v27, %v8555_v50  ;;  %v8066_v27 = vld [vmem:[%s11428_s4 + $0x48c] ss:$16 sps:$4 sm:$0xff]  }
  0x4e   :  { %v8941_v41 = vrot.slane %v157_v28, %v8555_v50  ;;  %v8061_v28 = vld [vmem:[%s11428_s4 + $0x480] ss:$16 sps:$4 sm:$0xff]  }
  0x4f   :  { %1911 = vmatpush1.bf16.msra.mxu0 %v7959_v30  ;;  %2075 = vmatpush1.bf16.msra.mxu1 %v7962_v32  ;;  %v8024_v30 = vld [vmem:[%s11428_s4 + $0x3ac] ss:$16 sps:$4 sm:$0xff]   ;;  %v214_v32 = vrot.slane %v8566_v53, %v8694_v42  ;;  %v8929_v53 = vsub.s32 7, %v8540_v44 }
  0x50   :  { %1912 = vmatprep.subr.bf16.mxu0 %v7967_v33  ;;  %2076 = vmatprep.subr.bf16.mxu1 %v7970_v35  ;;  %v8019_v33 = vld [vmem:[%s11428_s4 + $0x3a0] ss:$16 sps:$4 sm:$0xff]   ;;  %v8022_v35 = vld [vmem:[%s11428_s4 + $0x3a8] ss:$16 sps:$4 sm:$0xff]  }
  0x53   :  { %1913 = vmatpush1.bf16.msra.mxu0 %v7965_v37  ;;  %2077 = vmatpush1.bf16.msra.mxu1 %v7968_v38  ;;  %v8944_v37 = vsub.s32 6, %v8540_v44  ;;  %v236_v38 = vmul.f32 %v214_v32, %v8729_v4  ;;  %v8025_v44 = vld [vmem:[%s11428_s4 + $0x3c0] ss:$16 sps:$4 sm:$0xff]   ;;  %v8033_v4 = vld [vmem:[%s11428_s4 + $0x3e4] ss:$16 sps:$4 sm:$0xff]  }
  0x54   :  { %1914 = vmatprep.subr.bf16.mxu0 %v7973_v39  ;;  %2078 = vmatprep.subr.bf16.mxu1 %v7976_v40  ;;  %v264_v39 = vrot.slane %v8602_v5, %v8694_v42  ;;  %v85_v40 = vrot.slane %v8590_v62, %v8929_v53  ;;  %v8028_v5 = vld [vmem:[%s11428_s4 + $0x3c8] ss:$16 sps:$4 sm:$0xff]   ;;  %v8072_v32 = vld [vmem:[%s11428_s4 + $0x4ac] ss:$16 sps:$4 sm:$0xff]  }
  0x56   :  { %vm93_vm7 = vcmp.eq.s32.totalorder %v85_v40, 1  ;;  %v8079_v40 = vld [vmem:[%s11428_s4 + $0x4e0] ss:$16 sps:$4 sm:$0xff]  }
  0x57   :  { %1915 = vmatpush1.bf16.msra.mxu0 %v7971_v43  ;;  %2079 = vmatpush1.bf16.msra.mxu1 %v7974_v45  ;;  %v283_v43 = vadd.f32 %v252_v36, %v233_v31  ;;  %v129_v45 = vcombine.high %v8938_v34, %v8938_v34  ;;  %v8067_v31 = vld [vmem:[%s11428_s4 + $0x4a0] ss:$16 sps:$4 sm:$0xff]   ;;  %v8070_v36 = vld [vmem:[%s11428_s4 + $0x4a8] ss:$16 sps:$4 sm:$0xff]  }
  0x58   :  { %1916 = vmatprep.subr.bf16.mxu0 %v7979_v46  ;;  %2080 = vmatprep.subr.bf16.mxu1 %v7982_v48  ;;  %v173_v46 = vcombine.high %v8941_v41, %v8941_v41  ;;  %v81_v48 = vrot.slane %v8590_v62, %v8944_v37  ;;  %v8036_v62 = vld [vmem:[%s11428_s4 + $0x3ec] ss:$16 sps:$4 sm:$0xff]  }
  0x5a   :  { %vm8971_vm8 = vcmp.eq.s32.totalorder %v81_v48, 1  ;;  %v8085_v48 = vld [vmem:[%s11428_s4 + $0x500] ss:$16 sps:$4 sm:$0xff]  }
  0x5b   :  { %1917 = vmatpush1.bf16.msra.mxu0 %v7977_v49  ;;  %2081 = vmatpush1.bf16.msra.mxu1 %v7980_v56  ;;  %v8969_v49 = vsel %vm93_vm7, %v129_v45, %v173_v46  ;;  %v8087_v45 = vld [vmem:[%s11428_s4 + $0x504] ss:$16 sps:$4 sm:$0xff]   ;;  %v8090_v46 = vld [vmem:[%s11428_s4 + $0x50c] ss:$16 sps:$4 sm:$0xff]  }
  0x5c   :  { %1918 = vmatprep.subr.bf16.mxu0 %v7985_v57  ;;  %2082 = vmatprep.subr.bf16.mxu1 %v7988_v59  ;;  %v286_v57 = vadd.f32 %v264_v39, %v236_v38  ;;  %v188_v59 = vsel %vm8971_vm8, %v8938_v34, %v8941_v41  ;;  %v8081_v38 = vld [vmem:[%s11428_s4 + $0x4e4] ss:$16 sps:$4 sm:$0xff]   ;;  %v8084_v39 = vld [vmem:[%s11428_s4 + $0x4ec] ss:$16 sps:$4 sm:$0xff]  }
  0x5d   :  { %v8219_v34 = vld [vmem:[%s11428_s4 + $0x7c4] ss:$16 sps:$4 sm:$0xff]   ;;  %v8222_v41 = vld [vmem:[%s11428_s4 + $0x7cc] ss:$16 sps:$4 sm:$0xff]  }
  0x5f   :  { %1919 = vmatpush1.bf16.msra.mxu0 %v7983_v60  ;;  %2083 = vmatpush1.bf16.msra.mxu1 %v7986_v61  ;;  %v291_v60 = vmax.f32 %v283_v43, 0.0  ;;  %v8031_v61 = vld [vmem:[%s11428_s4 + $0x3e0] ss:$16 sps:$4 sm:$0xff]   ;;  %v8082_v43 = vld [vmem:[%s11428_s4 + $0x4e8] ss:$16 sps:$4 sm:$0xff]  }
  0x60   :  { %1920 = vmatprep.subr.bf16.mxu0 %v7991_v63  ;;  %2084 = vmatprep.subr.bf16.mxu1 %v7994_v0  ;;  %v8034_v63 = vld [vmem:[%s11428_s4 + $0x3e8] ss:$16 sps:$4 sm:$0xff]   ;;  %v8039_v0 = vld [vmem:[%s11428_s4 + $0x404] ss:$16 sps:$4 sm:$0xff]  }
  0x63   :  { %1921 = vmatpush1.bf16.msra.mxu0 %v7989_v1  ;;  %2085 = vmatpush1.bf16.msra.mxu1 %v7992_v2  ;;  %v8042_v1 = vld [vmem:[%s11428_s4 + $0x40c] ss:$16 sps:$4 sm:$0xff]   ;;  %v294_v2 = vmax.f32 %v286_v57, 0.0  ;;  %v8094_v57 = vld [vmem:[%s11428_s4 + $0x528] ss:$16 sps:$4 sm:$0xff]  }
  0x64   :  { %1922 = vmatprep.subr.bf16.mxu0 %v7997_v3  ;;  %2086 = vmatprep.subr.bf16.mxu1 %v8000_v7  ;;  %v299_v3 = vpack.c.bf16 %v291_v60, %v291_v60  ;;  %v8037_v7 = vld [vmem:[%s11428_s4 + $0x400] ss:$16 sps:$4 sm:$0xff]   ;;  %v8099_v60 = vld [vmem:[%s11428_s4 + $0x544] ss:$16 sps:$4 sm:$0xff]  }
  0x67   :  { %1923 = vmatpush1.bf16.msra.mxu0 %v7995_v8  ;;  %2087 = vmatpush1.bf16.msra.mxu1 %v7998_v10  ;;  %v8040_v8 = vld [vmem:[%s11428_s4 + $0x408] ss:$16 sps:$4 sm:$0xff]   ;;  %v8045_v10 = vld [vmem:[%s11428_s4 + $0x424] ss:$16 sps:$4 sm:$0xff]  }
  0x68   :  { %1924 = vmatprep.subr.bf16.mxu0 %v8003_v11  ;;  %2088 = vmatprep.subr.bf16.mxu1 %v8006_v13  ;;  %v8048_v11 = vld [vmem:[%s11428_s4 + $0x42c] ss:$16 sps:$4 sm:$0xff]   ;;  %v302_v13 = vpack.c.bf16 %v294_v2, %v294_v2 }
  0x69   :  { %v8108_v2 = vld [vmem:[%s11428_s4 + $0x56c] ss:$16 sps:$4 sm:$0xff]  }
  0x6b   :  { %1925 = vmatpush1.bf16.msra.mxu0 %v8001_v14  ;;  %2089 = vmatpush1.bf16.msra.mxu1 %v8004_v15  ;;  %v8043_v14 = vld [vmem:[%s11428_s4 + $0x420] ss:$16 sps:$4 sm:$0xff]   ;;  %v8046_v15 = vld [vmem:[%s11428_s4 + $0x428] ss:$16 sps:$4 sm:$0xff]  }
  0x6c   :  { %1926 = vmatprep.subr.bf16.mxu0 %v8009_v16  ;;  %2090 = vmatprep.subr.bf16.mxu1 %v8012_v17  ;;  %v8051_v16 = vld [vmem:[%s11428_s4 + $0x444] ss:$16 sps:$4 sm:$0xff]   ;;  %v8054_v17 = vld [vmem:[%s11428_s4 + $0x44c] ss:$16 sps:$4 sm:$0xff]  }
  0x6f   :  { %1927 = vmatpush1.bf16.msra.mxu0 %v8007_v20  ;;  %2091 = vmatpush1.bf16.msra.mxu1 %v8010_v21  ;;  %v8049_v20 = vld [vmem:[%s11428_s4 + $0x440] ss:$16 sps:$4 sm:$0xff]   ;;  %v8052_v21 = vld [vmem:[%s11428_s4 + $0x448] ss:$16 sps:$4 sm:$0xff]  }
  0x70   :  { %1928 = vmatprep.subr.bf16.mxu0 %v8015_v22  ;;  %2092 = vmatprep.subr.bf16.mxu1 %v8018_v23  ;;  %v8057_v22 = vld [vmem:[%s11428_s4 + $0x464] ss:$16 sps:$4 sm:$0xff]   ;;  %v8060_v23 = vld [vmem:[%s11428_s4 + $0x46c] ss:$16 sps:$4 sm:$0xff]  }
  0x73   :  { %1929 = vmatpush1.bf16.msra.mxu0 %v8013_v25  ;;  %2093 = vmatpush1.bf16.msra.mxu1 %v8016_v26  ;;  %v8058_v25 = vld [vmem:[%s11428_s4 + $0x468] ss:$16 sps:$4 sm:$0xff]   ;;  %v8063_v26 = vld [vmem:[%s11428_s4 + $0x484] ss:$16 sps:$4 sm:$0xff]  }
  0x74   :  { %1930 = vmatprep.subr.bf16.mxu0 %v8021_v29  ;;  %2094 = vmatprep.subr.bf16.mxu1 %v8024_v30  ;;  %v8064_v29 = vld [vmem:[%s11428_s4 + $0x488] ss:$16 sps:$4 sm:$0xff]   ;;  %v8069_v30 = vld [vmem:[%s11428_s4 + $0x4a4] ss:$16 sps:$4 sm:$0xff]  }
  0x77   :  { %1931 = vmatpush1.bf16.msra.mxu0 %v8019_v33  ;;  %2095 = vmatpush1.bf16.msra.mxu1 %v8022_v35  ;;  %v8075_v33 = vld [vmem:[%s11428_s4 + $0x4c4] ss:$16 sps:$4 sm:$0xff]   ;;  %v8078_v35 = vld [vmem:[%s11428_s4 + $0x4cc] ss:$16 sps:$4 sm:$0xff]  }
  0x78   :  { %1932 = vmatprep.subr.bf16.mxu0 %v8027_v18  ;;  %2096 = vmatprep.subr.bf16.mxu1 %v8030_v19  ;;  %v8073_v18 = vld [vmem:[%s11428_s4 + $0x4c0] ss:$16 sps:$4 sm:$0xff]   ;;  %v8076_v19 = vld [vmem:[%s11428_s4 + $0x4c8] ss:$16 sps:$4 sm:$0xff]  }
  0x7b   :  { %1933 = vmatpush1.bf16.msra.mxu0 %v8025_v44  ;;  %2097 = vmatpush1.bf16.msra.mxu1 %v8028_v5  ;;  %v8088_v44 = vld [vmem:[%s11428_s4 + $0x508] ss:$16 sps:$4 sm:$0xff]   ;;  %v8093_v5 = vld [vmem:[%s11428_s4 + $0x524] ss:$16 sps:$4 sm:$0xff]  }
  0x7c   :  { %1934 = vmatprep.subr.bf16.mxu0 %v8033_v4  ;;  %2098 = vmatprep.subr.bf16.mxu1 %v8036_v62  ;;  %v8096_v4 = vld [vmem:[%s11428_s4 + $0x52c] ss:$16 sps:$4 sm:$0xff]   ;;  %v8091_v62 = vld [vmem:[%s11428_s4 + $0x520] ss:$16 sps:$4 sm:$0xff]  }
  0x7f   :  { %1935 = vmatpush1.bf16.msra.mxu0 %v8031_v61  ;;  %2099 = vmatpush1.bf16.msra.mxu1 %v8034_v63  ;;  %v8102_v61 = vld [vmem:[%s11428_s4 + $0x54c] ss:$16 sps:$4 sm:$0xff]   ;;  %v8097_v63 = vld [vmem:[%s11428_s4 + $0x540] ss:$16 sps:$4 sm:$0xff]  }
  0x80   :  { %1945 = vmatprep.subr.bf16.mxu0 %v8039_v0  ;;  %2109 = vmatprep.subr.bf16.mxu1 %v8042_v1  ;;  %v8100_v0 = vld [vmem:[%s11428_s4 + $0x548] ss:$16 sps:$4 sm:$0xff]   ;;  %v8105_v1 = vld [vmem:[%s11428_s4 + $0x564] ss:$16 sps:$4 sm:$0xff]  }
  0x82   :  { %1937 = vmatmul.mubr.bf16.vlgmr.msra.gmra.mrb[0].mxu0 %v299_v3  ;;  %2101 = vmatmul.mubr.bf16.vlgmr.msra.gmra.mrb[0].mxu1 %v299_v3  ;;  %v8103_v3 = vld [vmem:[%s11428_s4 + $0x560] ss:$16 sps:$4 sm:$0xff]  }
  0x83   :  { %1946 = vmatpush1.bf16.msra.mxu0 %v8037_v7  ;;  %2110 = vmatpush1.bf16.msra.mxu1 %v8040_v8  ;;  %v8106_v7 = vld [vmem:[%s11428_s4 + $0x568] ss:$16 sps:$4 sm:$0xff]   ;;  %v8111_v8 = vld [vmem:[%s11428_s4 + $0x584] ss:$16 sps:$4 sm:$0xff]  }
  0x84   :  { %1947 = vmatprep.subr.bf16.mxu0 %v8045_v10  ;;  %2111 = vmatprep.subr.bf16.mxu1 %v8048_v11  ;;  %v8114_v10 = vld [vmem:[%s11428_s4 + $0x58c] ss:$16 sps:$4 sm:$0xff]   ;;  %v8109_v11 = vld [vmem:[%s11428_s4 + $0x580] ss:$16 sps:$4 sm:$0xff]  }
  0x85   :  { %1977 = vmatprep.mubr.bf16.mxu0 %v302_v13  ;;  %2141 = vmatprep.mubr.bf16.mxu1 %v302_v13  ;;  %v8112_v13 = vld [vmem:[%s11428_s4 + $0x588] ss:$16 sps:$4 sm:$0xff]  }
  0x87   :  { %1948 = vmatpush1.bf16.msra.mxu0 %v8043_v14  ;;  %2112 = vmatpush1.bf16.msra.mxu1 %v8046_v15  ;;  %v8117_v14 = vld [vmem:[%s11428_s4 + $0x5a4] ss:$16 sps:$4 sm:$0xff]   ;;  %v8120_v15 = vld [vmem:[%s11428_s4 + $0x5ac] ss:$16 sps:$4 sm:$0xff]  }
  0x88   :  { %1949 = vmatprep.subr.bf16.mxu0 %v8051_v16  ;;  %2113 = vmatprep.subr.bf16.mxu1 %v8054_v17  ;;  %v9150_v16 = vld [vmem:[%s11429_s2] sm:$0xff] }
  0x89   :  { %v210_v17 = vrot.slane %v9150_v16, %v8709_v55 }
  0x8b   :  { %1950 = vmatpush1.bf16.msra.mxu0 %v8049_v20  ;;  %2114 = vmatpush1.bf16.msra.mxu1 %v8052_v21  ;;  %v8115_v20 = vld [vmem:[%s11428_s4 + $0x5a0] ss:$16 sps:$4 sm:$0xff]   ;;  %v8118_v21 = vld [vmem:[%s11428_s4 + $0x5a8] ss:$16 sps:$4 sm:$0xff]  }
  0x8c   :  { %1951 = vmatprep.subr.bf16.mxu0 %v8057_v22  ;;  %2115 = vmatprep.subr.bf16.mxu1 %v8060_v23  ;;  %v222_v22 = vrot.slane %v9150_v16, %v8929_v53  ;;  %v8123_v23 = vld [vmem:[%s11428_s4 + $0x5c4] ss:$16 sps:$4 sm:$0xff]  }
  0x8e   :  { %v238_v51 = vmul.f32 %v222_v22, %v8969_v49  ;;  %v8127_v49 = vld [vmem:[%s11428_s4 + $0x5e0] ss:$16 sps:$4 sm:$0xff]  }
  0x8f   :  { %1952 = vmatpush1.bf16.msra.mxu0 %v8055_v24  ;;  %2116 = vmatpush1.bf16.msra.mxu1 %v8058_v25  ;;  %v8126_v24 = vld [vmem:[%s11428_s4 + $0x5cc] ss:$16 sps:$4 sm:$0xff]   ;;  %v235_v25 = vmul.f32 %v210_v17, %v186_v12  ;;  %v8172_v17 = vld [vmem:[%s11428_s4 + $0x6c8] ss:$16 sps:$4 sm:$0xff]   ;;  %v8175_v22 = vld [vmem:[%s11428_s4 + $0x6e0] ss:$16 sps:$4 sm:$0xff]  }
  0x90   :  { %1953 = vmatprep.subr.bf16.mxu0 %v8063_v26  ;;  %2117 = vmatprep.subr.bf16.mxu1 %v8066_v27  ;;  %v9176_v26 = vld [vmem:[%s11432_s3] sm:$0xff] }
  0x91   :  { %v260_v27 = vrot.slane %v9176_v26, %v8709_v55  ;;  %v272_v12 = vrot.slane %v9176_v26, %v8929_v53 }
  0x93   :  { %1954 = vmatpush1.bf16.msra.mxu0 %v8061_v28  ;;  %2118 = vmatpush1.bf16.msra.mxu1 %v8064_v29  ;;  %v8129_v28 = vld [vmem:[%s11428_s4 + $0x5e4] ss:$16 sps:$4 sm:$0xff]   ;;  %v8132_v29 = vld [vmem:[%s11428_s4 + $0x5ec] ss:$16 sps:$4 sm:$0xff]  }
  0x94   :  { %1955 = vmatprep.subr.bf16.mxu0 %v8069_v30  ;;  %2119 = vmatprep.subr.bf16.mxu1 %v8072_v32  ;;  %v285_v30 = vadd.f32 %v260_v27, %v235_v25  ;;  %v8130_v32 = vld [vmem:[%s11428_s4 + $0x5e8] ss:$16 sps:$4 sm:$0xff]   ;;  %v8186_v25 = vld [vmem:[%s11428_s4 + $0x70c] ss:$16 sps:$4 sm:$0xff]   ;;  %v8181_v27 = vld [vmem:[%s11428_s4 + $0x700] ss:$16 sps:$4 sm:$0xff]  }
  0x97   :  { %1956 = vmatpush1.bf16.msra.mxu0 %v8067_v31  ;;  %2120 = vmatpush1.bf16.msra.mxu1 %v8070_v36  ;;  %v288_v31 = vadd.f32 %v272_v12, %v238_v51  ;;  %v8135_v36 = vld [vmem:[%s11428_s4 + $0x604] ss:$16 sps:$4 sm:$0xff]   ;;  %v8192_v51 = vld [vmem:[%s11428_s4 + $0x72c] ss:$16 sps:$4 sm:$0xff]   ;;  %v8187_v12 = vld [vmem:[%s11428_s4 + $0x720] ss:$16 sps:$4 sm:$0xff]  }
  0x98   :  { %1957 = vmatprep.subr.bf16.mxu0 %v8075_v33  ;;  %2121 = vmatprep.subr.bf16.mxu1 %v8078_v35  ;;  %v8138_v33 = vld [vmem:[%s11428_s4 + $0x60c] ss:$16 sps:$4 sm:$0xff]   ;;  %v293_v35 = vmax.f32 %v285_v30, 0.0 }
  0x99   :  { %v8198_v30 = vld [vmem:[%s11428_s4 + $0x74c] ss:$16 sps:$4 sm:$0xff]  }
  0x9b   :  { %1958 = vmatpush1.bf16.msra.mxu0 %v8073_v18  ;;  %2122 = vmatpush1.bf16.msra.mxu1 %v8076_v19  ;;  %v8133_v18 = vld [vmem:[%s11428_s4 + $0x600] ss:$16 sps:$4 sm:$0xff]   ;;  %v8136_v19 = vld [vmem:[%s11428_s4 + $0x608] ss:$16 sps:$4 sm:$0xff]  }
  0x9c   :  { %1959 = vmatprep.subr.bf16.mxu0 %v8081_v38  ;;  %2123 = vmatprep.subr.bf16.mxu1 %v8084_v39  ;;  %v296_v38 = vmax.f32 %v288_v31, 0.0  ;;  %v301_v39 = vpack.c.bf16 %v293_v35, %v293_v35  ;;  %v8201_v31 = vld [vmem:[%s11428_s4 + $0x764] ss:$16 sps:$4 sm:$0xff]   ;;  %v8202_v35 = vld [vmem:[%s11428_s4 + $0x768] ss:$16 sps:$4 sm:$0xff]  }
  0x9f   :  { %1960 = vmatpush1.bf16.msra.mxu0 %v8079_v40  ;;  %2124 = vmatpush1.bf16.msra.mxu1 %v8082_v43  ;;  %v8141_v40 = vld [vmem:[%s11428_s4 + $0x624] ss:$16 sps:$4 sm:$0xff]   ;;  %v8144_v43 = vld [vmem:[%s11428_s4 + $0x62c] ss:$16 sps:$4 sm:$0xff]  }
  0xa0   :  { %1961 = vmatprep.subr.bf16.mxu0 %v8087_v45  ;;  %2125 = vmatprep.subr.bf16.mxu1 %v8090_v46  ;;  %v304_v45 = vpack.c.bf16 %v296_v38, %v296_v38  ;;  %v8139_v46 = vld [vmem:[%s11428_s4 + $0x620] ss:$16 sps:$4 sm:$0xff]   ;;  %v218_v38 = vrot.slane %v9150_v16, %v8944_v37  ;;  %v8216_v16 = vld [vmem:[%s11428_s4 + $0x7ac] ss:$16 sps:$4 sm:$0xff]  }
  0xa3   :  { %1962 = vmatpush1.bf16.msra.mxu0 %v8085_v48  ;;  %2126 = vmatpush1.bf16.msra.mxu1 %v8088_v44  ;;  %v8142_v48 = vld [vmem:[%s11428_s4 + $0x628] ss:$16 sps:$4 sm:$0xff]   ;;  %v8147_v44 = vld [vmem:[%s11428_s4 + $0x644] ss:$16 sps:$4 sm:$0xff]  }
  0xa4   :  { %1963 = vmatprep.subr.bf16.mxu0 %v8093_v5  ;;  %2127 = vmatprep.subr.bf16.mxu1 %v8096_v4  ;;  %v8150_v5 = vld [vmem:[%s11428_s4 + $0x64c] ss:$16 sps:$4 sm:$0xff]   ;;  %v8145_v4 = vld [vmem:[%s11428_s4 + $0x640] ss:$16 sps:$4 sm:$0xff]  }
  0xa7   :  { %1964 = vmatpush1.bf16.msra.mxu0 %v8091_v62  ;;  %2128 = vmatpush1.bf16.msra.mxu1 %v8094_v57  ;;  %v8148_v62 = vld [vmem:[%s11428_s4 + $0x648] ss:$16 sps:$4 sm:$0xff]   ;;  %v8153_v57 = vld [vmem:[%s11428_s4 + $0x664] ss:$16 sps:$4 sm:$0xff]  }
  0xa8   :  { %1965 = vmatprep.subr.bf16.mxu0 %v8099_v60  ;;  %2129 = vmatprep.subr.bf16.mxu1 %v8102_v61  ;;  %v8156_v60 = vld [vmem:[%s11428_s4 + $0x66c] ss:$16 sps:$4 sm:$0xff]   ;;  %v8151_v61 = vld [vmem:[%s11428_s4 + $0x660] ss:$16 sps:$4 sm:$0xff]  }
  0xab   :  { %1966 = vmatpush1.bf16.msra.mxu0 %v8097_v63  ;;  %2130 = vmatpush1.bf16.msra.mxu1 %v8100_v0  ;;  %v8154_v63 = vld [vmem:[%s11428_s4 + $0x668] ss:$16 sps:$4 sm:$0xff]   ;;  %v8159_v0 = vld [vmem:[%s11428_s4 + $0x684] ss:$16 sps:$4 sm:$0xff]  }
  0xac   :  { %1967 = vmatprep.subr.bf16.mxu0 %v8105_v1  ;;  %2131 = vmatprep.subr.bf16.mxu1 %v8108_v2  ;;  %v8162_v1 = vld [vmem:[%s11428_s4 + $0x68c] ss:$16 sps:$4 sm:$0xff]   ;;  %v8157_v2 = vld [vmem:[%s11428_s4 + $0x680] ss:$16 sps:$4 sm:$0xff]  }
  0xaf   :  { %1968 = vmatpush1.bf16.msra.mxu0 %v8103_v3  ;;  %2132 = vmatpush1.bf16.msra.mxu1 %v8106_v7  ;;  %v8160_v3 = vld [vmem:[%s11428_s4 + $0x688] ss:$16 sps:$4 sm:$0xff]   ;;  %v8165_v7 = vld [vmem:[%s11428_s4 + $0x6a4] ss:$16 sps:$4 sm:$0xff]  }
  0xb0   :  { %1969 = vmatprep.subr.bf16.mxu0 %v8111_v8  ;;  %2133 = vmatprep.subr.bf16.mxu1 %v8114_v10  ;;  %v8168_v8 = vld [vmem:[%s11428_s4 + $0x6ac] ss:$16 sps:$4 sm:$0xff]   ;;  %v8163_v10 = vld [vmem:[%s11428_s4 + $0x6a0] ss:$16 sps:$4 sm:$0xff]  }
  0xb3   :  { %1970 = vmatpush1.bf16.msra.mxu0 %v8109_v11  ;;  %2134 = vmatpush1.bf16.msra.mxu1 %v8112_v13  ;;  %v8166_v11 = vld [vmem:[%s11428_s4 + $0x6a8] ss:$16 sps:$4 sm:$0xff]   ;;  %v8171_v13 = vld [vmem:[%s11428_s4 + $0x6c4] ss:$16 sps:$4 sm:$0xff]  }
  0xb4   :  { %1971 = vmatprep.subr.bf16.mxu0 %v8117_v14  ;;  %2135 = vmatprep.subr.bf16.mxu1 %v8120_v15  ;;  %v8174_v14 = vld [vmem:[%s11428_s4 + $0x6cc] ss:$16 sps:$4 sm:$0xff]   ;;  %v8169_v15 = vld [vmem:[%s11428_s4 + $0x6c0] ss:$16 sps:$4 sm:$0xff]  }
  0xb7   :  { %1972 = vmatpush1.bf16.msra.mxu0 %v8115_v20  ;;  %2136 = vmatpush1.bf16.msra.mxu1 %v8118_v21  ;;  %v8177_v20 = vld [vmem:[%s11428_s4 + $0x6e4] ss:$16 sps:$4 sm:$0xff]   ;;  %v8180_v21 = vld [vmem:[%s11428_s4 + $0x6ec] ss:$16 sps:$4 sm:$0xff]  }
  0xb8   :  { %1973 = vmatprep.subr.bf16.mxu0 %v8123_v23  ;;  %2137 = vmatprep.subr.bf16.mxu1 %v8126_v24  ;;  %v8178_v23 = vld [vmem:[%s11428_s4 + $0x6e8] ss:$16 sps:$4 sm:$0xff]   ;;  %v8183_v24 = vld [vmem:[%s11428_s4 + $0x704] ss:$16 sps:$4 sm:$0xff]  }
  0xbb   :  { %1974 = vmatpush1.bf16.msra.mxu0 %v8121_v9  ;;  %2138 = vmatpush1.bf16.msra.mxu1 %v8124_v47  ;;  %v8184_v9 = vld [vmem:[%s11428_s4 + $0x708] ss:$16 sps:$4 sm:$0xff]   ;;  %v8189_v47 = vld [vmem:[%s11428_s4 + $0x724] ss:$16 sps:$4 sm:$0xff]  }
  0xbc   :  { %1975 = vmatprep.subr.bf16.mxu0 %v8129_v28  ;;  %2139 = vmatprep.subr.bf16.mxu1 %v8132_v29  ;;  %v8190_v28 = vld [vmem:[%s11428_s4 + $0x728] ss:$16 sps:$4 sm:$0xff]   ;;  %v8195_v29 = vld [vmem:[%s11428_s4 + $0x744] ss:$16 sps:$4 sm:$0xff]  }
  0xbf   :  { %1976 = vmatpush1.bf16.msra.mxu0 %v8127_v49  ;;  %2140 = vmatpush1.bf16.msra.mxu1 %v8130_v32  ;;  %v8193_v49 = vld [vmem:[%s11428_s4 + $0x740] ss:$16 sps:$4 sm:$0xff]   ;;  %v8196_v32 = vld [vmem:[%s11428_s4 + $0x748] ss:$16 sps:$4 sm:$0xff]  }
  0xc0   :  { %1986 = vmatprep.subr.bf16.mxu0 %v8135_v36  ;;  %2150 = vmatprep.subr.bf16.mxu1 %v8138_v33  ;;  %v8204_v36 = vld [vmem:[%s11428_s4 + $0x76c] ss:$16 sps:$4 sm:$0xff]   ;;  %v8199_v33 = vld [vmem:[%s11428_s4 + $0x760] ss:$16 sps:$4 sm:$0xff]  }
  0xc2   :  { %1978 = vmatmul.mubr.bf16.vlgmr.msra.gmra.mrb[0].mxu0 %v301_v39  ;;  %2142 = vmatmul.mubr.bf16.vlgmr.msra.gmra.mrb[0].mxu1 %v301_v39  ;;  %v8205_v39 = vld [vmem:[%s11428_s4 + $0x780] ss:$16 sps:$4 sm:$0xff]  }
  0xc3   :  { %1987 = vmatpush1.bf16.msra.mxu0 %v8133_v18  ;;  %2151 = vmatpush1.bf16.msra.mxu1 %v8136_v19  ;;  %v8207_v18 = vld [vmem:[%s11428_s4 + $0x784] ss:$16 sps:$4 sm:$0xff]   ;;  %v8210_v19 = vld [vmem:[%s11428_s4 + $0x78c] ss:$16 sps:$4 sm:$0xff]  }
  0xc4   :  { %1988 = vmatprep.subr.bf16.mxu0 %v8141_v40  ;;  %2152 = vmatprep.subr.bf16.mxu1 %v8144_v43  ;;  %v8208_v40 = vld [vmem:[%s11428_s4 + $0x788] ss:$16 sps:$4 sm:$0xff]   ;;  %v8213_v43 = vld [vmem:[%s11428_s4 + $0x7a4] ss:$16 sps:$4 sm:$0xff]  }
  0xc5   :  { %2018 = vmatprep.mubr.bf16.mxu0 %v304_v45  ;;  %2182 = vmatprep.mubr.bf16.mxu1 %v304_v45  ;;  %v237_v45 = vmul.f32 %v218_v38, %v188_v59  ;;  %v8217_v59 = vld [vmem:[%s11428_s4 + $0x7c0] ss:$16 sps:$4 sm:$0xff]  }
  0xc7   :  { %1989 = vmatpush1.bf16.msra.mxu0 %v8139_v46  ;;  %2153 = vmatpush1.bf16.msra.mxu1 %v8142_v48  ;;  %v268_v46 = vrot.slane %v9176_v26, %v8944_v37  ;;  %v8211_v48 = vld [vmem:[%s11428_s4 + $0x7a0] ss:$16 sps:$4 sm:$0xff]   ;;  %v8220_v26 = vld [vmem:[%s11428_s4 + $0x7c8] ss:$16 sps:$4 sm:$0xff]  }
  0xc8   :  { %1990 = vmatprep.subr.bf16.mxu0 %v8147_v44  ;;  %2154 = vmatprep.subr.bf16.mxu1 %v8150_v5  ;;  %v8214_v44 = vld [vmem:[%s11428_s4 + $0x7a8] ss:$16 sps:$4 sm:$0xff]   ;;  %v8225_v5 = vld [vmem:[%s11428_s4 + $0x7e4] ss:$16 sps:$4 sm:$0xff]  }
  0xc9   :  { %v287_v56 = vadd.f32 %v268_v46, %v237_v45  ;;  %v2889_v45 = vld [vmem:[%s11435_s12] sm:$0xff] }
  0xca   :  { %v2905_v46 = vld [vmem:[%s11435_s12 + $0x80] sm:$0xff] }
  0xcb   :  { %1991 = vmatpush1.bf16.msra.mxu0 %v8145_v4  ;;  %2155 = vmatpush1.bf16.msra.mxu1 %v8148_v62  ;;  %v8228_v4 = vld [vmem:[%s11428_s4 + $0x7ec] ss:$16 sps:$4 sm:$0xff]   ;;  %v295_v62 = vmax.f32 %v287_v56, 0.0  ;;  %v7293_v56 = vcombine.low %v2889_v45, %v2905_v46 }
  0xcc   :  { %1992 = vmatprep.subr.bf16.mxu0 %v8153_v57  ;;  %2156 = vmatprep.subr.bf16.mxu1 %v8156_v60  ;;  %v8223_v57 = vld [vmem:[%s11428_s4 + $0x7e0] ss:$16 sps:$4 sm:$0xff]   ;;  %v8226_v60 = vld [vmem:[%s11428_s4 + $0x7e8] ss:$16 sps:$4 sm:$0xff]  }
  0xcf   :  { %1993 = vmatpush1.bf16.msra.mxu0 %v8151_v61  ;;  %2157 = vmatpush1.bf16.msra.mxu1 %v8154_v63  ;;  %v8231_v61 = vld [vmem:[%s11433_s8 + $0x4] ss:$8 sps:$4 sm:$0xff]   ;;  %v303_v63 = vpack.c.bf16 %v295_v62, %v295_v62 }
  0xd0   :  { %1994 = vmatprep.subr.bf16.mxu0 %v8159_v0  ;;  %2158 = vmatprep.subr.bf16.mxu1 %v8162_v1  ;;  %v8229_v0 = vld [vmem:[%s11433_s8] ss:$8 sps:$4 sm:$0xff]   ;;  %v8234_v1 = vld [vmem:[%s11433_s8 + $0x14] ss:$8 sps:$4 sm:$0xff]  }
  0xd3   :  { %1995 = vmatpush1.bf16.msra.mxu0 %v8157_v2  ;;  %2159 = vmatpush1.bf16.msra.mxu1 %v8160_v3  ;;  %v8232_v2 = vld [vmem:[%s11433_s8 + $0x10] ss:$8 sps:$4 sm:$0xff]   ;;  %v8237_v3 = vld [vmem:[%s11433_s8 + $0x24] ss:$8 sps:$4 sm:$0xff]  }
  0xd4   :  { %1996 = vmatprep.subr.bf16.mxu0 %v8165_v7  ;;  %2160 = vmatprep.subr.bf16.mxu1 %v8168_v8  ;;  %v8235_v7 = vld [vmem:[%s11433_s8 + $0x20] ss:$8 sps:$4 sm:$0xff]   ;;  %v8240_v8 = vld [vmem:[%s11433_s8 + $0x34] ss:$8 sps:$4 sm:$0xff]  }
  0xd7   :  { %1997 = vmatpush1.bf16.msra.mxu0 %v8163_v10  ;;  %2161 = vmatpush1.bf16.msra.mxu1 %v8166_v11  ;;  %v8238_v10 = vld [vmem:[%s11433_s8 + $0x30] ss:$8 sps:$4 sm:$0xff]   ;;  %v8243_v11 = vld [vmem:[%s11433_s8 + $0x44] ss:$8 sps:$4 sm:$0xff]  }
  0xd8   :  { %1998 = vmatprep.subr.bf16.mxu0 %v8171_v13  ;;  %2162 = vmatprep.subr.bf16.mxu1 %v8174_v14  ;;  %v8241_v13 = vld [vmem:[%s11433_s8 + $0x40] ss:$8 sps:$4 sm:$0xff]   ;;  %v8246_v14 = vld [vmem:[%s11433_s8 + $0x54] ss:$8 sps:$4 sm:$0xff]  }
  0xdb   :  { %1999 = vmatpush1.bf16.msra.mxu0 %v8169_v15  ;;  %2163 = vmatpush1.bf16.msra.mxu1 %v8172_v17  ;;  %v8244_v15 = vld [vmem:[%s11433_s8 + $0x50] ss:$8 sps:$4 sm:$0xff]   ;;  %v8249_v17 = vld [vmem:[%s11433_s8 + $0x64] ss:$8 sps:$4 sm:$0xff]  }
  0xdc   :  { %2000 = vmatprep.subr.bf16.mxu0 %v8177_v20  ;;  %2164 = vmatprep.subr.bf16.mxu1 %v8180_v21  ;;  %v8247_v20 = vld [vmem:[%s11433_s8 + $0x60] ss:$8 sps:$4 sm:$0xff]   ;;  %v8252_v21 = vld [vmem:[%s11433_s8 + $0x74] ss:$8 sps:$4 sm:$0xff]  }
  0xdf   :  { %2001 = vmatpush1.bf16.msra.mxu0 %v8175_v22  ;;  %2165 = vmatpush1.bf16.msra.mxu1 %v8178_v23  ;;  %v8250_v22 = vld [vmem:[%s11433_s8 + $0x70] ss:$8 sps:$4 sm:$0xff]   ;;  %v8255_v23 = vld [vmem:[%s11433_s8 + $0x84] ss:$8 sps:$4 sm:$0xff]  }
  0xe0   :  { %2002 = vmatprep.subr.bf16.mxu0 %v8183_v24  ;;  %2166 = vmatprep.subr.bf16.mxu1 %v8186_v25  ;;  %v8253_v24 = vld [vmem:[%s11433_s8 + $0x80] ss:$8 sps:$4 sm:$0xff]   ;;  %v8258_v25 = vld [vmem:[%s11433_s8 + $0x94] ss:$8 sps:$4 sm:$0xff]  }
  0xe3   :  { %2003 = vmatpush1.bf16.msra.mxu0 %v8181_v27  ;;  %2167 = vmatpush1.bf16.msra.mxu1 %v8184_v9  ;;  %v8256_v27 = vld [vmem:[%s11433_s8 + $0x90] ss:$8 sps:$4 sm:$0xff]   ;;  %v8261_v9 = vld [vmem:[%s11433_s8 + $0xa4] ss:$8 sps:$4 sm:$0xff]  }
  0xe4   :  { %2004 = vmatprep.subr.bf16.mxu0 %v8189_v47  ;;  %2168 = vmatprep.subr.bf16.mxu1 %v8192_v51  ;;  %v8259_v47 = vld [vmem:[%s11433_s8 + $0xa0] ss:$8 sps:$4 sm:$0xff]   ;;  %v8264_v51 = vld [vmem:[%s11433_s8 + $0xb4] ss:$8 sps:$4 sm:$0xff]  }
  0xe7   :  { %2005 = vmatpush1.bf16.msra.mxu0 %v8187_v12  ;;  %2169 = vmatpush1.bf16.msra.mxu1 %v8190_v28  ;;  %v8262_v12 = vld [vmem:[%s11433_s8 + $0xb0] ss:$8 sps:$4 sm:$0xff]   ;;  %v8267_v28 = vld [vmem:[%s11433_s8 + $0xc4] ss:$8 sps:$4 sm:$0xff]  }
  0xe8   :  { %2006 = vmatprep.subr.bf16.mxu0 %v8195_v29  ;;  %2170 = vmatprep.subr.bf16.mxu1 %v8198_v30  ;;  %v8265_v29 = vld [vmem:[%s11433_s8 + $0xc0] ss:$8 sps:$4 sm:$0xff]   ;;  %v8270_v30 = vld [vmem:[%s11433_s8 + $0xd4] ss:$8 sps:$4 sm:$0xff]  }
  0xeb   :  { %2007 = vmatpush1.bf16.msra.mxu0 %v8193_v49  ;;  %2171 = vmatpush1.bf16.msra.mxu1 %v8196_v32  ;;  %v8268_v49 = vld [vmem:[%s11433_s8 + $0xd0] ss:$8 sps:$4 sm:$0xff]   ;;  %v8273_v32 = vld [vmem:[%s11433_s8 + $0xe4] ss:$8 sps:$4 sm:$0xff]  }
  0xec   :  { %2008 = vmatprep.subr.bf16.mxu0 %v8201_v31  ;;  %2172 = vmatprep.subr.bf16.mxu1 %v8204_v36  ;;  %v8271_v31 = vld [vmem:[%s11433_s8 + $0xe0] ss:$8 sps:$4 sm:$0xff]   ;;  %v8276_v36 = vld [vmem:[%s11433_s8 + $0xf4] ss:$8 sps:$4 sm:$0xff]  }
  0xef   :  { %2009 = vmatpush1.bf16.msra.mxu0 %v8199_v33  ;;  %2173 = vmatpush1.bf16.msra.mxu1 %v8202_v35  ;;  %v8274_v33 = vld [vmem:[%s11433_s8 + $0xf0] ss:$8 sps:$4 sm:$0xff]   ;;  %v8279_v35 = vld [vmem:[%s11433_s8 + $0x104] ss:$8 sps:$4 sm:$0xff]  }
  0xf0   :  { %2010 = vmatprep.subr.bf16.mxu0 %v8207_v18  ;;  %2174 = vmatprep.subr.bf16.mxu1 %v8210_v19  ;;  %v561_v18 = vld [vmem:[%s11434_s5] sm:$0xf] }
  0xf1   :  { %v566_v19 = vrot.slane %v561_v18, %v8569_v54  ;;  %v574_v38 = vrot.slane %v561_v18, %v8605_v6 }
  0xf3   :  { %2011 = vmatpush1.bf16.msra.mxu0 %v8205_v39  ;;  %2175 = vmatpush1.bf16.msra.mxu1 %v8208_v40  ;;  %v570_v39 = vrot.slane %v561_v18, %v8561_v52  ;;  %v578_v40 = vrot.slane %v561_v18, %v8582_v58 }
  0xf4   :  { %2012 = vmatprep.subr.bf16.mxu0 %v8213_v43  ;;  %2176 = vmatprep.subr.bf16.mxu1 %v8216_v16 }
  0xf7   :  { %2013 = vmatpush1.bf16.msra.mxu0 %v8211_v48  ;;  %2177 = vmatpush1.bf16.msra.mxu1 %v8214_v44 }
  0xf8   :  { %2014 = vmatprep.subr.bf16.mxu0 %v8219_v34  ;;  %2178 = vmatprep.subr.bf16.mxu1 %v8222_v41 }
  0xfb   :  { %2015 = vmatpush1.bf16.msra.mxu0 %v8217_v59  ;;  %2179 = vmatpush1.bf16.msra.mxu1 %v8220_v26  ;;  %v7294_v59 = vcombine.high %v2889_v45, %v2905_v46 }
  0xfc   :  { %2016 = vmatprep.subr.bf16.mxu0 %v8225_v5  ;;  %2180 = vmatprep.subr.bf16.mxu1 %v8228_v4 }
  0xff   :  { %2017 = vmatpush1.bf16.msra.mxu0 %v8223_v57  ;;  %2181 = vmatpush1.bf16.msra.mxu1 %v8226_v60 }
 0x100   :  { %2733 = vmatprep.subr.bf16.mxu0 %v8231_v61  ;;  %6129 = vmatprep.subr.bf16.mxu1 %v7294_v59 }
 0x102   :  { %2019 = vmatmul.mubr.bf16.vlgmr.msra.gmra.mrb[0].mxu0 %v303_v63  ;;  %2183 = vmatmul.mubr.bf16.vlgmr.msra.gmra.mrb[0].mxu1 %v303_v63 }
 0x103   :  { %2734 = vmatpush1.bf16.msra.mxu0 %v8229_v0  ;;  %6130 = vmatpush1.bf16.msra.mxu1 %v7293_v56 }
 0x104   :  { %2735 = vmatprep.subr.bf16.mxu0 %v8234_v1 }
 0x107   :  { %2736 = vmatpush1.bf16.msra.mxu0 %v8232_v2 }
 0x108   :  { %2737 = vmatprep.subr.bf16.mxu0 %v8237_v3 }
 0x10b   :  { %2738 = vmatpush1.bf16.msra.mxu0 %v8235_v7 }
 0x10c   :  { %2739 = vmatprep.subr.bf16.mxu0 %v8240_v8 }
 0x10f   :  { %2740 = vmatpush1.bf16.msra.mxu0 %v8238_v10 }
 0x110   :  { %2741 = vmatprep.subr.bf16.mxu0 %v8243_v11 }
 0x113   :  { %2742 = vmatpush1.bf16.msra.mxu0 %v8241_v13 }
 0x114   :  { %2743 = vmatprep.subr.bf16.mxu0 %v8246_v14 }
 0x117   :  { %2744 = vmatpush1.bf16.msra.mxu0 %v8244_v15 }
 0x118   :  { %2745 = vmatprep.subr.bf16.mxu0 %v8249_v17 }
 0x11b   :  { %2746 = vmatpush1.bf16.msra.mxu0 %v8247_v20 }
 0x11c   :  { %2747 = vmatprep.subr.bf16.mxu0 %v8252_v21 }
 0x11f   :  { %2748 = vmatpush1.bf16.msra.mxu0 %v8250_v22 }
 0x120   :  { %2749 = vmatprep.subr.bf16.mxu0 %v8255_v23 }
 0x123   :  { %2750 = vmatpush1.bf16.msra.mxu0 %v8253_v24 }
 0x124   :  { %2751 = vmatprep.subr.bf16.mxu0 %v8258_v25 }
 0x127   :  { %2752 = vmatpush1.bf16.msra.mxu0 %v8256_v27 }
 0x128   :  { %2753 = vmatprep.subr.bf16.mxu0 %v8261_v9 }
 0x12b   :  { %2754 = vmatpush1.bf16.msra.mxu0 %v8259_v47 }
 0x12c   :  { %2755 = vmatprep.subr.bf16.mxu0 %v8264_v51 }
 0x12f   :  { %2756 = vmatpush1.bf16.msra.mxu0 %v8262_v12 }
 0x130   :  { %2757 = vmatprep.subr.bf16.mxu0 %v8267_v28 }
 0x133   :  { %2758 = vmatpush1.bf16.msra.mxu0 %v8265_v29 }
 0x134   :  { %2759 = vmatprep.subr.bf16.mxu0 %v8270_v30 }
 0x137   :  { %2760 = vmatpush1.bf16.msra.mxu0 %v8268_v49 }
 0x138   :  { %2761 = vmatprep.subr.bf16.mxu0 %v8273_v32 }
 0x13b   :  { %2762 = vmatpush1.bf16.msra.mxu0 %v8271_v31 }
 0x13c   :  { %2763 = vmatprep.subr.bf16.mxu0 %v8276_v36 }
 0x13f   :  { %2764 = vmatpush1.bf16.msra.mxu0 %v8274_v33 }
 0x140   :  { %2774 = vmatprep.subr.bf16.mxu0 %v8279_v35 }
 0x1d5   :  { %v2020_v43 = vpop.f32.mrb[0].mxu0  ;;  %v2184_v16 = vpop.f32.mrb[0].mxu1 }
 0x1d6   :  { %v7805_v48 = vadd.f32 %v2020_v43, %v566_v19  ;;  %v7807_v44 = vadd.f32 %v2184_v16, %v574_v38  ;;  %v2022_v34 = vpop.f32.mrb[1].mxu0  ;;  %v2186_v41 = vpop.f32.mrb[1].mxu1 }
 0x1d7   :  { %v7806_v26 = vadd.f32 %v2022_v34, %v570_v39  ;;  %v7808_v5 = vadd.f32 %v2186_v41, %v578_v40  ;;  %v2024_v4 = vpop.f32.mrb[2].mxu0  ;;  %v2188_v62 = vpop.f32.mrb[2].mxu1 }
 0x1d8   :  { %v2194_v57 = vsel %vm2193_vm9, %v7805_v48, 0.0  ;;  %v2208_v60 = vsel %vm2193_vm9, %v7807_v44, 0.0  ;;  %v2025_v61 = vpop.f32.mrb[3].mxu0  ;;  %v2189_v63 = vpop.f32.mrb[3].mxu1 }
 0x1d9   :  { %v2195_v0 = vrot.slane %v2194_v57, 4  ;;  %v2209_v1 = vrot.slane %v2208_v60, 4  ;;  %v2201_v2 = vsel %vm2193_vm9, %v7806_v26, 0.0  ;;  %v2215_v3 = vsel %vm2193_vm9, %v7808_v5, 0.0 }
 0x1da   :  { %v2202_v7 = vrot.slane %v2201_v2, 4  ;;  %v2216_v8 = vrot.slane %v2215_v3, 4 }
 0x1db   :  { %v2196_v10 = vadd.f32 %v2195_v0, %v2194_v57  ;;  %v2210_v11 = vadd.f32 %v2209_v1, %v2208_v60 }
 0x1dc   :  { %v2203_v13 = vadd.f32 %v2202_v7, %v2201_v2  ;;  %v2217_v14 = vadd.f32 %v2216_v8, %v2215_v3 }
 0x1dd   :  { %v2197_v15 = vrot.slane %v2196_v10, 2  ;;  %v2211_v17 = vrot.slane %v2210_v11, 2 }
 0x1de   :  { %v2204_v20 = vrot.slane %v2203_v13, 2  ;;  %v2218_v21 = vrot.slane %v2217_v14, 2 }
 0x1df   :  { %v2198_v22 = vadd.f32 %v2197_v15, %v2196_v10  ;;  %v2212_v23 = vadd.f32 %v2211_v17, %v2210_v11 }
 0x1e0   :  { %v2205_v24 = vadd.f32 %v2204_v20, %v2203_v13  ;;  %v2219_v25 = vadd.f32 %v2218_v21, %v2217_v14 }
 0x1e1   :  { %v2199_v27 = vrot.slane %v2198_v22, 1  ;;  %v2213_v9 = vrot.slane %v2212_v23, 1 }
 0x1e2   :  { %v2206_v47 = vrot.slane %v2205_v24, 1  ;;  %v2220_v51 = vrot.slane %v2219_v25, 1 }
 0x1e3   :  { %v2200_v12 = vadd.f32 %v2199_v27, %v2198_v22  ;;  %v2214_v28 = vadd.f32 %v2213_v9, %v2212_v23  ;;  %v2191_v9 = vld [vmem:[%s11436_s6] sm:$0xf] }
 0x1e4   :  { %v2207_v29 = vadd.f32 %v2206_v47, %v2205_v24  ;;  %v2221_v30 = vadd.f32 %v2220_v51, %v2219_v25  ;;  %v2192_v47 = vld [vmem:[%s11437_s7] sm:$0xf]  ;;  %v2283_v51 = vrot.slane %v2191_v9, %v8569_v54 }
 0x1e5   :  { %v2223_v49 = vmul.f32 0.5, %v2200_v12  ;;  %v2225_v32 = vmul.f32 0.5, %v2214_v28  ;;  %v2291_v28 = vrot.slane %v2191_v9, %v8605_v6 }
 0x1e6   :  { %v2224_v31 = vmul.f32 0.5, %v2207_v29  ;;  %v2226_v36 = vmul.f32 0.5, %v2221_v30 }
 0x1e7   :  { %v2227_v33 = vsub.f32 %v7805_v48, %v2223_v49  ;;  %v2229_v35 = vsub.f32 %v7807_v44, %v2225_v32  ;;  %v2287_v49 = vrot.slane %v2191_v9, %v8561_v52  ;;  %v2308_v32 = vrot.slane %v2192_v47, %v8569_v54 }
 0x1e8   :  { %v9518_v18 = vsub.f32 %v7806_v26, %v2224_v31  ;;  %v9520_v19 = vsub.f32 %v7808_v5, %v2226_v36 }
 0x1e9   :  { %v2231_v38 = vmul.f32 %v2227_v33, %v2227_v33  ;;  %v2233_v39 = vmul.f32 %v2229_v35, %v2229_v35 }
 0x1ea   :  { %v2232_v40 = vmul.f32 %v9518_v18, %v9518_v18  ;;  %v2234_v43 = vmul.f32 %v9520_v19, %v9520_v19 }
 0x1eb   :  { %v2235_v16 = vsel %vm2193_vm9, %v2231_v38, 0.0  ;;  %v2249_v45 = vsel %vm2193_vm9, %v2233_v39, 0.0  ;;  %v2295_v38 = vrot.slane %v2191_v9, %v8582_v58  ;;  %v2316_v39 = vrot.slane %v2192_v47, %v8605_v6  ;;  %v8315_v9 = vld [vmem:[%s11433_s8 + $0x1c4] ss:$8 sps:$4 sm:$0xff]  }
 0x1ec   :  { %v2236_v46 = vrot.slane %v2235_v16, 4  ;;  %v2250_v34 = vrot.slane %v2249_v45, 4  ;;  %v2242_v48 = vsel %vm2193_vm9, %v2232_v40, 0.0  ;;  %v2256_v44 = vsel %vm2193_vm9, %v2234_v43, 0.0 }
 0x1ed   :  { %v2243_v41 = vrot.slane %v2242_v48, 4  ;;  %v2257_v56 = vrot.slane %v2256_v44, 4 }
 0x1ee   :  { %v2237_v59 = vadd.f32 %v2236_v46, %v2235_v16  ;;  %v2251_v26 = vadd.f32 %v2250_v34, %v2249_v45  ;;  %v2312_v45 = vrot.slane %v2192_v47, %v8561_v52 }
 0x1ef   :  { %v2244_v5 = vadd.f32 %v2243_v41, %v2242_v48  ;;  %v2258_v4 = vadd.f32 %v2257_v56, %v2256_v44 }
 0x1f0   :  { %v2238_v62 = vrot.slane %v2237_v59, 2  ;;  %v2252_v57 = vrot.slane %v2251_v26, 2 }
 0x1f1   :  { %v2245_v60 = vrot.slane %v2244_v5, 2  ;;  %v2259_v61 = vrot.slane %v2258_v4, 2 }
 0x1f2   :  { %v2239_v63 = vadd.f32 %v2238_v62, %v2237_v59  ;;  %v2253_v0 = vadd.f32 %v2252_v57, %v2251_v26 }
 0x1f3   :  { %v2246_v1 = vadd.f32 %v2245_v60, %v2244_v5  ;;  %v2260_v2 = vadd.f32 %v2259_v61, %v2258_v4  ;;  %v8280_v61 = vld [vmem:[%s11433_s8 + $0x110] ss:$8 sps:$4 sm:$0xff]  }
 0x1f4   :  { %v2240_v3 = vrot.slane %v2239_v63, 1  ;;  %v2254_v7 = vrot.slane %v2253_v0, 1 }
 0x1f5   :  { %v2247_v8 = vrot.slane %v2246_v1, 1  ;;  %v2261_v10 = vrot.slane %v2260_v2, 1 }
 0x1f6   :  { %v2241_v11 = vadd.f32 %v2240_v3, %v2239_v63  ;;  %v2255_v13 = vadd.f32 %v2254_v7, %v2253_v0  ;;  %v8285_v63 = vld [vmem:[%s11433_s8 + $0x124] ss:$8 sps:$4 sm:$0xff]   ;;  %v8283_v0 = vld [vmem:[%s11433_s8 + $0x120] ss:$8 sps:$4 sm:$0xff]  }
 0x1f7   :  { %v2248_v14 = vadd.f32 %v2247_v8, %v2246_v1  ;;  %v2262_v15 = vadd.f32 %v2261_v10, %v2260_v2  ;;  %v8288_v1 = vld [vmem:[%s11433_s8 + $0x134] ss:$8 sps:$4 sm:$0xff]   ;;  %v8286_v2 = vld [vmem:[%s11433_s8 + $0x130] ss:$8 sps:$4 sm:$0xff]   ;;  %v8291_v3 = vld [vmem:[%s11433_s8 + $0x144] ss:$8 sps:$4 sm:$0xff]  }
 0x1f8   :  { %v2263_v17 = vmul.f32 0.5, %v2241_v11  ;;  %v2265_v20 = vmul.f32 0.5, %v2255_v13  ;;  %v8289_v7 = vld [vmem:[%s11433_s8 + $0x140] ss:$8 sps:$4 sm:$0xff]   ;;  %v8294_v8 = vld [vmem:[%s11433_s8 + $0x154] ss:$8 sps:$4 sm:$0xff]  }
 0x1f9   :  { %v2264_v21 = vmul.f32 0.5, %v2248_v14  ;;  %v2266_v22 = vmul.f32 0.5, %v2262_v15  ;;  %v8292_v10 = vld [vmem:[%s11433_s8 + $0x150] ss:$8 sps:$4 sm:$0xff]   ;;  %v8297_v11 = vld [vmem:[%s11433_s8 + $0x164] ss:$8 sps:$4 sm:$0xff]  }
 0x1fa   :  { %v2267_v23 = vadd.f32 1e-05, %v2263_v17  ;;  %v2269_v24 = vadd.f32 1e-05, %v2265_v20  ;;  %v8295_v13 = vld [vmem:[%s11433_s8 + $0x160] ss:$8 sps:$4 sm:$0xff]  }
 0x1fb   :  { %v2268_v25 = vadd.f32 1e-05, %v2264_v21  ;;  %v2270_v27 = vadd.f32 1e-05, %v2266_v22  ;;  %v8300_v14 = vld [vmem:[%s11433_s8 + $0x174] ss:$8 sps:$4 sm:$0xff]  }
 0x1fc   :  { %8325 = vrsqrt.f32 %v2267_v23  ;;  %v8298_v15 = vld [vmem:[%s11433_s8 + $0x170] ss:$8 sps:$4 sm:$0xff]   ;;  %v8303_v17 = vld [vmem:[%s11433_s8 + $0x184] ss:$8 sps:$4 sm:$0xff]   ;;  %v8301_v20 = vld [vmem:[%s11433_s8 + $0x180] ss:$8 sps:$4 sm:$0xff]  }
 0x1fd   :  { %8327 = vrsqrt.f32 %v2269_v24  ;;  %v8306_v21 = vld [vmem:[%s11433_s8 + $0x194] ss:$8 sps:$4 sm:$0xff]   ;;  %v8304_v22 = vld [vmem:[%s11433_s8 + $0x190] ss:$8 sps:$4 sm:$0xff]   ;;  %v8309_v23 = vld [vmem:[%s11433_s8 + $0x1a4] ss:$8 sps:$4 sm:$0xff]  }
 0x1fe   :  { %8329 = vrsqrt.f32 %v2268_v25  ;;  %v8307_v24 = vld [vmem:[%s11433_s8 + $0x1a0] ss:$8 sps:$4 sm:$0xff]   ;;  %v8312_v25 = vld [vmem:[%s11433_s8 + $0x1b4] ss:$8 sps:$4 sm:$0xff]  }
 0x1ff   :  { %8331 = vrsqrt.f32 %v2270_v27  ;;  %v8310_v27 = vld [vmem:[%s11433_s8 + $0x1b0] ss:$8 sps:$4 sm:$0xff]  }
 0x206   :  { %v8326_v12 = vpop.eup %8325 }
 0x207   :  { %v8328_v29 = vpop.eup %8327  ;;  %v2275_v30 = vmul.f32 %v8326_v12, %v2227_v33  ;;  %v2320_v33 = vrot.slane %v2192_v47, %v8582_v58  ;;  %v8313_v47 = vld [vmem:[%s11433_s8 + $0x1c0] ss:$8 sps:$4 sm:$0xff]   ;;  %v8316_v12 = vld [vmem:[%s11433_s8 + $0x1d0] ss:$8 sps:$4 sm:$0xff]  }
 0x208   :  { %v8330_v31 = vpop.eup %8329  ;;  %v2277_v36 = vmul.f32 %v8328_v29, %v2229_v35  ;;  %v8319_v29 = vld [vmem:[%s11433_s8 + $0x1e0] ss:$8 sps:$4 sm:$0xff]  }
 0x209   :  { %v8332_v40 = vpop.eup %8331  ;;  %v2300_v43 = vmul.f32 %v2283_v51, %v2275_v30  ;;  %v2276_v16 = vmul.f32 %v8330_v31, %v9518_v18  ;;  %v8277_v18 = vld [vmem:[%s11433_s8 + $0x100] ss:$8 sps:$4 sm:$0xff]   ;;  %v8318_v51 = vld [vmem:[%s11433_s8 + $0x1d4] ss:$8 sps:$4 sm:$0xff]   ;;  %v8322_v31 = vld [vmem:[%s11433_s8 + $0x1f0] ss:$8 sps:$4 sm:$0xff]  }
 0x20a   :  { %v2302_v46 = vmul.f32 %v2291_v28, %v2277_v36  ;;  %v2278_v34 = vmul.f32 %v8332_v40, %v9520_v19  ;;  %v8282_v19 = vld [vmem:[%s11433_s8 + $0x114] ss:$8 sps:$4 sm:$0xff]   ;;  %v8321_v28 = vld [vmem:[%s11433_s8 + $0x1e4] ss:$8 sps:$4 sm:$0xff]  }
 0x20b   :  { %v2301_v48 = vmul.f32 %v2287_v49, %v2276_v16  ;;  %v2325_v44 = vadd.f32 %v2308_v32, %v2300_v43  ;;  %v8324_v30 = vld [vmem:[%s11433_s8 + $0x1f4] ss:$8 sps:$4 sm:$0xff]   ;;  %v2921_v43 = vld [vmem:[%s11435_s12 + $0x100] sm:$0xff] }
 0x20c   :  { %v2303_v41 = vmul.f32 %v2295_v38, %v2278_v34  ;;  %v9546_v56 = vadd.f32 %v2316_v39, %v2302_v46  ;;  %v2891_v49 = vld [vmem:[%s11435_s12 + $0x10] sm:$0xff]  ;;  %v2937_v16 = vld [vmem:[%s11435_s12 + $0x180] sm:$0xff] }
 0x20d   :  { %v2326_v35 = vadd.f32 %v2312_v45, %v2301_v48  ;;  %v2329_v59 = vmax.f32 %v2325_v44, 0.0  ;;  %v2907_v32 = vld [vmem:[%s11435_s12 + $0x90] sm:$0xff]  ;;  %v7326_v46 = vcombine.high %v2921_v43, %v2937_v16 }
 0x20e   :  { %v2328_v26 = vadd.f32 %v2320_v33, %v2303_v41  ;;  %v2331_v36 = vmax.f32 %v9546_v56, 0.0  ;;  %v7298_v38 = vcombine.high %v2891_v49, %v2907_v32  ;;  %v7297_v39 = vcombine.low %v2891_v49, %v2907_v32  ;;  %v2923_v45 = vld [vmem:[%s11435_s12 + $0x110] sm:$0xff]  ;;  %v2953_v41 = vld [vmem:[%s11435_s12 + $0x200] sm:$0xff] }
 0x20f   :  { %v2330_v5 = vmax.f32 %v2326_v35, 0.0  ;;  %v2333_v57 = vpack.c.bf16 %v2329_v59, %v2329_v59  ;;  %v2939_v34 = vld [vmem:[%s11435_s12 + $0x190] sm:$0xff]  ;;  %v7325_v33 = vcombine.low %v2921_v43, %v2937_v16  ;;  %6131 = vmatprep.subr.bf16.mxu1 %v7326_v46  ;;  %v2969_v56 = vld [vmem:[%s11435_s12 + $0x280] sm:$0xff] }
 0x210   :  { %v2332_v4 = vmax.f32 %v2328_v26, 0.0  ;;  %v2335_v40 = vpack.c.bf16 %v2331_v36, %v2331_v36  ;;  %v7329_v48 = vcombine.low %v2923_v45, %v2939_v34  ;;  %v7330_v44 = vcombine.high %v2923_v45, %v2939_v34  ;;  %v2955_v35 = vld [vmem:[%s11435_s12 + $0x210] sm:$0xff]  ;;  %v3113_v49 = vld [vmem:[%s11435_s12 + $0x700] sm:$0xff] }
 0x211   :  { %v2334_v62 = vpack.c.bf16 %v2330_v5, %v2330_v5  ;;  %6132 = vmatpush1.bf16.msra.mxu1 %v7325_v33  ;;  %v7358_v59 = vcombine.high %v2953_v41, %v2969_v56  ;;  %v2971_v26 = vld [vmem:[%s11435_s12 + $0x290] sm:$0xff]  ;;  %v7357_v5 = vcombine.low %v2953_v41, %v2969_v56  ;;  %v3129_v32 = vld [vmem:[%s11435_s12 + $0x780] sm:$0xff] }
 0x212   :  { %v2336_v60 = vpack.c.bf16 %v2332_v4, %v2332_v4  ;;  %v7361_v4 = vcombine.low %v2955_v35, %v2971_v26  ;;  %v7518_v36 = vcombine.high %v3113_v49, %v3129_v32  ;;  %v3145_v16 = vld [vmem:[%s11435_s12 + $0x800] sm:$0xff]  ;;  %v3147_v46 = vld [vmem:[%s11435_s12 + $0x810] sm:$0xff] }
 0x213   :  { %2765 = vmatprep.mubr.bf16.mxu0 %v2334_v62  ;;  %v7362_v62 = vcombine.high %v2955_v35, %v2971_v26  ;;  %6133 = vmatprep.subr.bf16.mxu1 %v7358_v59  ;;  %v3161_v45 = vld [vmem:[%s11435_s12 + $0x880] sm:$0xff]  ;;  %v3163_v33 = vld [vmem:[%s11435_s12 + $0x890] sm:$0xff] }
 0x214   :  { %2766 = vmatmul.mubr.bf16.vlgmr.msra.gmra.mrb[4].mxu0 %v2333_v57  ;;  %v3001_v57 = vld [vmem:[%s11435_s12 + $0x380] sm:$0xff]  ;;  %v7550_v34 = vcombine.high %v3145_v16, %v3161_v45  ;;  %v7554_v41 = vcombine.high %v3147_v46, %v3163_v33  ;;  %v3179_v59 = vld [vmem:[%s11435_s12 + $0x910] sm:$0xff] }
 0x215   :  { %2775 = vmatpush1.bf16.msra.mxu0 %v8277_v18  ;;  %2806 = vmatprep.mubr.bf16.mxu0 %v2336_v60  ;;  %v2985_v18 = vld [vmem:[%s11435_s12 + $0x300] sm:$0xff] }
 0x216   :  { %2776 = vmatprep.subr.bf16.mxu0 %v8282_v19  ;;  %6134 = vmatpush1.bf16.msra.mxu1 %v7357_v5  ;;  %v2987_v19 = vld [vmem:[%s11435_s12 + $0x310] sm:$0xff]  ;;  %v7390_v60 = vcombine.high %v2985_v18, %v3001_v57  ;;  %v3177_v56 = vld [vmem:[%s11435_s12 + $0x900] sm:$0xff] }
 0x217   :  { %v3193_v35 = vld [vmem:[%s11435_s12 + $0x980] sm:$0xff]  ;;  %v3195_v5 = vld [vmem:[%s11435_s12 + $0x990] sm:$0xff] }
 0x218   :  { %6135 = vmatprep.subr.bf16.mxu1 %v7390_v60  ;;  %v7582_v26 = vcombine.high %v3177_v56, %v3193_v35  ;;  %v3211_v60 = vld [vmem:[%s11435_s12 + $0xa10] sm:$0xff] }
 0x219   :  { %2777 = vmatpush1.bf16.msra.mxu0 %v8280_v61  ;;  %v3003_v61 = vld [vmem:[%s11435_s12 + $0x390] sm:$0xff] }
 0x21a   :  { %2778 = vmatprep.subr.bf16.mxu0 %v8285_v63  ;;  %v7389_v63 = vcombine.low %v2985_v18, %v3001_v57  ;;  %v7586_v18 = vcombine.high %v3179_v59, %v3195_v5  ;;  %v3209_v57 = vld [vmem:[%s11435_s12 + $0xa00] sm:$0xff] }
 0x21c   :  { %6136 = vmatpush1.bf16.msra.mxu1 %v7389_v63  ;;  %v3227_v63 = vld [vmem:[%s11435_s12 + $0xa90] sm:$0xff] }
 0x21d   :  { %2779 = vmatpush1.bf16.msra.mxu0 %v8283_v0  ;;  %v7393_v0 = vcombine.low %v2987_v19, %v3003_v61 }
 0x21e   :  { %2780 = vmatprep.subr.bf16.mxu0 %v8288_v1  ;;  %v7394_v1 = vcombine.high %v2987_v19, %v3003_v61  ;;  %v3225_v19 = vld [vmem:[%s11435_s12 + $0xa80] sm:$0xff] }
 0x21f   :  { %v7614_v61 = vcombine.high %v3209_v57, %v3225_v19 }
 0x221   :  { %2781 = vmatpush1.bf16.msra.mxu0 %v8286_v2  ;;  %v3017_v2 = vld [vmem:[%s11435_s12 + $0x400] sm:$0xff] }
 0x222   :  { %2782 = vmatprep.subr.bf16.mxu0 %v8291_v3  ;;  %v3033_v3 = vld [vmem:[%s11435_s12 + $0x480] sm:$0xff] }
 0x225   :  { %2783 = vmatpush1.bf16.msra.mxu0 %v8289_v7  ;;  %v3019_v7 = vld [vmem:[%s11435_s12 + $0x410] sm:$0xff] }
 0x226   :  { %2784 = vmatprep.subr.bf16.mxu0 %v8294_v8  ;;  %v7422_v8 = vcombine.high %v3017_v2, %v3033_v3 }
 0x228   :  { %6137 = vmatprep.subr.bf16.mxu1 %v7422_v8  ;;  %v3243_v8 = vld [vmem:[%s11435_s12 + $0xb10] sm:$0xff] }
 0x229   :  { %2785 = vmatpush1.bf16.msra.mxu0 %v8292_v10  ;;  %v3035_v10 = vld [vmem:[%s11435_s12 + $0x490] sm:$0xff] }
 0x22a   :  { %2786 = vmatprep.subr.bf16.mxu0 %v8297_v11  ;;  %v7421_v11 = vcombine.low %v3017_v2, %v3033_v3  ;;  %v7618_v2 = vcombine.high %v3211_v60, %v3227_v63  ;;  %v3241_v3 = vld [vmem:[%s11435_s12 + $0xb00] sm:$0xff] }
 0x22c   :  { %6138 = vmatpush1.bf16.msra.mxu1 %v7421_v11  ;;  %v3259_v11 = vld [vmem:[%s11435_s12 + $0xb90] sm:$0xff] }
 0x22d   :  { %2787 = vmatpush1.bf16.msra.mxu0 %v8295_v13  ;;  %v7425_v13 = vcombine.low %v3019_v7, %v3035_v10 }
 0x22e   :  { %2788 = vmatprep.subr.bf16.mxu0 %v8300_v14  ;;  %v7426_v14 = vcombine.high %v3019_v7, %v3035_v10  ;;  %v3257_v7 = vld [vmem:[%s11435_s12 + $0xb80] sm:$0xff] }
 0x22f   :  { %v7646_v10 = vcombine.high %v3241_v3, %v3257_v7 }
 0x231   :  { %2789 = vmatpush1.bf16.msra.mxu0 %v8298_v15  ;;  %v3049_v15 = vld [vmem:[%s11435_s12 + $0x500] sm:$0xff] }
 0x232   :  { %2790 = vmatprep.subr.bf16.mxu0 %v8303_v17  ;;  %v3065_v17 = vld [vmem:[%s11435_s12 + $0x580] sm:$0xff] }
 0x235   :  { %2791 = vmatpush1.bf16.msra.mxu0 %v8301_v20  ;;  %v3051_v20 = vld [vmem:[%s11435_s12 + $0x510] sm:$0xff] }
 0x236   :  { %2792 = vmatprep.subr.bf16.mxu0 %v8306_v21  ;;  %v7454_v21 = vcombine.high %v3049_v15, %v3065_v17 }
 0x238   :  { %6139 = vmatprep.subr.bf16.mxu1 %v7454_v21  ;;  %v3275_v21 = vld [vmem:[%s11435_s12 + $0xc10] sm:$0xff] }
 0x239   :  { %2793 = vmatpush1.bf16.msra.mxu0 %v8304_v22  ;;  %v3067_v22 = vld [vmem:[%s11435_s12 + $0x590] sm:$0xff] }
 0x23a   :  { %2794 = vmatprep.subr.bf16.mxu0 %v8309_v23  ;;  %v7453_v23 = vcombine.low %v3049_v15, %v3065_v17  ;;  %v7650_v15 = vcombine.high %v3243_v8, %v3259_v11  ;;  %v3273_v17 = vld [vmem:[%s11435_s12 + $0xc00] sm:$0xff] }
 0x23c   :  { %6140 = vmatpush1.bf16.msra.mxu1 %v7453_v23  ;;  %v3291_v23 = vld [vmem:[%s11435_s12 + $0xc90] sm:$0xff] }
 0x23d   :  { %2795 = vmatpush1.bf16.msra.mxu0 %v8307_v24  ;;  %v7457_v24 = vcombine.low %v3051_v20, %v3067_v22 }
 0x23e   :  { %2796 = vmatprep.subr.bf16.mxu0 %v8312_v25  ;;  %v7458_v25 = vcombine.high %v3051_v20, %v3067_v22  ;;  %v3289_v20 = vld [vmem:[%s11435_s12 + $0xc80] sm:$0xff] }
 0x23f   :  { %v7678_v22 = vcombine.high %v3273_v17, %v3289_v20 }
 0x241   :  { %2797 = vmatpush1.bf16.msra.mxu0 %v8310_v27  ;;  %v3081_v27 = vld [vmem:[%s11435_s12 + $0x600] sm:$0xff] }
 0x242   :  { %2798 = vmatprep.subr.bf16.mxu0 %v8315_v9  ;;  %v3097_v9 = vld [vmem:[%s11435_s12 + $0x680] sm:$0xff] }
 0x245   :  { %2799 = vmatpush1.bf16.msra.mxu0 %v8313_v47  ;;  %v3083_v47 = vld [vmem:[%s11435_s12 + $0x610] sm:$0xff] }
 0x246   :  { %2800 = vmatprep.subr.bf16.mxu0 %v8318_v51  ;;  %v7486_v51 = vcombine.high %v3081_v27, %v3097_v9 }
 0x248   :  { %6141 = vmatprep.subr.bf16.mxu1 %v7486_v51  ;;  %v3307_v51 = vld [vmem:[%s11435_s12 + $0xd10] sm:$0xff] }
 0x249   :  { %2801 = vmatpush1.bf16.msra.mxu0 %v8316_v12  ;;  %v3099_v12 = vld [vmem:[%s11435_s12 + $0x690] sm:$0xff] }
 0x24a   :  { %2802 = vmatprep.subr.bf16.mxu0 %v8321_v28  ;;  %v7485_v28 = vcombine.low %v3081_v27, %v3097_v9  ;;  %v7682_v27 = vcombine.high %v3275_v21, %v3291_v23  ;;  %v3305_v9 = vld [vmem:[%s11435_s12 + $0xd00] sm:$0xff] }
 0x24c   :  { %6142 = vmatpush1.bf16.msra.mxu1 %v7485_v28  ;;  %v3323_v28 = vld [vmem:[%s11435_s12 + $0xd90] sm:$0xff] }
 0x24d   :  { %2803 = vmatpush1.bf16.msra.mxu0 %v8319_v29  ;;  %v7489_v29 = vcombine.low %v3083_v47, %v3099_v12  ;;  %6143 = vmatprep.subr.bf16.mxu1 %v7518_v36  ;;  %v3339_v36 = vld [vmem:[%s11435_s12 + $0xe10] sm:$0xff] }
 0x24e   :  { %2804 = vmatprep.subr.bf16.mxu0 %v8324_v30  ;;  %v7490_v30 = vcombine.high %v3083_v47, %v3099_v12  ;;  %v3321_v47 = vld [vmem:[%s11435_s12 + $0xd80] sm:$0xff] }
 0x24f   :  { %v7710_v12 = vcombine.high %v3305_v9, %v3321_v47 }
 0x251   :  { %2805 = vmatpush1.bf16.msra.mxu0 %v8322_v31  ;;  %v3115_v31 = vld [vmem:[%s11435_s12 + $0x710] sm:$0xff] }
 0x252   :  { %6211 = vmatprep.subr.bf16.mxu0 %v7298_v38  ;;  %v3131_v38 = vld [vmem:[%s11435_s12 + $0x790] sm:$0xff] }
 0x253   :  { %v7522_v43 = vcombine.high %v3115_v31, %v3131_v38 }
 0x254   :  { %2807 = vmatmul.mubr.bf16.vlgmr.msra.gmra.mrb[4].mxu0 %v2335_v40  ;;  %v7521_v40 = vcombine.low %v3115_v31, %v3131_v38  ;;  %v3353_v31 = vld [vmem:[%s11435_s12 + $0xe80] sm:$0xff] }
 0x255   :  { %6212 = vmatpush1.bf16.msra.mxu0 %v7297_v39  ;;  %v7517_v39 = vcombine.low %v3113_v49, %v3129_v32  ;;  %v7714_v49 = vcombine.high %v3307_v51, %v3323_v28  ;;  %v3337_v32 = vld [vmem:[%s11435_s12 + $0xe00] sm:$0xff] }
 0x256   :  { %6213 = vmatprep.subr.bf16.mxu0 %v7330_v44  ;;  %v7553_v44 = vcombine.low %v3147_v46, %v3163_v33  ;;  %v7742_v38 = vcombine.high %v3337_v32, %v3353_v31  ;;  %v3385_v46 = vld [vmem:[%s11435_s12 + $0xf80] sm:$0xff] }
 0x257   :  { %6144 = vmatpush1.bf16.msra.mxu1 %v7517_v39  ;;  %v3355_v39 = vld [vmem:[%s11435_s12 + $0xe90] sm:$0xff] }
 0x258   :  { %6145 = vmatprep.subr.bf16.mxu1 %v7550_v34  ;;  %v3371_v34 = vld [vmem:[%s11435_s12 + $0xf10] sm:$0xff] }
 0x259   :  { %6214 = vmatpush1.bf16.msra.mxu0 %v7329_v48  ;;  %v7549_v48 = vcombine.low %v3145_v16, %v3161_v45  ;;  %v7746_v16 = vcombine.high %v3339_v36, %v3355_v39  ;;  %v3369_v45 = vld [vmem:[%s11435_s12 + $0xf00] sm:$0xff] }
 0x25a   :  { %6215 = vmatprep.subr.bf16.mxu0 %v7362_v62  ;;  %v7585_v62 = vcombine.low %v3179_v59, %v3195_v5  ;;  %v7774_v33 = vcombine.high %v3369_v45, %v3385_v46  ;;  %v9836_v59 = vld [vmem:[%s11435_s12 + $0x88] sm:$0xff] }
 0x25b   :  { %6146 = vmatpush1.bf16.msra.mxu1 %v7549_v48  ;;  %v3387_v48 = vld [vmem:[%s11435_s12 + $0xf90] sm:$0xff] }
 0x25c   :  { %6147 = vmatprep.subr.bf16.mxu1 %v7582_v26  ;;  %v9841_v26 = vld [vmem:[%s11435_s12 + $0x20] sm:$0xff] }
 0x25d   :  { %6216 = vmatpush1.bf16.msra.mxu0 %v7361_v4  ;;  %v7581_v4 = vcombine.low %v3177_v56, %v3193_v35  ;;  %v7778_v56 = vcombine.high %v3371_v34, %v3387_v48  ;;  %v9831_v35 = vld [vmem:[%s11435_s12 + $0x8] sm:$0xff] }
 0x25e   :  { %6217 = vmatprep.subr.bf16.mxu0 %v7394_v1  ;;  %v7617_v1 = vcombine.low %v3211_v60, %v3227_v63  ;;  %v7296_v5 = vcombine.high %v9831_v35, %v9836_v59 }
 0x25f   :  { %6148 = vmatpush1.bf16.msra.mxu1 %v7581_v4  ;;  %v9848_v4 = vld [vmem:[%s11435_s12 + $0xa0] sm:$0xff] }
 0x260   :  { %6149 = vmatprep.subr.bf16.mxu1 %v7614_v61 }
 0x261   :  { %6218 = vmatpush1.bf16.msra.mxu0 %v7393_v0  ;;  %v7613_v0 = vcombine.low %v3209_v57, %v3225_v19  ;;  %v7302_v57 = vcombine.high %v9841_v26, %v9848_v4  ;;  %v2401_v19 = vld [vmem:[%s11438_s9] sm:$0x3] }
 0x262   :  { %6219 = vmatprep.subr.bf16.mxu0 %v7426_v14  ;;  %v7649_v14 = vcombine.low %v3243_v8, %v3259_v11  ;;  %v2406_v60 = vrot.slane %v2401_v19, %v8569_v54  ;;  %v2410_v61 = vrot.slane %v2401_v19, %v8561_v52 }
 0x263   :  { %6150 = vmatpush1.bf16.msra.mxu1 %v7613_v0 }
 0x264   :  { %6151 = vmatprep.subr.bf16.mxu1 %v7646_v10 }
 0x265   :  { %6220 = vmatpush1.bf16.msra.mxu0 %v7425_v13  ;;  %v7645_v13 = vcombine.low %v3241_v3, %v3257_v7 }
 0x266   :  { %6221 = vmatprep.subr.bf16.mxu0 %v7458_v25  ;;  %v7681_v25 = vcombine.low %v3275_v21, %v3291_v23 }
 0x267   :  { %6152 = vmatpush1.bf16.msra.mxu1 %v7645_v13 }
 0x268   :  { %6153 = vmatprep.subr.bf16.mxu1 %v7678_v22 }
 0x269   :  { %6222 = vmatpush1.bf16.msra.mxu0 %v7457_v24  ;;  %v7677_v24 = vcombine.low %v3273_v17, %v3289_v20 }
 0x26a   :  { %6223 = vmatprep.subr.bf16.mxu0 %v7490_v30  ;;  %v7713_v30 = vcombine.low %v3307_v51, %v3323_v28 }
 0x26b   :  { %6154 = vmatpush1.bf16.msra.mxu1 %v7677_v24 }
 0x26c   :  { %6155 = vmatprep.subr.bf16.mxu1 %v7710_v12 }
 0x26d   :  { %6224 = vmatpush1.bf16.msra.mxu0 %v7489_v29  ;;  %v7709_v29 = vcombine.low %v3305_v9, %v3321_v47 }
 0x26e   :  { %6225 = vmatprep.subr.bf16.mxu0 %v7522_v43  ;;  %v7745_v43 = vcombine.low %v3339_v36, %v3355_v39 }
 0x26f   :  { %6156 = vmatpush1.bf16.msra.mxu1 %v7709_v29 }
 0x270   :  { %6157 = vmatprep.subr.bf16.mxu1 %v7742_v38 }
 0x271   :  { %6226 = vmatpush1.bf16.msra.mxu0 %v7521_v40  ;;  %v7741_v40 = vcombine.low %v3337_v32, %v3353_v31 }
 0x272   :  { %6227 = vmatprep.subr.bf16.mxu0 %v7554_v41  ;;  %v7777_v41 = vcombine.low %v3371_v34, %v3387_v48 }
 0x273   :  { %6158 = vmatpush1.bf16.msra.mxu1 %v7741_v40 }
 0x274   :  { %6159 = vmatprep.subr.bf16.mxu1 %v7774_v33 }
 0x275   :  { %6228 = vmatpush1.bf16.msra.mxu0 %v7553_v44  ;;  %v7773_v44 = vcombine.low %v3369_v45, %v3385_v46 }
 0x276   :  { %6229 = vmatprep.subr.bf16.mxu0 %v7586_v18  ;;  %v7301_v18 = vcombine.low %v9841_v26, %v9848_v4  ;;  %v3005_v26 = vld [vmem:[%s11435_s12 + $0x3a0] sm:$0xff] }
 0x277   :  { %6160 = vmatpush1.bf16.msra.mxu1 %v7773_v44 }
 0x278   :  { %6170 = vmatprep.subr.bf16.mxu1 %v7296_v5  ;;  %v2815_v5 = vld [vmem:[%s11439_s10] sm:$0x3] }
 0x279   :  { %6230 = vmatpush1.bf16.msra.mxu0 %v7585_v62  ;;  %v7295_v62 = vcombine.low %v9831_v35, %v9836_v59  ;;  %v2863_v19 = vrot.slane %v2815_v5, %v8569_v54  ;;  %v3002_v35 = vld [vmem:[%s11435_s12 + $0x388] sm:$0xff]  ;;  %v2989_v59 = vld [vmem:[%s11435_s12 + $0x320] sm:$0xff] }
 0x27a   :  { %6231 = vmatprep.subr.bf16.mxu0 %v7618_v2 }
 0x27d   :  { %6232 = vmatpush1.bf16.msra.mxu0 %v7617_v1 }
 0x27e   :  { %6233 = vmatprep.subr.bf16.mxu0 %v7650_v15 }
 0x281   :  { %6234 = vmatpush1.bf16.msra.mxu0 %v7649_v14 }
 0x282   :  { %6235 = vmatprep.subr.bf16.mxu0 %v7682_v27 }
 0x285   :  { %6236 = vmatpush1.bf16.msra.mxu0 %v7681_v25 }
 0x286   :  { %6237 = vmatprep.subr.bf16.mxu0 %v7714_v49 }
 0x289   :  { %6238 = vmatpush1.bf16.msra.mxu0 %v7713_v30 }
 0x28a   :  { %6239 = vmatprep.subr.bf16.mxu0 %v7746_v16 }
 0x28d   :  { %6240 = vmatpush1.bf16.msra.mxu0 %v7745_v43 }
 0x28e   :  { %6241 = vmatprep.subr.bf16.mxu0 %v7778_v56 }
 0x291   :  { %6242 = vmatpush1.bf16.msra.mxu0 %v7777_v41 }
 0x292   :  { %6293 = vmatprep.subr.bf16.mxu0 %v7302_v57  ;;  %v2816_v57 = vld [vmem:[%s11440_s11] sm:$0x3] }
 0x327   :  { %v2808_v63 = vpop.f32.mrb[4].mxu0 }
 0x328   :  { %v7809_v0 = vadd.f32 %v2808_v63, %v2406_v60  ;;  %v2810_v1 = vpop.f32.mrb[5].mxu0 }
 0x329   :  { %v7810_v2 = vadd.f32 %v2810_v1, %v2410_v61  ;;  %v2812_v3 = vpop.f32.mrb[6].mxu0  ;;  %v2867_v61 = vrot.slane %v2815_v5, %v8561_v52  ;;  %v2876_v1 = vrot.slane %v2816_v57, %v8569_v54 }
 0x32a   :  { %v2817_v7 = vsel %vm2193_vm9, %v7809_v0, 0.0  ;;  %v2813_v8 = vpop.f32.mrb[7].mxu0  ;;  %v2880_v3 = vrot.slane %v2816_v57, %v8561_v52  ;;  %v3082_v57 = vld [vmem:[%s11435_s12 + $0x608] sm:$0xff] }
 0x32b   :  { %v2818_v10 = vrot.slane %v2817_v7, 4  ;;  %v2824_v11 = vsel %vm2193_vm9, %v7810_v2, 0.0 }
 0x32c   :  { %v2825_v13 = vrot.slane %v2824_v11, 4 }
 0x32d   :  { %v2819_v14 = vadd.f32 %v2818_v10, %v2817_v7 }
 0x32e   :  { %v2826_v15 = vadd.f32 %v2825_v13, %v2824_v11 }
 0x32f   :  { %v2820_v17 = vrot.slane %v2819_v14, 2 }
 0x330   :  { %v2827_v20 = vrot.slane %v2826_v15, 2 }
 0x331   :  { %v2821_v21 = vadd.f32 %v2820_v17, %v2819_v14  ;;  %v2938_v17 = vld [vmem:[%s11435_s12 + $0x188] sm:$0xff] }
 0x332   :  { %v2828_v22 = vadd.f32 %v2827_v20, %v2826_v15  ;;  %v2922_v15 = vld [vmem:[%s11435_s12 + $0x108] sm:$0xff]  ;;  %v2925_v20 = vld [vmem:[%s11435_s12 + $0x120] sm:$0xff] }
 0x333   :  { %v2822_v23 = vrot.slane %v2821_v21, 1 }
 0x334   :  { %v2829_v24 = vrot.slane %v2828_v22, 1 }
 0x335   :  { %v2823_v25 = vadd.f32 %v2822_v23, %v2821_v21  ;;  %v2941_v21 = vld [vmem:[%s11435_s12 + $0x1a0] sm:$0xff] }
 0x336   :  { %v2830_v27 = vadd.f32 %v2829_v24, %v2828_v22  ;;  %v2954_v24 = vld [vmem:[%s11435_s12 + $0x208] sm:$0xff] }
 0x337   :  { %v2831_v9 = vmul.f32 0.5, %v2823_v25  ;;  %v7328_v25 = vcombine.high %v2922_v15, %v2938_v17 }
 0x338   :  { %v2832_v47 = vmul.f32 0.5, %v2830_v27  ;;  %v7334_v27 = vcombine.high %v2925_v20, %v2941_v21 }
 0x339   :  { %v2833_v51 = vsub.f32 %v7809_v0, %v2831_v9  ;;  %v2970_v9 = vld [vmem:[%s11435_s12 + $0x288] sm:$0xff] }
 0x33a   :  { %v2834_v12 = vsub.f32 %v7810_v2, %v2832_v47  ;;  %v2957_v47 = vld [vmem:[%s11435_s12 + $0x220] sm:$0xff]  ;;  %v7359_v4 = vcombine.low %v2954_v24, %v2970_v9 }
 0x33b   :  { %v2835_v28 = vmul.f32 %v2833_v51, %v2833_v51 }
 0x33c   :  { %v2836_v29 = vmul.f32 %v2834_v12, %v2834_v12 }
 0x33d   :  { %v2837_v30 = vsel %vm2193_vm9, %v2835_v28, 0.0  ;;  %v7333_v28 = vcombine.low %v2925_v20, %v2941_v21  ;;  %v3162_v20 = vld [vmem:[%s11435_s12 + $0x888] sm:$0xff]  ;;  %v3149_v21 = vld [vmem:[%s11435_s12 + $0x820] sm:$0xff] }
 0x33e   :  { %v2838_v49 = vrot.slane %v2837_v30, 4  ;;  %v2844_v32 = vsel %vm2193_vm9, %v2836_v29, 0.0  ;;  %v7360_v29 = vcombine.high %v2954_v24, %v2970_v9  ;;  %v3165_v24 = vld [vmem:[%s11435_s12 + $0x8a0] sm:$0xff] }
 0x33f   :  { %v2845_v31 = vrot.slane %v2844_v32, 4 }
 0x340   :  { %v2839_v36 = vadd.f32 %v2838_v49, %v2837_v30  ;;  %v2986_v49 = vld [vmem:[%s11435_s12 + $0x308] sm:$0xff] }
 0x341   :  { %v2846_v38 = vadd.f32 %v2845_v31, %v2844_v32  ;;  %v7398_v32 = vcombine.high %v2989_v59, %v3005_v26  ;;  %v3018_v31 = vld [vmem:[%s11435_s12 + $0x408] sm:$0xff] }
 0x342   :  { %v2840_v39 = vrot.slane %v2839_v36, 2 }
 0x343   :  { %v2847_v40 = vrot.slane %v2846_v38, 2 }
 0x344   :  { %v2841_v43 = vadd.f32 %v2840_v39, %v2839_v36  ;;  %v3034_v36 = vld [vmem:[%s11435_s12 + $0x488] sm:$0xff]  ;;  %v3037_v39 = vld [vmem:[%s11435_s12 + $0x4a0] sm:$0xff] }
 0x345   :  { %v2848_v16 = vadd.f32 %v2847_v40, %v2846_v38  ;;  %v3021_v38 = vld [vmem:[%s11435_s12 + $0x420] sm:$0xff]  ;;  %v7391_v40 = vcombine.low %v2986_v49, %v3002_v35 }
 0x346   :  { %v2842_v45 = vrot.slane %v2841_v43, 1 }
 0x347   :  { %v2849_v46 = vrot.slane %v2848_v16, 1 }
 0x348   :  { %v2843_v34 = vadd.f32 %v2842_v45, %v2841_v43  ;;  %v7397_v43 = vcombine.low %v2989_v59, %v3005_v26  ;;  %v7430_v45 = vcombine.high %v3021_v38, %v3037_v39  ;;  %v3210_v26 = vld [vmem:[%s11435_s12 + $0xa08] sm:$0xff] }
 0x349   :  { %v2850_v33 = vadd.f32 %v2849_v46, %v2848_v16  ;;  %v7424_v16 = vcombine.high %v3018_v31, %v3034_v36  ;;  %v3050_v46 = vld [vmem:[%s11435_s12 + $0x508] sm:$0xff] }
 0x34a   :  { %v2851_v48 = vmul.f32 0.5, %v2843_v34  ;;  %v3066_v34 = vld [vmem:[%s11435_s12 + $0x588] sm:$0xff] }
 0x34b   :  { %v2852_v44 = vmul.f32 0.5, %v2850_v33  ;;  %v3053_v33 = vld [vmem:[%s11435_s12 + $0x520] sm:$0xff] }
 0x34c   :  { %v2853_v41 = vadd.f32 1e-05, %v2851_v48  ;;  %v3069_v48 = vld [vmem:[%s11435_s12 + $0x5a0] sm:$0xff] }
 0x34d   :  { %v2854_v56 = vadd.f32 1e-05, %v2852_v44  ;;  %v7423_v44 = vcombine.low %v3018_v31, %v3034_v36  ;;  %v7462_v5 = vcombine.high %v3053_v33, %v3069_v48 }
 0x34e   :  { %8333 = vrsqrt.f32 %v2853_v41  ;;  %v7429_v41 = vcombine.low %v3021_v38, %v3037_v39  ;;  %v3242_v39 = vld [vmem:[%s11435_s12 + $0xb08] sm:$0xff] }
 0x34f   :  { %8335 = vrsqrt.f32 %v2854_v56  ;;  %v7456_v56 = vcombine.high %v3050_v46, %v3066_v34 }
 0x358   :  { %v8334_v60 = vpop.eup %8333 }
 0x359   :  { %v8336_v63 = vpop.eup %8335  ;;  %v2857_v0 = vmul.f32 %v8334_v60, %v2833_v51  ;;  %v2973_v51 = vld [vmem:[%s11435_s12 + $0x2a0] sm:$0xff] }
 0x35a   :  { %v2858_v2 = vmul.f32 %v8336_v63, %v2834_v12  ;;  %v7327_v12 = vcombine.low %v2922_v15, %v2938_v17  ;;  %v7366_v30 = vcombine.high %v2957_v47, %v2973_v51  ;;  %v3085_v60 = vld [vmem:[%s11435_s12 + $0x620] sm:$0xff]  ;;  %v7455_v63 = vcombine.low %v3050_v46, %v3066_v34  ;;  %v3146_v17 = vld [vmem:[%s11435_s12 + $0x808] sm:$0xff] }
 0x35b   :  { %v2870_v7 = vmul.f32 %v2863_v19, %v2857_v0  ;;  %v3098_v19 = vld [vmem:[%s11435_s12 + $0x688] sm:$0xff]  ;;  %v7461_v0 = vcombine.low %v3053_v33, %v3069_v48  ;;  %v7552_v9 = vcombine.high %v3146_v17, %v3162_v20 }
 0x35c   :  { %v2871_v8 = vmul.f32 %v2867_v61, %v2858_v2  ;;  %v3101_v61 = vld [vmem:[%s11435_s12 + $0x6a0] sm:$0xff]  ;;  %v3274_v48 = vld [vmem:[%s11435_s12 + $0xc08] sm:$0xff] }
 0x35d   :  { %v2883_v10 = vadd.f32 %v2876_v1, %v2870_v7  ;;  %v7488_v1 = vcombine.high %v3082_v57, %v3098_v19  ;;  %v7494_v2 = vcombine.high %v3085_v60, %v3101_v61  ;;  %v3130_v7 = vld [vmem:[%s11435_s12 + $0x788] sm:$0xff] }
 0x35e   :  { %v2884_v11 = vadd.f32 %v2880_v3, %v2871_v8  ;;  %v3114_v3 = vld [vmem:[%s11435_s12 + $0x708] sm:$0xff]  ;;  %v3117_v8 = vld [vmem:[%s11435_s12 + $0x720] sm:$0xff] }
 0x35f   :  { %v2885_v13 = vmax.f32 %v2883_v10, 0.0  ;;  %v3133_v10 = vld [vmem:[%s11435_s12 + $0x7a0] sm:$0xff] }
 0x360   :  { %v2886_v14 = vmax.f32 %v2884_v11, 0.0  ;;  %v7487_v11 = vcombine.low %v3082_v57, %v3098_v19  ;;  %v7526_v15 = vcombine.high %v3117_v8, %v3133_v10 }
 0x361   :  { %v9889_v23 = vpack.c.bf16 %v2885_v13, %v2885_v13  ;;  %v7493_v13 = vcombine.low %v3085_v60, %v3101_v61  ;;  %v3306_v61 = vld [vmem:[%s11435_s12 + $0xd08] sm:$0xff] }
 0x362   :  { %v9887_v22 = vpack.c.bf16 %v2886_v14, %v2886_v14  ;;  %v7520_v14 = vcombine.high %v3114_v3, %v3130_v7 }
 0x364   :  { %6161 = vmatprep.mubr.bf16.mxu1 %v9887_v22  ;;  %6243 = vmatprep.mubr.bf16.mxu0 %v9887_v22 }
 0x365   :  { %6162 = vmatmul.mubr.bf16.vlgmr.msra.gmra.mrb[4].mxu1 %v9889_v23  ;;  %6244 = vmatmul.mubr.bf16.vlgmr.msra.gmra.mrb[8].mxu0 %v9889_v23 }
 0x366   :  { %6171 = vmatpush1.bf16.msra.mxu1 %v7295_v62  ;;  %6294 = vmatpush1.bf16.msra.mxu0 %v7301_v18  ;;  %v7365_v62 = vcombine.low %v2957_v47, %v2973_v51  ;;  %v7392_v18 = vcombine.high %v2986_v49, %v3002_v35  ;;  %v7558_v47 = vcombine.high %v3149_v21, %v3165_v24  ;;  %v3178_v51 = vld [vmem:[%s11435_s12 + $0x908] sm:$0xff] }
 0x367   :  { %6202 = vmatprep.mubr.bf16.mxu1 %v9887_v22  ;;  %6325 = vmatprep.mubr.bf16.mxu0 %v9887_v22  ;;  %v7557_v49 = vcombine.low %v3149_v21, %v3165_v24  ;;  %v3370_v24 = vld [vmem:[%s11435_s12 + $0xf08] sm:$0xff] }
 0x368   :  { %6172 = vmatprep.subr.bf16.mxu1 %v7328_v25  ;;  %6295 = vmatprep.subr.bf16.mxu0 %v7334_v27  ;;  %v7519_v25 = vcombine.low %v3114_v3, %v3130_v7  ;;  %v7525_v27 = vcombine.low %v3117_v8, %v3133_v10  ;;  %v3338_v10 = vld [vmem:[%s11435_s12 + $0xe08] sm:$0xff] }
 0x36a   :  { %6173 = vmatpush1.bf16.msra.mxu1 %v7327_v12  ;;  %6296 = vmatpush1.bf16.msra.mxu0 %v7333_v28  ;;  %v3194_v12 = vld [vmem:[%s11435_s12 + $0x988] sm:$0xff]  ;;  %v3181_v28 = vld [vmem:[%s11435_s12 + $0x920] sm:$0xff] }
 0x36b   :  { %6174 = vmatprep.subr.bf16.mxu1 %v7360_v29  ;;  %6297 = vmatprep.subr.bf16.mxu0 %v7366_v30  ;;  %v3197_v29 = vld [vmem:[%s11435_s12 + $0x9a0] sm:$0xff]  ;;  %v7551_v30 = vcombine.low %v3146_v17, %v3162_v20  ;;  %v7584_v35 = vcombine.high %v3178_v51, %v3194_v12 }
 0x36c   :  { %v7590_v59 = vcombine.high %v3181_v28, %v3197_v29  ;;  %v7589_v31 = vcombine.low %v3181_v28, %v3197_v29  ;;  %v2892_v29 = vld [vmem:[%s11435_s12 + $0x18] sm:$0xff] }
 0x36e   :  { %6175 = vmatpush1.bf16.msra.mxu1 %v7359_v4  ;;  %6298 = vmatpush1.bf16.msra.mxu0 %v7365_v62  ;;  %v3226_v4 = vld [vmem:[%s11435_s12 + $0xa88] sm:$0xff]  ;;  %v3213_v62 = vld [vmem:[%s11435_s12 + $0xa20] sm:$0xff] }
 0x36f   :  { %6176 = vmatprep.subr.bf16.mxu1 %v7392_v18  ;;  %6299 = vmatprep.subr.bf16.mxu0 %v7398_v32  ;;  %v3229_v18 = vld [vmem:[%s11435_s12 + $0xaa0] sm:$0xff]  ;;  %v7583_v32 = vcombine.low %v3178_v51, %v3194_v12  ;;  %v7616_v36 = vcombine.high %v3210_v26, %v3226_v4 }
 0x370   :  { %v7622_v38 = vcombine.high %v3213_v62, %v3229_v18  ;;  %v7621_v46 = vcombine.low %v3213_v62, %v3229_v18  ;;  %v2924_v18 = vld [vmem:[%s11435_s12 + $0x118] sm:$0xff] }
 0x372   :  { %6177 = vmatpush1.bf16.msra.mxu1 %v7391_v40  ;;  %6300 = vmatpush1.bf16.msra.mxu0 %v7397_v43  ;;  %v3258_v40 = vld [vmem:[%s11435_s12 + $0xb88] sm:$0xff]  ;;  %v3245_v43 = vld [vmem:[%s11435_s12 + $0xb20] sm:$0xff] }
 0x373   :  { %6178 = vmatprep.subr.bf16.mxu1 %v7424_v16  ;;  %6301 = vmatprep.subr.bf16.mxu0 %v7430_v45  ;;  %v3261_v16 = vld [vmem:[%s11435_s12 + $0xba0] sm:$0xff]  ;;  %v7615_v45 = vcombine.low %v3210_v26, %v3226_v4  ;;  %v7648_v34 = vcombine.high %v3242_v39, %v3258_v40 }
 0x374   :  { %v7654_v33 = vcombine.high %v3245_v43, %v3261_v16  ;;  %v7653_v57 = vcombine.low %v3245_v43, %v3261_v16  ;;  %v2956_v16 = vld [vmem:[%s11435_s12 + $0x218] sm:$0xff] }
 0x376   :  { %6179 = vmatpush1.bf16.msra.mxu1 %v7423_v44  ;;  %6302 = vmatpush1.bf16.msra.mxu0 %v7429_v41  ;;  %v3290_v44 = vld [vmem:[%s11435_s12 + $0xc88] sm:$0xff]  ;;  %v3277_v41 = vld [vmem:[%s11435_s12 + $0xc20] sm:$0xff] }
 0x377   :  { %6180 = vmatprep.subr.bf16.mxu1 %v7456_v56  ;;  %6303 = vmatprep.subr.bf16.mxu0 %v7462_v5  ;;  %v3293_v56 = vld [vmem:[%s11435_s12 + $0xca0] sm:$0xff]  ;;  %v7647_v5 = vcombine.low %v3242_v39, %v3258_v40  ;;  %v7680_v19 = vcombine.high %v3274_v48, %v3290_v44 }
 0x378   :  { %v7686_v60 = vcombine.high %v3277_v41, %v3293_v56  ;;  %v7685_v3 = vcombine.low %v3277_v41, %v3293_v56  ;;  %v2988_v56 = vld [vmem:[%s11435_s12 + $0x318] sm:$0xff] }
 0x37a   :  { %6181 = vmatpush1.bf16.msra.mxu1 %v7455_v63  ;;  %6304 = vmatpush1.bf16.msra.mxu0 %v7461_v0  ;;  %v3322_v63 = vld [vmem:[%s11435_s12 + $0xd88] sm:$0xff]  ;;  %v3309_v0 = vld [vmem:[%s11435_s12 + $0xd20] sm:$0xff] }
 0x37b   :  { %6182 = vmatprep.subr.bf16.mxu1 %v7488_v1  ;;  %6305 = vmatprep.subr.bf16.mxu0 %v7494_v2  ;;  %v3325_v1 = vld [vmem:[%s11435_s12 + $0xda0] sm:$0xff]  ;;  %v7679_v2 = vcombine.low %v3274_v48, %v3290_v44  ;;  %v7712_v7 = vcombine.high %v3306_v61, %v3322_v63 }
 0x37c   :  { %v7718_v8 = vcombine.high %v3309_v0, %v3325_v1  ;;  %v7717_v17 = vcombine.low %v3309_v0, %v3325_v1  ;;  %v3020_v1 = vld [vmem:[%s11435_s12 + $0x418] sm:$0xff] }
 0x37e   :  { %6183 = vmatpush1.bf16.msra.mxu1 %v7487_v11  ;;  %6306 = vmatpush1.bf16.msra.mxu0 %v7493_v13  ;;  %v3354_v11 = vld [vmem:[%s11435_s12 + $0xe88] sm:$0xff]  ;;  %v3341_v13 = vld [vmem:[%s11435_s12 + $0xe20] sm:$0xff] }
 0x37f   :  { %6184 = vmatprep.subr.bf16.mxu1 %v7520_v14  ;;  %6307 = vmatprep.subr.bf16.mxu0 %v7526_v15  ;;  %v3357_v14 = vld [vmem:[%s11435_s12 + $0xea0] sm:$0xff]  ;;  %v7711_v15 = vcombine.low %v3306_v61, %v3322_v63  ;;  %v7744_v20 = vcombine.high %v3338_v10, %v3354_v11 }
 0x380   :  { %v7750_v21 = vcombine.high %v3341_v13, %v3357_v14  ;;  %v7749_v51 = vcombine.low %v3341_v13, %v3357_v14  ;;  %v3052_v14 = vld [vmem:[%s11435_s12 + $0x518] sm:$0xff] }
 0x382   :  { %6185 = vmatpush1.bf16.msra.mxu1 %v7519_v25  ;;  %6308 = vmatpush1.bf16.msra.mxu0 %v7525_v27  ;;  %v3386_v25 = vld [vmem:[%s11435_s12 + $0xf88] sm:$0xff]  ;;  %v3373_v27 = vld [vmem:[%s11435_s12 + $0xf20] sm:$0xff] }
 0x383   :  { %6186 = vmatprep.subr.bf16.mxu1 %v7552_v9  ;;  %6309 = vmatprep.subr.bf16.mxu0 %v7558_v47  ;;  %v3389_v9 = vld [vmem:[%s11435_s12 + $0xfa0] sm:$0xff]  ;;  %v7743_v47 = vcombine.low %v3338_v10, %v3354_v11  ;;  %v7776_v12 = vcombine.high %v3370_v24, %v3386_v25 }
 0x384   :  { %v7782_v28 = vcombine.high %v3373_v27, %v3389_v9  ;;  %v7781_v26 = vcombine.low %v3373_v27, %v3389_v9  ;;  %v3084_v9 = vld [vmem:[%s11435_s12 + $0x618] sm:$0xff] }
 0x386   :  { %6187 = vmatpush1.bf16.msra.mxu1 %v7551_v30  ;;  %6310 = vmatpush1.bf16.msra.mxu0 %v7557_v49  ;;  %v2908_v30 = vld [vmem:[%s11435_s12 + $0x98] sm:$0xff]  ;;  %v2895_v49 = vld [vmem:[%s11435_s12 + $0x30] sm:$0xff] }
 0x387   :  { %6188 = vmatprep.subr.bf16.mxu1 %v7584_v35  ;;  %6311 = vmatprep.subr.bf16.mxu0 %v7590_v59  ;;  %v2911_v35 = vld [vmem:[%s11435_s12 + $0xb0] sm:$0xff]  ;;  %v7775_v59 = vcombine.low %v3370_v24, %v3386_v25  ;;  %v7300_v4 = vcombine.high %v2892_v29, %v2908_v30 }
 0x388   :  { %v7306_v62 = vcombine.high %v2895_v49, %v2911_v35  ;;  %v7305_v39 = vcombine.low %v2895_v49, %v2911_v35  ;;  %v3116_v35 = vld [vmem:[%s11435_s12 + $0x718] sm:$0xff] }
 0x38a   :  { %6189 = vmatpush1.bf16.msra.mxu1 %v7583_v32  ;;  %6312 = vmatpush1.bf16.msra.mxu0 %v7589_v31  ;;  %v2940_v32 = vld [vmem:[%s11435_s12 + $0x198] sm:$0xff]  ;;  %v2927_v31 = vld [vmem:[%s11435_s12 + $0x130] sm:$0xff] }
 0x38b   :  { %6190 = vmatprep.subr.bf16.mxu1 %v7616_v36  ;;  %6313 = vmatprep.subr.bf16.mxu0 %v7622_v38  ;;  %v2943_v36 = vld [vmem:[%s11435_s12 + $0x1b0] sm:$0xff]  ;;  %v7299_v38 = vcombine.low %v2892_v29, %v2908_v30  ;;  %v7332_v40 = vcombine.high %v2924_v18, %v2940_v32 }
 0x38c   :  { %v7338_v43 = vcombine.high %v2927_v31, %v2943_v36  ;;  %v7337_v48 = vcombine.low %v2927_v31, %v2943_v36  ;;  %v3148_v36 = vld [vmem:[%s11435_s12 + $0x818] sm:$0xff] }
 0x38e   :  { %6191 = vmatpush1.bf16.msra.mxu1 %v7615_v45  ;;  %6314 = vmatpush1.bf16.msra.mxu0 %v7621_v46  ;;  %v2972_v45 = vld [vmem:[%s11435_s12 + $0x298] sm:$0xff]  ;;  %v2959_v46 = vld [vmem:[%s11435_s12 + $0x230] sm:$0xff] }
 0x38f   :  { %6192 = vmatprep.subr.bf16.mxu1 %v7648_v34  ;;  %6315 = vmatprep.subr.bf16.mxu0 %v7654_v33  ;;  %v2975_v34 = vld [vmem:[%s11435_s12 + $0x2b0] sm:$0xff]  ;;  %v7331_v33 = vcombine.low %v2924_v18, %v2940_v32  ;;  %v7364_v44 = vcombine.high %v2956_v16, %v2972_v45 }
 0x390   :  { %v7370_v41 = vcombine.high %v2959_v46, %v2975_v34  ;;  %v7369_v61 = vcombine.low %v2959_v46, %v2975_v34  ;;  %v3180_v34 = vld [vmem:[%s11435_s12 + $0x918] sm:$0xff] }
 0x392   :  { %6193 = vmatpush1.bf16.msra.mxu1 %v7647_v5  ;;  %6316 = vmatpush1.bf16.msra.mxu0 %v7653_v57  ;;  %v3004_v5 = vld [vmem:[%s11435_s12 + $0x398] sm:$0xff]  ;;  %v2991_v57 = vld [vmem:[%s11435_s12 + $0x330] sm:$0xff] }
 0x393   :  { %6194 = vmatprep.subr.bf16.mxu1 %v7680_v19  ;;  %6317 = vmatprep.subr.bf16.mxu0 %v7686_v60  ;;  %v3007_v19 = vld [vmem:[%s11435_s12 + $0x3b0] sm:$0xff]  ;;  %v7363_v60 = vcombine.low %v2956_v16, %v2972_v45  ;;  %v7396_v63 = vcombine.high %v2988_v56, %v3004_v5 }
 0x394   :  { %v7402_v0 = vcombine.high %v2991_v57, %v3007_v19  ;;  %v7401_v10 = vcombine.low %v2991_v57, %v3007_v19  ;;  %v3212_v19 = vld [vmem:[%s11435_s12 + $0xa18] sm:$0xff] }
 0x396   :  { %6195 = vmatpush1.bf16.msra.mxu1 %v7679_v2  ;;  %6318 = vmatpush1.bf16.msra.mxu0 %v7685_v3  ;;  %v3036_v2 = vld [vmem:[%s11435_s12 + $0x498] sm:$0xff]  ;;  %v3023_v3 = vld [vmem:[%s11435_s12 + $0x430] sm:$0xff] }
 0x397   :  { %6196 = vmatprep.subr.bf16.mxu1 %v7712_v7  ;;  %6319 = vmatprep.subr.bf16.mxu0 %v7718_v8  ;;  %v3039_v7 = vld [vmem:[%s11435_s12 + $0x4b0] sm:$0xff]  ;;  %v7395_v8 = vcombine.low %v2988_v56, %v3004_v5  ;;  %v7428_v11 = vcombine.high %v3020_v1, %v3036_v2 }
 0x398   :  { %v7434_v13 = vcombine.high %v3023_v3, %v3039_v7  ;;  %v7433_v24 = vcombine.low %v3023_v3, %v3039_v7  ;;  %v3244_v7 = vld [vmem:[%s11435_s12 + $0xb18] sm:$0xff] }
 0x39a   :  { %6197 = vmatpush1.bf16.msra.mxu1 %v7711_v15  ;;  %6320 = vmatpush1.bf16.msra.mxu0 %v7717_v17  ;;  %v3068_v15 = vld [vmem:[%s11435_s12 + $0x598] sm:$0xff]  ;;  %v3055_v17 = vld [vmem:[%s11435_s12 + $0x530] sm:$0xff] }
 0x39b   :  { %6198 = vmatprep.subr.bf16.mxu1 %v7744_v20  ;;  %6321 = vmatprep.subr.bf16.mxu0 %v7750_v21  ;;  %v3071_v20 = vld [vmem:[%s11435_s12 + $0x5b0] sm:$0xff]  ;;  %v7427_v21 = vcombine.low %v3020_v1, %v3036_v2  ;;  %v7460_v25 = vcombine.high %v3052_v14, %v3068_v15 }
 0x39c   :  { %v7466_v27 = vcombine.high %v3055_v17, %v3071_v20  ;;  %v7465_v29 = vcombine.low %v3055_v17, %v3071_v20  ;;  %v3276_v20 = vld [vmem:[%s11435_s12 + $0xc18] sm:$0xff] }
 0x39e   :  { %6199 = vmatpush1.bf16.msra.mxu1 %v7743_v47  ;;  %6322 = vmatpush1.bf16.msra.mxu0 %v7749_v51  ;;  %v3100_v47 = vld [vmem:[%s11435_s12 + $0x698] sm:$0xff]  ;;  %v3087_v51 = vld [vmem:[%s11435_s12 + $0x630] sm:$0xff] }
 0x39f   :  { %6200 = vmatprep.subr.bf16.mxu1 %v7776_v12  ;;  %6323 = vmatprep.subr.bf16.mxu0 %v7782_v28  ;;  %v3103_v12 = vld [vmem:[%s11435_s12 + $0x6b0] sm:$0xff]  ;;  %v7459_v28 = vcombine.low %v3052_v14, %v3068_v15  ;;  %v7492_v30 = vcombine.high %v3084_v9, %v3100_v47 }
 0x3a0   :  { %v7498_v49 = vcombine.high %v3087_v51, %v3103_v12  ;;  %v7497_v18 = vcombine.low %v3087_v51, %v3103_v12  ;;  %v3308_v12 = vld [vmem:[%s11435_s12 + $0xd18] sm:$0xff] }
 0x3a2   :  { %6201 = vmatpush1.bf16.msra.mxu1 %v7775_v59  ;;  %6324 = vmatpush1.bf16.msra.mxu0 %v7781_v26  ;;  %v3132_v59 = vld [vmem:[%s11435_s12 + $0x798] sm:$0xff]  ;;  %v3119_v26 = vld [vmem:[%s11435_s12 + $0x730] sm:$0xff] }
 0x3a3   :  { %6252 = vmatprep.subr.bf16.mxu1 %v7300_v4  ;;  %6375 = vmatprep.subr.bf16.mxu0 %v7306_v62  ;;  %v3135_v4 = vld [vmem:[%s11435_s12 + $0x7b0] sm:$0xff]  ;;  %v7491_v62 = vcombine.low %v3084_v9, %v3100_v47  ;;  %v7524_v32 = vcombine.high %v3116_v35, %v3132_v59 }
 0x3a4   :  { %v7530_v31 = vcombine.high %v3119_v26, %v3135_v4  ;;  %v7529_v16 = vcombine.low %v3119_v26, %v3135_v4  ;;  %v3340_v4 = vld [vmem:[%s11435_s12 + $0xe18] sm:$0xff] }
 0x3a5   :  { %6203 = vmatmul.mubr.bf16.vlgmr.msra.gmra.mrb[8].mxu1 %v9889_v23  ;;  %6326 = vmatmul.mubr.bf16.vlgmr.msra.gmra.mrb[12].mxu0 %v9889_v23 }
 0x3a6   :  { %6253 = vmatpush1.bf16.msra.mxu1 %v7299_v38  ;;  %6284 = vmatprep.mubr.bf16.mxu1 %v9887_v22  ;;  %v3164_v38 = vld [vmem:[%s11435_s12 + $0x898] sm:$0xff] }
 0x3a7   :  { %6376 = vmatpush1.bf16.msra.mxu0 %v7305_v39  ;;  %6407 = vmatprep.mubr.bf16.mxu0 %v9887_v22  ;;  %v3151_v39 = vld [vmem:[%s11435_s12 + $0x830] sm:$0xff]  ;;  %v7556_v45 = vcombine.high %v3148_v36, %v3164_v38 }
 0x3a8   :  { %6254 = vmatprep.subr.bf16.mxu1 %v7332_v40  ;;  %6377 = vmatprep.subr.bf16.mxu0 %v7338_v43  ;;  %v3167_v40 = vld [vmem:[%s11435_s12 + $0x8b0] sm:$0xff]  ;;  %v7523_v43 = vcombine.low %v3116_v35, %v3132_v59 }
 0x3a9   :  { %v7562_v46 = vcombine.high %v3151_v39, %v3167_v40  ;;  %v7561_v56 = vcombine.low %v3151_v39, %v3167_v40  ;;  %v3372_v40 = vld [vmem:[%s11435_s12 + $0xf18] sm:$0xff] }
 0x3aa   :  { %6255 = vmatpush1.bf16.msra.mxu1 %v7331_v33  ;;  %v3196_v33 = vld [vmem:[%s11435_s12 + $0x998] sm:$0xff] }
 0x3ab   :  { %6378 = vmatpush1.bf16.msra.mxu0 %v7337_v48  ;;  %6256 = vmatprep.subr.bf16.mxu1 %v7364_v44  ;;  %v3183_v48 = vld [vmem:[%s11435_s12 + $0x930] sm:$0xff]  ;;  %v7588_v5 = vcombine.high %v3180_v34, %v3196_v33 }
 0x3ac   :  { %6379 = vmatprep.subr.bf16.mxu0 %v7370_v41  ;;  %v3199_v44 = vld [vmem:[%s11435_s12 + $0x9b0] sm:$0xff]  ;;  %v7555_v41 = vcombine.low %v3148_v36, %v3164_v38 }
 0x3ad   :  { %v7594_v57 = vcombine.high %v3183_v48, %v3199_v44  ;;  %v7593_v1 = vcombine.low %v3183_v48, %v3199_v44  ;;  %v2894_v44 = vld [vmem:[%s11435_s12 + $0x28] sm:$0xff] }
 0x3ae   :  { %6257 = vmatpush1.bf16.msra.mxu1 %v7363_v60  ;;  %v3228_v60 = vld [vmem:[%s11435_s12 + $0xa98] sm:$0xff] }
 0x3af   :  { %6380 = vmatpush1.bf16.msra.mxu0 %v7369_v61  ;;  %6258 = vmatprep.subr.bf16.mxu1 %v7396_v63  ;;  %v3215_v61 = vld [vmem:[%s11435_s12 + $0xa30] sm:$0xff]  ;;  %v7620_v2 = vcombine.high %v3212_v19, %v3228_v60 }
 0x3b0   :  { %6381 = vmatprep.subr.bf16.mxu0 %v7402_v0  ;;  %v3231_v63 = vld [vmem:[%s11435_s12 + $0xab0] sm:$0xff]  ;;  %v7587_v0 = vcombine.low %v3180_v34, %v3196_v33 }
 0x3b1   :  { %v7626_v3 = vcombine.high %v3215_v61, %v3231_v63  ;;  %v7625_v14 = vcombine.low %v3215_v61, %v3231_v63  ;;  %v2926_v63 = vld [vmem:[%s11435_s12 + $0x128] sm:$0xff] }
 0x3b2   :  { %6259 = vmatpush1.bf16.msra.mxu1 %v7395_v8  ;;  %v3260_v8 = vld [vmem:[%s11435_s12 + $0xb98] sm:$0xff] }
 0x3b3   :  { %6382 = vmatpush1.bf16.msra.mxu0 %v7401_v10  ;;  %6260 = vmatprep.subr.bf16.mxu1 %v7428_v11  ;;  %v3247_v10 = vld [vmem:[%s11435_s12 + $0xb30] sm:$0xff]  ;;  %v7652_v15 = vcombine.high %v3244_v7, %v3260_v8 }
 0x3b4   :  { %6383 = vmatprep.subr.bf16.mxu0 %v7434_v13  ;;  %v3263_v11 = vld [vmem:[%s11435_s12 + $0xbb0] sm:$0xff]  ;;  %v7619_v13 = vcombine.low %v3212_v19, %v3228_v60 }
 0x3b5   :  { %v7658_v17 = vcombine.high %v3247_v10, %v3263_v11  ;;  %v7657_v9 = vcombine.low %v3247_v10, %v3263_v11  ;;  %v2958_v10 = vld [vmem:[%s11435_s12 + $0x228] sm:$0xff] }
 0x3b6   :  { %6261 = vmatpush1.bf16.msra.mxu1 %v7427_v21  ;;  %v3292_v21 = vld [vmem:[%s11435_s12 + $0xc98] sm:$0xff]  ;;  %v2974_v11 = vld [vmem:[%s11435_s12 + $0x2a8] sm:$0xff] }
 0x3b7   :  { %6384 = vmatpush1.bf16.msra.mxu0 %v7433_v24  ;;  %6262 = vmatprep.subr.bf16.mxu1 %v7460_v25  ;;  %v3279_v24 = vld [vmem:[%s11435_s12 + $0xc30] sm:$0xff]  ;;  %v7684_v47 = vcombine.high %v3276_v20, %v3292_v21 }
 0x3b8   :  { %6385 = vmatprep.subr.bf16.mxu0 %v7466_v27  ;;  %v3295_v25 = vld [vmem:[%s11435_s12 + $0xcb0] sm:$0xff]  ;;  %v7651_v27 = vcombine.low %v3244_v7, %v3260_v8 }
 0x3b9   :  { %v7690_v51 = vcombine.high %v3279_v24, %v3295_v25  ;;  %v7689_v35 = vcombine.low %v3279_v24, %v3295_v25  ;;  %v2990_v25 = vld [vmem:[%s11435_s12 + $0x328] sm:$0xff] }
 0x3ba   :  { %6263 = vmatpush1.bf16.msra.mxu1 %v7459_v28  ;;  %v3324_v28 = vld [vmem:[%s11435_s12 + $0xd98] sm:$0xff] }
 0x3bb   :  { %6386 = vmatpush1.bf16.msra.mxu0 %v7465_v29  ;;  %6264 = vmatprep.subr.bf16.mxu1 %v7492_v30  ;;  %v3311_v29 = vld [vmem:[%s11435_s12 + $0xd30] sm:$0xff]  ;;  %v7716_v59 = vcombine.high %v3308_v12, %v3324_v28 }
 0x3bc   :  { %6387 = vmatprep.subr.bf16.mxu0 %v7498_v49  ;;  %v3327_v30 = vld [vmem:[%s11435_s12 + $0xdb0] sm:$0xff]  ;;  %v7683_v49 = vcombine.low %v3276_v20, %v3292_v21  ;;  %v7368_v21 = vcombine.high %v2958_v10, %v2974_v11 }
 0x3bd   :  { %v7722_v26 = vcombine.high %v3311_v29, %v3327_v30  ;;  %v7721_v36 = vcombine.low %v3311_v29, %v3327_v30  ;;  %v3022_v30 = vld [vmem:[%s11435_s12 + $0x428] sm:$0xff] }
 0x3be   :  { %6265 = vmatpush1.bf16.msra.mxu1 %v7491_v62  ;;  %v3356_v62 = vld [vmem:[%s11435_s12 + $0xe98] sm:$0xff] }
 0x3bf   :  { %6388 = vmatpush1.bf16.msra.mxu0 %v7497_v18  ;;  %6266 = vmatprep.subr.bf16.mxu1 %v7524_v32  ;;  %v3343_v18 = vld [vmem:[%s11435_s12 + $0xe30] sm:$0xff]  ;;  %v7748_v38 = vcombine.high %v3340_v4, %v3356_v62 }
 0x3c0   :  { %6389 = vmatprep.subr.bf16.mxu0 %v7530_v31  ;;  %v3359_v32 = vld [vmem:[%s11435_s12 + $0xeb0] sm:$0xff]  ;;  %v7715_v31 = vcombine.low %v3308_v12, %v3324_v28 }
 0x3c1   :  { %v7754_v39 = vcombine.high %v3343_v18, %v3359_v32  ;;  %v7753_v34 = vcombine.low %v3343_v18, %v3359_v32  ;;  %v3054_v32 = vld [vmem:[%s11435_s12 + $0x528] sm:$0xff] }
 0x3c2   :  { %6267 = vmatpush1.bf16.msra.mxu1 %v7523_v43  ;;  %v3388_v43 = vld [vmem:[%s11435_s12 + $0xf98] sm:$0xff] }
 0x3c3   :  { %6390 = vmatpush1.bf16.msra.mxu0 %v7529_v16  ;;  %6268 = vmatprep.subr.bf16.mxu1 %v7556_v45  ;;  %v3375_v16 = vld [vmem:[%s11435_s12 + $0xf30] sm:$0xff]  ;;  %v7780_v33 = vcombine.high %v3372_v40, %v3388_v43 }
 0x3c4   :  { %6391 = vmatprep.subr.bf16.mxu0 %v7562_v46  ;;  %v3391_v45 = vld [vmem:[%s11435_s12 + $0xfb0] sm:$0xff]  ;;  %v7747_v46 = vcombine.low %v3340_v4, %v3356_v62 }
 0x3c5   :  { %v7786_v48 = vcombine.high %v3375_v16, %v3391_v45  ;;  %v7785_v19 = vcombine.low %v3375_v16, %v3391_v45  ;;  %v3086_v45 = vld [vmem:[%s11435_s12 + $0x628] sm:$0xff] }
 0x3c6   :  { %6269 = vmatpush1.bf16.msra.mxu1 %v7555_v41  ;;  %v2910_v41 = vld [vmem:[%s11435_s12 + $0xa8] sm:$0xff] }
 0x3c7   :  { %6392 = vmatpush1.bf16.msra.mxu0 %v7561_v56  ;;  %6270 = vmatprep.subr.bf16.mxu1 %v7588_v5  ;;  %v2897_v56 = vld [vmem:[%s11435_s12 + $0x40] sm:$0xff]  ;;  %v7304_v60 = vcombine.high %v2894_v44, %v2910_v41 }
 0x3c8   :  { %6393 = vmatprep.subr.bf16.mxu0 %v7594_v57  ;;  %v2913_v5 = vld [vmem:[%s11435_s12 + $0xc0] sm:$0xff]  ;;  %v7779_v57 = vcombine.low %v3372_v40, %v3388_v43 }
 0x3c9   :  { %v7310_v61 = vcombine.high %v2897_v56, %v2913_v5  ;;  %v7309_v7 = vcombine.low %v2897_v56, %v2913_v5  ;;  %v3118_v5 = vld [vmem:[%s11435_s12 + $0x728] sm:$0xff] }
 0x3ca   :  { %6271 = vmatpush1.bf16.msra.mxu1 %v7587_v0  ;;  %v2942_v0 = vld [vmem:[%s11435_s12 + $0x1a8] sm:$0xff] }
 0x3cb   :  { %6394 = vmatpush1.bf16.msra.mxu0 %v7593_v1  ;;  %6272 = vmatprep.subr.bf16.mxu1 %v7620_v2  ;;  %v7303_v1 = vcombine.low %v2894_v44, %v2910_v41  ;;  %v2929_v2 = vld [vmem:[%s11435_s12 + $0x140] sm:$0xff]  ;;  %v7336_v8 = vcombine.high %v2926_v63, %v2942_v0 }
 0x3cc   :  { %6395 = vmatprep.subr.bf16.mxu0 %v7626_v3  ;;  %v2945_v3 = vld [vmem:[%s11435_s12 + $0x1c0] sm:$0xff] }
 0x3cd   :  { %v7341_v20 = vcombine.low %v2929_v2, %v2945_v3 }
 0x3ce   :  { %6273 = vmatpush1.bf16.msra.mxu1 %v7619_v13  ;;  %v7342_v13 = vcombine.high %v2929_v2, %v2945_v3  ;;  %v3150_v2 = vld [vmem:[%s11435_s12 + $0x828] sm:$0xff] }
 0x3cf   :  { %6396 = vmatpush1.bf16.msra.mxu0 %v7625_v14  ;;  %6274 = vmatprep.subr.bf16.mxu1 %v7652_v15  ;;  %v2961_v14 = vld [vmem:[%s11435_s12 + $0x240] sm:$0xff]  ;;  %v3166_v3 = vld [vmem:[%s11435_s12 + $0x8a8] sm:$0xff] }
 0x3d0   :  { %6397 = vmatprep.subr.bf16.mxu0 %v7658_v17  ;;  %v2977_v15 = vld [vmem:[%s11435_s12 + $0x2c0] sm:$0xff]  ;;  %v7335_v17 = vcombine.low %v2926_v63, %v2942_v0 }
 0x3d1   :  { %v7374_v24 = vcombine.high %v2961_v14, %v2977_v15  ;;  %v7373_v12 = vcombine.low %v2961_v14, %v2977_v15  ;;  %v3182_v15 = vld [vmem:[%s11435_s12 + $0x928] sm:$0xff] }
 0x3d2   :  { %6275 = vmatpush1.bf16.msra.mxu1 %v7651_v27  ;;  %v3006_v27 = vld [vmem:[%s11435_s12 + $0x3a8] sm:$0xff] }
 0x3d3   :  { %6398 = vmatpush1.bf16.msra.mxu0 %v7657_v9  ;;  %6276 = vmatprep.subr.bf16.mxu1 %v7684_v47  ;;  %v2993_v9 = vld [vmem:[%s11435_s12 + $0x340] sm:$0xff]  ;;  %v7400_v28 = vcombine.high %v2990_v25, %v3006_v27 }
 0x3d4   :  { %6399 = vmatprep.subr.bf16.mxu0 %v7690_v51  ;;  %v3009_v47 = vld [vmem:[%s11435_s12 + $0x3c0] sm:$0xff]  ;;  %v7367_v51 = vcombine.low %v2958_v10, %v2974_v11 }
 0x3d5   :  { %v7406_v29 = vcombine.high %v2993_v9, %v3009_v47  ;;  %v7405_v4 = vcombine.low %v2993_v9, %v3009_v47  ;;  %v3214_v47 = vld [vmem:[%s11435_s12 + $0xa28] sm:$0xff] }
 0x3d6   :  { %6277 = vmatpush1.bf16.msra.mxu1 %v7683_v49  ;;  %v3038_v49 = vld [vmem:[%s11435_s12 + $0x4a8] sm:$0xff] }
 0x3d7   :  { %6400 = vmatpush1.bf16.msra.mxu0 %v7689_v35  ;;  %6278 = vmatprep.subr.bf16.mxu1 %v7716_v59  ;;  %v3025_v35 = vld [vmem:[%s11435_s12 + $0x440] sm:$0xff]  ;;  %v7432_v62 = vcombine.high %v3022_v30, %v3038_v49 }
 0x3d8   :  { %6401 = vmatprep.subr.bf16.mxu0 %v7722_v26  ;;  %v3041_v59 = vld [vmem:[%s11435_s12 + $0x4c0] sm:$0xff]  ;;  %v7399_v26 = vcombine.low %v2990_v25, %v3006_v27 }
 0x3d9   :  { %v7438_v18 = vcombine.high %v3025_v35, %v3041_v59  ;;  %v7437_v40 = vcombine.low %v3025_v35, %v3041_v59  ;;  %v3246_v59 = vld [vmem:[%s11435_s12 + $0xb28] sm:$0xff] }
 0x3da   :  { %6279 = vmatpush1.bf16.msra.mxu1 %v7715_v31  ;;  %v3070_v31 = vld [vmem:[%s11435_s12 + $0x5a8] sm:$0xff] }
 0x3db   :  { %6402 = vmatpush1.bf16.msra.mxu0 %v7721_v36  ;;  %6280 = vmatprep.subr.bf16.mxu1 %v7748_v38  ;;  %v3057_v36 = vld [vmem:[%s11435_s12 + $0x540] sm:$0xff]  ;;  %v7464_v43 = vcombine.high %v3054_v32, %v3070_v31 }
 0x3dc   :  { %6403 = vmatprep.subr.bf16.mxu0 %v7754_v39  ;;  %v3073_v38 = vld [vmem:[%s11435_s12 + $0x5c0] sm:$0xff]  ;;  %v7431_v39 = vcombine.low %v3022_v30, %v3038_v49 }
 0x3dd   :  { %v7470_v16 = vcombine.high %v3057_v36, %v3073_v38  ;;  %v7469_v44 = vcombine.low %v3057_v36, %v3073_v38  ;;  %v3278_v38 = vld [vmem:[%s11435_s12 + $0xc28] sm:$0xff] }
 0x3de   :  { %6281 = vmatpush1.bf16.msra.mxu1 %v7747_v46  ;;  %v3102_v46 = vld [vmem:[%s11435_s12 + $0x6a8] sm:$0xff] }
 0x3df   :  { %6404 = vmatpush1.bf16.msra.mxu0 %v7753_v34  ;;  %6282 = vmatprep.subr.bf16.mxu1 %v7780_v33  ;;  %v3089_v34 = vld [vmem:[%s11435_s12 + $0x640] sm:$0xff]  ;;  %v7496_v41 = vcombine.high %v3086_v45, %v3102_v46 }
 0x3e0   :  { %6405 = vmatprep.subr.bf16.mxu0 %v7786_v48  ;;  %v3105_v33 = vld [vmem:[%s11435_s12 + $0x6c0] sm:$0xff]  ;;  %v7463_v48 = vcombine.low %v3054_v32, %v3070_v31 }
 0x3e1   :  { %v7502_v56 = vcombine.high %v3089_v34, %v3105_v33  ;;  %v7501_v63 = vcombine.low %v3089_v34, %v3105_v33  ;;  %v3310_v33 = vld [vmem:[%s11435_s12 + $0xd28] sm:$0xff] }
 0x3e2   :  { %6283 = vmatpush1.bf16.msra.mxu1 %v7779_v57  ;;  %v3134_v57 = vld [vmem:[%s11435_s12 + $0x7a8] sm:$0xff] }
 0x3e3   :  { %6406 = vmatpush1.bf16.msra.mxu0 %v7785_v19  ;;  %6334 = vmatprep.subr.bf16.mxu1 %v7304_v60  ;;  %v3121_v19 = vld [vmem:[%s11435_s12 + $0x740] sm:$0xff]  ;;  %v7528_v0 = vcombine.high %v3118_v5, %v3134_v57  ;;  %v7527_v10 = vcombine.low %v3118_v5, %v3134_v57 }
 0x3e4   :  { %6457 = vmatprep.subr.bf16.mxu0 %v7310_v61  ;;  %v3137_v60 = vld [vmem:[%s11435_s12 + $0x7c0] sm:$0xff]  ;;  %v7495_v61 = vcombine.low %v3086_v45, %v3102_v46 }
 0x3e5   :  { %6285 = vmatmul.mubr.bf16.vlgmr.msra.gmra.mrb[12].mxu1 %v9889_v23  ;;  %v7533_v11 = vcombine.low %v3121_v19, %v3137_v60 }
 0x3e6   :  { %6408 = vmatmul.mubr.bf16.vlgmr.msra.gmra.mrb[16].mxu0 %v9889_v23  ;;  %6335 = vmatpush1.bf16.msra.mxu1 %v7303_v1  ;;  %v7534_v1 = vcombine.high %v3121_v19, %v3137_v60  ;;  %v3342_v60 = vld [vmem:[%s11435_s12 + $0xe28] sm:$0xff] }
 0x3e7   :  { %6366 = vmatprep.mubr.bf16.mxu1 %v9887_v22  ;;  %6458 = vmatpush1.bf16.msra.mxu0 %v7309_v7  ;;  %v3153_v7 = vld [vmem:[%s11435_s12 + $0x840] sm:$0xff] }
 0x3e8   :  { %6489 = vmatprep.mubr.bf16.mxu0 %v9887_v22  ;;  %6336 = vmatprep.subr.bf16.mxu1 %v7336_v8  ;;  %v3169_v8 = vld [vmem:[%s11435_s12 + $0x8c0] sm:$0xff] }
 0x3e9   :  { %6459 = vmatprep.subr.bf16.mxu0 %v7342_v13  ;;  %v7560_v13 = vcombine.high %v3150_v2, %v3166_v3  ;;  %v7566_v14 = vcombine.high %v3153_v7, %v3169_v8  ;;  %v7565_v25 = vcombine.low %v3153_v7, %v3169_v8  ;;  %v3374_v8 = vld [vmem:[%s11435_s12 + $0xf28] sm:$0xff] }
 0x3ea   :  { %6337 = vmatpush1.bf16.msra.mxu1 %v7335_v17  ;;  %v3198_v17 = vld [vmem:[%s11435_s12 + $0x9a8] sm:$0xff] }
 0x3eb   :  { %6460 = vmatpush1.bf16.msra.mxu0 %v7341_v20  ;;  %6338 = vmatprep.subr.bf16.mxu1 %v7368_v21  ;;  %v3185_v20 = vld [vmem:[%s11435_s12 + $0x940] sm:$0xff]  ;;  %v7592_v27 = vcombine.high %v3182_v15, %v3198_v17 }
 0x3ec   :  { %6461 = vmatprep.subr.bf16.mxu0 %v7374_v24  ;;  %v3201_v21 = vld [vmem:[%s11435_s12 + $0x9c0] sm:$0xff]  ;;  %v7559_v24 = vcombine.low %v3150_v2, %v3166_v3 }
 0x3ed   :  { %v7598_v9 = vcombine.high %v3185_v20, %v3201_v21  ;;  %v7597_v30 = vcombine.low %v3185_v20, %v3201_v21  ;;  %v2896_v21 = vld [vmem:[%s11435_s12 + $0x38] sm:$0xff] }
 0x3ee   :  { %6339 = vmatpush1.bf16.msra.mxu1 %v7367_v51  ;;  %v3230_v51 = vld [vmem:[%s11435_s12 + $0xaa8] sm:$0xff] }
 0x3ef   :  { %6462 = vmatpush1.bf16.msra.mxu0 %v7373_v12  ;;  %6340 = vmatprep.subr.bf16.mxu1 %v7400_v28  ;;  %v3217_v12 = vld [vmem:[%s11435_s12 + $0xa40] sm:$0xff]  ;;  %v7624_v49 = vcombine.high %v3214_v47, %v3230_v51 }
 0x3f0   :  { %6463 = vmatprep.subr.bf16.mxu0 %v7406_v29  ;;  %v3233_v28 = vld [vmem:[%s11435_s12 + $0xac0] sm:$0xff]  ;;  %v7591_v29 = vcombine.low %v3182_v15, %v3198_v17 }
 0x3f1   :  { %v7630_v35 = vcombine.high %v3217_v12, %v3233_v28  ;;  %v7629_v32 = vcombine.low %v3217_v12, %v3233_v28  ;;  %v2928_v28 = vld [vmem:[%s11435_s12 + $0x138] sm:$0xff] }
 0x3f2   :  { %6341 = vmatpush1.bf16.msra.mxu1 %v7399_v26  ;;  %v3262_v26 = vld [vmem:[%s11435_s12 + $0xba8] sm:$0xff] }
 0x3f3   :  { %6464 = vmatpush1.bf16.msra.mxu0 %v7405_v4  ;;  %6342 = vmatprep.subr.bf16.mxu1 %v7432_v62  ;;  %v3249_v4 = vld [vmem:[%s11435_s12 + $0xb40] sm:$0xff]  ;;  %v7656_v31 = vcombine.high %v3246_v59, %v3262_v26 }
 0x3f4   :  { %6465 = vmatprep.subr.bf16.mxu0 %v7438_v18  ;;  %v3265_v62 = vld [vmem:[%s11435_s12 + $0xbc0] sm:$0xff]  ;;  %v7623_v18 = vcombine.low %v3214_v47, %v3230_v51 }
 0x3f5   :  { %v7662_v36 = vcombine.high %v3249_v4, %v3265_v62  ;;  %v7661_v45 = vcombine.low %v3249_v4, %v3265_v62  ;;  %v2960_v4 = vld [vmem:[%s11435_s12 + $0x238] sm:$0xff] }
 0x3f6   :  { %6343 = vmatpush1.bf16.msra.mxu1 %v7431_v39  ;;  %v3294_v39 = vld [vmem:[%s11435_s12 + $0xca8] sm:$0xff]  ;;  %v2976_v62 = vld [vmem:[%s11435_s12 + $0x2b8] sm:$0xff] }
 0x3f7   :  { %6466 = vmatpush1.bf16.msra.mxu0 %v7437_v40  ;;  %6344 = vmatprep.subr.bf16.mxu1 %v7464_v43  ;;  %v3281_v40 = vld [vmem:[%s11435_s12 + $0xc40] sm:$0xff]  ;;  %v7688_v46 = vcombine.high %v3278_v38, %v3294_v39 }
 0x3f8   :  { %6467 = vmatprep.subr.bf16.mxu0 %v7470_v16  ;;  %v3297_v43 = vld [vmem:[%s11435_s12 + $0xcc0] sm:$0xff]  ;;  %v7655_v16 = vcombine.low %v3246_v59, %v3262_v26 }
 0x3f9   :  { %v7694_v34 = vcombine.high %v3281_v40, %v3297_v43  ;;  %v7693_v5 = vcombine.low %v3281_v40, %v3297_v43  ;;  %v2992_v43 = vld [vmem:[%s11435_s12 + $0x338] sm:$0xff] }
 0x3fa   :  { %6345 = vmatpush1.bf16.msra.mxu1 %v7463_v48  ;;  %v3326_v48 = vld [vmem:[%s11435_s12 + $0xda8] sm:$0xff] }
 0x3fb   :  { %6468 = vmatpush1.bf16.msra.mxu0 %v7469_v44  ;;  %6346 = vmatprep.subr.bf16.mxu1 %v7496_v41  ;;  %v3313_v44 = vld [vmem:[%s11435_s12 + $0xd40] sm:$0xff]  ;;  %v7720_v57 = vcombine.high %v3310_v33, %v3326_v48 }
 0x3fc   :  { %6469 = vmatprep.subr.bf16.mxu0 %v7502_v56  ;;  %v3329_v41 = vld [vmem:[%s11435_s12 + $0xdc0] sm:$0xff]  ;;  %v7687_v56 = vcombine.low %v3278_v38, %v3294_v39  ;;  %v7372_v39 = vcombine.high %v2960_v4, %v2976_v62 }
 0x3fd   :  { %v7726_v19 = vcombine.high %v3313_v44, %v3329_v41  ;;  %v7725_v2 = vcombine.low %v3313_v44, %v3329_v41  ;;  %v3024_v41 = vld [vmem:[%s11435_s12 + $0x438] sm:$0xff] }
 0x3fe   :  { %6347 = vmatpush1.bf16.msra.mxu1 %v7495_v61  ;;  %v3358_v61 = vld [vmem:[%s11435_s12 + $0xea8] sm:$0xff] }
 0x3ff   :  { %6470 = vmatpush1.bf16.msra.mxu0 %v7501_v63  ;;  %6348 = vmatprep.subr.bf16.mxu1 %v7528_v0  ;;  %v3345_v63 = vld [vmem:[%s11435_s12 + $0xe40] sm:$0xff]  ;;  %v7752_v3 = vcombine.high %v3342_v60, %v3358_v61 }
 0x400   :  { %6471 = vmatprep.subr.bf16.mxu0 %v7534_v1  ;;  %v3361_v0 = vld [vmem:[%s11435_s12 + $0xec0] sm:$0xff]  ;;  %v7719_v1 = vcombine.low %v3310_v33, %v3326_v48 }
 0x401   :  { %v7758_v7 = vcombine.high %v3345_v63, %v3361_v0  ;;  %v7757_v15 = vcombine.low %v3345_v63, %v3361_v0  ;;  %v3056_v0 = vld [vmem:[%s11435_s12 + $0x538] sm:$0xff] }
 0x402   :  { %6349 = vmatpush1.bf16.msra.mxu1 %v7527_v10  ;;  %v3390_v10 = vld [vmem:[%s11435_s12 + $0xfa8] sm:$0xff] }
 0x403   :  { %6472 = vmatpush1.bf16.msra.mxu0 %v7533_v11  ;;  %6350 = vmatprep.subr.bf16.mxu1 %v7560_v13  ;;  %v3377_v11 = vld [vmem:[%s11435_s12 + $0xf40] sm:$0xff]  ;;  %v7784_v17 = vcombine.high %v3374_v8, %v3390_v10 }
 0x404   :  { %6473 = vmatprep.subr.bf16.mxu0 %v7566_v14  ;;  %v3393_v13 = vld [vmem:[%s11435_s12 + $0xfc0] sm:$0xff]  ;;  %v7751_v14 = vcombine.low %v3342_v60, %v3358_v61 }
 0x405   :  { %v7790_v20 = vcombine.high %v3377_v11, %v3393_v13  ;;  %v7789_v47 = vcombine.low %v3377_v11, %v3393_v13 }
 0x406   :  { %6351 = vmatpush1.bf16.msra.mxu1 %v7559_v24  ;;  %v2912_v24 = vld [vmem:[%s11435_s12 + $0xb8] sm:$0xff] }
 0x407   :  { %6474 = vmatpush1.bf16.msra.mxu0 %v7565_v25  ;;  %6352 = vmatprep.subr.bf16.mxu1 %v7592_v27  ;;  %v2899_v25 = vld [vmem:[%s11435_s12 + $0x50] sm:$0xff]  ;;  %v7308_v51 = vcombine.high %v2896_v21, %v2912_v24 }
 0x408   :  { %6475 = vmatprep.subr.bf16.mxu0 %v7598_v9  ;;  %v2915_v27 = vld [vmem:[%s11435_s12 + $0xd0] sm:$0xff]  ;;  %v7783_v9 = vcombine.low %v3374_v8, %v3390_v10  ;;  %v10542_v8 = vld [vmem:[%s11441_s13] sm:$0xff] }
 0x409   :  { %v7314_v12 = vcombine.high %v2899_v25, %v2915_v27  ;;  %v7313_v59 = vcombine.low %v2899_v25, %v2915_v27  ;;  %v3416_v27 = vrot.slane %v10542_v8, %v8561_v52 }
 0x40a   :  { %6353 = vmatpush1.bf16.msra.mxu1 %v7591_v29  ;;  %v2944_v29 = vld [vmem:[%s11435_s12 + $0x1b8] sm:$0xff] }
 0x40b   :  { %6476 = vmatpush1.bf16.msra.mxu0 %v7597_v30  ;;  %6354 = vmatprep.subr.bf16.mxu1 %v7624_v49  ;;  %v7307_v30 = vcombine.low %v2896_v21, %v2912_v24  ;;  %v2931_v49 = vld [vmem:[%s11435_s12 + $0x150] sm:$0xff]  ;;  %v7340_v26 = vcombine.high %v2928_v28, %v2944_v29 }
 0x40c   :  { %6477 = vmatprep.subr.bf16.mxu0 %v7630_v35  ;;  %v2947_v35 = vld [vmem:[%s11435_s12 + $0x1d0] sm:$0xff] }
 0x40d   :  { %v7345_v38 = vcombine.low %v2931_v49, %v2947_v35  ;;  %v3091_v21 = vld [vmem:[%s11435_s12 + $0x650] sm:$0xff] }
 0x40e   :  { %6355 = vmatpush1.bf16.msra.mxu1 %v7623_v18  ;;  %v7346_v18 = vcombine.high %v2931_v49, %v2947_v35  ;;  %v3107_v24 = vld [vmem:[%s11435_s12 + $0x6d0] sm:$0xff]  ;;  %v3136_v49 = vld [vmem:[%s11435_s12 + $0x7b8] sm:$0xff] }
 0x40f   :  { %6478 = vmatpush1.bf16.msra.mxu0 %v7629_v32  ;;  %6356 = vmatprep.subr.bf16.mxu1 %v7656_v31  ;;  %v2963_v32 = vld [vmem:[%s11435_s12 + $0x250] sm:$0xff] }
 0x410   :  { %6479 = vmatprep.subr.bf16.mxu0 %v7662_v36  ;;  %v2979_v31 = vld [vmem:[%s11435_s12 + $0x2d0] sm:$0xff]  ;;  %v7339_v36 = vcombine.low %v2928_v28, %v2944_v29  ;;  %v7506_v29 = vcombine.high %v3091_v21, %v3107_v24 }
 0x411   :  { %v7378_v40 = vcombine.high %v2963_v32, %v2979_v31  ;;  %v7377_v33 = vcombine.low %v2963_v32, %v2979_v31 }
 0x412   :  { %6357 = vmatpush1.bf16.msra.mxu1 %v7655_v16  ;;  %v3008_v16 = vld [vmem:[%s11435_s12 + $0x3b8] sm:$0xff] }
 0x413   :  { %6480 = vmatpush1.bf16.msra.mxu0 %v7661_v45  ;;  %6358 = vmatprep.subr.bf16.mxu1 %v7688_v46  ;;  %v2995_v45 = vld [vmem:[%s11435_s12 + $0x350] sm:$0xff]  ;;  %v7404_v48 = vcombine.high %v2992_v43, %v3008_v16 }
 0x414   :  { %6481 = vmatprep.subr.bf16.mxu0 %v7694_v34  ;;  %v3011_v46 = vld [vmem:[%s11435_s12 + $0x3d0] sm:$0xff]  ;;  %v7371_v34 = vcombine.low %v2960_v4, %v2976_v62 }
 0x415   :  { %v7410_v44 = vcombine.high %v2995_v45, %v3011_v46  ;;  %v7409_v60 = vcombine.low %v2995_v45, %v3011_v46  ;;  %v3123_v62 = vld [vmem:[%s11435_s12 + $0x750] sm:$0xff] }
 0x416   :  { %6359 = vmatpush1.bf16.msra.mxu1 %v7687_v56  ;;  %v3040_v56 = vld [vmem:[%s11435_s12 + $0x4b8] sm:$0xff] }
 0x417   :  { %6482 = vmatpush1.bf16.msra.mxu0 %v7693_v5  ;;  %6360 = vmatprep.subr.bf16.mxu1 %v7720_v57  ;;  %v3027_v5 = vld [vmem:[%s11435_s12 + $0x450] sm:$0xff]  ;;  %v7436_v61 = vcombine.high %v3024_v41, %v3040_v56 }
 0x418   :  { %6483 = vmatprep.subr.bf16.mxu0 %v7726_v19  ;;  %v3043_v57 = vld [vmem:[%s11435_s12 + $0x4d0] sm:$0xff]  ;;  %v7403_v19 = vcombine.low %v2992_v43, %v3008_v16  ;;  %v7505_v16 = vcombine.low %v3091_v21, %v3107_v24 }
 0x419   :  { %v7442_v63 = vcombine.high %v3027_v5, %v3043_v57  ;;  %v7441_v10 = vcombine.low %v3027_v5, %v3043_v57 }
 0x41a   :  { %6361 = vmatpush1.bf16.msra.mxu1 %v7719_v1  ;;  %v3072_v1 = vld [vmem:[%s11435_s12 + $0x5b8] sm:$0xff] }
 0x41b   :  { %6484 = vmatpush1.bf16.msra.mxu0 %v7725_v2  ;;  %6362 = vmatprep.subr.bf16.mxu1 %v7752_v3  ;;  %v3059_v2 = vld [vmem:[%s11435_s12 + $0x550] sm:$0xff]  ;;  %v7468_v11 = vcombine.high %v3056_v0, %v3072_v1  ;;  %v7467_v25 = vcombine.low %v3056_v0, %v3072_v1 }
 0x41c   :  { %6485 = vmatprep.subr.bf16.mxu0 %v7758_v7  ;;  %v3075_v3 = vld [vmem:[%s11435_s12 + $0x5d0] sm:$0xff]  ;;  %v7435_v7 = vcombine.low %v3024_v41, %v3040_v56 }
 0x41d   :  { %v7474_v13 = vcombine.high %v3059_v2, %v3075_v3  ;;  %v3155_v41 = vld [vmem:[%s11435_s12 + $0x850] sm:$0xff] }
 0x41e   :  { %6363 = vmatpush1.bf16.msra.mxu1 %v7751_v14  ;;  %v3088_v14 = vld [vmem:[%s11435_s12 + $0x638] sm:$0xff]  ;;  %v3171_v56 = vld [vmem:[%s11435_s12 + $0x8d0] sm:$0xff] }
 0x41f   :  { %6486 = vmatpush1.bf16.msra.mxu0 %v7757_v15  ;;  %6364 = vmatprep.subr.bf16.mxu1 %v7784_v17  ;;  %v3104_v15 = vld [vmem:[%s11435_s12 + $0x6b8] sm:$0xff]  ;;  %v3412_v17 = vrot.slane %v10542_v8, %v8569_v54  ;;  %v3187_v0 = vld [vmem:[%s11435_s12 + $0x950] sm:$0xff] }
 0x420   :  { %6487 = vmatprep.subr.bf16.mxu0 %v7790_v20  ;;  %v3428_v20 = vrot.slane %v10542_v8, %v8709_v55  ;;  %v3203_v1 = vld [vmem:[%s11435_s12 + $0x9d0] sm:$0xff] }
 0x422   :  { %6365 = vmatpush1.bf16.msra.mxu1 %v7783_v9  ;;  %v3432_v9 = vrot.slane %v10542_v8, %v8694_v42 }
 0x423   :  { %6488 = vmatpush1.bf16.msra.mxu0 %v7789_v47  ;;  %6416 = vmatprep.subr.bf16.mxu1 %v7308_v51  ;;  %v7473_v47 = vcombine.low %v3059_v2, %v3075_v3  ;;  %v7500_v51 = vcombine.high %v3088_v14, %v3104_v15  ;;  %v7569_v3 = vcombine.low %v3155_v41, %v3171_v56 }
 0x424   :  { %6539 = vmatprep.subr.bf16.mxu0 %v7314_v12 }
 0x425   :  { %6367 = vmatmul.mubr.bf16.vlgmr.msra.gmra.mrb[16].mxu1 %v9889_v23 }
 0x426   :  { %6490 = vmatmul.mubr.bf16.vlgmr.msra.gmra.mrb[20].mxu0 %v9889_v23  ;;  %6417 = vmatpush1.bf16.msra.mxu1 %v7307_v30  ;;  %v3120_v30 = vld [vmem:[%s11435_s12 + $0x738] sm:$0xff] }
 0x427   :  { %6448 = vmatprep.mubr.bf16.mxu1 %v9887_v22  ;;  %6540 = vmatpush1.bf16.msra.mxu0 %v7313_v59  ;;  %v7532_v45 = vcombine.high %v3120_v30, %v3136_v49  ;;  %v7531_v5 = vcombine.low %v3120_v30, %v3136_v49  ;;  %v3280_v30 = vld [vmem:[%s11435_s12 + $0xc38] sm:$0xff] }
 0x428   :  { %6571 = vmatprep.mubr.bf16.mxu0 %v9887_v22  ;;  %6418 = vmatprep.subr.bf16.mxu1 %v7340_v26  ;;  %v3296_v49 = vld [vmem:[%s11435_s12 + $0xcb8] sm:$0xff] }
 0x429   :  { %6541 = vmatprep.subr.bf16.mxu0 %v7346_v18  ;;  %v3139_v18 = vld [vmem:[%s11435_s12 + $0x7d0] sm:$0xff] }
 0x42a   :  { %6419 = vmatpush1.bf16.msra.mxu1 %v7339_v36  ;;  %v7537_v57 = vcombine.low %v3123_v62, %v3139_v18 }
 0x42b   :  { %6542 = vmatpush1.bf16.msra.mxu0 %v7345_v38  ;;  %6420 = vmatprep.subr.bf16.mxu1 %v7372_v39  ;;  %v7499_v39 = vcombine.low %v3088_v14, %v3104_v15  ;;  %v3219_v14 = vld [vmem:[%s11435_s12 + $0xa50] sm:$0xff] }
 0x42c   :  { %6543 = vmatprep.subr.bf16.mxu0 %v7378_v40  ;;  %v3235_v15 = vld [vmem:[%s11435_s12 + $0xad0] sm:$0xff] }
 0x42d   :  { %v7634_v24 = vcombine.high %v3219_v14, %v3235_v15 }
 0x42e   :  { %6421 = vmatpush1.bf16.msra.mxu1 %v7371_v34 }
 0x42f   :  { %6544 = vmatpush1.bf16.msra.mxu0 %v7377_v33  ;;  %6422 = vmatprep.subr.bf16.mxu1 %v7404_v48  ;;  %v7538_v33 = vcombine.high %v3123_v62, %v3139_v18  ;;  %v3152_v48 = vld [vmem:[%s11435_s12 + $0x838] sm:$0xff] }
 0x430   :  { %6545 = vmatprep.subr.bf16.mxu0 %v7410_v44  ;;  %v3168_v44 = vld [vmem:[%s11435_s12 + $0x8b8] sm:$0xff] }
 0x431   :  { %v7563_v2 = vcombine.low %v3152_v48, %v3168_v44 }
 0x432   :  { %6423 = vmatpush1.bf16.msra.mxu1 %v7403_v19  ;;  %v7564_v19 = vcombine.high %v3152_v48, %v3168_v44 }
 0x433   :  { %6546 = vmatpush1.bf16.msra.mxu0 %v7409_v60  ;;  %6424 = vmatprep.subr.bf16.mxu1 %v7436_v61  ;;  %v7570_v60 = vcombine.high %v3155_v41, %v3171_v56  ;;  %v3184_v61 = vld [vmem:[%s11435_s12 + $0x938] sm:$0xff] }
 0x434   :  { %6547 = vmatprep.subr.bf16.mxu0 %v7442_v63  ;;  %v3200_v63 = vld [vmem:[%s11435_s12 + $0x9b8] sm:$0xff] }
 0x435   :  { %v3344_v41 = vld [vmem:[%s11435_s12 + $0xe38] sm:$0xff] }
 0x436   :  { %6425 = vmatpush1.bf16.msra.mxu1 %v7435_v7  ;;  %v7596_v7 = vcombine.high %v3184_v61, %v3200_v63  ;;  %v3360_v56 = vld [vmem:[%s11435_s12 + $0xeb8] sm:$0xff] }
 0x437   :  { %6548 = vmatpush1.bf16.msra.mxu0 %v7441_v10  ;;  %6426 = vmatprep.subr.bf16.mxu1 %v7468_v11  ;;  %v7602_v10 = vcombine.high %v3187_v0, %v3203_v1  ;;  %v3216_v11 = vld [vmem:[%s11435_s12 + $0xa38] sm:$0xff] }
 0x438   :  { %v6163_v12 = vpop.f32.mrb[4].mxu1  ;;  %v6245_v28 = vpop.f32.mrb[8].mxu0  ;;  %6549 = vmatprep.subr.bf16.mxu0 %v7474_v13  ;;  %v3232_v13 = vld [vmem:[%s11435_s12 + $0xab8] sm:$0xff] }
 0x439   :  { %v10570_v35 = vadd.f32 %v6163_v12, %v3412_v17  ;;  %v10572_v59 = vadd.f32 %v6245_v28, %v3428_v20  ;;  %v6165_v26 = vpop.f32.mrb[5].mxu1  ;;  %v6247_v4 = vpop.f32.mrb[9].mxu0  ;;  %v7595_v17 = vcombine.low %v3184_v61, %v3200_v63  ;;  %v7601_v20 = vcombine.low %v3187_v0, %v3203_v1  ;;  %v3376_v0 = vld [vmem:[%s11435_s12 + $0xf38] sm:$0xff] }
 0x43a   :  { %v10580_v32 = vadd.f32 %v6165_v26, %v3416_v27  ;;  %v10582_v31 = vadd.f32 %v6247_v4, %v3432_v9  ;;  %6427 = vmatpush1.bf16.msra.mxu1 %v7467_v25  ;;  %v6167_v36 = vpop.f32.mrb[6].mxu1  ;;  %v6249_v38 = vpop.f32.mrb[10].mxu0  ;;  %v7628_v21 = vcombine.high %v3216_v11, %v3232_v13  ;;  %v3248_v25 = vld [vmem:[%s11435_s12 + $0xb38] sm:$0xff]  ;;  %v3251_v9 = vld [vmem:[%s11435_s12 + $0xb50] sm:$0xff]  ;;  %v7633_v12 = vcombine.low %v3219_v14, %v3235_v15  ;;  %v2898_v14 = vld [vmem:[%s11435_s12 + $0x48] sm:$0xff] }
 0x43b   :  { %6550 = vmatpush1.bf16.msra.mxu0 %v7473_v47  ;;  %v6168_v40 = vpop.f32.mrb[7].mxu1  ;;  %v6250_v43 = vpop.f32.mrb[11].mxu0  ;;  %6428 = vmatprep.subr.bf16.mxu1 %v7500_v51  ;;  %v3264_v27 = vld [vmem:[%s11435_s12 + $0xbb8] sm:$0xff]  ;;  %v3267_v47 = vld [vmem:[%s11435_s12 + $0xbd0] sm:$0xff]  ;;  %v7627_v51 = vcombine.low %v3216_v11, %v3232_v13  ;;  %v7692_v36 = vcombine.high %v3280_v30, %v3296_v49  ;;  %v7756_v61 = vcombine.high %v3344_v41, %v3360_v56  ;;  %v2914_v15 = vld [vmem:[%s11435_s12 + $0xc8] sm:$0xff] }
 0x43c   :  { %v6817_v46 = vcombine.low %v10570_v35, %v10580_v32  ;;  %v6834_v34 = vcombine.low %v10572_v59, %v10582_v31  ;;  %6551 = vmatprep.subr.bf16.mxu0 %v7506_v29  ;;  %v7660_v28 = vcombine.high %v3248_v25, %v3264_v27  ;;  %v7666_v29 = vcombine.high %v3251_v9, %v3267_v47  ;;  %v3283_v26 = vld [vmem:[%s11435_s12 + $0xc50] sm:$0xff]  ;;  %v3328_v40 = vld [vmem:[%s11435_s12 + $0xdb8] sm:$0xff]  ;;  %v3202_v35 = vld [vmem:[%s11435_s12 + $0x9c8] sm:$0xff] }
 0x43d   :  { %v3299_v4 = vld [vmem:[%s11435_s12 + $0xcd0] sm:$0xff]  ;;  %v7659_v62 = vcombine.low %v3248_v25, %v3264_v27  ;;  %v7665_v18 = vcombine.low %v3251_v9, %v3267_v47  ;;  %v3392_v1 = vld [vmem:[%s11435_s12 + $0xfb8] sm:$0xff]  ;;  %v7312_v25 = vcombine.high %v2898_v14, %v2914_v15  ;;  %v2930_v9 = vld [vmem:[%s11435_s12 + $0x148] sm:$0xff] }
 0x43e   :  { %6429 = vmatpush1.bf16.msra.mxu1 %v7499_v39  ;;  %v7698_v38 = vcombine.high %v3283_v26, %v3299_v4  ;;  %v3312_v39 = vld [vmem:[%s11435_s12 + $0xd38] sm:$0xff]  ;;  %v3315_v43 = vld [vmem:[%s11435_s12 + $0xd50] sm:$0xff]  ;;  %v7788_v11 = vcombine.high %v3376_v0, %v3392_v1  ;;  %v2946_v47 = vld [vmem:[%s11435_s12 + $0x1c8] sm:$0xff] }
 0x43f   :  { %6552 = vmatpush1.bf16.msra.mxu0 %v7505_v16  ;;  %6430 = vmatprep.subr.bf16.mxu1 %v7532_v45  ;;  %v3331_v16 = vld [vmem:[%s11435_s12 + $0xdd0] sm:$0xff]  ;;  %v7691_v45 = vcombine.low %v3280_v30, %v3296_v49  ;;  %v7724_v48 = vcombine.high %v3312_v39, %v3328_v40  ;;  %v7344_v30 = vcombine.high %v2930_v9, %v2946_v47  ;;  %v2962_v49 = vld [vmem:[%s11435_s12 + $0x248] sm:$0xff]  ;;  %v3189_v32 = vld [vmem:[%s11435_s12 + $0x960] sm:$0xff] }
 0x440   :  { %6553 = vmatprep.subr.bf16.mxu0 %v7538_v33  ;;  %v7697_v33 = vcombine.low %v3283_v26, %v3299_v4  ;;  %v7730_v44 = vcombine.high %v3315_v43, %v3331_v16  ;;  %v2978_v26 = vld [vmem:[%s11435_s12 + $0x2c8] sm:$0xff]  ;;  %v3204_v59 = vld [vmem:[%s11435_s12 + $0x9d8] sm:$0xff]  ;;  %v3191_v31 = vld [vmem:[%s11435_s12 + $0x970] sm:$0xff] }
 0x442   :  { %6431 = vmatpush1.bf16.msra.mxu1 %v7531_v5  ;;  %v3347_v5 = vld [vmem:[%s11435_s12 + $0xe50] sm:$0xff] }
 0x443   :  { %6554 = vmatpush1.bf16.msra.mxu0 %v7537_v57  ;;  %6432 = vmatprep.subr.bf16.mxu1 %v7564_v19  ;;  %v3363_v57 = vld [vmem:[%s11435_s12 + $0xed0] sm:$0xff]  ;;  %v7723_v19 = vcombine.low %v3312_v39, %v3328_v40  ;;  %v7376_v39 = vcombine.high %v2962_v49, %v2978_v26 }
 0x444   :  { %6555 = vmatprep.subr.bf16.mxu0 %v7570_v60  ;;  %v7729_v60 = vcombine.low %v3315_v43, %v3331_v16  ;;  %v7762_v63 = vcombine.high %v3347_v5, %v3363_v57  ;;  %v2994_v43 = vld [vmem:[%s11435_s12 + $0x348] sm:$0xff] }
 0x445   :  { %v3010_v16 = vld [vmem:[%s11435_s12 + $0x3c8] sm:$0xff] }
 0x446   :  { %6433 = vmatpush1.bf16.msra.mxu1 %v7563_v2  ;;  %v3379_v2 = vld [vmem:[%s11435_s12 + $0xf50] sm:$0xff] }
 0x447   :  { %6556 = vmatpush1.bf16.msra.mxu0 %v7569_v3  ;;  %6434 = vmatprep.subr.bf16.mxu1 %v7596_v7  ;;  %v3395_v3 = vld [vmem:[%s11435_s12 + $0xfd0] sm:$0xff]  ;;  %v7755_v7 = vcombine.low %v3344_v41, %v3360_v56  ;;  %v7408_v41 = vcombine.high %v2994_v43, %v3010_v16 }
 0x448   :  { %6557 = vmatprep.subr.bf16.mxu0 %v7602_v10  ;;  %v7761_v10 = vcombine.low %v3347_v5, %v3363_v57  ;;  %v7794_v13 = vcombine.high %v3379_v2, %v3395_v3  ;;  %v3026_v5 = vld [vmem:[%s11435_s12 + $0x448] sm:$0xff] }
 0x449   :  { %v3042_v57 = vld [vmem:[%s11435_s12 + $0x4c8] sm:$0xff] }
 0x44a   :  { %6435 = vmatpush1.bf16.msra.mxu1 %v7595_v17  ;;  %v2901_v17 = vld [vmem:[%s11435_s12 + $0x60] sm:$0xff] }
 0x44b   :  { %6558 = vmatpush1.bf16.msra.mxu0 %v7601_v20  ;;  %6436 = vmatprep.subr.bf16.mxu1 %v7628_v21  ;;  %v2917_v20 = vld [vmem:[%s11435_s12 + $0xe0] sm:$0xff]  ;;  %v7787_v21 = vcombine.low %v3376_v0, %v3392_v1  ;;  %v7440_v0 = vcombine.high %v3026_v5, %v3042_v57 }
 0x44c   :  { %6559 = vmatprep.subr.bf16.mxu0 %v7634_v24  ;;  %v7793_v24 = vcombine.low %v3379_v2, %v3395_v3  ;;  %v7318_v27 = vcombine.high %v2901_v17, %v2917_v20  ;;  %v3058_v2 = vld [vmem:[%s11435_s12 + $0x548] sm:$0xff] }
 0x44d   :  { %v3074_v3 = vld [vmem:[%s11435_s12 + $0x5c8] sm:$0xff] }
 0x44e   :  { %6437 = vmatpush1.bf16.msra.mxu1 %v7627_v51  ;;  %v7311_v51 = vcombine.low %v2898_v14, %v2914_v15  ;;  %v7472_v15 = vcombine.high %v3058_v2, %v3074_v3 }
 0x44f   :  { %6560 = vmatpush1.bf16.msra.mxu0 %v7633_v12  ;;  %6438 = vmatprep.subr.bf16.mxu1 %v7660_v28  ;;  %v2933_v12 = vld [vmem:[%s11435_s12 + $0x160] sm:$0xff] }
 0x450   :  { %6561 = vmatprep.subr.bf16.mxu0 %v7666_v29  ;;  %v2949_v28 = vld [vmem:[%s11435_s12 + $0x1e0] sm:$0xff]  ;;  %v7317_v29 = vcombine.low %v2901_v17, %v2917_v20  ;;  %v3090_v20 = vld [vmem:[%s11435_s12 + $0x648] sm:$0xff] }
 0x451   :  { %v7350_v4 = vcombine.high %v2933_v12, %v2949_v28 }
 0x452   :  { %6439 = vmatpush1.bf16.msra.mxu1 %v7659_v62  ;;  %v2965_v62 = vld [vmem:[%s11435_s12 + $0x260] sm:$0xff] }
 0x453   :  { %6562 = vmatpush1.bf16.msra.mxu0 %v7665_v18  ;;  %6440 = vmatprep.subr.bf16.mxu1 %v7692_v36  ;;  %v2981_v18 = vld [vmem:[%s11435_s12 + $0x2e0] sm:$0xff]  ;;  %v7343_v36 = vcombine.low %v2930_v9, %v2946_v47  ;;  %v3424_v47 = vrot.slane %v10542_v8, %v8582_v58 }
 0x454   :  { %6563 = vmatprep.subr.bf16.mxu0 %v7698_v38  ;;  %v7349_v38 = vcombine.low %v2933_v12, %v2949_v28  ;;  %v7382_v40 = vcombine.high %v2965_v62, %v2981_v18  ;;  %v3109_v9 = vld [vmem:[%s11435_s12 + $0x6e0] sm:$0xff]  ;;  %v7471_v12 = vcombine.low %v3058_v2, %v3074_v3  ;;  %v6825_v3 = vrot.slane %v6817_v46, %v8555_v50 }
 0x455   :  { %v3173_v2 = vld [vmem:[%s11435_s12 + $0x8e0] sm:$0xff] }
 0x456   :  { %6441 = vmatpush1.bf16.msra.mxu1 %v7691_v45  ;;  %v2997_v45 = vld [vmem:[%s11435_s12 + $0x360] sm:$0xff] }
 0x457   :  { %6564 = vmatpush1.bf16.msra.mxu0 %v7697_v33  ;;  %6442 = vmatprep.subr.bf16.mxu1 %v7724_v48  ;;  %v3013_v33 = vld [vmem:[%s11435_s12 + $0x3e0] sm:$0xff]  ;;  %v7375_v48 = vcombine.low %v2962_v49, %v2978_v26 }
 0x458   :  { %6565 = vmatprep.subr.bf16.mxu0 %v7730_v44  ;;  %v7381_v44 = vcombine.low %v2965_v62, %v2981_v18  ;;  %v7414_v56 = vcombine.high %v2997_v45, %v3013_v33  ;;  %v3138_v62 = vld [vmem:[%s11435_s12 + $0x7c8] sm:$0xff]  ;;  %v3205_v46 = vld [vmem:[%s11435_s12 + $0x9e0] sm:$0xff] }
 0x45a   :  { %6443 = vmatpush1.bf16.msra.mxu1 %v7723_v19  ;;  %v3029_v19 = vld [vmem:[%s11435_s12 + $0x460] sm:$0xff] }
 0x45b   :  { %6566 = vmatpush1.bf16.msra.mxu0 %v7729_v60  ;;  %6444 = vmatprep.subr.bf16.mxu1 %v7756_v61  ;;  %v3045_v60 = vld [vmem:[%s11435_s12 + $0x4e0] sm:$0xff]  ;;  %v7407_v61 = vcombine.low %v2994_v43, %v3010_v16 }
 0x45c   :  { %6567 = vmatprep.subr.bf16.mxu0 %v7762_v63  ;;  %v7413_v63 = vcombine.low %v2997_v45, %v3013_v33  ;;  %v7446_v1 = vcombine.high %v3029_v19, %v3045_v60  ;;  %v7445_v14 = vcombine.low %v3029_v19, %v3045_v60  ;;  %v3141_v43 = vld [vmem:[%s11435_s12 + $0x7e0] sm:$0xff] }
 0x45e   :  { %6445 = vmatpush1.bf16.msra.mxu1 %v7755_v7  ;;  %v3061_v7 = vld [vmem:[%s11435_s12 + $0x560] sm:$0xff] }
 0x45f   :  { %6568 = vmatpush1.bf16.msra.mxu0 %v7761_v10  ;;  %6446 = vmatprep.subr.bf16.mxu1 %v7788_v11  ;;  %v3077_v10 = vld [vmem:[%s11435_s12 + $0x5e0] sm:$0xff]  ;;  %v7439_v11 = vcombine.low %v3026_v5, %v3042_v57 }
 0x460   :  { %6569 = vmatprep.subr.bf16.mxu0 %v7794_v13  ;;  %v10763_v13 = vld [vmem:[%s11441_s13 + $0x8] sm:$0xff]  ;;  %v7478_v17 = vcombine.high %v3061_v7, %v3077_v10  ;;  %v7477_v28 = vcombine.low %v3061_v7, %v3077_v10 }
 0x462   :  { %6447 = vmatpush1.bf16.msra.mxu1 %v7787_v21  ;;  %v3106_v21 = vld [vmem:[%s11435_s12 + $0x6c8] sm:$0xff] }
 0x463   :  { %6570 = vmatpush1.bf16.msra.mxu0 %v7793_v24  ;;  %6498 = vmatprep.subr.bf16.mxu1 %v7312_v25  ;;  %v3420_v24 = vrot.slane %v10542_v8, %v8605_v6  ;;  %v3444_v25 = vrot.slane %v10763_v13, %v8569_v54 }
 0x464   :  { %6621 = vmatprep.subr.bf16.mxu0 %v7318_v27  ;;  %v3093_v27 = vld [vmem:[%s11435_s12 + $0x660] sm:$0xff] }
 0x465   :  { %6449 = vmatmul.mubr.bf16.vlgmr.msra.gmra.mrb[20].mxu1 %v9889_v23  ;;  %v7510_v26 = vcombine.high %v3093_v27, %v3109_v9  ;;  %v7509_v5 = vcombine.low %v3093_v27, %v3109_v9  ;;  %v7606_v27 = vcombine.high %v3189_v32, %v3205_v46  ;;  %v3218_v9 = vld [vmem:[%s11435_s12 + $0xa48] sm:$0xff] }
 0x466   :  { %6572 = vmatmul.mubr.bf16.vlgmr.msra.gmra.mrb[24].mxu0 %v9889_v23  ;;  %6499 = vmatpush1.bf16.msra.mxu1 %v7311_v51  ;;  %v3448_v51 = vrot.slane %v10763_v13, %v8561_v52 }
 0x467   :  { %6530 = vmatprep.mubr.bf16.mxu1 %v9887_v22  ;;  %6622 = vmatpush1.bf16.msra.mxu0 %v7317_v29  ;;  %v7504_v29 = vcombine.high %v3090_v20, %v3106_v21 }
 0x468   :  { %6653 = vmatprep.mubr.bf16.mxu0 %v9887_v22  ;;  %6500 = vmatprep.subr.bf16.mxu1 %v7344_v30 }
 0x469   :  { %6623 = vmatprep.subr.bf16.mxu0 %v7350_v4  ;;  %v3122_v4 = vld [vmem:[%s11435_s12 + $0x748] sm:$0xff] }
 0x46a   :  { %6501 = vmatpush1.bf16.msra.mxu1 %v7343_v36  ;;  %v7536_v57 = vcombine.high %v3122_v4, %v3138_v62  ;;  %v7535_v10 = vcombine.low %v3122_v4, %v3138_v62  ;;  %v3266_v4 = vld [vmem:[%s11435_s12 + $0xbc8] sm:$0xff]  ;;  %v3253_v62 = vld [vmem:[%s11435_s12 + $0xb60] sm:$0xff] }
 0x46b   :  { %6624 = vmatpush1.bf16.msra.mxu0 %v7349_v38  ;;  %6502 = vmatprep.subr.bf16.mxu1 %v7376_v39 }
 0x46c   :  { %6625 = vmatprep.subr.bf16.mxu0 %v7382_v40  ;;  %v3125_v40 = vld [vmem:[%s11435_s12 + $0x760] sm:$0xff] }
 0x46e   :  { %6503 = vmatpush1.bf16.msra.mxu1 %v7375_v48 }
 0x46f   :  { %6626 = vmatpush1.bf16.msra.mxu0 %v7381_v44  ;;  %6504 = vmatprep.subr.bf16.mxu1 %v7408_v41  ;;  %v7503_v44 = vcombine.low %v3090_v20, %v3106_v21  ;;  %v3186_v20 = vld [vmem:[%s11435_s12 + $0x948] sm:$0xff] }
 0x470   :  { %6627 = vmatprep.subr.bf16.mxu0 %v7414_v56 }
 0x472   :  { %6505 = vmatpush1.bf16.msra.mxu1 %v7407_v61  ;;  %v7542_v61 = vcombine.high %v3125_v40, %v3141_v43 }
 0x473   :  { %6628 = vmatpush1.bf16.msra.mxu0 %v7413_v63  ;;  %6506 = vmatprep.subr.bf16.mxu1 %v7440_v0  ;;  %v3154_v63 = vld [vmem:[%s11435_s12 + $0x848] sm:$0xff] }
 0x474   :  { %6629 = vmatprep.subr.bf16.mxu0 %v7446_v1  ;;  %v3170_v0 = vld [vmem:[%s11435_s12 + $0x8c8] sm:$0xff]  ;;  %v3157_v1 = vld [vmem:[%s11435_s12 + $0x860] sm:$0xff] }
 0x475   :  { %v7567_v21 = vcombine.low %v3154_v63, %v3170_v0 }
 0x476   :  { %6507 = vmatpush1.bf16.msra.mxu1 %v7439_v11  ;;  %v7541_v11 = vcombine.low %v3125_v40, %v3141_v43 }
 0x477   :  { %6630 = vmatpush1.bf16.msra.mxu0 %v7445_v14  ;;  %6508 = vmatprep.subr.bf16.mxu1 %v7472_v15  ;;  %v7568_v14 = vcombine.high %v3154_v63, %v3170_v0  ;;  %v3317_v63 = vld [vmem:[%s11435_s12 + $0xd60] sm:$0xff] }
 0x478   :  { %v6204_v30 = vpop.f32.mrb[8].mxu1  ;;  %v6327_v49 = vpop.f32.mrb[12].mxu0  ;;  %6631 = vmatprep.subr.bf16.mxu0 %v7478_v17  ;;  %v7574_v17 = vcombine.high %v3157_v1, %v3173_v2  ;;  %v3333_v0 = vld [vmem:[%s11435_s12 + $0xde0] sm:$0xff] }
 0x479   :  { %v6205_v18 = vadd.f32 %v6204_v30, %v3420_v24  ;;  %v10791_v36 = vadd.f32 %v6327_v49, %v3444_v25  ;;  %v6206_v38 = vpop.f32.mrb[9].mxu1  ;;  %v6329_v39 = vpop.f32.mrb[13].mxu0  ;;  %v7573_v24 = vcombine.low %v3157_v1, %v3173_v2  ;;  %v7600_v25 = vcombine.high %v3186_v20, %v3202_v35 }
 0x47a   :  { %v6207_v16 = vadd.f32 %v6206_v38, %v3424_v47  ;;  %v10799_v45 = vadd.f32 %v6329_v39, %v3448_v51  ;;  %v6208_v33 = vpop.f32.mrb[10].mxu1  ;;  %v6331_v48 = vpop.f32.mrb[14].mxu0  ;;  %6509 = vmatpush1.bf16.msra.mxu1 %v7471_v12  ;;  %v3234_v47 = vld [vmem:[%s11435_s12 + $0xac8] sm:$0xff]  ;;  %v3221_v51 = vld [vmem:[%s11435_s12 + $0xa60] sm:$0xff] }
 0x47b   :  { %6632 = vmatpush1.bf16.msra.mxu0 %v7477_v28  ;;  %v6209_v41 = vpop.f32.mrb[11].mxu1  ;;  %v6332_v56 = vpop.f32.mrb[15].mxu0  ;;  %6510 = vmatprep.subr.bf16.mxu1 %v7504_v29  ;;  %v3237_v12 = vld [vmem:[%s11435_s12 + $0xae0] sm:$0xff]  ;;  %v7599_v28 = vcombine.low %v3186_v20, %v3202_v35  ;;  %v7605_v29 = vcombine.low %v3189_v32, %v3205_v46  ;;  %v7632_v30 = vcombine.high %v3218_v9, %v3234_v47  ;;  %v3298_v33 = vld [vmem:[%s11435_s12 + $0xcc8] sm:$0xff] }
 0x47c   :  { %v6818_v19 = vcombine.low %v6205_v18, %v6207_v16  ;;  %v6851_v60 = vcombine.low %v10791_v36, %v10799_v45  ;;  %6633 = vmatprep.subr.bf16.mxu0 %v7510_v26  ;;  %v7638_v49 = vcombine.high %v3221_v51, %v3237_v12  ;;  %v3250_v26 = vld [vmem:[%s11435_s12 + $0xb48] sm:$0xff]  ;;  %v3269_v18 = vld [vmem:[%s11435_s12 + $0xbe0] sm:$0xff]  ;;  %v7631_v38 = vcombine.low %v3218_v9, %v3234_v47 }
 0x47d   :  { %v7637_v39 = vcombine.low %v3221_v51, %v3237_v12  ;;  %v7664_v40 = vcombine.high %v3250_v26, %v3266_v4  ;;  %v7670_v43 = vcombine.high %v3253_v62, %v3269_v18  ;;  %v3282_v16 = vld [vmem:[%s11435_s12 + $0xc48] sm:$0xff]  ;;  %v3285_v48 = vld [vmem:[%s11435_s12 + $0xc60] sm:$0xff]  ;;  %v7663_v41 = vcombine.low %v3250_v26, %v3266_v4  ;;  %v2900_v12 = vld [vmem:[%s11435_s12 + $0x58] sm:$0xff] }
 0x47e   :  { %v6832_v7 = vrot.slane %v6818_v19, %v8555_v50  ;;  %6511 = vmatpush1.bf16.msra.mxu1 %v7503_v44  ;;  %v3301_v44 = vld [vmem:[%s11435_s12 + $0xce0] sm:$0xff]  ;;  %v7669_v56 = vcombine.low %v3253_v62, %v3269_v18  ;;  %v3314_v19 = vld [vmem:[%s11435_s12 + $0xd48] sm:$0xff]  ;;  %v7695_v1 = vcombine.low %v3282_v16, %v3298_v33  ;;  %v7733_v20 = vcombine.low %v3317_v63, %v3333_v0  ;;  %v2932_v18 = vld [vmem:[%s11435_s12 + $0x158] sm:$0xff] }
 0x47f   :  { %6634 = vmatpush1.bf16.msra.mxu0 %v7509_v5  ;;  %6512 = vmatprep.subr.bf16.mxu1 %v7536_v57  ;;  %v7696_v5 = vcombine.high %v3282_v16, %v3298_v33  ;;  %v7702_v57 = vcombine.high %v3285_v48, %v3301_v44  ;;  %v7701_v2 = vcombine.low %v3285_v48, %v3301_v44  ;;  %v3378_v46 = vld [vmem:[%s11435_s12 + $0xf48] sm:$0xff]  ;;  %v2964_v48 = vld [vmem:[%s11435_s12 + $0x258] sm:$0xff] }
 0x480   :  { %v6833_v15 = vcombine.low %v6825_v3, %v6832_v7  ;;  %6635 = vmatprep.subr.bf16.mxu0 %v7542_v61  ;;  %v3330_v61 = vld [vmem:[%s11435_s12 + $0xdc8] sm:$0xff]  ;;  %v7734_v7 = vcombine.high %v3317_v63, %v3333_v0  ;;  %v2980_v44 = vld [vmem:[%s11435_s12 + $0x2d8] sm:$0xff] }
 0x481   :  { %v7728_v3 = vcombine.high %v3314_v19, %v3330_v61  ;;  %v2996_v0 = vld [vmem:[%s11435_s12 + $0x358] sm:$0xff] }
 0x482   :  { %6961 = vst [vmem:[%s11442_s14] sm:$0xff] %v6833_v15  ;;  %6513 = vmatpush1.bf16.msra.mxu1 %v7535_v10  ;;  %v3346_v10 = vld [vmem:[%s11435_s12 + $0xe48] sm:$0xff]  ;;  %v3365_v15 = vld [vmem:[%s11435_s12 + $0xee0] sm:$0xff] }
 0x483   :  { %6636 = vmatpush1.bf16.msra.mxu0 %v7541_v11  ;;  %6514 = vmatprep.subr.bf16.mxu1 %v7568_v14  ;;  %v3362_v11 = vld [vmem:[%s11435_s12 + $0xec8] sm:$0xff]  ;;  %v3349_v14 = vld [vmem:[%s11435_s12 + $0xe60] sm:$0xff] }
 0x484   :  { %6637 = vmatprep.subr.bf16.mxu0 %v7574_v17  ;;  %v7727_v17 = vcombine.low %v3314_v19, %v3330_v61  ;;  %v7760_v35 = vcombine.high %v3346_v10, %v3362_v11  ;;  %v7766_v32 = vcombine.high %v3349_v14, %v3365_v15  ;;  %v7765_v9 = vcombine.low %v3349_v14, %v3365_v15  ;;  %v3028_v15 = vld [vmem:[%s11435_s12 + $0x458] sm:$0xff] }
 0x485   :  { %v7380_v61 = vcombine.high %v2964_v48, %v2980_v44 }
 0x486   :  { %6515 = vmatpush1.bf16.msra.mxu1 %v7567_v21  ;;  %v3394_v21 = vld [vmem:[%s11435_s12 + $0xfc8] sm:$0xff] }
 0x487   :  { %6638 = vmatpush1.bf16.msra.mxu0 %v7573_v24  ;;  %6516 = vmatprep.subr.bf16.mxu1 %v7600_v25  ;;  %v3381_v24 = vld [vmem:[%s11435_s12 + $0xf60] sm:$0xff]  ;;  %v7792_v47 = vcombine.high %v3378_v46, %v3394_v21 }
 0x488   :  { %6639 = vmatprep.subr.bf16.mxu0 %v7606_v27  ;;  %v3397_v25 = vld [vmem:[%s11435_s12 + $0xfe0] sm:$0xff]  ;;  %v7759_v27 = vcombine.low %v3346_v10, %v3362_v11 }
 0x489   :  { %v7798_v51 = vcombine.high %v3381_v24, %v3397_v25  ;;  %v7797_v26 = vcombine.low %v3381_v24, %v3397_v25  ;;  %v3060_v25 = vld [vmem:[%s11435_s12 + $0x558] sm:$0xff] }
 0x48a   :  { %6517 = vmatpush1.bf16.msra.mxu1 %v7599_v28  ;;  %v2916_v28 = vld [vmem:[%s11435_s12 + $0xd8] sm:$0xff] }
 0x48b   :  { %6640 = vmatpush1.bf16.msra.mxu0 %v7605_v29  ;;  %6518 = vmatprep.subr.bf16.mxu1 %v7632_v30  ;;  %v2903_v29 = vld [vmem:[%s11435_s12 + $0x70] sm:$0xff]  ;;  %v7316_v4 = vcombine.high %v2900_v12, %v2916_v28 }
 0x48c   :  { %6641 = vmatprep.subr.bf16.mxu0 %v7638_v49  ;;  %v2919_v30 = vld [vmem:[%s11435_s12 + $0xf0] sm:$0xff]  ;;  %v7791_v49 = vcombine.low %v3378_v46, %v3394_v21 }
 0x48d   :  { %v7322_v62 = vcombine.high %v2903_v29, %v2919_v30  ;;  %v7321_v16 = vcombine.low %v2903_v29, %v2919_v30  ;;  %v3092_v30 = vld [vmem:[%s11435_s12 + $0x658] sm:$0xff] }
 0x48e   :  { %6519 = vmatpush1.bf16.msra.mxu1 %v7631_v38  ;;  %v2948_v38 = vld [vmem:[%s11435_s12 + $0x1d8] sm:$0xff] }
 0x48f   :  { %6642 = vmatpush1.bf16.msra.mxu0 %v7637_v39  ;;  %6520 = vmatprep.subr.bf16.mxu1 %v7664_v40  ;;  %v7315_v39 = vcombine.low %v2900_v12, %v2916_v28  ;;  %v2935_v40 = vld [vmem:[%s11435_s12 + $0x170] sm:$0xff]  ;;  %v7348_v33 = vcombine.high %v2932_v18, %v2948_v38 }
 0x490   :  { %6643 = vmatprep.subr.bf16.mxu0 %v7670_v43  ;;  %v2951_v43 = vld [vmem:[%s11435_s12 + $0x1f0] sm:$0xff] }
 0x491   :  { %v7353_v19 = vcombine.low %v2935_v40, %v2951_v43 }
 0x492   :  { %6521 = vmatpush1.bf16.msra.mxu1 %v7663_v41  ;;  %v7354_v41 = vcombine.high %v2935_v40, %v2951_v43  ;;  %v3464_v40 = vrot.slane %v10763_v13, %v8694_v42 }
 0x493   :  { %6644 = vmatpush1.bf16.msra.mxu0 %v7669_v56  ;;  %6522 = vmatprep.subr.bf16.mxu1 %v7696_v5  ;;  %v2967_v56 = vld [vmem:[%s11435_s12 + $0x270] sm:$0xff] }
 0x494   :  { %6645 = vmatprep.subr.bf16.mxu0 %v7702_v57  ;;  %v2983_v5 = vld [vmem:[%s11435_s12 + $0x2f0] sm:$0xff]  ;;  %v7347_v57 = vcombine.low %v2932_v18, %v2948_v38  ;;  %v3460_v18 = vrot.slane %v10763_v13, %v8709_v55  ;;  %v3440_v38 = vrot.slane %v10542_v8, %v8929_v53 }
 0x495   :  { %v7386_v63 = vcombine.high %v2967_v56, %v2983_v5  ;;  %v7385_v10 = vcombine.low %v2967_v56, %v2983_v5 }
 0x496   :  { %6523 = vmatpush1.bf16.msra.mxu1 %v7695_v1  ;;  %v3012_v1 = vld [vmem:[%s11435_s12 + $0x3d8] sm:$0xff] }
 0x497   :  { %6646 = vmatpush1.bf16.msra.mxu0 %v7701_v2  ;;  %6524 = vmatprep.subr.bf16.mxu1 %v7728_v3  ;;  %v2999_v2 = vld [vmem:[%s11435_s12 + $0x370] sm:$0xff]  ;;  %v7412_v11 = vcombine.high %v2996_v0, %v3012_v1 }
 0x498   :  { %6647 = vmatprep.subr.bf16.mxu0 %v7734_v7  ;;  %v3015_v3 = vld [vmem:[%s11435_s12 + $0x3f0] sm:$0xff]  ;;  %v7379_v7 = vcombine.low %v2964_v48, %v2980_v44  ;;  %v3124_v44 = vld [vmem:[%s11435_s12 + $0x758] sm:$0xff] }
 0x499   :  { %v7418_v14 = vcombine.high %v2999_v2, %v3015_v3  ;;  %v7417_v46 = vcombine.low %v2999_v2, %v3015_v3 }
 0x49a   :  { %6525 = vmatpush1.bf16.msra.mxu1 %v7727_v17  ;;  %v3044_v17 = vld [vmem:[%s11435_s12 + $0x4d8] sm:$0xff] }
 0x49b   :  { %6648 = vmatpush1.bf16.msra.mxu0 %v7733_v20  ;;  %6526 = vmatprep.subr.bf16.mxu1 %v7760_v35  ;;  %v3031_v20 = vld [vmem:[%s11435_s12 + $0x470] sm:$0xff]  ;;  %v7444_v21 = vcombine.high %v3028_v15, %v3044_v17 }
 0x49c   :  { %6649 = vmatprep.subr.bf16.mxu0 %v7766_v32  ;;  %v3047_v35 = vld [vmem:[%s11435_s12 + $0x4f0] sm:$0xff]  ;;  %v7411_v32 = vcombine.low %v2996_v0, %v3012_v1 }
 0x49d   :  { %v7450_v24 = vcombine.high %v3031_v20, %v3047_v35  ;;  %v7449_v12 = vcombine.low %v3031_v20, %v3047_v35  ;;  %v3156_v35 = vld [vmem:[%s11435_s12 + $0x858] sm:$0xff] }
 0x49e   :  { %6527 = vmatpush1.bf16.msra.mxu1 %v7759_v27  ;;  %v3076_v27 = vld [vmem:[%s11435_s12 + $0x5d8] sm:$0xff] }
 0x49f   :  { %6650 = vmatpush1.bf16.msra.mxu0 %v7765_v9  ;;  %6528 = vmatprep.subr.bf16.mxu1 %v7792_v47  ;;  %v3063_v9 = vld [vmem:[%s11435_s12 + $0x570] sm:$0xff]  ;;  %v7476_v28 = vcombine.high %v3060_v25, %v3076_v27 }
 0x4a0   :  { %6651 = vmatprep.subr.bf16.mxu0 %v7798_v51  ;;  %v3079_v47 = vld [vmem:[%s11435_s12 + $0x5f0] sm:$0xff]  ;;  %v7443_v51 = vcombine.low %v3028_v15, %v3044_v17 }
 0x4a1   :  { %v7482_v29 = vcombine.high %v3063_v9, %v3079_v47  ;;  %v7481_v43 = vcombine.low %v3063_v9, %v3079_v47 }
 0x4a2   :  { %6529 = vmatpush1.bf16.msra.mxu1 %v7791_v49  ;;  %v3108_v49 = vld [vmem:[%s11435_s12 + $0x6d8] sm:$0xff] }
 0x4a3   :  { %6652 = vmatpush1.bf16.msra.mxu0 %v7797_v26  ;;  %6580 = vmatprep.subr.bf16.mxu1 %v7316_v4  ;;  %v3436_v26 = vrot.slane %v10542_v8, %v8944_v37  ;;  %v3095_v4 = vld [vmem:[%s11435_s12 + $0x670] sm:$0xff]  ;;  %v7507_v2 = vcombine.low %v3092_v30, %v3108_v49 }
 0x4a4   :  { %6703 = vmatprep.subr.bf16.mxu0 %v7322_v62  ;;  %v3111_v62 = vld [vmem:[%s11435_s12 + $0x6f0] sm:$0xff] }
 0x4a5   :  { %6531 = vmatmul.mubr.bf16.vlgmr.msra.gmra.mrb[24].mxu1 %v9889_v23  ;;  %v7514_v48 = vcombine.high %v3095_v4, %v3111_v62 }
 0x4a6   :  { %6654 = vmatmul.mubr.bf16.vlgmr.msra.gmra.mrb[28].mxu0 %v9889_v23  ;;  %6581 = vmatpush1.bf16.msra.mxu1 %v7315_v39  ;;  %v7475_v39 = vcombine.low %v3060_v25, %v3076_v27  ;;  %v6842_v25 = vrot.slane %v6834_v34, %v8555_v50  ;;  %v3207_v34 = vld [vmem:[%s11435_s12 + $0x9f0] sm:$0xff] }
 0x4a7   :  { %6612 = vmatprep.mubr.bf16.mxu1 %v9887_v22  ;;  %6704 = vmatpush1.bf16.msra.mxu0 %v7321_v16  ;;  %v7508_v16 = vcombine.high %v3092_v30, %v3108_v49 }
 0x4a8   :  { %6735 = vmatprep.mubr.bf16.mxu0 %v9887_v22  ;;  %6582 = vmatprep.subr.bf16.mxu1 %v7348_v33 }
 0x4a9   :  { %6705 = vmatprep.subr.bf16.mxu0 %v7354_v41  ;;  %v3140_v41 = vld [vmem:[%s11435_s12 + $0x7d8] sm:$0xff] }
 0x4aa   :  { %6583 = vmatpush1.bf16.msra.mxu1 %v7347_v57  ;;  %v3127_v57 = vld [vmem:[%s11435_s12 + $0x770] sm:$0xff]  ;;  %v7539_v9 = vcombine.low %v3124_v44, %v3140_v41 }
 0x4ab   :  { %6706 = vmatpush1.bf16.msra.mxu0 %v7353_v19  ;;  %6584 = vmatprep.subr.bf16.mxu1 %v7380_v61  ;;  %v3143_v19 = vld [vmem:[%s11435_s12 + $0x7f0] sm:$0xff] }
 0x4ac   :  { %6707 = vmatprep.subr.bf16.mxu0 %v7386_v63  ;;  %v7546_v20 = vcombine.high %v3127_v57, %v3143_v19  ;;  %v7545_v47 = vcombine.low %v3127_v57, %v3143_v19 }
 0x4ae   :  { %6585 = vmatpush1.bf16.msra.mxu1 %v7379_v7 }
 0x4af   :  { %6708 = vmatpush1.bf16.msra.mxu0 %v7385_v10  ;;  %6586 = vmatprep.subr.bf16.mxu1 %v7412_v11  ;;  %v7513_v11 = vcombine.low %v3095_v4, %v3111_v62  ;;  %v7610_v4 = vcombine.high %v3191_v31, %v3207_v34  ;;  %v3220_v62 = vld [vmem:[%s11435_s12 + $0xa58] sm:$0xff] }
 0x4b0   :  { %6709 = vmatprep.subr.bf16.mxu0 %v7418_v14  ;;  %v7540_v14 = vcombine.high %v3124_v44, %v3140_v41  ;;  %v3268_v44 = vld [vmem:[%s11435_s12 + $0xbd8] sm:$0xff]  ;;  %v3255_v41 = vld [vmem:[%s11435_s12 + $0xb70] sm:$0xff] }
 0x4b2   :  { %6587 = vmatpush1.bf16.msra.mxu1 %v7411_v32  ;;  %v3172_v32 = vld [vmem:[%s11435_s12 + $0x8d8] sm:$0xff] }
 0x4b3   :  { %6710 = vmatpush1.bf16.msra.mxu0 %v7417_v46  ;;  %6588 = vmatprep.subr.bf16.mxu1 %v7444_v21  ;;  %v3159_v21 = vld [vmem:[%s11435_s12 + $0x870] sm:$0xff]  ;;  %v7571_v30 = vcombine.low %v3156_v35, %v3172_v32 }
 0x4b4   :  { %6711 = vmatprep.subr.bf16.mxu0 %v7450_v24  ;;  %v3175_v24 = vld [vmem:[%s11435_s12 + $0x8f0] sm:$0xff] }
 0x4b5   :  { %v7577_v49 = vcombine.low %v3159_v21, %v3175_v24 }
 0x4b6   :  { %6589 = vmatpush1.bf16.msra.mxu1 %v7443_v51  ;;  %v7572_v51 = vcombine.high %v3156_v35, %v3172_v32  ;;  %v3335_v35 = vld [vmem:[%s11435_s12 + $0xdf0] sm:$0xff] }
 0x4b7   :  { %6712 = vmatpush1.bf16.msra.mxu0 %v7449_v12  ;;  %6590 = vmatprep.subr.bf16.mxu1 %v7476_v28  ;;  %v7578_v28 = vcombine.high %v3159_v21, %v3175_v24 }
 0x4b8   :  { %v6286_v33 = vpop.f32.mrb[12].mxu1  ;;  %6713 = vmatprep.subr.bf16.mxu0 %v7482_v29  ;;  %v3188_v29 = vld [vmem:[%s11435_s12 + $0x958] sm:$0xff] }
 0x4b9   :  { %v6287_v8 = vadd.f32 %v6286_v33, %v3436_v26  ;;  %v6409_v56 = vpop.f32.mrb[16].mxu0  ;;  %v6288_v5 = vpop.f32.mrb[13].mxu1  ;;  %v7604_v26 = vcombine.high %v3188_v29, %v3204_v59 }
 0x4ba   :  { %v11015_v61 = vadd.f32 %v6409_v56, %v3460_v18  ;;  %v6289_v63 = vadd.f32 %v6288_v5, %v3440_v38  ;;  %v6411_v0 = vpop.f32.mrb[17].mxu0  ;;  %v6290_v1 = vpop.f32.mrb[14].mxu1  ;;  %6591 = vmatpush1.bf16.msra.mxu1 %v7475_v39  ;;  %v3236_v18 = vld [vmem:[%s11435_s12 + $0xad8] sm:$0xff]  ;;  %v3223_v38 = vld [vmem:[%s11435_s12 + $0xa70] sm:$0xff] }
 0x4bb   :  { %v11017_v3 = vadd.f32 %v6411_v0, %v3464_v40  ;;  %v6413_v7 = vpop.f32.mrb[18].mxu0  ;;  %6714 = vmatpush1.bf16.msra.mxu0 %v7481_v43  ;;  %v6291_v10 = vpop.f32.mrb[15].mxu1  ;;  %6592 = vmatprep.subr.bf16.mxu1 %v7508_v16  ;;  %v3239_v39 = vld [vmem:[%s11435_s12 + $0xaf0] sm:$0xff]  ;;  %v7603_v40 = vcombine.low %v3188_v29, %v3204_v59  ;;  %v7609_v43 = vcombine.low %v3191_v31, %v3207_v34  ;;  %v3300_v0 = vld [vmem:[%s11435_s12 + $0xcd8] sm:$0xff] }
 0x4bc   :  { %v6835_v15 = vcombine.low %v6287_v8, %v6289_v63  ;;  %v6414_v17 = vpop.f32.mrb[19].mxu0  ;;  %6715 = vmatprep.subr.bf16.mxu0 %v7514_v48  ;;  %v7636_v16 = vcombine.high %v3220_v62, %v3236_v18  ;;  %v7642_v33 = vcombine.high %v3223_v38, %v3239_v39  ;;  %v3252_v48 = vld [vmem:[%s11435_s12 + $0xb58] sm:$0xff]  ;;  %v3271_v8 = vld [vmem:[%s11435_s12 + $0xbf0] sm:$0xff]  ;;  %v7635_v56 = vcombine.low %v3220_v62, %v3236_v18 }
 0x4bd   :  { %v6868_v46 = vcombine.low %v11015_v61, %v11017_v3  ;;  %v7641_v5 = vcombine.low %v3223_v38, %v3239_v39  ;;  %v7668_v57 = vcombine.high %v3252_v48, %v3268_v44  ;;  %v7674_v19 = vcombine.high %v3255_v41, %v3271_v8  ;;  %v3284_v63 = vld [vmem:[%s11435_s12 + $0xc58] sm:$0xff]  ;;  %v3287_v1 = vld [vmem:[%s11435_s12 + $0xc70] sm:$0xff]  ;;  %v2902_v38 = vld [vmem:[%s11435_s12 + $0x68] sm:$0xff] }
 0x4be   :  { %v6849_v27 = vrot.slane %v6835_v15, %v8555_v50  ;;  %6593 = vmatpush1.bf16.msra.mxu1 %v7507_v2  ;;  %v3303_v2 = vld [vmem:[%s11435_s12 + $0xcf0] sm:$0xff]  ;;  %v7667_v7 = vcombine.low %v3252_v48, %v3268_v44  ;;  %v7673_v10 = vcombine.low %v3255_v41, %v3271_v8  ;;  %v3316_v15 = vld [vmem:[%s11435_s12 + $0xd58] sm:$0xff]  ;;  %v7699_v32 = vcombine.low %v3284_v63, %v3300_v0  ;;  %v2918_v39 = vld [vmem:[%s11435_s12 + $0xe8] sm:$0xff] }
 0x4bf   :  { %6716 = vmatpush1.bf16.msra.mxu0 %v7513_v11  ;;  %6594 = vmatprep.subr.bf16.mxu1 %v7540_v14  ;;  %v7700_v11 = vcombine.high %v3284_v63, %v3300_v0  ;;  %v7706_v14 = vcombine.high %v3287_v1, %v3303_v2  ;;  %v3332_v17 = vld [vmem:[%s11435_s12 + $0xdd8] sm:$0xff]  ;;  %v7705_v21 = vcombine.low %v3287_v1, %v3303_v2  ;;  %v2950_v48 = vld [vmem:[%s11435_s12 + $0x1e8] sm:$0xff] }
 0x4c0   :  { %v6850_v12 = vcombine.low %v6842_v25, %v6849_v27  ;;  %6717 = vmatprep.subr.bf16.mxu0 %v7546_v20  ;;  %v3319_v20 = vld [vmem:[%s11435_s12 + $0xd70] sm:$0xff]  ;;  %v7732_v24 = vcombine.high %v3316_v15, %v3332_v17  ;;  %v3348_v27 = vld [vmem:[%s11435_s12 + $0xe58] sm:$0xff]  ;;  %v7319_v44 = vcombine.low %v2902_v38, %v2918_v39  ;;  %v2966_v8 = vld [vmem:[%s11435_s12 + $0x268] sm:$0xff] }
 0x4c1   :  { %v7738_v25 = vcombine.high %v3319_v20, %v3335_v35  ;;  %v3380_v31 = vld [vmem:[%s11435_s12 + $0xf58] sm:$0xff]  ;;  %v3014_v63 = vld [vmem:[%s11435_s12 + $0x3e8] sm:$0xff] }
 0x4c2   :  { %6962 = vst [vmem:[%s11442_s14 + $0x8] sm:$0xff] %v6850_v12  ;;  %6595 = vmatpush1.bf16.msra.mxu1 %v7539_v9  ;;  %v3364_v9 = vld [vmem:[%s11435_s12 + $0xed8] sm:$0xff]  ;;  %v7731_v12 = vcombine.low %v3316_v15, %v3332_v17  ;;  %v3030_v2 = vld [vmem:[%s11435_s12 + $0x468] sm:$0xff] }
 0x4c3   :  { %6718 = vmatpush1.bf16.msra.mxu0 %v7545_v47  ;;  %6596 = vmatprep.subr.bf16.mxu1 %v7572_v51  ;;  %v3351_v47 = vld [vmem:[%s11435_s12 + $0xe70] sm:$0xff]  ;;  %v7764_v29 = vcombine.high %v3348_v27, %v3364_v9  ;;  %v3396_v34 = vld [vmem:[%s11435_s12 + $0xfd8] sm:$0xff]  ;;  %v3078_v15 = vld [vmem:[%s11435_s12 + $0x5e8] sm:$0xff] }
 0x4c4   :  { %6719 = vmatprep.subr.bf16.mxu0 %v7578_v28  ;;  %v3367_v51 = vld [vmem:[%s11435_s12 + $0xef0] sm:$0xff]  ;;  %v7737_v28 = vcombine.low %v3319_v20, %v3335_v35  ;;  %v7796_v62 = vcombine.high %v3380_v31, %v3396_v34 }
 0x4c5   :  { %v7770_v59 = vcombine.high %v3351_v47, %v3367_v51  ;;  %v11167_v20 = vld [vmem:[%s11441_s13 + $0x10] sm:$0xff] }
 0x4c6   :  { %6597 = vmatpush1.bf16.msra.mxu1 %v7571_v30  ;;  %v3383_v30 = vld [vmem:[%s11435_s12 + $0xf70] sm:$0xff] }
 0x4c7   :  { %6720 = vmatpush1.bf16.msra.mxu0 %v7577_v49  ;;  %6598 = vmatprep.subr.bf16.mxu1 %v7604_v26  ;;  %v3399_v49 = vld [vmem:[%s11435_s12 + $0xff0] sm:$0xff]  ;;  %v7763_v26 = vcombine.low %v3348_v27, %v3364_v9  ;;  %v3456_v27 = vrot.slane %v10763_v13, %v8582_v58 }
 0x4c8   :  { %6721 = vmatprep.subr.bf16.mxu0 %v7610_v4  ;;  %v7769_v4 = vcombine.low %v3351_v47, %v3367_v51  ;;  %v7802_v18 = vcombine.high %v3383_v30, %v3399_v49  ;;  %v3480_v47 = vrot.slane %v11167_v20, %v8561_v52 }
 0x4ca   :  { %6599 = vmatpush1.bf16.msra.mxu1 %v7603_v40  ;;  %v7795_v40 = vcombine.low %v3380_v31, %v3396_v34 }
 0x4cb   :  { %6722 = vmatpush1.bf16.msra.mxu0 %v7609_v43  ;;  %6600 = vmatprep.subr.bf16.mxu1 %v7636_v16  ;;  %v7801_v43 = vcombine.low %v3383_v30, %v3399_v49  ;;  %v7320_v16 = vcombine.high %v2902_v38, %v2918_v39 }
 0x4cc   :  { %6723 = vmatprep.subr.bf16.mxu0 %v7642_v33  ;;  %v2934_v33 = vld [vmem:[%s11435_s12 + $0x168] sm:$0xff] }
 0x4cd   :  { %v7352_v41 = vcombine.high %v2934_v33, %v2950_v48 }
 0x4ce   :  { %6601 = vmatpush1.bf16.msra.mxu1 %v7635_v56  ;;  %v2982_v56 = vld [vmem:[%s11435_s12 + $0x2e8] sm:$0xff] }
 0x4cf   :  { %6724 = vmatpush1.bf16.msra.mxu0 %v7641_v5  ;;  %6602 = vmatprep.subr.bf16.mxu1 %v7668_v57  ;;  %v7351_v5 = vcombine.low %v2934_v33, %v2950_v48  ;;  %v7384_v57 = vcombine.high %v2966_v8, %v2982_v56  ;;  %v7383_v0 = vcombine.low %v2966_v8, %v2982_v56  ;;  %v3174_v33 = vld [vmem:[%s11435_s12 + $0x8e8] sm:$0xff] }
 0x4d0   :  { %6725 = vmatprep.subr.bf16.mxu0 %v7674_v19  ;;  %v2998_v19 = vld [vmem:[%s11435_s12 + $0x368] sm:$0xff] }
 0x4d1   :  { %v7416_v1 = vcombine.high %v2998_v19, %v3014_v63 }
 0x4d2   :  { %6603 = vmatpush1.bf16.msra.mxu1 %v7667_v7  ;;  %v3046_v7 = vld [vmem:[%s11435_s12 + $0x4e8] sm:$0xff] }
 0x4d3   :  { %6726 = vmatpush1.bf16.msra.mxu0 %v7673_v10  ;;  %6604 = vmatprep.subr.bf16.mxu1 %v7700_v11  ;;  %v7415_v10 = vcombine.low %v2998_v19, %v3014_v63  ;;  %v7448_v11 = vcombine.high %v3030_v2, %v3046_v7  ;;  %v7447_v17 = vcombine.low %v3030_v2, %v3046_v7  ;;  %v3206_v19 = vld [vmem:[%s11435_s12 + $0x9e8] sm:$0xff] }
 0x4d4   :  { %6727 = vmatprep.subr.bf16.mxu0 %v7706_v14  ;;  %v3062_v14 = vld [vmem:[%s11435_s12 + $0x568] sm:$0xff] }
 0x4d5   :  { %v7480_v35 = vcombine.high %v3062_v14, %v3078_v15  ;;  %v7479_v9 = vcombine.low %v3062_v14, %v3078_v15  ;;  %v3238_v63 = vld [vmem:[%s11435_s12 + $0xae8] sm:$0xff] }
 0x4d6   :  { %6605 = vmatpush1.bf16.msra.mxu1 %v7699_v32  ;;  %v3094_v32 = vld [vmem:[%s11435_s12 + $0x668] sm:$0xff] }
 0x4d7   :  { %6728 = vmatpush1.bf16.msra.mxu0 %v7705_v21  ;;  %6606 = vmatprep.subr.bf16.mxu1 %v7732_v24  ;;  %v3110_v21 = vld [vmem:[%s11435_s12 + $0x6e8] sm:$0xff]  ;;  %v3452_v24 = vrot.slane %v10763_v13, %v8605_v6 }
 0x4d8   :  { %6729 = vmatprep.subr.bf16.mxu0 %v7738_v25  ;;  %v3476_v25 = vrot.slane %v11167_v20, %v8569_v54  ;;  %v7512_v51 = vcombine.high %v3094_v32, %v3110_v21  ;;  %v3254_v2 = vld [vmem:[%s11435_s12 + $0xb68] sm:$0xff] }
 0x4d9   :  { %v3270_v7 = vld [vmem:[%s11435_s12 + $0xbe8] sm:$0xff] }
 0x4da   :  { %6607 = vmatpush1.bf16.msra.mxu1 %v7731_v12  ;;  %v3286_v14 = vld [vmem:[%s11435_s12 + $0xc68] sm:$0xff] }
 0x4db   :  { %6730 = vmatpush1.bf16.msra.mxu0 %v7737_v28  ;;  %6608 = vmatprep.subr.bf16.mxu1 %v7764_v29  ;;  %v3126_v28 = vld [vmem:[%s11435_s12 + $0x768] sm:$0xff] }
 0x4dc   :  { %6731 = vmatprep.subr.bf16.mxu0 %v7770_v59  ;;  %v3142_v29 = vld [vmem:[%s11435_s12 + $0x7e8] sm:$0xff] }
 0x4dd   :  { %v7544_v39 = vcombine.high %v3126_v28, %v3142_v29  ;;  %v7543_v8 = vcombine.low %v3126_v28, %v3142_v29  ;;  %v3302_v15 = vld [vmem:[%s11435_s12 + $0xce8] sm:$0xff] }
 0x4de   :  { %6609 = vmatpush1.bf16.msra.mxu1 %v7763_v26  ;;  %v3398_v28 = vld [vmem:[%s11435_s12 + $0xfe8] sm:$0xff] }
 0x4df   :  { %6732 = vmatpush1.bf16.msra.mxu0 %v7769_v4  ;;  %6610 = vmatprep.subr.bf16.mxu1 %v7796_v62  ;;  %v7511_v4 = vcombine.low %v3094_v32, %v3110_v21  ;;  %v3318_v32 = vld [vmem:[%s11435_s12 + $0xd68] sm:$0xff] }
 0x4e0   :  { %6733 = vmatprep.subr.bf16.mxu0 %v7802_v18  ;;  %v3334_v21 = vld [vmem:[%s11435_s12 + $0xde8] sm:$0xff] }
 0x4e2   :  { %6611 = vmatpush1.bf16.msra.mxu1 %v7795_v40 }
 0x4e3   :  { %6734 = vmatpush1.bf16.msra.mxu0 %v7801_v43  ;;  %6662 = vmatprep.subr.bf16.mxu1 %v7320_v16  ;;  %v3158_v16 = vld [vmem:[%s11435_s12 + $0x868] sm:$0xff] }
 0x4e4   :  { %v7576_v56 = vcombine.high %v3158_v16, %v3174_v33  ;;  %v7575_v36 = vcombine.low %v3158_v16, %v3174_v33  ;;  %v3000_v33 = vld [vmem:[%s11435_s12 + $0x378] sm:$0xff] }
 0x4e5   :  { %6613 = vmatmul.mubr.bf16.vlgmr.msra.gmra.mrb[28].mxu1 %v9889_v23 }
 0x4e6   :  { %6736 = vmatmul.mubr.bf16.vlgmr.msra.gmra.mrb[32].mxu0 %v9889_v23  ;;  %6663 = vmatpush1.bf16.msra.mxu1 %v7319_v44  ;;  %v6859_v44 = vrot.slane %v6851_v60, %v8555_v50  ;;  %v3222_v60 = vld [vmem:[%s11435_s12 + $0xa68] sm:$0xff] }
 0x4e7   :  { %6694 = vmatprep.mubr.bf16.mxu1 %v9887_v22  ;;  %6664 = vmatprep.subr.bf16.mxu1 %v7352_v41 }
 0x4ea   :  { %6665 = vmatpush1.bf16.msra.mxu1 %v7351_v5 }
 0x4eb   :  { %6666 = vmatprep.subr.bf16.mxu1 %v7384_v57  ;;  %v3190_v57 = vld [vmem:[%s11435_s12 + $0x968] sm:$0xff] }
 0x4ec   :  { %v7608_v45 = vcombine.high %v3190_v57, %v3206_v19 }
 0x4ee   :  { %6667 = vmatpush1.bf16.msra.mxu1 %v7383_v0  ;;  %v7607_v0 = vcombine.low %v3190_v57, %v3206_v19  ;;  %v3064_v19 = vld [vmem:[%s11435_s12 + $0x578] sm:$0xff] }
 0x4ef   :  { %6668 = vmatprep.subr.bf16.mxu1 %v7416_v1  ;;  %v7640_v1 = vcombine.high %v3222_v60, %v3238_v63 }
 0x4f2   :  { %6669 = vmatpush1.bf16.msra.mxu1 %v7415_v10  ;;  %v7639_v10 = vcombine.low %v3222_v60, %v3238_v63  ;;  %v3096_v63 = vld [vmem:[%s11435_s12 + $0x678] sm:$0xff] }
 0x4f3   :  { %6670 = vmatprep.subr.bf16.mxu1 %v7448_v11  ;;  %v7672_v11 = vcombine.high %v3254_v2, %v3270_v7 }
 0x4f6   :  { %6671 = vmatpush1.bf16.msra.mxu1 %v7447_v17  ;;  %v7671_v17 = vcombine.low %v3254_v2, %v3270_v7  ;;  %v3492_v7 = vrot.slane %v11167_v20, %v8709_v55 }
 0x4f7   :  { %6672 = vmatprep.subr.bf16.mxu1 %v7480_v35  ;;  %v7704_v35 = vcombine.high %v3286_v14, %v3302_v15 }
 0x4f8   :  { %v6368_v12 = vpop.f32.mrb[16].mxu1 }
 0x4f9   :  { %v6369_v59 = vadd.f32 %v6368_v12, %v3452_v24  ;;  %v6491_v31 = vpop.f32.mrb[20].mxu0  ;;  %v6370_v34 = vpop.f32.mrb[17].mxu1  ;;  %v7703_v24 = vcombine.low %v3286_v14, %v3302_v15  ;;  %v3382_v12 = vld [vmem:[%s11435_s12 + $0xf68] sm:$0xff]  ;;  %v3496_v14 = vrot.slane %v11167_v20, %v8694_v42 }
 0x4fa   :  { %v11189_v30 = vadd.f32 %v6491_v31, %v3476_v25  ;;  %v6371_v13 = vadd.f32 %v6370_v34, %v3456_v27  ;;  %v6493_v49 = vpop.f32.mrb[21].mxu0  ;;  %v6372_v26 = vpop.f32.mrb[18].mxu1  ;;  %6673 = vmatpush1.bf16.msra.mxu1 %v7479_v9  ;;  %v7736_v25 = vcombine.high %v3318_v32, %v3334_v21  ;;  %v3350_v27 = vld [vmem:[%s11435_s12 + $0xe68] sm:$0xff]  ;;  %v2904_v31 = vld [vmem:[%s11435_s12 + $0x78] sm:$0xff] }
 0x4fb   :  { %v11191_v62 = vadd.f32 %v6493_v49, %v3480_v47  ;;  %v6495_v18 = vpop.f32.mrb[22].mxu0  ;;  %v6373_v38 = vpop.f32.mrb[19].mxu1  ;;  %6674 = vmatprep.subr.bf16.mxu1 %v7512_v51  ;;  %v3366_v9 = vld [vmem:[%s11435_s12 + $0xee8] sm:$0xff]  ;;  %v7735_v47 = vcombine.low %v3318_v32, %v3334_v21  ;;  %v2920_v34 = vld [vmem:[%s11435_s12 + $0xf8] sm:$0xff] }
 0x4fc   :  { %v6852_v40 = vcombine.low %v6369_v59, %v6371_v13  ;;  %v6496_v43 = vpop.f32.mrb[23].mxu0  ;;  %v7768_v51 = vcombine.high %v3350_v27, %v3366_v9  ;;  %v7767_v29 = vcombine.low %v3350_v27, %v3366_v9  ;;  %v7800_v59 = vcombine.high %v3382_v12, %v3398_v28  ;;  %v2936_v26 = vld [vmem:[%s11435_s12 + $0x178] sm:$0xff] }
 0x4fd   :  { %v6885_v48 = vcombine.low %v11189_v30, %v11191_v62  ;;  %v7799_v13 = vcombine.low %v3382_v12, %v3398_v28  ;;  %v7324_v49 = vcombine.high %v2904_v31, %v2920_v34  ;;  %v7323_v18 = vcombine.low %v2904_v31, %v2920_v34  ;;  %v3144_v32 = vld [vmem:[%s11435_s12 + $0x7f8] sm:$0xff] }
 0x4fe   :  { %v6866_v41 = vrot.slane %v6852_v40, %v8555_v50  ;;  %6675 = vmatpush1.bf16.msra.mxu1 %v7511_v4  ;;  %v2952_v4 = vld [vmem:[%s11435_s12 + $0x1f8] sm:$0xff] }
 0x4ff   :  { %6676 = vmatprep.subr.bf16.mxu1 %v7544_v39  ;;  %v7356_v38 = vcombine.high %v2936_v26, %v2952_v4  ;;  %v2968_v39 = vld [vmem:[%s11435_s12 + $0x278] sm:$0xff]  ;;  %v7355_v43 = vcombine.low %v2936_v26, %v2952_v4 }
 0x500   :  { %v6867_v5 = vcombine.low %v6859_v44, %v6866_v41  ;;  %v2984_v40 = vld [vmem:[%s11435_s12 + $0x2f8] sm:$0xff] }
 0x501   :  { %v7388_v16 = vcombine.high %v2968_v39, %v2984_v40  ;;  %v3016_v44 = vld [vmem:[%s11435_s12 + $0x3f8] sm:$0xff]  ;;  %v7387_v41 = vcombine.low %v2968_v39, %v2984_v40 }
 0x502   :  { %6963 = vst [vmem:[%s11442_s14 + $0x10] sm:$0xff] %v6867_v5  ;;  %6677 = vmatpush1.bf16.msra.mxu1 %v7543_v8  ;;  %v7420_v8 = vcombine.high %v3000_v33, %v3016_v44  ;;  %v7419_v5 = vcombine.low %v3000_v33, %v3016_v44  ;;  %v3176_v26 = vld [vmem:[%s11435_s12 + $0x8f8] sm:$0xff] }
 0x503   :  { %6678 = vmatprep.subr.bf16.mxu1 %v7576_v56  ;;  %v3032_v56 = vld [vmem:[%s11435_s12 + $0x478] sm:$0xff] }
 0x504   :  { %v3208_v33 = vld [vmem:[%s11435_s12 + $0x9f8] sm:$0xff] }
 0x505   :  { %v3240_v44 = vld [vmem:[%s11435_s12 + $0xaf8] sm:$0xff] }
 0x506   :  { %6679 = vmatpush1.bf16.msra.mxu1 %v7575_v36  ;;  %v3080_v36 = vld [vmem:[%s11435_s12 + $0x5f8] sm:$0xff] }
 0x507   :  { %6680 = vmatprep.subr.bf16.mxu1 %v7608_v45  ;;  %v7484_v60 = vcombine.high %v3064_v19, %v3080_v36 }
 0x50a   :  { %6681 = vmatpush1.bf16.msra.mxu1 %v7607_v0  ;;  %v3112_v0 = vld [vmem:[%s11435_s12 + $0x6f8] sm:$0xff] }
 0x50b   :  { %6682 = vmatprep.subr.bf16.mxu1 %v7640_v1  ;;  %v8339_v1 = vld [vmem:[%s11441_s13 + $0x8] sm:$0xff]  ;;  %v7516_v15 = vcombine.high %v3096_v63, %v3112_v0  ;;  %v7515_v12 = vcombine.low %v3096_v63, %v3112_v0  ;;  %v3320_v63 = vld [vmem:[%s11435_s12 + $0xd78] sm:$0xff] }
 0x50c   :  { %v3468_v2 = vrot.slane %v8339_v1, %v8944_v37  ;;  %v3336_v0 = vld [vmem:[%s11435_s12 + $0xdf8] sm:$0xff] }
 0x50e   :  { %6683 = vmatpush1.bf16.msra.mxu1 %v7639_v10  ;;  %v3472_v10 = vrot.slane %v8339_v1, %v8929_v53 }
 0x50f   :  { %6684 = vmatprep.subr.bf16.mxu1 %v7672_v11  ;;  %v7483_v11 = vcombine.low %v3064_v19, %v3080_v36  ;;  %v3288_v19 = vld [vmem:[%s11435_s12 + $0xc78] sm:$0xff] }
 0x510   :  { %v3304_v36 = vld [vmem:[%s11435_s12 + $0xcf8] sm:$0xff] }
 0x511   :  { %v7707_v1 = vcombine.low %v3288_v19, %v3304_v36 }
 0x512   :  { %6685 = vmatpush1.bf16.msra.mxu1 %v7671_v17 }
 0x513   :  { %6686 = vmatprep.subr.bf16.mxu1 %v7704_v35  ;;  %v3128_v35 = vld [vmem:[%s11435_s12 + $0x778] sm:$0xff] }
 0x514   :  { %v7548_v31 = vcombine.high %v3128_v35, %v3144_v32  ;;  %v7547_v39 = vcombine.low %v3128_v35, %v3144_v32 }
 0x516   :  { %6687 = vmatpush1.bf16.msra.mxu1 %v7703_v24 }
 0x517   :  { %6688 = vmatprep.subr.bf16.mxu1 %v7736_v25 }
 0x51a   :  { %6689 = vmatpush1.bf16.msra.mxu1 %v7735_v47 }
 0x51b   :  { %6690 = vmatprep.subr.bf16.mxu1 %v7768_v51 }
 0x51e   :  { %6691 = vmatpush1.bf16.msra.mxu1 %v7767_v29 }
 0x51f   :  { %6692 = vmatprep.subr.bf16.mxu1 %v7800_v59 }
 0x522   :  { %6693 = vmatpush1.bf16.msra.mxu1 %v7799_v13 }
 0x523   :  { %6744 = vmatprep.subr.bf16.mxu1 %v7324_v49  ;;  %v3160_v49 = vld [vmem:[%s11435_s12 + $0x878] sm:$0xff] }
 0x524   :  { %v7580_v40 = vcombine.high %v3160_v49, %v3176_v26  ;;  %v7579_v61 = vcombine.low %v3160_v49, %v3176_v26 }
 0x525   :  { %6695 = vmatmul.mubr.bf16.vlgmr.msra.gmra.mrb[32].mxu1 %v9889_v23 }
 0x526   :  { %6745 = vmatpush1.bf16.msra.mxu1 %v7323_v18  ;;  %6776 = vmatprep.mubr.bf16.mxu1 %v9887_v22  ;;  %v3048_v22 = vld [vmem:[%s11435_s12 + $0x4f8] sm:$0xff]  ;;  %v6876_v18 = vrot.slane %v6868_v46, %v8555_v50 }
 0x527   :  { %6746 = vmatprep.subr.bf16.mxu1 %v7356_v38  ;;  %v7452_v57 = vcombine.high %v3032_v56, %v3048_v22  ;;  %v7451_v45 = vcombine.low %v3032_v56, %v3048_v22  ;;  %v3224_v46 = vld [vmem:[%s11435_s12 + $0xa78] sm:$0xff] }
 0x528   :  { %v3256_v56 = vld [vmem:[%s11435_s12 + $0xb78] sm:$0xff] }
 0x529   :  { %v3272_v22 = vld [vmem:[%s11435_s12 + $0xbf8] sm:$0xff] }
 0x52a   :  { %6747 = vmatpush1.bf16.msra.mxu1 %v7355_v43 }
 0x52b   :  { %6748 = vmatprep.subr.bf16.mxu1 %v7388_v16  ;;  %v3192_v16 = vld [vmem:[%s11435_s12 + $0x978] sm:$0xff] }
 0x52c   :  { %v7612_v3 = vcombine.high %v3192_v16, %v3208_v33 }
 0x52e   :  { %6749 = vmatpush1.bf16.msra.mxu1 %v7387_v41  ;;  %v7611_v41 = vcombine.low %v3192_v16, %v3208_v33  ;;  %v3500_v33 = vrot.slane %v11167_v20, %v8944_v37 }
 0x52f   :  { %6750 = vmatprep.subr.bf16.mxu1 %v7420_v8  ;;  %v7644_v8 = vcombine.high %v3224_v46, %v3240_v44 }
 0x532   :  { %6751 = vmatpush1.bf16.msra.mxu1 %v7419_v5  ;;  %v7643_v5 = vcombine.low %v3224_v46, %v3240_v44 }
 0x533   :  { %6752 = vmatprep.subr.bf16.mxu1 %v7452_v57  ;;  %v7676_v57 = vcombine.high %v3256_v56, %v3272_v22 }
 0x536   :  { %6753 = vmatpush1.bf16.msra.mxu1 %v7451_v45  ;;  %v7675_v45 = vcombine.low %v3256_v56, %v3272_v22 }
 0x537   :  { %6754 = vmatprep.subr.bf16.mxu1 %v7484_v60  ;;  %v7708_v60 = vcombine.high %v3288_v19, %v3304_v36 }
 0x538   :  { %v6450_v17 = vpop.f32.mrb[20].mxu1 }
 0x539   :  { %v6451_v21 = vadd.f32 %v6450_v17, %v3468_v2  ;;  %v6573_v24 = vpop.f32.mrb[24].mxu0  ;;  %v6452_v25 = vpop.f32.mrb[21].mxu1  ;;  %v7740_v2 = vcombine.high %v3320_v63, %v3336_v0  ;;  %v3400_v17 = vld [vmem:[%s11435_s12 + $0xff8] sm:$0xff] }
 0x53a   :  { %v11310_v27 = vadd.f32 %v6573_v24, %v3492_v7  ;;  %v6453_v9 = vadd.f32 %v6452_v25, %v3472_v10  ;;  %v6575_v47 = vpop.f32.mrb[25].mxu0  ;;  %v6454_v51 = vpop.f32.mrb[22].mxu1  ;;  %6755 = vmatpush1.bf16.msra.mxu1 %v7483_v11  ;;  %v3352_v7 = vld [vmem:[%s11435_s12 + $0xe78] sm:$0xff]  ;;  %v7739_v11 = vcombine.low %v3320_v63, %v3336_v0  ;;  %v3484_v25 = vrot.slane %v11167_v20, %v8605_v6 }
 0x53b   :  { %v11312_v28 = vadd.f32 %v6575_v47, %v3496_v14  ;;  %v6577_v29 = vpop.f32.mrb[26].mxu0  ;;  %v6455_v59 = vpop.f32.mrb[23].mxu1  ;;  %6756 = vmatprep.subr.bf16.mxu1 %v7516_v15  ;;  %v3368_v10 = vld [vmem:[%s11435_s12 + $0xef8] sm:$0xff]  ;;  %v3488_v47 = vrot.slane %v11167_v20, %v8582_v58 }
 0x53c   :  { %v6869_v34 = vcombine.low %v6451_v21, %v6453_v9  ;;  %v6578_v13 = vpop.f32.mrb[27].mxu0  ;;  %v7772_v14 = vcombine.high %v3352_v7, %v3368_v10  ;;  %v3384_v15 = vld [vmem:[%s11435_s12 + $0xf78] sm:$0xff]  ;;  %v7771_v35 = vcombine.low %v3352_v7, %v3368_v10 }
 0x53d   :  { %v6902_v4 = vcombine.low %v11310_v27, %v11312_v28  ;;  %v7804_v32 = vcombine.high %v3384_v15, %v3400_v17  ;;  %v7803_v21 = vcombine.low %v3384_v15, %v3400_v17  ;;  %v11376_v24 = vld [vmem:[%s11441_s13 + $0x18] sm:$0xff] }
 0x53e   :  { %v6883_v38 = vrot.slane %v6869_v34, %v8555_v50  ;;  %6757 = vmatpush1.bf16.msra.mxu1 %v7515_v12  ;;  %v3508_v9 = vrot.slane %v11376_v24, %v8569_v54  ;;  %v3512_v51 = vrot.slane %v11376_v24, %v8561_v52  ;;  %v3528_v30 = vrot.slane %v11376_v24, %v8694_v42 }
 0x53f   :  { %6758 = vmatprep.subr.bf16.mxu1 %v7548_v31  ;;  %v3516_v63 = vrot.slane %v11376_v24, %v8605_v6  ;;  %v3520_v0 = vrot.slane %v11376_v24, %v8582_v58  ;;  %v3532_v6 = vrot.slane %v11376_v24, %v8944_v37  ;;  %v3536_v58 = vrot.slane %v11376_v24, %v8929_v53 }
 0x540   :  { %v6884_v43 = vcombine.low %v6876_v18, %v6883_v38 }
 0x542   :  { %6964 = vst [vmem:[%s11442_s14 + $0x18] sm:$0xff] %v6884_v43  ;;  %6759 = vmatpush1.bf16.msra.mxu1 %v7547_v39  ;;  %v6893_v43 = vrot.slane %v6885_v48, %v8555_v50 }
 0x543   :  { %6760 = vmatprep.subr.bf16.mxu1 %v7580_v40 }
 0x546   :  { %6761 = vmatpush1.bf16.msra.mxu1 %v7579_v61  ;;  %v3524_v61 = vrot.slane %v11376_v24, %v8709_v55 }
 0x547   :  { %6762 = vmatprep.subr.bf16.mxu1 %v7612_v3  ;;  %v3504_v3 = vrot.slane %v11167_v20, %v8929_v53  ;;  %v6910_v20 = vrot.slane %v6902_v4, %v8555_v50 }
 0x54a   :  { %6763 = vmatpush1.bf16.msra.mxu1 %v7611_v41 }
 0x54b   :  { %6764 = vmatprep.subr.bf16.mxu1 %v7644_v8 }
 0x54e   :  { %6765 = vmatpush1.bf16.msra.mxu1 %v7643_v5 }
 0x54f   :  { %6766 = vmatprep.subr.bf16.mxu1 %v7676_v57 }
 0x552   :  { %6767 = vmatpush1.bf16.msra.mxu1 %v7675_v45 }
 0x553   :  { %6768 = vmatprep.subr.bf16.mxu1 %v7708_v60 }
 0x556   :  { %6769 = vmatpush1.bf16.msra.mxu1 %v7707_v1 }
 0x557   :  { %6770 = vmatprep.subr.bf16.mxu1 %v7740_v2 }
 0x55a   :  { %6771 = vmatpush1.bf16.msra.mxu1 %v7739_v11 }
 0x55b   :  { %6772 = vmatprep.subr.bf16.mxu1 %v7772_v14 }
 0x55e   :  { %6773 = vmatpush1.bf16.msra.mxu1 %v7771_v35 }
 0x55f   :  { %6774 = vmatprep.subr.bf16.mxu1 %v7804_v32 }
 0x562   :  { %6775 = vmatpush1.bf16.msra.mxu1 %v7803_v21 }
 0x565   :  { %6777 = vmatmul.mubr.bf16.vlgmr.msra.gmra.mrb[36].mxu1 %v9889_v23 }
 0x578   :  { %v6532_v12 = vpop.f32.mrb[24].mxu1 }
 0x579   :  { %v6533_v29 = vadd.f32 %v6532_v12, %v3484_v25  ;;  %v6655_v23 = vpop.f32.mrb[28].mxu0  ;;  %v6534_v59 = vpop.f32.mrb[25].mxu1 }
 0x57a   :  { %v6656_v31 = vadd.f32 %v6655_v23, %v3508_v9  ;;  %v6535_v34 = vadd.f32 %v6534_v59, %v3488_v47  ;;  %v6657_v13 = vpop.f32.mrb[29].mxu0  ;;  %v6536_v49 = vpop.f32.mrb[26].mxu1 }
 0x57b   :  { %v6658_v26 = vadd.f32 %v6657_v13, %v3512_v51  ;;  %v6659_v18 = vpop.f32.mrb[30].mxu0  ;;  %v6537_v38 = vpop.f32.mrb[27].mxu1 }
 0x57c   :  { %v6886_v39 = vcombine.low %v6533_v29, %v6535_v34  ;;  %v6660_v40 = vpop.f32.mrb[31].mxu0 }
 0x57d   :  { %v6919_v54 = vcombine.low %v6656_v31, %v6658_v26 }
 0x57e   :  { %v6900_v52 = vrot.slane %v6886_v39, %v8555_v50 }
 0x57f   :  { %v6927_v4 = vrot.slane %v6919_v54, %v8555_v50 }
 0x580   :  { %v6901_v16 = vcombine.low %v6893_v43, %v6900_v52 }
 0x582   :  { %6965 = vst [vmem:[%s11442_s14 + $0x20] sm:$0xff] %v6901_v16 }
 0x5b8   :  { %v6614_v62 = vpop.f32.mrb[28].mxu1 }
 0x5b9   :  { %v6615_v48 = vadd.f32 %v6614_v62, %v3500_v33  ;;  %v6737_v46 = vpop.f32.mrb[32].mxu0  ;;  %v6616_v44 = vpop.f32.mrb[29].mxu1 }
 0x5ba   :  { %v6738_v41 = vadd.f32 %v6737_v46, %v3524_v61  ;;  %v6617_v8 = vadd.f32 %v6616_v44, %v3504_v3  ;;  %v6739_v56 = vpop.f32.mrb[33].mxu0  ;;  %v6618_v22 = vpop.f32.mrb[30].mxu1 }
 0x5bb   :  { %v6740_v5 = vadd.f32 %v6739_v56, %v3528_v30  ;;  %v6741_v57 = vpop.f32.mrb[34].mxu0  ;;  %v6619_v19 = vpop.f32.mrb[31].mxu1 }
 0x5bc   :  { %v6903_v36 = vcombine.low %v6615_v48, %v6617_v8  ;;  %v6742_v45 = vpop.f32.mrb[35].mxu0 }
 0x5bd   :  { %v6936_v55 = vcombine.low %v6738_v41, %v6740_v5 }
 0x5be   :  { %v6917_v42 = vrot.slane %v6903_v36, %v8555_v50 }
 0x5bf   :  { %v6944_v51 = vrot.slane %v6936_v55, %v8555_v50 }
 0x5c0   :  { %v6918_v60 = vcombine.low %v6910_v20, %v6917_v42 }
 0x5c2   :  { %6966 = vst [vmem:[%s11442_s14 + $0x28] sm:$0xff] %v6918_v60 }
 0x5f8   :  { %v6696_v1 = vpop.f32.mrb[32].mxu1 }
 0x5f9   :  { %v6697_v2 = vadd.f32 %v6696_v1, %v3516_v63  ;;  %v6698_v7 = vpop.f32.mrb[33].mxu1 }
 0x5fa   :  { %v6699_v10 = vadd.f32 %v6698_v7, %v3520_v0  ;;  %v6700_v11 = vpop.f32.mrb[34].mxu1 }
 0x5fb   :  { %v6701_v27 = vpop.f32.mrb[35].mxu1 }
 0x5fc   :  { %v6920_v28 = vcombine.low %v6697_v2, %v6699_v10 }
 0x5fe   :  { %v6934_v14 = vrot.slane %v6920_v28, %v8555_v50 }
 0x600   :  { %v6935_v15 = vcombine.low %v6927_v4, %v6934_v14 }
 0x602   :  { %6967 = vst [vmem:[%s11442_s14 + $0x30] sm:$0xff] %v6935_v15 }
 0x638   :  { %v6778_v17 = vpop.f32.mrb[36].mxu1 }
 0x639   :  { %v6779_v35 = vadd.f32 %v6778_v17, %v3532_v6  ;;  %v6780_v32 = vpop.f32.mrb[37].mxu1 }
 0x63a   :  { %v6781_v21 = vadd.f32 %v6780_v32, %v3536_v58  ;;  %v6782_v25 = vpop.f32.mrb[38].mxu1 }
 0x63b   :  { %v6783_v9 = vpop.f32.mrb[39].mxu1 }
 0x63c   :  { %v6937_v47 = vcombine.low %v6779_v35, %v6781_v21 }
 0x63e   :  { %v6951_v12 = vrot.slane %v6937_v47, %v8555_v50 }
 0x640   :  { %v6952_v29 = vcombine.low %v6944_v51, %v6951_v12 }
 0x642   :  { %6968 = vst [vmem:[%s11442_s14 + $0x38] sm:$0xff] %v6952_v29 }

</bundles_post_ra>
